<compile_context>
chip_gen: v5e
topology: v5e:2x2
jax: 0.10.0
libtpu: 0.0.40
codegen_flags: <defaults>
</compile_context>

<pallas_src>
import functools

import jax
import jax.numpy as jnp
from jax import lax
from jax.experimental import pallas as pl
from jax.experimental.pallas import tpu as pltpu

LEAKY_SLOPE = 0.1
BN_EPS = 1e-5


# ---------------------------------------------------------------------------
# Pallas kernels
# ---------------------------------------------------------------------------
def _conv_block_kernel(xs_ref, w_ref, scale_ref, shift_ref, o_ref):
    """Conv2d(k=4,s=2,p=1) + folded BatchNorm(eval) + LeakyReLU(0.1).

    xs_ref : (NB, HS, WS, 4*Cin) bf16 -- padded space-to-depth input block.
    w_ref  : (2, 2, 4*Cin, Cout) bf16 -- conv weight regrouped per 2x2 shift.
    o_ref  : (NB*OH*OW, Cout)    bf16 -- NHWC-flattened output rows.
    """
    nb, hs, ws, kc = xs_ref.shape
    oh, ow = hs - 1, ws - 1
    cout = o_ref.shape[-1]
    acc = jnp.zeros((nb * oh * ow, cout), jnp.float32)
    for i1 in range(2):
        for j1 in range(2):
            patch = xs_ref[:, pl.ds(i1, oh), pl.ds(j1, ow), :]
            patch = patch.reshape(nb * oh * ow, kc)
            acc = acc + jnp.dot(patch, w_ref[i1, j1],
                                preferred_element_type=jnp.float32)
    y = acc * scale_ref[...] + shift_ref[...]
    o_ref[...] = jnp.where(y >= 0.0, y, LEAKY_SLOPE * y).astype(o_ref.dtype)


def _conv3_classifier_kernel(xs_ref, w3_ref, s3_ref, t3_ref,
                             w1_ref, b1_ref, w2_ref, b2_ref, o_ref):
    """Last conv block fused with the classifier head.

    xs_ref : (NB, OH+1, OW+1, 4*Cin) bf16 -- padded s2d input of conv block 3.
    w3_ref : (2, 2, 4*Cin, Cout)     bf16
    w1_ref : (OH, OW, Cout, HID)     bf16 -- classifier w1 in NHWC row order.
    s3/t3  : (1, Cout) f32, b1: (1, HID) f32, w2: (1, HID) f32, b2: (1, 1) f32.
    o_ref  : (NB, 1) f32 -- discriminator scores.
    """
    nb = xs_ref.shape[0]
    oh = xs_ref.shape[1] - 1
    ow = xs_ref.shape[2] - 1
    cout = w3_ref.shape[-1]
    hid = b1_ref.shape[-1]

    h1 = jnp.zeros((nb, hid), jnp.float32)
    for p in range(oh):
        for q in range(ow):
            acc = jnp.zeros((nb, cout), jnp.float32)
            for i1 in range(2):
                for j1 in range(2):
                    acc = acc + jnp.dot(xs_ref[:, p + i1, q + j1, :],
                                        w3_ref[i1, j1],
                                        preferred_element_type=jnp.float32)
            y = acc * s3_ref[...] + t3_ref[...]
            y = jnp.where(y >= 0.0, y, LEAKY_SLOPE * y)
            h1 = h1 + jnp.dot(y.astype(jnp.bfloat16), w1_ref[p, q],
                              preferred_element_type=jnp.float32)
    h1 = h1 + b1_ref[...]
    h1 = jnp.where(h1 >= 0.0, h1, LEAKY_SLOPE * h1)
    # Dropout(p=0.2) is the identity in eval mode.
    # Final (hid -> 1) projection: VPU multiply + XLU lane reduction
    # (avoids a 1-wide MXU matmul).
    o_ref[...] = jnp.sum(h1 * w2_ref[...], axis=-1, keepdims=True) + b2_ref[...]


# ---------------------------------------------------------------------------
# Wrapper glue (plain JAX): layout prep, parameter folding, pallas_call sites
# ---------------------------------------------------------------------------
def _pad_s2d(x):
    """NHWC (N, H, W, C) -> padded space-to-depth (N, (H+2)//2, (W+2)//2, 4*C)."""
    n, h, w, c = x.shape
    xp = jnp.pad(x, ((0, 0), (1, 1), (1, 1), (0, 0)))
    hs, ws = (h + 2) // 2, (w + 2) // 2
    xs = xp.reshape(n, hs, 2, ws, 2, c).transpose(0, 1, 3, 2, 4, 5)
    return xs.reshape(n, hs, ws, 4 * c)


def _regroup_conv_weight(w):
    """OIHW (Cout, Cin, 4, 4) -> (2, 2, 4*Cin, Cout) matching the s2d layout."""
    cout, cin, _, _ = w.shape
    wk = w.reshape(cout, cin, 2, 2, 2, 2)        # (o, c, i1, u, j1, v)
    wk = wk.transpose(2, 4, 3, 5, 1, 0)          # (i1, j1, u, v, c, o)
    return wk.reshape(2, 2, 4 * cin, cout).astype(jnp.bfloat16)


def _fold_bn(bias, gamma, beta, rmean, rvar):
    s = gamma / jnp.sqrt(rvar + BN_EPS)
    t = beta - rmean * s + bias * s
    return (s.reshape(1, -1).astype(jnp.float32),
            t.reshape(1, -1).astype(jnp.float32))


def _conv_block(xs, wk, scale, shift, nb):
    n, hs, ws, kc = xs.shape
    oh, ow = hs - 1, ws - 1
    cout = wk.shape[-1]
    m = n * oh * ow
    flops = 2 * m * 4 * kc * cout
    bytes_accessed = (xs.size * 2 + wk.size * 2
                      + (scale.size + shift.size) * 4 + m * cout * 2)
    out = pl.pallas_call(
        _conv_block_kernel,
        out_shape=jax.ShapeDtypeStruct((m, cout), jnp.bfloat16),
        grid_spec=pltpu.PrefetchScalarGridSpec(
            num_scalar_prefetch=0,
            grid=(n // nb,),
            in_specs=[
                pl.BlockSpec((nb, hs, ws, kc), lambda b: (b, 0, 0, 0)),
                pl.BlockSpec(wk.shape, lambda b: (0, 0, 0, 0)),
                pl.BlockSpec(scale.shape, lambda b: (0, 0)),
                pl.BlockSpec(shift.shape, lambda b: (0, 0)),
            ],
            out_specs=pl.BlockSpec((nb * oh * ow, cout), lambda b: (b, 0)),
        ),
        compiler_params=pltpu.CompilerParams(
            dimension_semantics=("parallel",),
            vmem_limit_bytes=32 * 1024 * 1024,
        ),
        cost_estimate=pl.CostEstimate(flops=int(flops), transcendentals=0,
                                      bytes_accessed=int(bytes_accessed)),
    )(xs, wk, scale, shift)
    return out.reshape(n, oh, ow, cout)


def _conv3_classifier(xs, w3k, s3, t3, w1c, b1, w2row, b2, nb):
    n, hs, ws, kc = xs.shape
    oh, ow = hs - 1, ws - 1
    cout = w3k.shape[-1]
    hid = b1.shape[-1]
    flops = 2 * n * oh * ow * (4 * kc * cout + cout * hid) + 2 * n * hid
    bytes_accessed = (xs.size * 2 + w3k.size * 2 + w1c.size * 2
                      + (s3.size + t3.size + b1.size + w2row.size + b2.size) * 4
                      + n * 4)
    return pl.pallas_call(
        _conv3_classifier_kernel,
        out_shape=jax.ShapeDtypeStruct((n, 1), jnp.float32),
        grid_spec=pltpu.PrefetchScalarGridSpec(
            num_scalar_prefetch=0,
            grid=(n // nb,),
            in_specs=[
                pl.BlockSpec((nb, hs, ws, kc), lambda b: (b, 0, 0, 0)),
                pl.BlockSpec(w3k.shape, lambda b: (0, 0, 0, 0)),
                pl.BlockSpec(s3.shape, lambda b: (0, 0)),
                pl.BlockSpec(t3.shape, lambda b: (0, 0)),
                pl.BlockSpec(w1c.shape, lambda b: (0, 0, 0, 0)),
                pl.BlockSpec(b1.shape, lambda b: (0, 0)),
                pl.BlockSpec(w2row.shape, lambda b: (0, 0)),
                pl.BlockSpec(b2.shape, lambda b: (0, 0)),
            ],
            out_specs=pl.BlockSpec((nb, 1), lambda b: (b, 0)),
        ),
        compiler_params=pltpu.CompilerParams(
            dimension_semantics=("parallel",),
            vmem_limit_bytes=32 * 1024 * 1024,
        ),
        cost_estimate=pl.CostEstimate(flops=int(flops), transcendentals=0,
                                      bytes_accessed=int(bytes_accessed)),
    )(xs, w3k, s3, t3, w1c, b1, w2row, b2)


# ---------------------------------------------------------------------------
# Discriminator: parameter construction, kernel-side prep, forward
# ---------------------------------------------------------------------------
def init_discriminator(key, in_size):
    c_in, h, w = in_size
    channels = [c_in, 64, 128, 256]
    params = {"convs": []}
    oh, ow = h, w
    for i in range(len(channels) - 1):
        key, kw_, kb_ = jax.random.split(key, 3)
        cin, cout = channels[i], channels[i + 1]
        wgt = jax.random.normal(kw_, (cout, cin, 4, 4), jnp.float32) * 0.05
        bias = jax.random.normal(kb_, (cout,), jnp.float32) * 0.01
        gamma = jnp.ones((cout,), jnp.float32)
        beta = jnp.zeros((cout,), jnp.float32)
        rmean = jnp.zeros((cout,), jnp.float32)
        rvar = jnp.ones((cout,), jnp.float32)
        params["convs"].append((wgt, bias, gamma, beta, rmean, rvar))
        oh, ow = (oh + 2 - 4) // 2 + 1, (ow + 2 - 4) // 2 + 1
    feat_dim = channels[-1] * oh * ow
    hidden = feat_dim // 4
    key, k1, k2, k3, k4 = jax.random.split(key, 5)
    params["w1"] = jax.random.normal(k1, (feat_dim, hidden), jnp.float32) * 0.02
    params["b1"] = jax.random.normal(k2, (hidden,), jnp.float32) * 0.01
    params["w2"] = jax.random.normal(k3, (hidden, 1), jnp.float32) * 0.02
    params["b2"] = jax.random.normal(k4, (1,), jnp.float32) * 0.01
    return params


def prepare_params(params, in_size):
    """Fold BN, regroup conv weights for the s2d kernels, permute classifier w1."""
    prepped = {"conv_blocks": []}
    for (wgt, bias, gamma, beta, rmean, rvar) in params["convs"]:
        wk = _regroup_conv_weight(wgt)
        s, t = _fold_bn(bias, gamma, beta, rmean, rvar)
        prepped["conv_blocks"].append((wk, s, t))
    c_last = params["convs"][-1][0].shape[0]
    n_blocks = len(params["convs"])
    fh, fw = in_size[1] // (2 ** n_blocks), in_size[2] // (2 ** n_blocks)
    feat_dim, hidden = params["w1"].shape
    assert feat_dim == c_last * fh * fw
    # PyTorch flattens NCHW (f = c*fh*fw + h*fw + w); kernel consumes NHWC
    # features, so permute w1 rows once here (free at prep time).
    w1c = params["w1"].reshape(c_last, fh, fw, hidden).transpose(1, 2, 0, 3)
    prepped["w1c"] = w1c.astype(jnp.bfloat16)                  # (fh, fw, C, hid)
    prepped["b1"] = params["b1"].reshape(1, hidden).astype(jnp.float32)
    prepped["w2row"] = params["w2"].reshape(1, hidden).astype(jnp.float32)
    prepped["b2"] = params["b2"].reshape(1, 1).astype(jnp.float32)
    return prepped


def discriminator_forward(prepped, x, *, batch_block=8):
    n0 = x.shape[0]
    nb = min(n0, batch_block)
    pad = (-n0) % nb
    if pad:
        x = jnp.concatenate([x, jnp.zeros((pad,) + x.shape[1:], x.dtype)], axis=0)
    h = jnp.transpose(x, (0, 2, 3, 1))            # NCHW -> NHWC, once at the top
    for (wk, s, t) in prepped["conv_blocks"][:-1]:
        xs = _pad_s2d(h).astype(jnp.bfloat16)
        h = _conv_block(xs, wk, s, t, nb)         # (N, OH, OW, Cout) bf16
    wk3, s3, t3 = prepped["conv_blocks"][-1]
    xs3 = _pad_s2d(h).astype(jnp.bfloat16)
    y = _conv3_classifier(xs3, wk3, s3, t3, prepped["w1c"], prepped["b1"],
                          prepped["w2row"], prepped["b2"], nb)
    return y[:n0]


# Pure-JAX reference (for correctness check only)
def reference_forward(params, x):
    h = x
    for (wgt, bias, gamma, beta, rmean, rvar) in params["convs"]:
        z = lax.conv_general_dilated(
            h, wgt, (2, 2), ((1, 1), (1, 1)),
            dimension_numbers=("NCHW", "OIHW", "NCHW")) + bias[None, :, None, None]
        s = gamma / jnp.sqrt(rvar + BN_EPS)
        z = z * s[None, :, None, None] + (beta - rmean * s)[None, :, None, None]
        h = jnp.where(z >= 0.0, z, LEAKY_SLOPE * z)
    n = x.shape[0]
    feat = h.reshape(n, -1)
    y = feat @ params["w1"] + params["b1"]
    y = jnp.where(y >= 0.0, y, LEAKY_SLOPE * y)
    return y @ params["w2"] + params["b2"]


if __name__ == "__main__":
    key = jax.random.PRNGKey(0)
    in_size = (4, 16, 16)          # (C, H, W), matching the module's in_size
    batch = 2

    key, kx, kp = jax.random.split(key, 3)
    x = jax.random.normal(kx, (batch,) + in_size, jnp.float32)
    raw_params = init_discriminator(kp, in_size)
    prepped = prepare_params(raw_params, in_size)

    fwd = jax.jit(functools.partial(discriminator_forward, batch_block=8))
    y = jax.block_until_ready(fwd(prepped, x))
    assert y.shape == (batch, 1), y.shape

    y_ref = jax.block_until_ready(reference_forward(raw_params, x))
    # bf16 matmul operands vs f32 reference -> loosened tolerance.
    assert jnp.allclose(y, y_ref, atol=1e-2, rtol=2e-2), (y, y_ref)

    print("KERNEL_OK")
</pallas_src>

<mosaic_0001>
module attributes {stable_mosaic.version = 11 : i64} {
  func.func @_conv_block_kernel(%arg0: i32, %arg1: memref<2x9x9x16xbf16, #tpu.memory_space<vmem>>, %arg2: memref<2x2x16x64xbf16, #tpu.memory_space<vmem>>, %arg3: memref<1x64xf32, #tpu.memory_space<vmem>>, %arg4: memref<1x64xf32, #tpu.memory_space<vmem>>, %arg5: memref<128x64xbf16, #tpu.memory_space<vmem>>) attributes {dimension_semantics = [#tpu.dimension_semantics<parallel>], iteration_bounds = array<i64: 1>, scalar_prefetch = 0 : i64, scratch_operands = 0 : i64, tpu.core_type = #tpu.core_type<tc>, window_params = [{transform_indices = @transform_0, window_bounds = array<i64: 2, 9, 9, 16>}, {pipeline_mode = #tpu.pipeline_mode<synchronous>, transform_indices = @transform_1, window_bounds = array<i64: 2, 2, 16, 64>}, {pipeline_mode = #tpu.pipeline_mode<synchronous>, transform_indices = @transform_2, window_bounds = array<i64: 1, 64>}, {pipeline_mode = #tpu.pipeline_mode<synchronous>, transform_indices = @transform_3, window_bounds = array<i64: 1, 64>}, {transform_indices = @transform_4, window_bounds = array<i64: 128, 64>}]} {
    %cst = arith.constant 0.000000e+00 : f32
    %0 = vector.broadcast %cst : f32 to vector<128x64xf32>
    %c0 = arith.constant 0 : index
    %c0_0 = arith.constant 0 : index
    %c0_1 = arith.constant 0 : index
    %c0_2 = arith.constant 0 : index
    %1 = vector.load %arg1[%c0, %c0_0, %c0_1, %c0_2] : memref<2x9x9x16xbf16, #tpu.memory_space<vmem>>, vector<2x8x8x16xbf16>
    %2 = vector.shape_cast %1 : vector<2x8x8x16xbf16> to vector<128x16xbf16>
    %c0_3 = arith.constant 0 : index
    %c0_4 = arith.constant 0 : index
    %c0_5 = arith.constant 0 : index
    %c0_6 = arith.constant 0 : index
    %3 = vector.load %arg2[%c0_3, %c0_4, %c0_5, %c0_6] : memref<2x2x16x64xbf16, #tpu.memory_space<vmem>>, vector<1x1x16x64xbf16>
    %4 = vector.shape_cast %3 : vector<1x1x16x64xbf16> to vector<16x64xbf16>
    %cst_7 = arith.constant dense<0.000000e+00> : vector<128x64xf32>
    %5 = tpu.matmul %2, %4, %cst_7 {dimension_numbers = #tpu.dot_dimension_numbers<[1], [0], [0], [1], [0, 0, 1, 1], [], []>} : vector<128x16xbf16>, vector<16x64xbf16>, vector<128x64xf32> -> vector<128x64xf32>
    %6 = arith.addf %0, %5 : vector<128x64xf32>
    %c0_8 = arith.constant 0 : index
    %c0_9 = arith.constant 0 : index
    %c1 = arith.constant 1 : index
    %c0_10 = arith.constant 0 : index
    %7 = vector.load %arg1[%c0_8, %c0_9, %c1, %c0_10] : memref<2x9x9x16xbf16, #tpu.memory_space<vmem>>, vector<2x8x8x16xbf16>
    %8 = vector.shape_cast %7 : vector<2x8x8x16xbf16> to vector<128x16xbf16>
    %c0_11 = arith.constant 0 : index
    %c1_12 = arith.constant 1 : index
    %c0_13 = arith.constant 0 : index
    %c0_14 = arith.constant 0 : index
    %9 = vector.load %arg2[%c0_11, %c1_12, %c0_13, %c0_14] : memref<2x2x16x64xbf16, #tpu.memory_space<vmem>>, vector<1x1x16x64xbf16>
    %10 = vector.shape_cast %9 : vector<1x1x16x64xbf16> to vector<16x64xbf16>
    %cst_15 = arith.constant dense<0.000000e+00> : vector<128x64xf32>
    %11 = tpu.matmul %8, %10, %cst_15 {dimension_numbers = #tpu.dot_dimension_numbers<[1], [0], [0], [1], [0, 0, 1, 1], [], []>} : vector<128x16xbf16>, vector<16x64xbf16>, vector<128x64xf32> -> vector<128x64xf32>
    %12 = arith.addf %6, %11 : vector<128x64xf32>
    %c0_16 = arith.constant 0 : index
    %c1_17 = arith.constant 1 : index
    %c0_18 = arith.constant 0 : index
    %c0_19 = arith.constant 0 : index
    %13 = vector.load %arg1[%c0_16, %c1_17, %c0_18, %c0_19] : memref<2x9x9x16xbf16, #tpu.memory_space<vmem>>, vector<2x8x8x16xbf16>
    %14 = vector.shape_cast %13 : vector<2x8x8x16xbf16> to vector<128x16xbf16>
    %c1_20 = arith.constant 1 : index
    %c0_21 = arith.constant 0 : index
    %c0_22 = arith.constant 0 : index
    %c0_23 = arith.constant 0 : index
    %15 = vector.load %arg2[%c1_20, %c0_21, %c0_22, %c0_23] : memref<2x2x16x64xbf16, #tpu.memory_space<vmem>>, vector<1x1x16x64xbf16>
    %16 = vector.shape_cast %15 : vector<1x1x16x64xbf16> to vector<16x64xbf16>
    %cst_24 = arith.constant dense<0.000000e+00> : vector<128x64xf32>
    %17 = tpu.matmul %14, %16, %cst_24 {dimension_numbers = #tpu.dot_dimension_numbers<[1], [0], [0], [1], [0, 0, 1, 1], [], []>} : vector<128x16xbf16>, vector<16x64xbf16>, vector<128x64xf32> -> vector<128x64xf32>
    %18 = arith.addf %12, %17 : vector<128x64xf32>
    %c0_25 = arith.constant 0 : index
    %c1_26 = arith.constant 1 : index
    %c1_27 = arith.constant 1 : index
    %c0_28 = arith.constant 0 : index
    %19 = vector.load %arg1[%c0_25, %c1_26, %c1_27, %c0_28] : memref<2x9x9x16xbf16, #tpu.memory_space<vmem>>, vector<2x8x8x16xbf16>
    %20 = vector.shape_cast %19 : vector<2x8x8x16xbf16> to vector<128x16xbf16>
    %c1_29 = arith.constant 1 : index
    %c1_30 = arith.constant 1 : index
    %c0_31 = arith.constant 0 : index
    %c0_32 = arith.constant 0 : index
    %21 = vector.load %arg2[%c1_29, %c1_30, %c0_31, %c0_32] : memref<2x2x16x64xbf16, #tpu.memory_space<vmem>>, vector<1x1x16x64xbf16>
    %22 = vector.shape_cast %21 : vector<1x1x16x64xbf16> to vector<16x64xbf16>
    %cst_33 = arith.constant dense<0.000000e+00> : vector<128x64xf32>
    %23 = tpu.matmul %20, %22, %cst_33 {dimension_numbers = #tpu.dot_dimension_numbers<[1], [0], [0], [1], [0, 0, 1, 1], [], []>} : vector<128x16xbf16>, vector<16x64xbf16>, vector<128x64xf32> -> vector<128x64xf32>
    %24 = arith.addf %18, %23 : vector<128x64xf32>
    %c0_34 = arith.constant 0 : index
    %c0_35 = arith.constant 0 : index
    %25 = vector.load %arg3[%c0_34, %c0_35] : memref<1x64xf32, #tpu.memory_space<vmem>>, vector<1x64xf32>
    %26 = vector.broadcast %25 : vector<1x64xf32> to vector<128x64xf32>
    %27 = arith.mulf %24, %26 : vector<128x64xf32>
    %c0_36 = arith.constant 0 : index
    %c0_37 = arith.constant 0 : index
    %28 = vector.load %arg4[%c0_36, %c0_37] : memref<1x64xf32, #tpu.memory_space<vmem>>, vector<1x64xf32>
    %29 = vector.broadcast %28 : vector<1x64xf32> to vector<128x64xf32>
    %30 = arith.addf %27, %29 : vector<128x64xf32>
    %cst_38 = arith.constant 0.000000e+00 : f32
    %31 = vector.broadcast %cst_38 : f32 to vector<128x64xf32>
    %32 = arith.cmpf oge, %30, %31 : vector<128x64xf32>
    %cst_39 = arith.constant 1.000000e-01 : f32
    %33 = vector.broadcast %cst_39 : f32 to vector<128x64xf32>
    %34 = arith.mulf %33, %30 : vector<128x64xf32>
    %35 = arith.select %32, %30, %34 : vector<128x64xi1>, vector<128x64xf32>
    %36 = arith.truncf %35 : vector<128x64xf32> to vector<128x64xbf16>
    %c0_40 = arith.constant 0 : index
    %c0_41 = arith.constant 0 : index
    %37 = vector.load %arg5[%c0_40, %c0_41] : memref<128x64xbf16, #tpu.memory_space<vmem>>, vector<128x64xbf16>
    tpu.vector_store %arg5[%c0_40, %c0_41], %36 {strides = array<i32>} : memref<128x64xbf16, #tpu.memory_space<vmem>>, vector<128x64xbf16>,
    return
  }
  func.func @transform_0(%arg0: i32) -> (i32, i32, i32, i32) {
    %c0_i32 = arith.constant 0 : i32
    %c0_i32_0 = arith.constant 0 : i32
    %c0_i32_1 = arith.constant 0 : i32
    %c0_i32_2 = arith.constant 0 : i32
    return %arg0, %c0_i32, %c0_i32_0, %c0_i32_1 : i32, i32, i32, i32
  }
  func.func @transform_1(%arg0: i32) -> (i32, i32, i32, i32) {
    %c0_i32 = arith.constant 0 : i32
    %c0_i32_0 = arith.constant 0 : i32
    %c0_i32_1 = arith.constant 0 : i32
    %c0_i32_2 = arith.constant 0 : i32
    %c0_i32_3 = arith.constant 0 : i32
    return %c0_i32, %c0_i32_0, %c0_i32_1, %c0_i32_2 : i32, i32, i32, i32
  }
  func.func @transform_2(%arg0: i32) -> (i32, i32) {
    %c0_i32 = arith.constant 0 : i32
    %c0_i32_0 = arith.constant 0 : i32
    %c0_i32_1 = arith.constant 0 : i32
    return %c0_i32, %c0_i32_0 : i32, i32
  }
  func.func @transform_3(%arg0: i32) -> (i32, i32) {
    %c0_i32 = arith.constant 0 : i32
    %c0_i32_0 = arith.constant 0 : i32
    %c0_i32_1 = arith.constant 0 : i32
    return %c0_i32, %c0_i32_0 : i32, i32
  }
  func.func @transform_4(%arg0: i32) -> (i32, i32) {
    %c0_i32 = arith.constant 0 : i32
    %c0_i32_0 = arith.constant 0 : i32
    return %arg0, %c0_i32 : i32, i32
  }
}

module attributes {stable_mosaic.version = 11 : i64} {
  func.func @_conv_block_kernel(%arg0: i32, %arg1: memref<2x5x5x256xbf16, #tpu.memory_space<vmem>>, %arg2: memref<2x2x256x128xbf16, #tpu.memory_space<vmem>>, %arg3: memref<1x128xf32, #tpu.memory_space<vmem>>, %arg4: memref<1x128xf32, #tpu.memory_space<vmem>>, %arg5: memref<32x128xbf16, #tpu.memory_space<vmem>>) attributes {dimension_semantics = [#tpu.dimension_semantics<parallel>], iteration_bounds = array<i64: 1>, scalar_prefetch = 0 : i64, scratch_operands = 0 : i64, tpu.core_type = #tpu.core_type<tc>, window_params = [{transform_indices = @transform_0, window_bounds = array<i64: 2, 5, 5, 256>}, {pipeline_mode = #tpu.pipeline_mode<synchronous>, transform_indices = @transform_1, window_bounds = array<i64: 2, 2, 256, 128>}, {pipeline_mode = #tpu.pipeline_mode<synchronous>, transform_indices = @transform_2, window_bounds = array<i64: 1, 128>}, {pipeline_mode = #tpu.pipeline_mode<synchronous>, transform_indices = @transform_3, window_bounds = array<i64: 1, 128>}, {transform_indices = @transform_4, window_bounds = array<i64: 32, 128>}]} {
    %cst = arith.constant 0.000000e+00 : f32
    %0 = vector.broadcast %cst : f32 to vector<32x128xf32>
    %c0 = arith.constant 0 : index
    %c0_0 = arith.constant 0 : index
    %c0_1 = arith.constant 0 : index
    %c0_2 = arith.constant 0 : index
    %1 = vector.load %arg1[%c0, %c0_0, %c0_1, %c0_2] : memref<2x5x5x256xbf16, #tpu.memory_space<vmem>>, vector<2x4x4x256xbf16>
    %2 = vector.shape_cast %1 : vector<2x4x4x256xbf16> to vector<32x256xbf16>
    %c0_3 = arith.constant 0 : index
    %c0_4 = arith.constant 0 : index
    %c0_5 = arith.constant 0 : index
    %c0_6 = arith.constant 0 : index
    %3 = vector.load %arg2[%c0_3, %c0_4, %c0_5, %c0_6] : memref<2x2x256x128xbf16, #tpu.memory_space<vmem>>, vector<1x1x256x128xbf16>
    %4 = vector.shape_cast %3 : vector<1x1x256x128xbf16> to vector<256x128xbf16>
    %cst_7 = arith.constant dense<0.000000e+00> : vector<32x128xf32>
    %5 = tpu.matmul %2, %4, %cst_7 {dimension_numbers = #tpu.dot_dimension_numbers<[1], [0], [0], [1], [0, 0, 1, 1], [], []>} : vector<32x256xbf16>, vector<256x128xbf16>, vector<32x128xf32> -> vector<32x128xf32>
    %6 = arith.addf %0, %5 : vector<32x128xf32>
    %c0_8 = arith.constant 0 : index
    %c0_9 = arith.constant 0 : index
    %c1 = arith.constant 1 : index
    %c0_10 = arith.constant 0 : index
    %7 = vector.load %arg1[%c0_8, %c0_9, %c1, %c0_10] : memref<2x5x5x256xbf16, #tpu.memory_space<vmem>>, vector<2x4x4x256xbf16>
    %8 = vector.shape_cast %7 : vector<2x4x4x256xbf16> to vector<32x256xbf16>
    %c0_11 = arith.constant 0 : index
    %c1_12 = arith.constant 1 : index
    %c0_13 = arith.constant 0 : index
    %c0_14 = arith.constant 0 : index
    %9 = vector.load %arg2[%c0_11, %c1_12, %c0_13, %c0_14] : memref<2x2x256x128xbf16, #tpu.memory_space<vmem>>, vector<1x1x256x128xbf16>
    %10 = vector.shape_cast %9 : vector<1x1x256x128xbf16> to vector<256x128xbf16>
    %cst_15 = arith.constant dense<0.000000e+00> : vector<32x128xf32>
    %11 = tpu.matmul %8, %10, %cst_15 {dimension_numbers = #tpu.dot_dimension_numbers<[1], [0], [0], [1], [0, 0, 1, 1], [], []>} : vector<32x256xbf16>, vector<256x128xbf16>, vector<32x128xf32> -> vector<32x128xf32>
    %12 = arith.addf %6, %11 : vector<32x128xf32>
    %c0_16 = arith.constant 0 : index
    %c1_17 = arith.constant 1 : index
    %c0_18 = arith.constant 0 : index
    %c0_19 = arith.constant 0 : index
    %13 = vector.load %arg1[%c0_16, %c1_17, %c0_18, %c0_19] : memref<2x5x5x256xbf16, #tpu.memory_space<vmem>>, vector<2x4x4x256xbf16>
    %14 = vector.shape_cast %13 : vector<2x4x4x256xbf16> to vector<32x256xbf16>
    %c1_20 = arith.constant 1 : index
    %c0_21 = arith.constant 0 : index
    %c0_22 = arith.constant 0 : index
    %c0_23 = arith.constant 0 : index
    %15 = vector.load %arg2[%c1_20, %c0_21, %c0_22, %c0_23] : memref<2x2x256x128xbf16, #tpu.memory_space<vmem>>, vector<1x1x256x128xbf16>
    %16 = vector.shape_cast %15 : vector<1x1x256x128xbf16> to vector<256x128xbf16>
    %cst_24 = arith.constant dense<0.000000e+00> : vector<32x128xf32>
    %17 = tpu.matmul %14, %16, %cst_24 {dimension_numbers = #tpu.dot_dimension_numbers<[1], [0], [0], [1], [0, 0, 1, 1], [], []>} : vector<32x256xbf16>, vector<256x128xbf16>, vector<32x128xf32> -> vector<32x128xf32>
    %18 = arith.addf %12, %17 : vector<32x128xf32>
    %c0_25 = arith.constant 0 : index
    %c1_26 = arith.constant 1 : index
    %c1_27 = arith.constant 1 : index
    %c0_28 = arith.constant 0 : index
    %19 = vector.load %arg1[%c0_25, %c1_26, %c1_27, %c0_28] : memref<2x5x5x256xbf16, #tpu.memory_space<vmem>>, vector<2x4x4x256xbf16>
    %20 = vector.shape_cast %19 : vector<2x4x4x256xbf16> to vector<32x256xbf16>
    %c1_29 = arith.constant 1 : index
    %c1_30 = arith.constant 1 : index
    %c0_31 = arith.constant 0 : index
    %c0_32 = arith.constant 0 : index
    %21 = vector.load %arg2[%c1_29, %c1_30, %c0_31, %c0_32] : memref<2x2x256x128xbf16, #tpu.memory_space<vmem>>, vector<1x1x256x128xbf16>
    %22 = vector.shape_cast %21 : vector<1x1x256x128xbf16> to vector<256x128xbf16>
    %cst_33 = arith.constant dense<0.000000e+00> : vector<32x128xf32>
    %23 = tpu.matmul %20, %22, %cst_33 {dimension_numbers = #tpu.dot_dimension_numbers<[1], [0], [0], [1], [0, 0, 1, 1], [], []>} : vector<32x256xbf16>, vector<256x128xbf16>, vector<32x128xf32> -> vector<32x128xf32>
    %24 = arith.addf %18, %23 : vector<32x128xf32>
    %c0_34 = arith.constant 0 : index
    %c0_35 = arith.constant 0 : index
    %25 = vector.load %arg3[%c0_34, %c0_35] : memref<1x128xf32, #tpu.memory_space<vmem>>, vector<1x128xf32>
    %26 = vector.broadcast %25 : vector<1x128xf32> to vector<32x128xf32>
    %27 = arith.mulf %24, %26 : vector<32x128xf32>
    %c0_36 = arith.constant 0 : index
    %c0_37 = arith.constant 0 : index
    %28 = vector.load %arg4[%c0_36, %c0_37] : memref<1x128xf32, #tpu.memory_space<vmem>>, vector<1x128xf32>
    %29 = vector.broadcast %28 : vector<1x128xf32> to vector<32x128xf32>
    %30 = arith.addf %27, %29 : vector<32x128xf32>
    %cst_38 = arith.constant 0.000000e+00 : f32
    %31 = vector.broadcast %cst_38 : f32 to vector<32x128xf32>
    %32 = arith.cmpf oge, %30, %31 : vector<32x128xf32>
    %cst_39 = arith.constant 1.000000e-01 : f32
    %33 = vector.broadcast %cst_39 : f32 to vector<32x128xf32>
    %34 = arith.mulf %33, %30 : vector<32x128xf32>
    %35 = arith.select %32, %30, %34 : vector<32x128xi1>, vector<32x128xf32>
    %36 = arith.truncf %35 : vector<32x128xf32> to vector<32x128xbf16>
    %c0_40 = arith.constant 0 : index
    %c0_41 = arith.constant 0 : index
    %37 = vector.load %arg5[%c0_40, %c0_41] : memref<32x128xbf16, #tpu.memory_space<vmem>>, vector<32x128xbf16>
    tpu.vector_store %arg5[%c0_40, %c0_41], %36 {strides = array<i32>} : memref<32x128xbf16, #tpu.memory_space<vmem>>, vector<32x128xbf16>,
    return
  }
  func.func @transform_0(%arg0: i32) -> (i32, i32, i32, i32) {
    %c0_i32 = arith.constant 0 : i32
    %c0_i32_0 = arith.constant 0 : i32
    %c0_i32_1 = arith.constant 0 : i32
    %c0_i32_2 = arith.constant 0 : i32
    return %arg0, %c0_i32, %c0_i32_0, %c0_i32_1 : i32, i32, i32, i32
  }
  func.func @transform_1(%arg0: i32) -> (i32, i32, i32, i32) {
    %c0_i32 = arith.constant 0 : i32
    %c0_i32_0 = arith.constant 0 : i32
    %c0_i32_1 = arith.constant 0 : i32
    %c0_i32_2 = arith.constant 0 : i32
    %c0_i32_3 = arith.constant 0 : i32
    return %c0_i32, %c0_i32_0, %c0_i32_1, %c0_i32_2 : i32, i32, i32, i32
  }
  func.func @transform_2(%arg0: i32) -> (i32, i32) {
    %c0_i32 = arith.constant 0 : i32
    %c0_i32_0 = arith.constant 0 : i32
    %c0_i32_1 = arith.constant 0 : i32
    return %c0_i32, %c0_i32_0 : i32, i32
  }
  func.func @transform_3(%arg0: i32) -> (i32, i32) {
    %c0_i32 = arith.constant 0 : i32
    %c0_i32_0 = arith.constant 0 : i32
    %c0_i32_1 = arith.constant 0 : i32
    return %c0_i32, %c0_i32_0 : i32, i32
  }
  func.func @transform_4(%arg0: i32) -> (i32, i32) {
    %c0_i32 = arith.constant 0 : i32
    %c0_i32_0 = arith.constant 0 : i32
    return %arg0, %c0_i32 : i32, i32
  }
}

module attributes {stable_mosaic.version = 11 : i64} {
  func.func @_conv3_classifier_kernel(%arg0: i32, %arg1: memref<2x3x3x512xbf16, #tpu.memory_space<vmem>>, %arg2: memref<2x2x512x256xbf16, #tpu.memory_space<vmem>>, %arg3: memref<1x256xf32, #tpu.memory_space<vmem>>, %arg4: memref<1x256xf32, #tpu.memory_space<vmem>>, %arg5: memref<2x2x256x256xbf16, #tpu.memory_space<vmem>>, %arg6: memref<1x256xf32, #tpu.memory_space<vmem>>, %arg7: memref<1x256xf32, #tpu.memory_space<vmem>>, %arg8: memref<1x1xf32, #tpu.memory_space<vmem>>, %arg9: memref<2x1xf32, #tpu.memory_space<vmem>>) attributes {dimension_semantics = [#tpu.dimension_semantics<parallel>], iteration_bounds = array<i64: 1>, scalar_prefetch = 0 : i64, scratch_operands = 0 : i64, tpu.core_type = #tpu.core_type<tc>, window_params = [{transform_indices = @transform_0, window_bounds = array<i64: 2, 3, 3, 512>}, {pipeline_mode = #tpu.pipeline_mode<synchronous>, transform_indices = @transform_1, window_bounds = array<i64: 2, 2, 512, 256>}, {pipeline_mode = #tpu.pipeline_mode<synchronous>, transform_indices = @transform_2, window_bounds = array<i64: 1, 256>}, {pipeline_mode = #tpu.pipeline_mode<synchronous>, transform_indices = @transform_3, window_bounds = array<i64: 1, 256>}, {pipeline_mode = #tpu.pipeline_mode<synchronous>, transform_indices = @transform_4, window_bounds = array<i64: 2, 2, 256, 256>}, {pipeline_mode = #tpu.pipeline_mode<synchronous>, transform_indices = @transform_5, window_bounds = array<i64: 1, 256>}, {pipeline_mode = #tpu.pipeline_mode<synchronous>, transform_indices = @transform_6, window_bounds = array<i64: 1, 256>}, {pipeline_mode = #tpu.pipeline_mode<synchronous>, transform_indices = @transform_7, window_bounds = array<i64: 1, 1>}, {transform_indices = @transform_8, window_bounds = array<i64: 2, 1>}]} {
    %cst = arith.constant 0.000000e+00 : f32
    %0 = vector.broadcast %cst : f32 to vector<2x256xf32>
    %cst_0 = arith.constant 0.000000e+00 : f32
    %1 = vector.broadcast %cst_0 : f32 to vector<2x256xf32>
    %c0 = arith.constant 0 : index
    %c0_1 = arith.constant 0 : index
    %c0_2 = arith.constant 0 : index
    %c0_3 = arith.constant 0 : index
    %2 = vector.load %arg1[%c0, %c0_1, %c0_2, %c0_3] : memref<2x3x3x512xbf16, #tpu.memory_space<vmem>>, vector<2x1x1x512xbf16>
    %3 = vector.shape_cast %2 : vector<2x1x1x512xbf16> to vector<2x512xbf16>
    %c0_4 = arith.constant 0 : index
    %c0_5 = arith.constant 0 : index
    %c0_6 = arith.constant 0 : index
    %c0_7 = arith.constant 0 : index
    %4 = vector.load %arg2[%c0_4, %c0_5, %c0_6, %c0_7] : memref<2x2x512x256xbf16, #tpu.memory_space<vmem>>, vector<1x1x512x256xbf16>
    %5 = vector.shape_cast %4 : vector<1x1x512x256xbf16> to vector<512x256xbf16>
    %cst_8 = arith.constant dense<0.000000e+00> : vector<2x256xf32>
    %6 = tpu.matmul %3, %5, %cst_8 {dimension_numbers = #tpu.dot_dimension_numbers<[1], [0], [0], [1], [0, 0, 1, 1], [], []>} : vector<2x512xbf16>, vector<512x256xbf16>, vector<2x256xf32> -> vector<2x256xf32>
    %7 = arith.addf %1, %6 : vector<2x256xf32>
    %c0_9 = arith.constant 0 : index
    %c0_10 = arith.constant 0 : index
    %c1 = arith.constant 1 : index
    %c0_11 = arith.constant 0 : index
    %8 = vector.load %arg1[%c0_9, %c0_10, %c1, %c0_11] : memref<2x3x3x512xbf16, #tpu.memory_space<vmem>>, vector<2x1x1x512xbf16>
    %9 = vector.shape_cast %8 : vector<2x1x1x512xbf16> to vector<2x512xbf16>
    %c0_12 = arith.constant 0 : index
    %c1_13 = arith.constant 1 : index
    %c0_14 = arith.constant 0 : index
    %c0_15 = arith.constant 0 : index
    %10 = vector.load %arg2[%c0_12, %c1_13, %c0_14, %c0_15] : memref<2x2x512x256xbf16, #tpu.memory_space<vmem>>, vector<1x1x512x256xbf16>
    %11 = vector.shape_cast %10 : vector<1x1x512x256xbf16> to vector<512x256xbf16>
    %cst_16 = arith.constant dense<0.000000e+00> : vector<2x256xf32>
    %12 = tpu.matmul %9, %11, %cst_16 {dimension_numbers = #tpu.dot_dimension_numbers<[1], [0], [0], [1], [0, 0, 1, 1], [], []>} : vector<2x512xbf16>, vector<512x256xbf16>, vector<2x256xf32> -> vector<2x256xf32>
    %13 = arith.addf %7, %12 : vector<2x256xf32>
    %c0_17 = arith.constant 0 : index
    %c1_18 = arith.constant 1 : index
    %c0_19 = arith.constant 0 : index
    %c0_20 = arith.constant 0 : index
    %14 = vector.load %arg1[%c0_17, %c1_18, %c0_19, %c0_20] : memref<2x3x3x512xbf16, #tpu.memory_space<vmem>>, vector<2x1x1x512xbf16>
    %15 = vector.shape_cast %14 : vector<2x1x1x512xbf16> to vector<2x512xbf16>
    %c1_21 = arith.constant 1 : index
    %c0_22 = arith.constant 0 : index
    %c0_23 = arith.constant 0 : index
    %c0_24 = arith.constant 0 : index
    %16 = vector.load %arg2[%c1_21, %c0_22, %c0_23, %c0_24] : memref<2x2x512x256xbf16, #tpu.memory_space<vmem>>, vector<1x1x512x256xbf16>
    %17 = vector.shape_cast %16 : vector<1x1x512x256xbf16> to vector<512x256xbf16>
    %cst_25 = arith.constant dense<0.000000e+00> : vector<2x256xf32>
    %18 = tpu.matmul %15, %17, %cst_25 {dimension_numbers = #tpu.dot_dimension_numbers<[1], [0], [0], [1], [0, 0, 1, 1], [], []>} : vector<2x512xbf16>, vector<512x256xbf16>, vector<2x256xf32> -> vector<2x256xf32>
    %19 = arith.addf %13, %18 : vector<2x256xf32>
    %c0_26 = arith.constant 0 : index
    %c1_27 = arith.constant 1 : index
    %c1_28 = arith.constant 1 : index
    %c0_29 = arith.constant 0 : index
    %20 = vector.load %arg1[%c0_26, %c1_27, %c1_28, %c0_29] : memref<2x3x3x512xbf16, #tpu.memory_space<vmem>>, vector<2x1x1x512xbf16>
    %21 = vector.shape_cast %20 : vector<2x1x1x512xbf16> to vector<2x512xbf16>
    %c1_30 = arith.constant 1 : index
    %c1_31 = arith.constant 1 : index
    %c0_32 = arith.constant 0 : index
    %c0_33 = arith.constant 0 : index
    %22 = vector.load %arg2[%c1_30, %c1_31, %c0_32, %c0_33] : memref<2x2x512x256xbf16, #tpu.memory_space<vmem>>, vector<1x1x512x256xbf16>
    %23 = vector.shape_cast %22 : vector<1x1x512x256xbf16> to vector<512x256xbf16>
    %cst_34 = arith.constant dense<0.000000e+00> : vector<2x256xf32>
    %24 = tpu.matmul %21, %23, %cst_34 {dimension_numbers = #tpu.dot_dimension_numbers<[1], [0], [0], [1], [0, 0, 1, 1], [], []>} : vector<2x512xbf16>, vector<512x256xbf16>, vector<2x256xf32> -> vector<2x256xf32>
    %25 = arith.addf %19, %24 : vector<2x256xf32>
    %c0_35 = arith.constant 0 : index
    %c0_36 = arith.constant 0 : index
    %26 = vector.load %arg3[%c0_35, %c0_36] : memref<1x256xf32, #tpu.memory_space<vmem>>, vector<1x256xf32>
    %27 = vector.broadcast %26 : vector<1x256xf32> to vector<2x256xf32>
    %28 = arith.mulf %25, %27 : vector<2x256xf32>
    %c0_37 = arith.constant 0 : index
    %c0_38 = arith.constant 0 : index
    %29 = vector.load %arg4[%c0_37, %c0_38] : memref<1x256xf32, #tpu.memory_space<vmem>>, vector<1x256xf32>
    %30 = vector.broadcast %29 : vector<1x256xf32> to vector<2x256xf32>
    %31 = arith.addf %28, %30 : vector<2x256xf32>
    %cst_39 = arith.constant 0.000000e+00 : f32
    %32 = vector.broadcast %cst_39 : f32 to vector<2x256xf32>
    %33 = arith.cmpf oge, %31, %32 : vector<2x256xf32>
    %cst_40 = arith.constant 1.000000e-01 : f32
    %34 = vector.broadcast %cst_40 : f32 to vector<2x256xf32>
    %35 = arith.mulf %34, %31 : vector<2x256xf32>
    %36 = arith.select %33, %31, %35 : vector<2x256xi1>, vector<2x256xf32>
    %37 = arith.truncf %36 : vector<2x256xf32> to vector<2x256xbf16>
    %c0_41 = arith.constant 0 : index
    %c0_42 = arith.constant 0 : index
    %c0_43 = arith.constant 0 : index
    %c0_44 = arith.constant 0 : index
    %38 = vector.load %arg5[%c0_41, %c0_42, %c0_43, %c0_44] : memref<2x2x256x256xbf16, #tpu.memory_space<vmem>>, vector<1x1x256x256xbf16>
    %39 = vector.shape_cast %38 : vector<1x1x256x256xbf16> to vector<256x256xbf16>
    %cst_45 = arith.constant dense<0.000000e+00> : vector<2x256xf32>
    %40 = tpu.matmul %37, %39, %cst_45 {dimension_numbers = #tpu.dot_dimension_numbers<[1], [0], [0], [1], [0, 0, 1, 1], [], []>} : vector<2x256xbf16>, vector<256x256xbf16>, vector<2x256xf32> -> vector<2x256xf32>
    %41 = arith.addf %0, %40 : vector<2x256xf32>
    %cst_46 = arith.constant 0.000000e+00 : f32
    %42 = vector.broadcast %cst_46 : f32 to vector<2x256xf32>
    %c0_47 = arith.constant 0 : index
    %c0_48 = arith.constant 0 : index
    %c1_49 = arith.constant 1 : index
    %c0_50 = arith.constant 0 : index
    %43 = vector.load %arg1[%c0_47, %c0_48, %c1_49, %c0_50] : memref<2x3x3x512xbf16, #tpu.memory_space<vmem>>, vector<2x1x1x512xbf16>
    %44 = vector.shape_cast %43 : vector<2x1x1x512xbf16> to vector<2x512xbf16>
    %c0_51 = arith.constant 0 : index
    %c0_52 = arith.constant 0 : index
    %c0_53 = arith.constant 0 : index
    %c0_54 = arith.constant 0 : index
    %45 = vector.load %arg2[%c0_51, %c0_52, %c0_53, %c0_54] : memref<2x2x512x256xbf16, #tpu.memory_space<vmem>>, vector<1x1x512x256xbf16>
    %46 = vector.shape_cast %45 : vector<1x1x512x256xbf16> to vector<512x256xbf16>
    %cst_55 = arith.constant dense<0.000000e+00> : vector<2x256xf32>
    %47 = tpu.matmul %44, %46, %cst_55 {dimension_numbers = #tpu.dot_dimension_numbers<[1], [0], [0], [1], [0, 0, 1, 1], [], []>} : vector<2x512xbf16>, vector<512x256xbf16>, vector<2x256xf32> -> vector<2x256xf32>
    %48 = arith.addf %42, %47 : vector<2x256xf32>
    %c0_56 = arith.constant 0 : index
    %c0_57 = arith.constant 0 : index
    %c2 = arith.constant 2 : index
    %c0_58 = arith.constant 0 : index
    %49 = vector.load %arg1[%c0_56, %c0_57, %c2, %c0_58] : memref<2x3x3x512xbf16, #tpu.memory_space<vmem>>, vector<2x1x1x512xbf16>
    %50 = vector.shape_cast %49 : vector<2x1x1x512xbf16> to vector<2x512xbf16>
    %c0_59 = arith.constant 0 : index
    %c1_60 = arith.constant 1 : index
    %c0_61 = arith.constant 0 : index
    %c0_62 = arith.constant 0 : index
    %51 = vector.load %arg2[%c0_59, %c1_60, %c0_61, %c0_62] : memref<2x2x512x256xbf16, #tpu.memory_space<vmem>>, vector<1x1x512x256xbf16>
    %52 = vector.shape_cast %51 : vector<1x1x512x256xbf16> to vector<512x256xbf16>
    %cst_63 = arith.constant dense<0.000000e+00> : vector<2x256xf32>
    %53 = tpu.matmul %50, %52, %cst_63 {dimension_numbers = #tpu.dot_dimension_numbers<[1], [0], [0], [1], [0, 0, 1, 1], [], []>} : vector<2x512xbf16>, vector<512x256xbf16>, vector<2x256xf32> -> vector<2x256xf32>
    %54 = arith.addf %48, %53 : vector<2x256xf32>
    %c0_64 = arith.constant 0 : index
    %c1_65 = arith.constant 1 : index
    %c1_66 = arith.constant 1 : index
    %c0_67 = arith.constant 0 : index
    %55 = vector.load %arg1[%c0_64, %c1_65, %c1_66, %c0_67] : memref<2x3x3x512xbf16, #tpu.memory_space<vmem>>, vector<2x1x1x512xbf16>
    %56 = vector.shape_cast %55 : vector<2x1x1x512xbf16> to vector<2x512xbf16>
    %c1_68 = arith.constant 1 : index
    %c0_69 = arith.constant 0 : index
    %c0_70 = arith.constant 0 : index
    %c0_71 = arith.constant 0 : index
    %57 = vector.load %arg2[%c1_68, %c0_69, %c0_70, %c0_71] : memref<2x2x512x256xbf16, #tpu.memory_space<vmem>>, vector<1x1x512x256xbf16>
    %58 = vector.shape_cast %57 : vector<1x1x512x256xbf16> to vector<512x256xbf16>
    %cst_72 = arith.constant dense<0.000000e+00> : vector<2x256xf32>
    %59 = tpu.matmul %56, %58, %cst_72 {dimension_numbers = #tpu.dot_dimension_numbers<[1], [0], [0], [1], [0, 0, 1, 1], [], []>} : vector<2x512xbf16>, vector<512x256xbf16>, vector<2x256xf32> -> vector<2x256xf32>
    %60 = arith.addf %54, %59 : vector<2x256xf32>
    %c0_73 = arith.constant 0 : index
    %c1_74 = arith.constant 1 : index
    %c2_75 = arith.constant 2 : index
    %c0_76 = arith.constant 0 : index
    %61 = vector.load %arg1[%c0_73, %c1_74, %c2_75, %c0_76] : memref<2x3x3x512xbf16, #tpu.memory_space<vmem>>, vector<2x1x1x512xbf16>
    %62 = vector.shape_cast %61 : vector<2x1x1x512xbf16> to vector<2x512xbf16>
    %c1_77 = arith.constant 1 : index
    %c1_78 = arith.constant 1 : index
    %c0_79 = arith.constant 0 : index
    %c0_80 = arith.constant 0 : index
    %63 = vector.load %arg2[%c1_77, %c1_78, %c0_79, %c0_80] : memref<2x2x512x256xbf16, #tpu.memory_space<vmem>>, vector<1x1x512x256xbf16>
    %64 = vector.shape_cast %63 : vector<1x1x512x256xbf16> to vector<512x256xbf16>
    %cst_81 = arith.constant dense<0.000000e+00> : vector<2x256xf32>
    %65 = tpu.matmul %62, %64, %cst_81 {dimension_numbers = #tpu.dot_dimension_numbers<[1], [0], [0], [1], [0, 0, 1, 1], [], []>} : vector<2x512xbf16>, vector<512x256xbf16>, vector<2x256xf32> -> vector<2x256xf32>
    %66 = arith.addf %60, %65 : vector<2x256xf32>
    %c0_82 = arith.constant 0 : index
    %c0_83 = arith.constant 0 : index
    %67 = vector.load %arg3[%c0_82, %c0_83] : memref<1x256xf32, #tpu.memory_space<vmem>>, vector<1x256xf32>
    %68 = vector.broadcast %67 : vector<1x256xf32> to vector<2x256xf32>
    %69 = arith.mulf %66, %68 : vector<2x256xf32>
    %c0_84 = arith.constant 0 : index
    %c0_85 = arith.constant 0 : index
    %70 = vector.load %arg4[%c0_84, %c0_85] : memref<1x256xf32, #tpu.memory_space<vmem>>, vector<1x256xf32>
    %71 = vector.broadcast %70 : vector<1x256xf32> to vector<2x256xf32>
    %72 = arith.addf %69, %71 : vector<2x256xf32>
    %cst_86 = arith.constant 0.000000e+00 : f32
    %73 = vector.broadcast %cst_86 : f32 to vector<2x256xf32>
    %74 = arith.cmpf oge, %72, %73 : vector<2x256xf32>
    %cst_87 = arith.constant 1.000000e-01 : f32
    %75 = vector.broadcast %cst_87 : f32 to vector<2x256xf32>
    %76 = arith.mulf %75, %72 : vector<2x256xf32>
    %77 = arith.select %74, %72, %76 : vector<2x256xi1>, vector<2x256xf32>
    %78 = arith.truncf %77 : vector<2x256xf32> to vector<2x256xbf16>
    %c0_88 = arith.constant 0 : index
    %c1_89 = arith.constant 1 : index
    %c0_90 = arith.constant 0 : index
    %c0_91 = arith.constant 0 : index
    %79 = vector.load %arg5[%c0_88, %c1_89, %c0_90, %c0_91] : memref<2x2x256x256xbf16, #tpu.memory_space<vmem>>, vector<1x1x256x256xbf16>
    %80 = vector.shape_cast %79 : vector<1x1x256x256xbf16> to vector<256x256xbf16>
    %cst_92 = arith.constant dense<0.000000e+00> : vector<2x256xf32>
    %81 = tpu.matmul %78, %80, %cst_92 {dimension_numbers = #tpu.dot_dimension_numbers<[1], [0], [0], [1], [0, 0, 1, 1], [], []>} : vector<2x256xbf16>, vector<256x256xbf16>, vector<2x256xf32> -> vector<2x256xf32>
    %82 = arith.addf %41, %81 : vector<2x256xf32>
    %cst_93 = arith.constant 0.000000e+00 : f32
    %83 = vector.broadcast %cst_93 : f32 to vector<2x256xf32>
    %c0_94 = arith.constant 0 : index
    %c1_95 = arith.constant 1 : index
    %c0_96 = arith.constant 0 : index
    %c0_97 = arith.constant 0 : index
    %84 = vector.load %arg1[%c0_94, %c1_95, %c0_96, %c0_97] : memref<2x3x3x512xbf16, #tpu.memory_space<vmem>>, vector<2x1x1x512xbf16>
    %85 = vector.shape_cast %84 : vector<2x1x1x512xbf16> to vector<2x512xbf16>
    %c0_98 = arith.constant 0 : index
    %c0_99 = arith.constant 0 : index
    %c0_100 = arith.constant 0 : index
    %c0_101 = arith.constant 0 : index
    %86 = vector.load %arg2[%c0_98, %c0_99, %c0_100, %c0_101] : memref<2x2x512x256xbf16, #tpu.memory_space<vmem>>, vector<1x1x512x256xbf16>
    %87 = vector.shape_cast %86 : vector<1x1x512x256xbf16> to vector<512x256xbf16>
    %cst_102 = arith.constant dense<0.000000e+00> : vector<2x256xf32>
    %88 = tpu.matmul %85, %87, %cst_102 {dimension_numbers = #tpu.dot_dimension_numbers<[1], [0], [0], [1], [0, 0, 1, 1], [], []>} : vector<2x512xbf16>, vector<512x256xbf16>, vector<2x256xf32> -> vector<2x256xf32>
    %89 = arith.addf %83, %88 : vector<2x256xf32>
    %c0_103 = arith.constant 0 : index
    %c1_104 = arith.constant 1 : index
    %c1_105 = arith.constant 1 : index
    %c0_106 = arith.constant 0 : index
    %90 = vector.load %arg1[%c0_103, %c1_104, %c1_105, %c0_106] : memref<2x3x3x512xbf16, #tpu.memory_space<vmem>>, vector<2x1x1x512xbf16>
    %91 = vector.shape_cast %90 : vector<2x1x1x512xbf16> to vector<2x512xbf16>
    %c0_107 = arith.constant 0 : index
    %c1_108 = arith.constant 1 : index
    %c0_109 = arith.constant 0 : index
    %c0_110 = arith.constant 0 : index
    %92 = vector.load %arg2[%c0_107, %c1_108, %c0_109, %c0_110] : memref<2x2x512x256xbf16, #tpu.memory_space<vmem>>, vector<1x1x512x256xbf16>
    %93 = vector.shape_cast %92 : vector<1x1x512x256xbf16> to vector<512x256xbf16>
    %cst_111 = arith.constant dense<0.000000e+00> : vector<2x256xf32>
    %94 = tpu.matmul %91, %93, %cst_111 {dimension_numbers = #tpu.dot_dimension_numbers<[1], [0], [0], [1], [0, 0, 1, 1], [], []>} : vector<2x512xbf16>, vector<512x256xbf16>, vector<2x256xf32> -> vector<2x256xf32>
    %95 = arith.addf %89, %94 : vector<2x256xf32>
    %c0_112 = arith.constant 0 : index
    %c2_113 = arith.constant 2 : index
    %c0_114 = arith.constant 0 : index
    %c0_115 = arith.constant 0 : index
    %96 = vector.load %arg1[%c0_112, %c2_113, %c0_114, %c0_115] : memref<2x3x3x512xbf16, #tpu.memory_space<vmem>>, vector<2x1x1x512xbf16>
    %97 = vector.shape_cast %96 : vector<2x1x1x512xbf16> to vector<2x512xbf16>
    %c1_116 = arith.constant 1 : index
    %c0_117 = arith.constant 0 : index
    %c0_118 = arith.constant 0 : index
    %c0_119 = arith.constant 0 : index
    %98 = vector.load %arg2[%c1_116, %c0_117, %c0_118, %c0_119] : memref<2x2x512x256xbf16, #tpu.memory_space<vmem>>, vector<1x1x512x256xbf16>
    %99 = vector.shape_cast %98 : vector<1x1x512x256xbf16> to vector<512x256xbf16>
    %cst_120 = arith.constant dense<0.000000e+00> : vector<2x256xf32>
    %100 = tpu.matmul %97, %99, %cst_120 {dimension_numbers = #tpu.dot_dimension_numbers<[1], [0], [0], [1], [0, 0, 1, 1], [], []>} : vector<2x512xbf16>, vector<512x256xbf16>, vector<2x256xf32> -> vector<2x256xf32>
    %101 = arith.addf %95, %100 : vector<2x256xf32>
    %c0_121 = arith.constant 0 : index
    %c2_122 = arith.constant 2 : index
    %c1_123 = arith.constant 1 : index
    %c0_124 = arith.constant 0 : index
    %102 = vector.load %arg1[%c0_121, %c2_122, %c1_123, %c0_124] : memref<2x3x3x512xbf16, #tpu.memory_space<vmem>>, vector<2x1x1x512xbf16>
    %103 = vector.shape_cast %102 : vector<2x1x1x512xbf16> to vector<2x512xbf16>
    %c1_125 = arith.constant 1 : index
    %c1_126 = arith.constant 1 : index
    %c0_127 = arith.constant 0 : index
    %c0_128 = arith.constant 0 : index
    %104 = vector.load %arg2[%c1_125, %c1_126, %c0_127, %c0_128] : memref<2x2x512x256xbf16, #tpu.memory_space<vmem>>, vector<1x1x512x256xbf16>
    %105 = vector.shape_cast %104 : vector<1x1x512x256xbf16> to vector<512x256xbf16>
    %cst_129 = arith.constant dense<0.000000e+00> : vector<2x256xf32>
    %106 = tpu.matmul %103, %105, %cst_129 {dimension_numbers = #tpu.dot_dimension_numbers<[1], [0], [0], [1], [0, 0, 1, 1], [], []>} : vector<2x512xbf16>, vector<512x256xbf16>, vector<2x256xf32> -> vector<2x256xf32>
    %107 = arith.addf %101, %106 : vector<2x256xf32>
    %c0_130 = arith.constant 0 : index
    %c0_131 = arith.constant 0 : index
    %108 = vector.load %arg3[%c0_130, %c0_131] : memref<1x256xf32, #tpu.memory_space<vmem>>, vector<1x256xf32>
    %109 = vector.broadcast %108 : vector<1x256xf32> to vector<2x256xf32>
    %110 = arith.mulf %107, %109 : vector<2x256xf32>
    %c0_132 = arith.constant 0 : index
    %c0_133 = arith.constant 0 : index
    %111 = vector.load %arg4[%c0_132, %c0_133] : memref<1x256xf32, #tpu.memory_space<vmem>>, vector<1x256xf32>
    %112 = vector.broadcast %111 : vector<1x256xf32> to vector<2x256xf32>
    %113 = arith.addf %110, %112 : vector<2x256xf32>
    %cst_134 = arith.constant 0.000000e+00 : f32
    %114 = vector.broadcast %cst_134 : f32 to vector<2x256xf32>
    %115 = arith.cmpf oge, %113, %114 : vector<2x256xf32>
    %cst_135 = arith.constant 1.000000e-01 : f32
    %116 = vector.broadcast %cst_135 : f32 to vector<2x256xf32>
    %117 = arith.mulf %116, %113 : vector<2x256xf32>
    %118 = arith.select %115, %113, %117 : vector<2x256xi1>, vector<2x256xf32>
    %119 = arith.truncf %118 : vector<2x256xf32> to vector<2x256xbf16>
    %c1_136 = arith.constant 1 : index
    %c0_137 = arith.constant 0 : index
    %c0_138 = arith.constant 0 : index
    %c0_139 = arith.constant 0 : index
    %120 = vector.load %arg5[%c1_136, %c0_137, %c0_138, %c0_139] : memref<2x2x256x256xbf16, #tpu.memory_space<vmem>>, vector<1x1x256x256xbf16>
    %121 = vector.shape_cast %120 : vector<1x1x256x256xbf16> to vector<256x256xbf16>
    %cst_140 = arith.constant dense<0.000000e+00> : vector<2x256xf32>
    %122 = tpu.matmul %119, %121, %cst_140 {dimension_numbers = #tpu.dot_dimension_numbers<[1], [0], [0], [1], [0, 0, 1, 1], [], []>} : vector<2x256xbf16>, vector<256x256xbf16>, vector<2x256xf32> -> vector<2x256xf32>
    %123 = arith.addf %82, %122 : vector<2x256xf32>
    %cst_141 = arith.constant 0.000000e+00 : f32
    %124 = vector.broadcast %cst_141 : f32 to vector<2x256xf32>
    %c0_142 = arith.constant 0 : index
    %c1_143 = arith.constant 1 : index
    %c1_144 = arith.constant 1 : index
    %c0_145 = arith.constant 0 : index
    %125 = vector.load %arg1[%c0_142, %c1_143, %c1_144, %c0_145] : memref<2x3x3x512xbf16, #tpu.memory_space<vmem>>, vector<2x1x1x512xbf16>
    %126 = vector.shape_cast %125 : vector<2x1x1x512xbf16> to vector<2x512xbf16>
    %c0_146 = arith.constant 0 : index
    %c0_147 = arith.constant 0 : index
    %c0_148 = arith.constant 0 : index
    %c0_149 = arith.constant 0 : index
    %127 = vector.load %arg2[%c0_146, %c0_147, %c0_148, %c0_149] : memref<2x2x512x256xbf16, #tpu.memory_space<vmem>>, vector<1x1x512x256xbf16>
    %128 = vector.shape_cast %127 : vector<1x1x512x256xbf16> to vector<512x256xbf16>
    %cst_150 = arith.constant dense<0.000000e+00> : vector<2x256xf32>
    %129 = tpu.matmul %126, %128, %cst_150 {dimension_numbers = #tpu.dot_dimension_numbers<[1], [0], [0], [1], [0, 0, 1, 1], [], []>} : vector<2x512xbf16>, vector<512x256xbf16>, vector<2x256xf32> -> vector<2x256xf32>
    %130 = arith.addf %124, %129 : vector<2x256xf32>
    %c0_151 = arith.constant 0 : index
    %c1_152 = arith.constant 1 : index
    %c2_153 = arith.constant 2 : index
    %c0_154 = arith.constant 0 : index
    %131 = vector.load %arg1[%c0_151, %c1_152, %c2_153, %c0_154] : memref<2x3x3x512xbf16, #tpu.memory_space<vmem>>, vector<2x1x1x512xbf16>
    %132 = vector.shape_cast %131 : vector<2x1x1x512xbf16> to vector<2x512xbf16>
    %c0_155 = arith.constant 0 : index
    %c1_156 = arith.constant 1 : index
    %c0_157 = arith.constant 0 : index
    %c0_158 = arith.constant 0 : index
    %133 = vector.load %arg2[%c0_155, %c1_156, %c0_157, %c0_158] : memref<2x2x512x256xbf16, #tpu.memory_space<vmem>>, vector<1x1x512x256xbf16>
    %134 = vector.shape_cast %133 : vector<1x1x512x256xbf16> to vector<512x256xbf16>
    %cst_159 = arith.constant dense<0.000000e+00> : vector<2x256xf32>
    %135 = tpu.matmul %132, %134, %cst_159 {dimension_numbers = #tpu.dot_dimension_numbers<[1], [0], [0], [1], [0, 0, 1, 1], [], []>} : vector<2x512xbf16>, vector<512x256xbf16>, vector<2x256xf32> -> vector<2x256xf32>
    %136 = arith.addf %130, %135 : vector<2x256xf32>
    %c0_160 = arith.constant 0 : index
    %c2_161 = arith.constant 2 : index
    %c1_162 = arith.constant 1 : index
    %c0_163 = arith.constant 0 : index
    %137 = vector.load %arg1[%c0_160, %c2_161, %c1_162, %c0_163] : memref<2x3x3x512xbf16, #tpu.memory_space<vmem>>, vector<2x1x1x512xbf16>
    %138 = vector.shape_cast %137 : vector<2x1x1x512xbf16> to vector<2x512xbf16>
    %c1_164 = arith.constant 1 : index
    %c0_165 = arith.constant 0 : index
    %c0_166 = arith.constant 0 : index
    %c0_167 = arith.constant 0 : index
    %139 = vector.load %arg2[%c1_164, %c0_165, %c0_166, %c0_167] : memref<2x2x512x256xbf16, #tpu.memory_space<vmem>>, vector<1x1x512x256xbf16>
    %140 = vector.shape_cast %139 : vector<1x1x512x256xbf16> to vector<512x256xbf16>
    %cst_168 = arith.constant dense<0.000000e+00> : vector<2x256xf32>
    %141 = tpu.matmul %138, %140, %cst_168 {dimension_numbers = #tpu.dot_dimension_numbers<[1], [0], [0], [1], [0, 0, 1, 1], [], []>} : vector<2x512xbf16>, vector<512x256xbf16>, vector<2x256xf32> -> vector<2x256xf32>
    %142 = arith.addf %136, %141 : vector<2x256xf32>
    %c0_169 = arith.constant 0 : index
    %c2_170 = arith.constant 2 : index
    %c2_171 = arith.constant 2 : index
    %c0_172 = arith.constant 0 : index
    %143 = vector.load %arg1[%c0_169, %c2_170, %c2_171, %c0_172] : memref<2x3x3x512xbf16, #tpu.memory_space<vmem>>, vector<2x1x1x512xbf16>
    %144 = vector.shape_cast %143 : vector<2x1x1x512xbf16> to vector<2x512xbf16>
    %c1_173 = arith.constant 1 : index
    %c1_174 = arith.constant 1 : index
    %c0_175 = arith.constant 0 : index
    %c0_176 = arith.constant 0 : index
    %145 = vector.load %arg2[%c1_173, %c1_174, %c0_175, %c0_176] : memref<2x2x512x256xbf16, #tpu.memory_space<vmem>>, vector<1x1x512x256xbf16>
    %146 = vector.shape_cast %145 : vector<1x1x512x256xbf16> to vector<512x256xbf16>
    %cst_177 = arith.constant dense<0.000000e+00> : vector<2x256xf32>
    %147 = tpu.matmul %144, %146, %cst_177 {dimension_numbers = #tpu.dot_dimension_numbers<[1], [0], [0], [1], [0, 0, 1, 1], [], []>} : vector<2x512xbf16>, vector<512x256xbf16>, vector<2x256xf32> -> vector<2x256xf32>
    %148 = arith.addf %142, %147 : vector<2x256xf32>
    %c0_178 = arith.constant 0 : index
    %c0_179 = arith.constant 0 : index
    %149 = vector.load %arg3[%c0_178, %c0_179] : memref<1x256xf32, #tpu.memory_space<vmem>>, vector<1x256xf32>
    %150 = vector.broadcast %149 : vector<1x256xf32> to vector<2x256xf32>
    %151 = arith.mulf %148, %150 : vector<2x256xf32>
    %c0_180 = arith.constant 0 : index
    %c0_181 = arith.constant 0 : index
    %152 = vector.load %arg4[%c0_180, %c0_181] : memref<1x256xf32, #tpu.memory_space<vmem>>, vector<1x256xf32>
    %153 = vector.broadcast %152 : vector<1x256xf32> to vector<2x256xf32>
    %154 = arith.addf %151, %153 : vector<2x256xf32>
    %cst_182 = arith.constant 0.000000e+00 : f32
    %155 = vector.broadcast %cst_182 : f32 to vector<2x256xf32>
    %156 = arith.cmpf oge, %154, %155 : vector<2x256xf32>
    %cst_183 = arith.constant 1.000000e-01 : f32
    %157 = vector.broadcast %cst_183 : f32 to vector<2x256xf32>
    %158 = arith.mulf %157, %154 : vector<2x256xf32>
    %159 = arith.select %156, %154, %158 : vector<2x256xi1>, vector<2x256xf32>
    %160 = arith.truncf %159 : vector<2x256xf32> to vector<2x256xbf16>
    %c1_184 = arith.constant 1 : index
    %c1_185 = arith.constant 1 : index
    %c0_186 = arith.constant 0 : index
    %c0_187 = arith.constant 0 : index
    %161 = vector.load %arg5[%c1_184, %c1_185, %c0_186, %c0_187] : memref<2x2x256x256xbf16, #tpu.memory_space<vmem>>, vector<1x1x256x256xbf16>
    %162 = vector.shape_cast %161 : vector<1x1x256x256xbf16> to vector<256x256xbf16>
    %cst_188 = arith.constant dense<0.000000e+00> : vector<2x256xf32>
    %163 = tpu.matmul %160, %162, %cst_188 {dimension_numbers = #tpu.dot_dimension_numbers<[1], [0], [0], [1], [0, 0, 1, 1], [], []>} : vector<2x256xbf16>, vector<256x256xbf16>, vector<2x256xf32> -> vector<2x256xf32>
    %164 = arith.addf %123, %163 : vector<2x256xf32>
    %c0_189 = arith.constant 0 : index
    %c0_190 = arith.constant 0 : index
    %165 = vector.load %arg6[%c0_189, %c0_190] : memref<1x256xf32, #tpu.memory_space<vmem>>, vector<1x256xf32>
    %166 = vector.broadcast %165 : vector<1x256xf32> to vector<2x256xf32>
    %167 = arith.addf %164, %166 : vector<2x256xf32>
    %cst_191 = arith.constant 0.000000e+00 : f32
    %168 = vector.broadcast %cst_191 : f32 to vector<2x256xf32>
    %169 = arith.cmpf oge, %167, %168 : vector<2x256xf32>
    %cst_192 = arith.constant 1.000000e-01 : f32
    %170 = vector.broadcast %cst_192 : f32 to vector<2x256xf32>
    %171 = arith.mulf %170, %167 : vector<2x256xf32>
    %172 = arith.select %169, %167, %171 : vector<2x256xi1>, vector<2x256xf32>
    %c0_193 = arith.constant 0 : index
    %c0_194 = arith.constant 0 : index
    %173 = vector.load %arg7[%c0_193, %c0_194] : memref<1x256xf32, #tpu.memory_space<vmem>>, vector<1x256xf32>
    %174 = vector.broadcast %173 : vector<1x256xf32> to vector<2x256xf32>
    %175 = arith.mulf %172, %174 : vector<2x256xf32>
    %cst_195 = arith.constant dense<0.000000e+00> : vector<2xf32>
    %176 = vector.multi_reduction <add>, %175, %cst_195 [1] : vector<2x256xf32> to vector<2xf32>
    %177 = vector.shape_cast %176 : vector<2xf32> to vector<2x1xf32>
    %c0_196 = arith.constant 0 : index
    %c0_197 = arith.constant 0 : index
    %178 = vector.load %arg8[%c0_196, %c0_197] : memref<1x1xf32, #tpu.memory_space<vmem>>, vector<1x1xf32>
    %179 = vector.broadcast %178 : vector<1x1xf32> to vector<2x1xf32>
    %180 = arith.addf %177, %179 : vector<2x1xf32>
    %c0_198 = arith.constant 0 : index
    %c0_199 = arith.constant 0 : index
    %181 = vector.load %arg9[%c0_198, %c0_199] : memref<2x1xf32, #tpu.memory_space<vmem>>, vector<2x1xf32>
    tpu.vector_store %arg9[%c0_198, %c0_199], %180 {strides = array<i32>} : memref<2x1xf32, #tpu.memory_space<vmem>>, vector<2x1xf32>,
    return
  }
  func.func @transform_0(%arg0: i32) -> (i32, i32, i32, i32) {
    %c0_i32 = arith.constant 0 : i32
    %c0_i32_0 = arith.constant 0 : i32
    %c0_i32_1 = arith.constant 0 : i32
    %c0_i32_2 = arith.constant 0 : i32
    return %arg0, %c0_i32, %c0_i32_0, %c0_i32_1 : i32, i32, i32, i32
  }
  func.func @transform_1(%arg0: i32) -> (i32, i32, i32, i32) {
    %c0_i32 = arith.constant 0 : i32
    %c0_i32_0 = arith.constant 0 : i32
    %c0_i32_1 = arith.constant 0 : i32
    %c0_i32_2 = arith.constant 0 : i32
    %c0_i32_3 = arith.constant 0 : i32
    return %c0_i32, %c0_i32_0, %c0_i32_1, %c0_i32_2 : i32, i32, i32, i32
  }
  func.func @transform_2(%arg0: i32) -> (i32, i32) {
    %c0_i32 = arith.constant 0 : i32
    %c0_i32_0 = arith.constant 0 : i32
    %c0_i32_1 = arith.constant 0 : i32
    return %c0_i32, %c0_i32_0 : i32, i32
  }
  func.func @transform_3(%arg0: i32) -> (i32, i32) {
    %c0_i32 = arith.constant 0 : i32
    %c0_i32_0 = arith.constant 0 : i32
    %c0_i32_1 = arith.constant 0 : i32
    return %c0_i32, %c0_i32_0 : i32, i32
  }
  func.func @transform_4(%arg0: i32) -> (i32, i32, i32, i32) {
    %c0_i32 = arith.constant 0 : i32
    %c0_i32_0 = arith.constant 0 : i32
    %c0_i32_1 = arith.constant 0 : i32
    %c0_i32_2 = arith.constant 0 : i32
    %c0_i32_3 = arith.constant 0 : i32
    return %c0_i32, %c0_i32_0, %c0_i32_1, %c0_i32_2 : i32, i32, i32, i32
  }
  func.func @transform_5(%arg0: i32) -> (i32, i32) {
    %c0_i32 = arith.constant 0 : i32
    %c0_i32_0 = arith.constant 0 : i32
    %c0_i32_1 = arith.constant 0 : i32
    return %c0_i32, %c0_i32_0 : i32, i32
  }
  func.func @transform_6(%arg0: i32) -> (i32, i32) {
    %c0_i32 = arith.constant 0 : i32
    %c0_i32_0 = arith.constant 0 : i32
    %c0_i32_1 = arith.constant 0 : i32
    return %c0_i32, %c0_i32_0 : i32, i32
  }
  func.func @transform_7(%arg0: i32) -> (i32, i32) {
    %c0_i32 = arith.constant 0 : i32
    %c0_i32_0 = arith.constant 0 : i32
    %c0_i32_1 = arith.constant 0 : i32
    return %c0_i32, %c0_i32_0 : i32, i32
  }
  func.func @transform_8(%arg0: i32) -> (i32, i32) {
    %c0_i32 = arith.constant 0 : i32
    %c0_i32_0 = arith.constant 0 : i32
    return %arg0, %c0_i32 : i32, i32
  }
}

</mosaic_0001>

<bundles_post_ra>
// kernel: discriminator_forward.3
= control target key start
LH: loop header
LB: loop body
LE: loop exit
PB: predicated region body
PF: predicated region fallthrough
CT: control target
= control target key end

     0   :  { %9 = vsyncpa [#allocation3], 0  ;;  %s2006_s0 = inlined_call_operand.vmem [shape: bf16[2,9,9,16], index: 0, kind: input, shape index: {}]   ;;  %s2007_s1 = inlined_call_operand.hbm [shape: bf16[2,2,16,64], index: 1, kind: input, shape index: {}]   ;;  %s2008_s2 = inlined_call_operand.hbm [shape: f32[1,64], index: 2, kind: input, shape index: {}]   ;;  %s2009_s3 = inlined_call_operand.hbm [shape: f32[1,64], index: 3, kind: input, shape index: {}]   ;;  %s2010_s4 = inlined_call_operand.vmem [shape: bf16[128,64], index: 4, kind: output, shape index: {}]  }
   0x1   :  { %10 = vsyncpa [#allocation5], 0  ;;  %s31_s17 = sshll.u32 %s2008_s2, 4  ;;  %s1471_s18 = smov [#allocation4]   ;;  %s32_s17 = int_to_ptr.hbm [resolvable:$true] %s31_s17 }
   0x2   :  { %s33_s19 = sshll.u32 %s1471_s18, 4  ;;  %s17_s22 = sshll.u32 %s2007_s1, 4  ;;  %s34_s19 = int_to_ptr.vmem [resolvable:$true] %s33_s19  ;;  %s18_s22 = int_to_ptr.hbm [resolvable:$true] %s17_s22 }
   0x3   :  { %36 = dma.hbm_to_vmem [thread:$0]  %s32_s17, 16, %s34_s19, [#allocation5]  }
   0x4   :  { %s1472_s23 = smov [#allocation2]   ;;  %s1473_s25 = smov 64  }
   0x5   :  { %s19_s24 = sshll.u32 %s1472_s23, 4  ;;  %s1474_s26 = smov 4   ;;  %s20_s24 = int_to_ptr.vmem [resolvable:$true] %s19_s24 }
   0x6   :  { %25 = dma.hbm_to_vmem [thread:$0]  %s18_s22, 512, %s20_s24, [#allocation3], %s1473_s25, %s1473_s25, %s1474_s26  }
   0x7   :  { %s42_s2 = sshll.u32 %s2009_s3, 4  ;;  %s1475_s29 = smov [#allocation6]   ;;  %s43_s2 = int_to_ptr.hbm [resolvable:$true] %s42_s2 }
   0x8   :  { %s44_s30 = sshll.u32 %s1475_s29, 4  ;;  %s45_s30 = int_to_ptr.vmem [resolvable:$true] %s44_s30 }
   0x9   :  { %47 = dma.hbm_to_vmem [thread:$0]  %s43_s2, 16, %s45_s30, [#allocation5]  }
   0xa   :  { %1467 = dma.done.wait [#allocation3], 512  }
   0xb   :  { %1468 = vsyncadd [#allocation3], 4294966784 }
   0xc   :  { %1469 = dma.done.wait [#allocation5], 32  }
   0xd   :  { %1470 = vsyncadd [#allocation5], 4294967264  ;;  %vm355_vm0 = vcmask 130048   ;;  %v1386_v0 = vld [vmem:[#allocation2 + $0x10] sm:$0xff]  ;;  %v1376_v1 = vld [vmem:[#allocation2] sm:$0xff]  ;;  %vm1185_vm5 = vcmask 519168  }
   0xe   :  { %v1282_v2 = vld [vmem:[%s2006_s0 + $0x8] sm:$0xf]  ;;  %vm95_vm1 = vsmask.f32 3328  ;;  %v1378_v3 = vld [vmem:[%s2006_s0 + $0xc] sm:$0xf0]  ;;  %645 = vmatpush.bf16.msra.mxu2 %v1386_v0  ;;  %506 = vmatpush.bf16.msra.mxu1 %v1376_v1 }
   0xf   :  { %v1222_v4 = vld [vmem:[%s2006_s0] sm:$0xf]  ;;  %v1368_v5 = vld [vmem:[%s2006_s0 + $0x4] sm:$0xf0]  ;;  %v1283_v6 = vor.u32 %v1378_v3, %v1282_v2  ;;  %v1387_v9 = vld [vmem:[#allocation2 + $0x18] sm:$0xff] }
  0x10   :  { %v1223_v7 = vor.u32 %v1368_v5, %v1222_v4  ;;  %v1377_v8 = vld [vmem:[#allocation2 + $0x8] sm:$0xff]  ;;  %v61_v10 = vld [vmem:[%s2006_s0] sm:$0xf]  ;;  %vm96_vm2 = vsmask.f32 7440  ;;  %1023 = vmatpush.bf16.msra.mxu3 %v1387_v9 }
  0x11   :  { %v62_v11 = vld [vmem:[%s2006_s0 + $0x8] sm:$0xf]  ;;  %v79_v12 = vld [vmem:[%s2006_s0 + $0x4] sm:$0x1]  ;;  %v80_v13 = vld [vmem:[%s2006_s0 + $0xc] sm:$0x1]  ;;  %387 = vmatpush.bf16.msra.mxu0 %v1377_v8  ;;  %1316 = vmatmul.msk.bf16.vlgmr.msra.gmra.mxu2 %vm355_vm0, %v1283_v6 }
  0x12   :  { %v99_v14 = vshrl.u32 %v61_v10, 16  ;;  %v102_v15 = vshll.u32 %v61_v10, 16  ;;  %v108_v16 = vshll.u32 %v79_v12, 16  ;;  %v113_v17 = vshrl.u32 %v62_v11, 16  ;;  %v1324_v18 = vld [vmem:[%s2006_s0 + $0x8] sm:$0xf]  ;;  %1256 = vmatmul.msk.bf16.vlgmr.msra.gmra.mxu1 %vm355_vm0, %v1223_v7  ;;  %vm1560_vm3 = vmor %vm95_vm1, %vm96_vm2 }
  0x13   :  { %v116_v19 = vshll.u32 %v62_v11, 16  ;;  %v122_v20 = vshll.u32 %v80_v13, 16  ;;  %v1325_v21 = vld [vmem:[%s2006_s0 + $0xc] sm:$0x1]  ;;  %v1326_v22 = vld [vmem:[%s2006_s0 + $0x10] sm:$0xf] }
  0x14   :  { %v101_v23 = vrot.slane %v99_v14, 4  ;;  %v104_v24 = vrot.slane %v102_v15, 5  ;;  %v110_v25 = vrot.slane %v108_v16, 5  ;;  %v115_v26 = vrot.slane %v113_v17, 4  ;;  %v1327_v27 = vld [vmem:[%s2006_s0 + $0x14] sm:$0x1] }
  0x15   :  { %v118_v28 = vrot.slane %v116_v19, 5  ;;  %v124_v29 = vrot.slane %v122_v20, 5  ;;  %v736_v30 = vshrl.u32 %v1324_v18, 16  ;;  %v739_v31 = vshll.u32 %v1324_v18, 16  ;;  %v1551_v32 = vld [vmem:[%s2006_s0 + $0x18] sm:$0xf] }
  0x16   :  { %v105_v33 = vor.u32 %v104_v24, %v101_v23  ;;  %v745_v34 = vshll.u32 %v1325_v21, 16  ;;  %v750_v35 = vshrl.u32 %v1326_v22, 16  ;;  %v753_v36 = vshll.u32 %v1326_v22, 16  ;;  %v1556_v37 = vld [vmem:[%s2006_s0 + $0x1c] sm:$0xf0] }
  0x17   :  { %v119_v39 = vor.u32 %v118_v28, %v115_v26  ;;  %v738_v40 = vrot.slane %v736_v30, 4  ;;  %v741_v41 = vrot.slane %v739_v31, 5  ;;  %v759_v42 = vshll.u32 %v1327_v27, 16  ;;  %v1226_v43 = vld [vmem:[%s2006_s0 + $0x10] sm:$0xf] }
  0x18   :  { %v106_v44 = vrot.slane %v105_v33, 4  ;;  %v747_v45 = vrot.slane %v745_v34, 5  ;;  %v752_v46 = vrot.slane %v750_v35, 4  ;;  %v755_v47 = vrot.slane %v753_v36, 5  ;;  %v1369_v48 = vld [vmem:[%s2006_s0 + $0x14] sm:$0xf0] }
  0x19   :  { %v120_v49 = vrot.slane %v119_v39, 4  ;;  %v742_v50 = vor.u32 %v741_v41, %v738_v40  ;;  %v761_v51 = vrot.slane %v759_v42, 5  ;;  %v1287_v52 = vor.u32 %v1556_v37, %v1551_v32  ;;  %v63_v53 = vld [vmem:[%s2006_s0 + $0x10] sm:$0xf]  ;;  %v64_v57 = vld [vmem:[%s2006_s0 + $0x18] sm:$0xf] }
  0x1a   :  { %v111_v54 = vsel %vm1560_vm3, %v106_v44, %v110_v25  ;;  %v756_v55 = vor.u32 %v755_v47, %v752_v46  ;;  %v1227_v56 = vor.u32 %v1369_v48, %v1226_v43  ;;  %v81_v58 = vld [vmem:[%s2006_s0 + $0x14] sm:$0x1]  ;;  %v127_v59 = vshrl.u32 %v63_v53, 16  ;;  %v82_v63 = vld [vmem:[%s2006_s0 + $0x1c] sm:$0x1] }
  0x1b   :  { %v125_v60 = vsel %vm1560_vm3, %v120_v49, %v124_v29  ;;  %v325_v61 = vunpack.c.l.b16 %v111_v54  ;;  %v743_v62 = vrot.slane %v742_v50, 4  ;;  %v130_v0 = vshll.u32 %v63_v53, 16  ;;  %v1328_v5 = vld [vmem:[%s2006_s0 + $0x18] sm:$0xf]  ;;  %v1329_v10 = vld [vmem:[%s2006_s0 + $0x1c] sm:$0x1] }
  0x1c   :  { %v326_v1 = vunpack.c.l.b16 %v125_v60  ;;  %v757_v2 = vrot.slane %v756_v55, 4  ;;  %v129_v3 = vrot.slane %v127_v59, 4  ;;  %v136_v4 = vshll.u32 %v81_v58, 16  ;;  %v1330_v15 = vld [vmem:[%s2006_s0 + $0x20] sm:$0xf] }
  0x1d   :  { %v748_v6 = vsel %vm1560_vm3, %v743_v62, %v747_v45  ;;  %v132_v7 = vrot.slane %v130_v0, 5  ;;  %v141_v8 = vshrl.u32 %v64_v57, 16  ;;  %v144_v9 = vshll.u32 %v64_v57, 16  ;;  %v1331_v27 = vld [vmem:[%s2006_s0 + $0x24] sm:$0x1] }
  0x1e   :  { %v341_v11 = vpack.c.b16 %v326_v1, %v325_v61  ;;  %v762_v12 = vsel %vm1560_vm3, %v757_v2, %v761_v51  ;;  %v962_v13 = vunpack.c.l.b16 %v748_v6  ;;  %v138_v14 = vrot.slane %v136_v4, 5  ;;  %v65_v32 = vld [vmem:[%s2006_s0 + $0x20] sm:$0xf]  ;;  %v66_v41 = vld [vmem:[%s2006_s0 + $0x28] sm:$0xf] }
  0x1f   :  { %v963_v16 = vunpack.c.l.b16 %v762_v12  ;;  %v133_v17 = vor.u32 %v132_v7, %v129_v3  ;;  %v143_v18 = vrot.slane %v141_v8, 4  ;;  %v146_v19 = vrot.slane %v144_v9, 5  ;;  %v83_v47 = vld [vmem:[%s2006_s0 + $0x24] sm:$0x1]  ;;  %v1332_v53 = vld [vmem:[%s2006_s0 + $0x28] sm:$0xf] }
  0x20   :  { %1212 = vmatmul.msk.bf16.vlgmr.msra.gmra.mxu0 %vm355_vm0, %v341_v11  ;;  %v150_v20 = vshll.u32 %v82_v63, 16  ;;  %v764_v21 = vshrl.u32 %v1328_v5, 16  ;;  %v767_v22 = vshll.u32 %v1328_v5, 16  ;;  %v773_v23 = vshll.u32 %v1329_v10, 16  ;;  %v1334_v59 = vld [vmem:[%s2006_s0 + $0x30] sm:$0xf] }
  0x21   :  { %v978_v24 = vpack.c.b16 %v963_v16, %v962_v13  ;;  %v134_v25 = vrot.slane %v133_v17, 4  ;;  %v147_v26 = vor.u32 %v146_v19, %v143_v18  ;;  %v778_v28 = vshrl.u32 %v1330_v15, 16  ;;  %1317 = vmatmul.msk.bf16.gmra.mxu2 %vm355_vm0, %v1287_v52  ;;  %v1290_v0 = vld [vmem:[%s2006_s0 + $0x28] sm:$0xf]  ;;  %v1380_v1 = vld [vmem:[%s2006_s0 + $0x2c] sm:$0xf0] }
  0x22   :  { %v152_v29 = vrot.slane %v150_v20, 5  ;;  %v766_v30 = vrot.slane %v764_v21, 4  ;;  %v769_v31 = vrot.slane %v767_v22, 5  ;;  %v781_v36 = vshll.u32 %v1330_v15, 16  ;;  %1257 = vmatmul.msk.bf16.gmra.mxu1 %vm355_vm0, %v1227_v56  ;;  %v84_v56 = vld [vmem:[%s2006_s0 + $0x2c] sm:$0x1] }
  0x23   :  { %1360 = vmatmul.msk.bf16.vlgmr.msra.gmra.mxu3 %vm355_vm0, %v978_v24  ;;  %v139_v33 = vsel %vm1560_vm3, %v134_v25, %v138_v14  ;;  %v148_v34 = vrot.slane %v147_v26, 4  ;;  %v780_v35 = vrot.slane %v778_v28, 4  ;;  %v775_v39 = vrot.slane %v773_v23, 5  ;;  %v1333_v7 = vld [vmem:[%s2006_s0 + $0x2c] sm:$0x1] }
  0x24   :  { %v770_v37 = vor.u32 %v769_v31, %v766_v30  ;;  %v787_v40 = vshll.u32 %v1331_v27, 16  ;;  %v783_v43 = vrot.slane %v781_v36, 5  ;;  %v155_v44 = vshrl.u32 %v65_v32, 16  ;;  %v1230_v12 = vld [vmem:[%s2006_s0 + $0x20] sm:$0xf] }
  0x25   :  { %v153_v42 = vsel %vm1560_vm3, %v148_v34, %v152_v29  ;;  %v327_v45 = vunpack.c.l.b16 %v139_v33  ;;  %v158_v48 = vshll.u32 %v65_v32, 16  ;;  %v169_v52 = vshrl.u32 %v66_v41, 16  ;;  %v1370_v13 = vld [vmem:[%s2006_s0 + $0x24] sm:$0xf0]  ;;  %v1335_v17 = vld [vmem:[%s2006_s0 + $0x34] sm:$0x1] }
  0x26   :  { %v771_v46 = vrot.slane %v770_v37, 4  ;;  %v784_v49 = vor.u32 %v783_v43, %v780_v35  ;;  %v789_v50 = vrot.slane %v787_v40, 5  ;;  %v157_v51 = vrot.slane %v155_v44, 4  ;;  %v67_v28 = vld [vmem:[%s2006_s0 + $0x30] sm:$0xf] }
  0x27   :  { %v328_v54 = vunpack.c.l.b16 %v153_v42  ;;  %v160_v57 = vrot.slane %v158_v48, 5  ;;  %v172_v58 = vshll.u32 %v66_v41, 16  ;;  %v164_v61 = vshll.u32 %v83_v47, 16  ;;  %v68_v32 = vld [vmem:[%s2006_s0 + $0x38] sm:$0xf] }
  0x28   :  { %v776_v55 = vsel %vm1560_vm3, %v771_v46, %v775_v39  ;;  %v785_v60 = vrot.slane %v784_v49, 4  ;;  %v171_v62 = vrot.slane %v169_v52, 4  ;;  %v792_v4 = vshrl.u32 %v1332_v53, 16  ;;  %v1338_v46 = vld [vmem:[%s2006_s0 + $0x40] sm:$0xf] }
  0x29   :  { %v964_v63 = vunpack.c.l.b16 %v776_v55  ;;  %v161_v2 = vor.u32 %v160_v57, %v157_v51  ;;  %v174_v3 = vrot.slane %v172_v58, 5  ;;  %v178_v6 = vshll.u32 %v84_v56, 16  ;;  %v85_v51 = vld [vmem:[%s2006_s0 + $0x34] sm:$0x1] }
  0x2a   :  { %v790_v5 = vsel %vm1560_vm3, %v785_v60, %v789_v50  ;;  %v795_v8 = vshll.u32 %v1332_v53, 16  ;;  %v806_v9 = vshrl.u32 %v1334_v59, 16  ;;  %v342_v10 = vpack.c.b16 %v328_v54, %v327_v45  ;;  %v1336_v45 = vld [vmem:[%s2006_s0 + $0x38] sm:$0xf] }
  0x2b   :  { %v965_v11 = vunpack.c.l.b16 %v790_v5  ;;  %v175_v14 = vor.u32 %v174_v3, %v171_v62  ;;  %v1291_v15 = vor.u32 %v1380_v1, %v1290_v0  ;;  %v166_v16 = vrot.slane %v164_v61, 5  ;;  %v1381_v0 = vld [vmem:[%s2006_s0 + $0x3c] sm:$0xf0]  ;;  %v1234_v3 = vld [vmem:[%s2006_s0 + $0x30] sm:$0xf] }
  0x2c   :  { %v794_v18 = vrot.slane %v792_v4, 4  ;;  %v797_v19 = vrot.slane %v795_v8, 5  ;;  %v162_v20 = vrot.slane %v161_v2, 4  ;;  %v801_v21 = vshll.u32 %v1333_v7, 16  ;;  %v1371_v4 = vld [vmem:[%s2006_s0 + $0x34] sm:$0xf0] }
  0x2d   :  { %v808_v22 = vrot.slane %v806_v9, 4  ;;  %v809_v23 = vshll.u32 %v1334_v59, 16  ;;  %v979_v24 = vpack.c.b16 %v965_v11, %v964_v63  ;;  %v176_v25 = vrot.slane %v175_v14, 4  ;;  %v86_v59 = vld [vmem:[%s2006_s0 + $0x3c] sm:$0x1] }
  0x2e   :  { %v180_v26 = vrot.slane %v178_v6, 5  ;;  %v798_v27 = vor.u32 %v797_v19, %v794_v18  ;;  %v1231_v29 = vor.u32 %v1370_v13, %v1230_v12  ;;  %v815_v31 = vshll.u32 %v1335_v17, 16  ;;  %v1294_v63 = vld [vmem:[%s2006_s0 + $0x38] sm:$0xf]  ;;  %v1339_v13 = vld [vmem:[%s2006_s0 + $0x44] sm:$0x1] }
  0x2f   :  { %v811_v30 = vrot.slane %v809_v23, 5  ;;  %v803_v33 = vrot.slane %v801_v21, 5  ;;  %v183_v35 = vshrl.u32 %v67_v28, 16  ;;  %v167_v36 = vsel %vm1560_vm3, %v162_v20, %v166_v16 }
  0x30   :  { %1213 = vmatmul.msk.bf16.gmra.mxu0 %vm355_vm0, %v342_v10  ;;  %v181_v37 = vsel %vm1560_vm3, %v176_v25, %v180_v26  ;;  %v799_v39 = vrot.slane %v798_v27, 4  ;;  %v186_v40 = vshll.u32 %v67_v28, 16  ;;  %v817_v42 = vrot.slane %v815_v31, 5  ;;  %v1337_v10 = vld [vmem:[%s2006_s0 + $0x3c] sm:$0x1] }
  0x31   :  { %v812_v34 = vor.u32 %v811_v30, %v808_v22  ;;  %1318 = vmatmul.msk.bf16.gmra.mxu2 %vm355_vm0, %v1291_v15  ;;  %v197_v43 = vshrl.u32 %v68_v32, 16  ;;  %v200_v44 = vshll.u32 %v68_v32, 16  ;;  %v329_v47 = vunpack.c.l.b16 %v167_v36  ;;  %v69_v25 = vld [vmem:[%s2006_s0 + $0x48] sm:$0xf]  ;;  %v70_v26 = vld [vmem:[%s2006_s0 + $0x50] sm:$0xf] }
  0x32   :  { %1258 = vmatmul.msk.bf16.gmra.mxu1 %vm355_vm0, %v1231_v29  ;;  %v330_v48 = vunpack.c.l.b16 %v181_v37  ;;  %v185_v49 = vrot.slane %v183_v35, 4  ;;  %v804_v50 = vsel %vm1560_vm3, %v799_v39, %v803_v33  ;;  %v188_v52 = vrot.slane %v186_v40, 5  ;;  %v1340_v27 = vld [vmem:[%s2006_s0 + $0x50] sm:$0xf]  ;;  %v1342_v39 = vld [vmem:[%s2006_s0 + $0x58] sm:$0xf] }
  0x33   :  { %1361 = vmatmul.msk.bf16.gmra.mxu3 %vm355_vm0, %v979_v24  ;;  %v813_v41 = vrot.slane %v812_v34, 4  ;;  %v820_v53 = vshrl.u32 %v1336_v45, 16  ;;  %v823_v54 = vshll.u32 %v1336_v45, 16  ;;  %v199_v56 = vrot.slane %v197_v43, 4 }
  0x34   :  { %v202_v57 = vrot.slane %v200_v44, 5  ;;  %v834_v58 = vshrl.u32 %v1338_v46, 16  ;;  %v837_v60 = vshll.u32 %v1338_v46, 16  ;;  %v343_v61 = vpack.c.b16 %v330_v48, %v329_v47  ;;  %v87_v47 = vld [vmem:[%s2006_s0 + $0x4c] sm:$0x1] }
  0x35   :  { %v818_v55 = vsel %vm1560_vm3, %v813_v41, %v817_v42  ;;  %v966_v62 = vunpack.c.l.b16 %v804_v50  ;;  %v192_v1 = vshll.u32 %v85_v51, 16  ;;  %v189_v5 = vor.u32 %v188_v52, %v185_v49 }
  0x36   :  { %v967_v2 = vunpack.c.l.b16 %v818_v55  ;;  %v822_v6 = vrot.slane %v820_v53, 4  ;;  %v825_v7 = vrot.slane %v823_v54, 5  ;;  %v203_v8 = vor.u32 %v202_v57, %v199_v56  ;;  %v88_v55 = vld [vmem:[%s2006_s0 + $0x54] sm:$0x1] }
  0x37   :  { %v206_v9 = vshll.u32 %v86_v59, 16  ;;  %v836_v11 = vrot.slane %v834_v58, 4  ;;  %v839_v12 = vrot.slane %v837_v60, 5  ;;  %v1295_v14 = vor.u32 %v1381_v0, %v1294_v63  ;;  %v1341_v56 = vld [vmem:[%s2006_s0 + $0x54] sm:$0x1] }
  0x38   :  { %v1235_v15 = vor.u32 %v1371_v4, %v1234_v3  ;;  %v194_v16 = vrot.slane %v192_v1, 5  ;;  %v980_v17 = vpack.c.b16 %v967_v2, %v966_v62  ;;  %v190_v18 = vrot.slane %v189_v5, 4  ;;  %v1298_v59 = vld [vmem:[%s2006_s0 + $0x50] sm:$0xf]  ;;  %v1382_v60 = vld [vmem:[%s2006_s0 + $0x54] sm:$0xf0] }
  0x39   :  { %v826_v19 = vor.u32 %v825_v7, %v822_v6  ;;  %v829_v20 = vshll.u32 %v1337_v10, 16  ;;  %v204_v21 = vrot.slane %v203_v8, 4  ;;  %v208_v22 = vrot.slane %v206_v9, 5  ;;  %v1238_v63 = vld [vmem:[%s2006_s0 + $0x48] sm:$0xf] }
  0x3a   :  { %v840_v23 = vor.u32 %v839_v12, %v836_v11  ;;  %v843_v24 = vshll.u32 %v1339_v13, 16  ;;  %v195_v28 = vsel %vm1560_vm3, %v190_v18, %v194_v16  ;;  %v211_v31 = vshrl.u32 %v69_v25, 16  ;;  %v1372_v0 = vld [vmem:[%s2006_s0 + $0x4c] sm:$0xf0]  ;;  %v1343_v6 = vld [vmem:[%s2006_s0 + $0x5c] sm:$0x1] }
  0x3b   :  { %v827_v29 = vrot.slane %v826_v19, 4  ;;  %v831_v30 = vrot.slane %v829_v20, 5  ;;  %v209_v32 = vsel %vm1560_vm3, %v204_v21, %v208_v22  ;;  %v214_v35 = vshll.u32 %v69_v25, 16  ;;  %v71_v12 = vld [vmem:[%s2006_s0 + $0x58] sm:$0xf] }
  0x3c   :  { %v841_v33 = vrot.slane %v840_v23, 4  ;;  %v845_v34 = vrot.slane %v843_v24, 5  ;;  %v225_v36 = vshrl.u32 %v70_v26, 16  ;;  %v228_v37 = vshll.u32 %v70_v26, 16  ;;  %v1344_v26 = vld [vmem:[%s2006_s0 + $0x60] sm:$0xf] }
  0x3d   :  { %v848_v40 = vshrl.u32 %v1340_v27, 16  ;;  %v851_v41 = vshll.u32 %v1340_v27, 16  ;;  %v331_v42 = vunpack.c.l.b16 %v195_v28  ;;  %v332_v43 = vunpack.c.l.b16 %v209_v32  ;;  %v1346_v27 = vld [vmem:[%s2006_s0 + $0x68] sm:$0xf] }
  0x3e   :  { %v832_v44 = vsel %vm1560_vm3, %v827_v29, %v831_v30  ;;  %v213_v45 = vrot.slane %v211_v31, 4  ;;  %v846_v46 = vsel %vm1560_vm3, %v841_v33, %v845_v34  ;;  %v216_v48 = vrot.slane %v214_v35, 5  ;;  %v89_v33 = vld [vmem:[%s2006_s0 + $0x5c] sm:$0x1] }
  0x3f   :  { %v862_v49 = vshrl.u32 %v1342_v39, 16  ;;  %v865_v50 = vshll.u32 %v1342_v39, 16  ;;  %v227_v51 = vrot.slane %v225_v36, 4  ;;  %v230_v52 = vrot.slane %v228_v37, 5 }
  0x40   :  { %1214 = vmatmul.msk.bf16.gmra.mxu0 %vm355_vm0, %v343_v61  ;;  %v850_v53 = vrot.slane %v848_v40, 4  ;;  %v853_v54 = vrot.slane %v851_v41, 5  ;;  %v968_v57 = vunpack.c.l.b16 %v832_v44  ;;  %v969_v58 = vunpack.c.l.b16 %v846_v46  ;;  %v90_v46 = vld [vmem:[%s2006_s0 + $0x64] sm:$0x1] }
  0x41   :  { %1319 = vmatmul.msk.bf16.gmra.mxu2 %vm355_vm0, %v1295_v14  ;;  %v220_v61 = vshll.u32 %v87_v47, 16  ;;  %v344_v62 = vpack.c.b16 %v332_v43, %v331_v42  ;;  %v217_v1 = vor.u32 %v216_v48, %v213_v45  ;;  %v864_v2 = vrot.slane %v862_v49, 4  ;;  %v1302_v48 = vld [vmem:[%s2006_s0 + $0x60] sm:$0xf] }
  0x42   :  { %1259 = vmatmul.msk.bf16.gmra.mxu1 %vm355_vm0, %v1235_v15  ;;  %v867_v3 = vrot.slane %v865_v50, 5  ;;  %v231_v4 = vor.u32 %v230_v52, %v227_v51  ;;  %v234_v5 = vshll.u32 %v88_v55, 16  ;;  %v854_v7 = vor.u32 %v853_v54, %v850_v53  ;;  %v1383_v50 = vld [vmem:[%s2006_s0 + $0x64] sm:$0xf0] }
  0x43   :  { %1362 = vmatmul.msk.bf16.gmra.mxu3 %vm355_vm0, %v980_v17  ;;  %v857_v8 = vshll.u32 %v1341_v56, 16  ;;  %v981_v9 = vpack.c.b16 %v969_v58, %v968_v57  ;;  %v1299_v10 = vor.u32 %v1382_v60, %v1298_v59  ;;  %v1239_v11 = vor.u32 %v1372_v0, %v1238_v63  ;;  %v72_v17 = vld [vmem:[%s2006_s0 + $0x60] sm:$0xf]  ;;  %v1345_v59 = vld [vmem:[%s2006_s0 + $0x64] sm:$0x1] }
  0x44   :  { %v218_v13 = vrot.slane %v217_v1, 4  ;;  %v222_v14 = vrot.slane %v220_v61, 5  ;;  %v868_v15 = vor.u32 %v867_v3, %v864_v2  ;;  %v871_v16 = vshll.u32 %v1343_v6, 16  ;;  %v1347_v60 = vld [vmem:[%s2006_s0 + $0x6c] sm:$0x1] }
  0x45   :  { %v232_v18 = vrot.slane %v231_v4, 4  ;;  %v236_v19 = vrot.slane %v234_v5, 5  ;;  %v855_v20 = vrot.slane %v854_v7, 4  ;;  %v859_v21 = vrot.slane %v857_v8, 5  ;;  %v1242_v63 = vld [vmem:[%s2006_s0 + $0x58] sm:$0xf] }
  0x46   :  { %v239_v22 = vshrl.u32 %v71_v12, 16  ;;  %v242_v23 = vshll.u32 %v71_v12, 16  ;;  %v253_v24 = vshrl.u32 %v72_v17, 16  ;;  %v256_v25 = vshll.u32 %v72_v17, 16  ;;  %v1373_v0 = vld [vmem:[%s2006_s0 + $0x5c] sm:$0xf0] }
  0x47   :  { %v869_v28 = vrot.slane %v868_v15, 4  ;;  %v873_v29 = vrot.slane %v871_v16, 5  ;;  %v223_v30 = vsel %vm1560_vm3, %v218_v13, %v222_v14  ;;  %v237_v31 = vsel %vm1560_vm3, %v232_v18, %v236_v19  ;;  %v74_v12 = vld [vmem:[%s2006_s0 + $0x70] sm:$0xf] }
  0x48   :  { %v860_v32 = vsel %vm1560_vm3, %v855_v20, %v859_v21  ;;  %v876_v34 = vshrl.u32 %v1344_v26, 16  ;;  %v879_v35 = vshll.u32 %v1344_v26, 16  ;;  %v890_v36 = vshrl.u32 %v1346_v27, 16 }
  0x49   :  { %v893_v37 = vshll.u32 %v1346_v27, 16  ;;  %v241_v39 = vrot.slane %v239_v22, 4  ;;  %v244_v40 = vrot.slane %v242_v23, 5  ;;  %v255_v41 = vrot.slane %v253_v24, 4  ;;  %v1348_v23 = vld [vmem:[%s2006_s0 + $0x70] sm:$0xf] }
  0x4a   :  { %v258_v42 = vrot.slane %v256_v25, 5  ;;  %v333_v43 = vunpack.c.l.b16 %v223_v30  ;;  %v334_v44 = vunpack.c.l.b16 %v237_v31  ;;  %v874_v45 = vsel %vm1560_vm3, %v869_v28, %v873_v29  ;;  %v1350_v24 = vld [vmem:[%s2006_s0 + $0x78] sm:$0xf] }
  0x4b   :  { %v970_v47 = vunpack.c.l.b16 %v860_v32  ;;  %v248_v49 = vshll.u32 %v89_v33, 16  ;;  %v878_v51 = vrot.slane %v876_v34, 4  ;;  %v881_v52 = vrot.slane %v879_v35, 5 }
  0x4c   :  { %v892_v53 = vrot.slane %v890_v36, 4  ;;  %v895_v54 = vrot.slane %v893_v37, 5  ;;  %v971_v55 = vunpack.c.l.b16 %v874_v45  ;;  %v245_v56 = vor.u32 %v244_v40, %v241_v39  ;;  %v91_v37 = vld [vmem:[%s2006_s0 + $0x6c] sm:$0x1]  ;;  %v92_v39 = vld [vmem:[%s2006_s0 + $0x74] sm:$0x1] }
  0x4d   :  { %v259_v57 = vor.u32 %v258_v42, %v255_v41  ;;  %v262_v58 = vshll.u32 %v90_v46, 16  ;;  %v345_v61 = vpack.c.b16 %v334_v44, %v333_v43  ;;  %v250_v1 = vrot.slane %v248_v49, 5  ;;  %v1306_v43 = vld [vmem:[%s2006_s0 + $0x70] sm:$0xf]  ;;  %v1384_v44 = vld [vmem:[%s2006_s0 + $0x74] sm:$0xf0] }
  0x4e   :  { %v882_v2 = vor.u32 %v881_v52, %v878_v51  ;;  %v885_v3 = vshll.u32 %v1345_v59, 16  ;;  %v896_v4 = vor.u32 %v895_v54, %v892_v53  ;;  %v899_v5 = vshll.u32 %v1347_v60, 16  ;;  %v1246_v45 = vld [vmem:[%s2006_s0 + $0x68] sm:$0xf]  ;;  %v1374_v46 = vld [vmem:[%s2006_s0 + $0x6c] sm:$0xf0] }
  0x4f   :  { %v982_v6 = vpack.c.b16 %v971_v55, %v970_v47  ;;  %v246_v7 = vrot.slane %v245_v56, 4  ;;  %v260_v8 = vrot.slane %v259_v57, 4  ;;  %v281_v21 = vshrl.u32 %v74_v12, 16  ;;  %v1349_v55 = vld [vmem:[%s2006_s0 + $0x74] sm:$0x1] }
  0x50   :  { %1215 = vmatmul.msk.bf16.gmra.mxu0 %vm355_vm0, %v344_v62  ;;  %v1303_v62 = vor.u32 %v1383_v50, %v1302_v48  ;;  %v883_v13 = vrot.slane %v882_v2, 4  ;;  %v887_v14 = vrot.slane %v885_v3, 5  ;;  %v897_v15 = vrot.slane %v896_v4, 4  ;;  %v1351_v56 = vld [vmem:[%s2006_s0 + $0x7c] sm:$0x1] }
  0x51   :  { %1320 = vmatmul.msk.bf16.gmra.mxu2 %vm355_vm0, %v1299_v10  ;;  %v1243_v10 = vor.u32 %v1373_v0, %v1242_v63  ;;  %v901_v16 = vrot.slane %v899_v5, 5  ;;  %v251_v17 = vsel %vm1560_vm3, %v246_v7, %v250_v1  ;;  %v284_v22 = vshll.u32 %v74_v12, 16  ;;  %v75_v4 = vld [vmem:[%s2006_s0 + $0x78] sm:$0xf]  ;;  %v76_v5 = vld [vmem:[%s2006_s0 + $0x80] sm:$0xf] }
  0x52   :  { %1260 = vmatmul.msk.bf16.gmra.mxu1 %vm355_vm0, %v1239_v11  ;;  %v73_v11 = vld [vmem:[%s2006_s0 + $0x68] sm:$0xf]  ;;  %v335_v25 = vunpack.c.l.b16 %v251_v17  ;;  %v888_v27 = vsel %vm1560_vm3, %v883_v13, %v887_v14  ;;  %v904_v29 = vshrl.u32 %v1348_v23, 16  ;;  %v907_v30 = vshll.u32 %v1348_v23, 16 }
  0x53   :  { %1363 = vmatmul.msk.bf16.gmra.mxu3 %vm355_vm0, %v981_v9  ;;  %v264_v9 = vrot.slane %v262_v58, 5  ;;  %v267_v19 = vshrl.u32 %v73_v11, 16  ;;  %v270_v20 = vshll.u32 %v73_v11, 16  ;;  %v902_v28 = vsel %vm1560_vm3, %v897_v15, %v901_v16  ;;  %v1352_v16 = vld [vmem:[%s2006_s0 + $0x80] sm:$0xf] }
  0x54   :  { %v918_v31 = vshrl.u32 %v1350_v24, 16  ;;  %v921_v32 = vshll.u32 %v1350_v24, 16  ;;  %v283_v35 = vrot.slane %v281_v21, 4  ;;  %v286_v36 = vrot.slane %v284_v22, 5  ;;  %v1354_v17 = vld [vmem:[%s2006_s0 + $0x88] sm:$0xf] }
  0x55   :  { %v265_v18 = vsel %vm1560_vm3, %v260_v8, %v264_v9  ;;  %v269_v33 = vrot.slane %v267_v19, 4  ;;  %v272_v34 = vrot.slane %v270_v20, 5  ;;  %v972_v41 = vunpack.c.l.b16 %v888_v27 }
  0x56   :  { %v336_v26 = vunpack.c.l.b16 %v265_v18  ;;  %v973_v42 = vunpack.c.l.b16 %v902_v28  ;;  %v906_v47 = vrot.slane %v904_v29, 4  ;;  %v909_v48 = vrot.slane %v907_v30, 5  ;;  %v93_v30 = vld [vmem:[%s2006_s0 + $0x7c] sm:$0x1] }
  0x57   :  { %v920_v49 = vrot.slane %v918_v31, 4  ;;  %v923_v50 = vrot.slane %v921_v32, 5  ;;  %v273_v51 = vor.u32 %v272_v34, %v269_v33  ;;  %v276_v52 = vshll.u32 %v91_v37, 16  ;;  %v94_v31 = vld [vmem:[%s2006_s0 + $0x84] sm:$0x1] }
  0x58   :  { %v346_v40 = vpack.c.b16 %v336_v26, %v335_v25  ;;  %v287_v53 = vor.u32 %v286_v36, %v283_v35  ;;  %v290_v54 = vshll.u32 %v92_v39, 16  ;;  %v983_v57 = vpack.c.b16 %v973_v42, %v972_v41  ;;  %v1310_v35 = vld [vmem:[%s2006_s0 + $0x80] sm:$0xf]  ;;  %v1385_v36 = vld [vmem:[%s2006_s0 + $0x84] sm:$0xf0] }
  0x59   :  { %v1307_v58 = vor.u32 %v1384_v44, %v1306_v43  ;;  %v1247_v59 = vor.u32 %v1374_v46, %v1246_v45  ;;  %v910_v60 = vor.u32 %v909_v48, %v906_v47  ;;  %v927_v63 = vshll.u32 %v1351_v56, 16  ;;  %v1250_v37 = vld [vmem:[%s2006_s0 + $0x78] sm:$0xf]  ;;  %v1375_v39 = vld [vmem:[%s2006_s0 + $0x7c] sm:$0xf0] }
  0x5a   :  { %v274_v0 = vrot.slane %v273_v51, 4  ;;  %v278_v1 = vrot.slane %v276_v52, 5  ;;  %v288_v2 = vrot.slane %v287_v53, 4  ;;  %v292_v3 = vrot.slane %v290_v54, 5  ;;  %v1353_v48 = vld [vmem:[%s2006_s0 + $0x84] sm:$0x1] }
  0x5b   :  { %v929_v9 = vrot.slane %v927_v63, 5  ;;  %v295_v12 = vshrl.u32 %v75_v4, 16  ;;  %v298_v13 = vshll.u32 %v75_v4, 16  ;;  %v309_v14 = vshrl.u32 %v76_v5, 16 }
  0x5c   :  { %v293_v11 = vsel %vm1560_vm3, %v288_v2, %v292_v3  ;;  %v312_v15 = vshll.u32 %v76_v5, 16  ;;  %v932_v22 = vshrl.u32 %v1352_v16, 16  ;;  %v935_v23 = vshll.u32 %v1352_v16, 16 }
  0x5d   :  { %v338_v19 = vunpack.c.l.b16 %v293_v11  ;;  %v946_v24 = vshrl.u32 %v1354_v17, 16  ;;  %v949_v25 = vshll.u32 %v1354_v17, 16  ;;  %v297_v26 = vrot.slane %v295_v12, 4 }
  0x5e   :  { %v300_v27 = vrot.slane %v298_v13, 5  ;;  %v311_v28 = vrot.slane %v309_v14, 4  ;;  %v314_v29 = vrot.slane %v312_v15, 5  ;;  %v937_v41 = vrot.slane %v935_v23, 5  ;;  %v1908_v23 = vld [vmem:[#allocation6] ss:$0 sm:$0xff] }
  0x5f   :  { %v948_v42 = vrot.slane %v946_v24, 4  ;;  %v951_v43 = vrot.slane %v949_v25, 5  ;;  %v304_v45 = vshll.u32 %v93_v30, 16  ;;  %v318_v47 = vshll.u32 %v94_v31, 16 }
  0x60   :  { %1216 = vmatmul.msk.bf16.gmra.mxu0 %vm355_vm0, %v345_v61  ;;  %v913_v61 = vshll.u32 %v1349_v55, 16  ;;  %v301_v44 = vor.u32 %v300_v27, %v297_v26  ;;  %v315_v46 = vor.u32 %v314_v29, %v311_v28  ;;  %v1311_v51 = vor.u32 %v1385_v36, %v1310_v35 }
  0x61   :  { %1321 = vmatmul.msk.bf16.gmra.mxu2 %vm355_vm0, %v1303_v62  ;;  %v924_v62 = vor.u32 %v923_v50, %v920_v49  ;;  %v1355_v49 = vld [vmem:[%s2006_s0 + $0x8c] sm:$0x1]  ;;  %v1251_v52 = vor.u32 %v1375_v39, %v1250_v37  ;;  %v941_v54 = vshll.u32 %v1353_v48, 16  ;;  %v952_v55 = vor.u32 %v951_v43, %v948_v42 }
  0x62   :  { %1261 = vmatmul.msk.bf16.gmra.mxu1 %vm355_vm0, %v1243_v10  ;;  %v915_v7 = vrot.slane %v913_v61, 5  ;;  %v279_v10 = vsel %vm1560_vm3, %v274_v0, %v278_v1  ;;  %v955_v56 = vshll.u32 %v1355_v49, 16 }
  0x63   :  { %1364 = vmatmul.msk.bf16.gmra.mxu3 %vm355_vm0, %v982_v6  ;;  %v911_v6 = vrot.slane %v910_v60, 4  ;;  %v925_v8 = vrot.slane %v924_v62, 4  ;;  %v337_v18 = vunpack.c.l.b16 %v279_v10  ;;  %v320_v60 = vrot.slane %v318_v47, 5 }
  0x64   :  { %v943_v62 = vrot.slane %v941_v54, 5  ;;  %v953_v63 = vrot.slane %v952_v55, 4  ;;  %v957_v0 = vrot.slane %v955_v56, 5 }
  0x65   :  { %v916_v20 = vsel %vm1560_vm3, %v911_v6, %v915_v7  ;;  %v930_v21 = vsel %vm1560_vm3, %v925_v8, %v929_v9  ;;  %v347_v32 = vpack.c.b16 %v338_v19, %v337_v18  ;;  %v1906_v19 = vld [vmem:[#allocation4] ss:$0 sm:$0xff] }
  0x66   :  { %v974_v33 = vunpack.c.l.b16 %v916_v20  ;;  %v975_v34 = vunpack.c.l.b16 %v930_v21  ;;  %v958_v6 = vsel %vm1560_vm3, %v953_v63, %v957_v0 }
  0x67   :  { %v977_v8 = vunpack.c.l.b16 %v958_v6 }
  0x68   :  { %v984_v50 = vpack.c.b16 %v975_v34, %v974_v33 }
  0x70   :  { %1217 = vmatmul.msk.bf16.gmra.mxu0 %vm355_vm0, %v346_v40  ;;  %v934_v40 = vrot.slane %v932_v22, 4 }
  0x71   :  { %1322 = vmatmul.msk.bf16.gmra.mxu2 %vm355_vm0, %v1307_v58  ;;  %v306_v58 = vrot.slane %v304_v45, 5 }
  0x72   :  { %1262 = vmatmul.msk.bf16.gmra.mxu1 %vm355_vm0, %v1247_v59  ;;  %v938_v53 = vor.u32 %v937_v41, %v934_v40  ;;  %v316_v59 = vrot.slane %v315_v46, 4 }
  0x73   :  { %1365 = vmatmul.msk.bf16.gmra.mxu3 %vm355_vm0, %v983_v57  ;;  %v302_v57 = vrot.slane %v301_v44, 4 }
  0x74   :  { %v939_v61 = vrot.slane %v938_v53, 4  ;;  %v321_v2 = vsel %vm1560_vm3, %v316_v59, %v320_v60 }
  0x75   :  { %v307_v1 = vsel %vm1560_vm3, %v302_v57, %v306_v58  ;;  %v340_v4 = vunpack.c.l.b16 %v321_v2 }
  0x76   :  { %v339_v3 = vunpack.c.l.b16 %v307_v1  ;;  %v944_v5 = vsel %vm1560_vm3, %v939_v61, %v943_v62 }
  0x77   :  { %v976_v7 = vunpack.c.l.b16 %v944_v5 }
  0x78   :  { %v348_v9 = vpack.c.b16 %v340_v4, %v339_v3 }
  0x79   :  { %v985_v10 = vpack.c.b16 %v977_v8, %v976_v7 }
  0x80   :  { %1218 = vmatmul.msk.bf16.gmra.mxu0 %vm355_vm0, %v347_v32 }
  0x81   :  { %1323 = vmatmul.msk.bf16.gmra.mxu2 %vm355_vm0, %v1311_v51 }
  0x82   :  { %1263 = vmatmul.msk.bf16.gmra.mxu1 %vm355_vm0, %v1251_v52 }
  0x83   :  { %1366 = vmatmul.msk.bf16.gmra.mxu3 %vm355_vm0, %v984_v50 }
  0x8f   :  { %v508_v11 = vpop.f32.mrf.mxu1 }
  0x90   :  { %1219 = vmatmul.msk.bf16.gmra.mxu0 %vm355_vm0, %v348_v9 }
  0x93   :  { %1367 = vmatmul.msk.bf16.gmra.mxu3 %vm355_vm0, %v985_v10 }
  0x94   :  { %v647_v12 = vpop.f32.mrf.mxu2 }
  0x97   :  { %v510_v13 = vpop.f32.mrf.mxu1 }
  0x9c   :  { %v649_v15 = vpop.f32.mrf.mxu2 }
  0x9d   :  { %v389_v14 = vpop.f32.mrf.mxu0 }
  0x9e   :  { %v509_v16 = vadd.f32 %v508_v11, %v389_v14 }
  0x9f   :  { %v513_v17 = vpop.f32.mrf.mxu1 }
  0xa0   :  { %v687_v18 = vadd.f32 %v647_v12, %v509_v16 }
  0xa4   :  { %v652_v21 = vpop.f32.mrf.mxu2 }
  0xa5   :  { %v391_v38 = vpop.f32.mrf.mxu0 }
  0xa6   :  { %v1025_v20 = vpop.f32.mrf.mxu3  ;;  %v511_v25 = vadd.f32 %v510_v13, %v391_v38 }
  0xa7   :  { %v1065_v22 = vadd.f32 %v1025_v20, %v687_v18  ;;  %v515_v26 = vpop.f32.mrf.mxu1 }
  0xa8   :  { %v688_v29 = vadd.f32 %v649_v15, %v511_v25 }
  0xa9   :  { %v1085_v24 = vmul.f32 %v1906_v19, %v1065_v22 }
  0xab   :  { %v1105_v27 = vadd.f32 %v1908_v23, %v1085_v24 }
  0xac   :  { %v654_v32 = vpop.f32.mrf.mxu2 }
  0xad   :  { %vm1121_vm4 = vcmp.ge.f32.partialorder %v1105_v27, 0.0  ;;  %v1137_v28 = vmul.f32 0.1, %v1105_v27  ;;  %v394_v30 = vpop.f32.mrf.mxu0 }
  0xae   :  { %v1027_v31 = vpop.f32.mrf.mxu3  ;;  %v514_v35 = vadd.f32 %v513_v17, %v394_v30 }
  0xaf   :  { %v1153_v33 = vsel %vm1121_vm4, %v1105_v27, %v1137_v28  ;;  %v1066_v34 = vadd.f32 %v1027_v31, %v688_v29  ;;  %v518_v39 = vpop.f32.mrf.mxu1 }
  0xb0   :  { %v1169_v36 = vpack.c.bf16 %v1153_v33, %v1153_v33  ;;  %v689_v41 = vadd.f32 %v652_v21, %v514_v35 }
  0xb1   :  { %v1086_v37 = vmul.f32 %v1906_v19, %v1066_v34 }
  0xb2   :  { %1186 = vst.msk [vmem:[%s2010_s4] sm:$0xf] %vm1185_vm5, %v1169_v36 }
  0xb3   :  { %v1106_v40 = vadd.f32 %v1908_v23, %v1086_v37 }
  0xb4   :  { %v657_v45 = vpop.f32.mrf.mxu2 }
  0xb5   :  { %vm1122_vm6 = vcmp.ge.f32.partialorder %v1106_v40, 0.0  ;;  %v1138_v42 = vmul.f32 0.1, %v1106_v40  ;;  %v396_v43 = vpop.f32.mrf.mxu0 }
  0xb6   :  { %v1030_v44 = vpop.f32.mrf.mxu3  ;;  %v516_v50 = vadd.f32 %v515_v26, %v396_v43 }
  0xb7   :  { %v1154_v46 = vsel %vm1122_vm6, %v1106_v40, %v1138_v42  ;;  %v1067_v47 = vadd.f32 %v1030_v44, %v689_v41  ;;  %v520_v51 = vpop.f32.mrf.mxu1 }
  0xb8   :  { %v1170_v48 = vpack.c.bf16 %v1154_v46, %v1154_v46  ;;  %v690_v54 = vadd.f32 %v654_v32, %v516_v50 }
  0xb9   :  { %v1087_v49 = vmul.f32 %v1906_v19, %v1067_v47 }
  0xba   :  { %1187 = vst.msk [vmem:[%s2010_s4 + $0x4] sm:$0xf] %vm1185_vm5, %v1170_v48 }
  0xbb   :  { %v1107_v52 = vadd.f32 %v1908_v23, %v1087_v49 }
  0xbc   :  { %v659_v57 = vpop.f32.mrf.mxu2 }
  0xbd   :  { %vm1123_vm7 = vcmp.ge.f32.partialorder %v1107_v52, 0.0  ;;  %v1139_v53 = vmul.f32 0.1, %v1107_v52  ;;  %v399_v55 = vpop.f32.mrf.mxu0 }
  0xbe   :  { %v1032_v56 = vpop.f32.mrf.mxu3  ;;  %v519_v60 = vadd.f32 %v518_v39, %v399_v55 }
  0xbf   :  { %v1155_v58 = vsel %vm1123_vm7, %v1107_v52, %v1139_v53  ;;  %v1068_v59 = vadd.f32 %v1032_v56, %v690_v54  ;;  %v523_v63 = vpop.f32.mrf.mxu1 }
  0xc0   :  { %v1171_v61 = vpack.c.bf16 %v1155_v58, %v1155_v58  ;;  %v691_v1 = vadd.f32 %v657_v45, %v519_v60 }
  0xc1   :  { %v1088_v62 = vmul.f32 %v1906_v19, %v1068_v59 }
  0xc2   :  { %1188 = vst.msk [vmem:[%s2010_s4 + $0x8] sm:$0xf] %vm1185_vm5, %v1171_v61 }
  0xc3   :  { %v1108_v0 = vadd.f32 %v1908_v23, %v1088_v62 }
  0xc4   :  { %v662_v5 = vpop.f32.mrf.mxu2 }
  0xc5   :  { %vm1124_vm8 = vcmp.ge.f32.partialorder %v1108_v0, 0.0  ;;  %v1140_v2 = vmul.f32 0.1, %v1108_v0  ;;  %v401_v3 = vpop.f32.mrf.mxu0 }
  0xc6   :  { %v1035_v4 = vpop.f32.mrf.mxu3  ;;  %v521_v10 = vadd.f32 %v520_v51, %v401_v3 }
  0xc7   :  { %v1156_v6 = vsel %vm1124_vm8, %v1108_v0, %v1140_v2  ;;  %v1069_v7 = vadd.f32 %v1035_v4, %v691_v1  ;;  %v525_v11 = vpop.f32.mrf.mxu1 }
  0xc8   :  { %v1172_v8 = vpack.c.bf16 %v1156_v6, %v1156_v6  ;;  %v692_v14 = vadd.f32 %v659_v57, %v521_v10 }
  0xc9   :  { %v1089_v9 = vmul.f32 %v1906_v19, %v1069_v7 }
  0xca   :  { %1189 = vst.msk [vmem:[%s2010_s4 + $0xc] sm:$0xf] %vm1185_vm5, %v1172_v8 }
  0xcb   :  { %v1109_v12 = vadd.f32 %v1908_v23, %v1089_v9 }
  0xcc   :  { %v664_v17 = vpop.f32.mrf.mxu2 }
  0xcd   :  { %vm1125_vm9 = vcmp.ge.f32.partialorder %v1109_v12, 0.0  ;;  %v1141_v13 = vmul.f32 0.1, %v1109_v12  ;;  %v404_v15 = vpop.f32.mrf.mxu0 }
  0xce   :  { %v1037_v16 = vpop.f32.mrf.mxu3  ;;  %v524_v20 = vadd.f32 %v523_v63, %v404_v15 }
  0xcf   :  { %v1157_v18 = vsel %vm1125_vm9, %v1109_v12, %v1141_v13  ;;  %v1070_v38 = vadd.f32 %v1037_v16, %v692_v14  ;;  %v528_v24 = vpop.f32.mrf.mxu1 }
  0xd0   :  { %v1173_v21 = vpack.c.bf16 %v1157_v18, %v1157_v18  ;;  %v693_v26 = vadd.f32 %v662_v5, %v524_v20 }
  0xd1   :  { %v1090_v22 = vmul.f32 %v1906_v19, %v1070_v38 }
  0xd2   :  { %1190 = vst.msk [vmem:[%s2010_s4 + $0x10] sm:$0xf] %vm1185_vm5, %v1173_v21 }
  0xd3   :  { %v1110_v25 = vadd.f32 %v1908_v23, %v1090_v22 }
  0xd4   :  { %v667_v30 = vpop.f32.mrf.mxu2 }
  0xd5   :  { %vm1126_vm10 = vcmp.ge.f32.partialorder %v1110_v25, 0.0  ;;  %v1142_v27 = vmul.f32 0.1, %v1110_v25  ;;  %v406_v28 = vpop.f32.mrf.mxu0 }
  0xd6   :  { %v1040_v29 = vpop.f32.mrf.mxu3  ;;  %v526_v35 = vadd.f32 %v525_v11, %v406_v28 }
  0xd7   :  { %v1158_v31 = vsel %vm1126_vm10, %v1110_v25, %v1142_v27  ;;  %v1071_v32 = vadd.f32 %v1040_v29, %v693_v26  ;;  %v530_v37 = vpop.f32.mrf.mxu1 }
  0xd8   :  { %v1174_v33 = vpack.c.bf16 %v1158_v31, %v1158_v31  ;;  %v694_v40 = vadd.f32 %v664_v17, %v526_v35 }
  0xd9   :  { %v1091_v34 = vmul.f32 %v1906_v19, %v1071_v32 }
  0xda   :  { %1191 = vst.msk [vmem:[%s2010_s4 + $0x14] sm:$0xf] %vm1185_vm5, %v1174_v33 }
  0xdb   :  { %v1111_v36 = vadd.f32 %v1908_v23, %v1091_v34 }
  0xdc   :  { %v669_v47 = vpop.f32.mrf.mxu2 }
  0xdd   :  { %vm1127_vm11 = vcmp.ge.f32.partialorder %v1111_v36, 0.0  ;;  %v1143_v39 = vmul.f32 0.1, %v1111_v36  ;;  %v409_v41 = vpop.f32.mrf.mxu0 }
  0xde   :  { %v1042_v42 = vpop.f32.mrf.mxu3  ;;  %v529_v45 = vadd.f32 %v528_v24, %v409_v41 }
  0xdf   :  { %v1159_v43 = vsel %vm1127_vm11, %v1111_v36, %v1143_v39  ;;  %v1072_v44 = vadd.f32 %v1042_v42, %v694_v40  ;;  %v533_v54 = vpop.f32.mrf.mxu1 }
  0xe0   :  { %v1175_v46 = vpack.c.bf16 %v1159_v43, %v1159_v43  ;;  %v695_v50 = vadd.f32 %v667_v30, %v529_v45 }
  0xe1   :  { %v1092_v48 = vmul.f32 %v1906_v19, %v1072_v44 }
  0xe2   :  { %1192 = vst.msk [vmem:[%s2010_s4 + $0x18] sm:$0xf] %vm1185_vm5, %v1175_v46 }
  0xe3   :  { %v1112_v49 = vadd.f32 %v1908_v23, %v1092_v48 }
  0xe4   :  { %v672_v60 = vpop.f32.mrf.mxu2 }
  0xe5   :  { %vm1128_vm12 = vcmp.ge.f32.partialorder %v1112_v49, 0.0  ;;  %v1144_v51 = vmul.f32 0.1, %v1112_v49  ;;  %v411_v52 = vpop.f32.mrf.mxu0 }
  0xe6   :  { %v1045_v53 = vpop.f32.mrf.mxu3  ;;  %v531_v59 = vadd.f32 %v530_v37, %v411_v52 }
  0xe7   :  { %v1160_v55 = vsel %vm1128_vm12, %v1112_v49, %v1144_v51  ;;  %v1073_v56 = vadd.f32 %v1045_v53, %v695_v50  ;;  %v535_v6 = vpop.f32.mrf.mxu1 }
  0xe8   :  { %v1176_v57 = vpack.c.bf16 %v1160_v55, %v1160_v55  ;;  %v696_v63 = vadd.f32 %v669_v47, %v531_v59 }
  0xe9   :  { %v1093_v58 = vmul.f32 %v1906_v19, %v1073_v56 }
  0xea   :  { %1193 = vst.msk [vmem:[%s2010_s4 + $0x1c] sm:$0xf] %vm1185_vm5, %v1176_v57 }
  0xeb   :  { %v1113_v61 = vadd.f32 %v1908_v23, %v1093_v58 }
  0xec   :  { %v674_v10 = vpop.f32.mrf.mxu2 }
  0xed   :  { %vm1129_vm13 = vcmp.ge.f32.partialorder %v1113_v61, 0.0  ;;  %v1145_v62 = vmul.f32 0.1, %v1113_v61  ;;  %v414_v0 = vpop.f32.mrf.mxu0 }
  0xee   :  { %v1047_v1 = vpop.f32.mrf.mxu3  ;;  %v534_v4 = vadd.f32 %v533_v54, %v414_v0 }
  0xef   :  { %v1161_v2 = vsel %vm1129_vm13, %v1113_v61, %v1145_v62  ;;  %v1074_v3 = vadd.f32 %v1047_v1, %v696_v63  ;;  %v538_v38 = vpop.f32.mrf.mxu1 }
  0xf0   :  { %v1177_v5 = vpack.c.bf16 %v1161_v2, %v1161_v2  ;;  %v697_v9 = vadd.f32 %v672_v60, %v534_v4 }
  0xf1   :  { %v1094_v7 = vmul.f32 %v1906_v19, %v1074_v3 }
  0xf2   :  { %1194 = vst.msk [vmem:[%s2010_s4 + $0x20] sm:$0xf] %vm1185_vm5, %v1177_v5 }
  0xf3   :  { %v1114_v8 = vadd.f32 %v1908_v23, %v1094_v7 }
  0xf4   :  { %v677_v25 = vpop.f32.mrf.mxu2 }
  0xf5   :  { %vm1130_vm14 = vcmp.ge.f32.partialorder %v1114_v8, 0.0  ;;  %v1146_v11 = vmul.f32 0.1, %v1114_v8  ;;  %v416_v12 = vpop.f32.mrf.mxu0 }
  0xf6   :  { %v1050_v13 = vpop.f32.mrf.mxu3  ;;  %v536_v18 = vadd.f32 %v535_v6, %v416_v12 }
  0xf7   :  { %v1162_v14 = vsel %vm1130_vm14, %v1114_v8, %v1146_v11  ;;  %v1075_v15 = vadd.f32 %v1050_v13, %v697_v9  ;;  %v540_v34 = vpop.f32.mrf.mxu1 }
  0xf8   :  { %v1178_v16 = vpack.c.bf16 %v1162_v14, %v1162_v14  ;;  %v698_v22 = vadd.f32 %v674_v10, %v536_v18 }
  0xf9   :  { %v1095_v17 = vmul.f32 %v1906_v19, %v1075_v15 }
  0xfa   :  { %1195 = vst.msk [vmem:[%s2010_s4 + $0x24] sm:$0xf] %vm1185_vm5, %v1178_v16 }
  0xfb   :  { %v1115_v20 = vadd.f32 %v1908_v23, %v1095_v17 }
  0xfc   :  { %v679_v42 = vpop.f32.mrf.mxu2 }
  0xfd   :  { %vm1131_vm15 = vcmp.ge.f32.partialorder %v1115_v20, 0.0  ;;  %v1147_v21 = vmul.f32 0.1, %v1115_v20  ;;  %v419_v24 = vpop.f32.mrf.mxu0 }
  0xfe   :  { %v1052_v26 = vpop.f32.mrf.mxu3  ;;  %v539_v29 = vadd.f32 %v538_v38, %v419_v24 }
  0xff   :  { %v1163_v27 = vsel %vm1131_vm15, %v1115_v20, %v1147_v21  ;;  %v1076_v28 = vadd.f32 %v1052_v26, %v698_v22  ;;  %v543_v49 = vpop.f32.mrf.mxu1 }
 0x100   :  { %v1179_v30 = vpack.c.bf16 %v1163_v27, %v1163_v27  ;;  %v699_v33 = vadd.f32 %v677_v25, %v539_v29 }
 0x101   :  { %v1096_v31 = vmul.f32 %v1906_v19, %v1076_v28 }
 0x102   :  { %1196 = vst.msk [vmem:[%s2010_s4 + $0x28] sm:$0xf] %vm1185_vm5, %v1179_v30 }
 0x103   :  { %v1116_v32 = vadd.f32 %v1908_v23, %v1096_v31 }
 0x104   :  { %v682_v56 = vpop.f32.mrf.mxu2 }
 0x105   :  { %vm1132_vm0 = vcmp.ge.f32.partialorder %v1116_v32, 0.0  ;;  %v1148_v35 = vmul.f32 0.1, %v1116_v32  ;;  %v421_v36 = vpop.f32.mrf.mxu0 }
 0x106   :  { %v1055_v37 = vpop.f32.mrf.mxu3  ;;  %v541_v44 = vadd.f32 %v540_v34, %v421_v36 }
 0x107   :  { %v1164_v39 = vsel %vm1132_vm0, %v1116_v32, %v1148_v35  ;;  %v1077_v40 = vadd.f32 %v1055_v37, %v699_v33  ;;  %v545_v1 = vpop.f32.mrf.mxu1 }
 0x108   :  { %v1180_v41 = vpack.c.bf16 %v1164_v39, %v1164_v39  ;;  %v700_v47 = vadd.f32 %v679_v42, %v541_v44 }
 0x109   :  { %v1097_v43 = vmul.f32 %v1906_v19, %v1077_v40 }
 0x10a   :  { %1197 = vst.msk [vmem:[%s2010_s4 + $0x2c] sm:$0xf] %vm1185_vm5, %v1180_v41 }
 0x10b   :  { %v1117_v45 = vadd.f32 %v1908_v23, %v1097_v43 }
 0x10c   :  { %v684_v5 = vpop.f32.mrf.mxu2 }
 0x10d   :  { %vm1133_vm1 = vcmp.ge.f32.partialorder %v1117_v45, 0.0  ;;  %v1149_v46 = vmul.f32 0.1, %v1117_v45  ;;  %v424_v48 = vpop.f32.mrf.mxu0 }
 0x10e   :  { %v1057_v50 = vpop.f32.mrf.mxu3  ;;  %v544_v53 = vadd.f32 %v543_v49, %v424_v48 }
 0x10f   :  { %v1165_v51 = vsel %vm1133_vm1, %v1117_v45, %v1149_v46  ;;  %v1078_v52 = vadd.f32 %v1057_v50, %v700_v47 }
 0x110   :  { %v1181_v54 = vpack.c.bf16 %v1165_v51, %v1165_v51  ;;  %v701_v58 = vadd.f32 %v682_v56, %v544_v53 }
 0x111   :  { %v1098_v55 = vmul.f32 %v1906_v19, %v1078_v52 }
 0x112   :  { %1198 = vst.msk [vmem:[%s2010_s4 + $0x30] sm:$0xf] %vm1185_vm5, %v1181_v54 }
 0x113   :  { %v1118_v57 = vadd.f32 %v1908_v23, %v1098_v55 }
 0x115   :  { %vm1134_vm2 = vcmp.ge.f32.partialorder %v1118_v57, 0.0  ;;  %v1150_v59 = vmul.f32 0.1, %v1118_v57  ;;  %v426_v61 = vpop.f32.mrf.mxu0 }
 0x116   :  { %v1060_v60 = vpop.f32.mrf.mxu3  ;;  %v546_v3 = vadd.f32 %v545_v1, %v426_v61 }
 0x117   :  { %v1166_v62 = vsel %vm1134_vm2, %v1118_v57, %v1150_v59  ;;  %v1079_v63 = vadd.f32 %v1060_v60, %v701_v58 }
 0x118   :  { %v1182_v0 = vpack.c.bf16 %v1166_v62, %v1166_v62  ;;  %v702_v7 = vadd.f32 %v684_v5, %v546_v3 }
 0x119   :  { %v1099_v2 = vmul.f32 %v1906_v19, %v1079_v63 }
 0x11a   :  { %1199 = vst.msk [vmem:[%s2010_s4 + $0x34] sm:$0xf] %vm1185_vm5, %v1182_v0 }
 0x11b   :  { %v1119_v4 = vadd.f32 %v1908_v23, %v1099_v2 }
 0x11d   :  { %vm1135_vm3 = vcmp.ge.f32.partialorder %v1119_v4, 0.0  ;;  %v1151_v6 = vmul.f32 0.1, %v1119_v4 }
 0x11e   :  { %v1062_v8 = vpop.f32.mrf.mxu3 }
 0x11f   :  { %v1167_v9 = vsel %vm1135_vm3, %v1119_v4, %v1151_v6  ;;  %v1080_v10 = vadd.f32 %v1062_v8, %v702_v7 }
 0x120   :  { %v1183_v11 = vpack.c.bf16 %v1167_v9, %v1167_v9 }
 0x121   :  { %v1100_v12 = vmul.f32 %v1906_v19, %v1080_v10 }
 0x122   :  { %1200 = vst.msk [vmem:[%s2010_s4 + $0x38] sm:$0xf] %vm1185_vm5, %v1183_v11 }
 0x123   :  { %v1120_v13 = vadd.f32 %v1908_v23, %v1100_v12 }
 0x125   :  { %vm1136_vm4 = vcmp.ge.f32.partialorder %v1120_v13, 0.0  ;;  %v1152_v14 = vmul.f32 0.1, %v1120_v13 }
 0x127   :  { %v1168_v15 = vsel %vm1136_vm4, %v1120_v13, %v1152_v14 }
 0x128   :  { %v1184_v16 = vpack.c.bf16 %v1168_v15, %v1168_v15 }
 0x12a   :  { %1201 = vst.msk [vmem:[%s2010_s4 + $0x3c] sm:$0xf] %vm1185_vm5, %v1184_v16 }
 0x12b   :  { %1206 = vsyncpa [#allocation3], 1 }
 0x12c   :  { %1207 = vsyncpa [#allocation5], 1 }

// kernel: discriminator_forward.4
= control target key start
LH: loop header
LB: loop body
LE: loop exit
PB: predicated region body
PF: predicated region fallthrough
CT: control target
= control target key end

     0   :  { %9 = vsyncpa [#allocation3], 0  ;;  %s1693_s18 = smov [#allocation2]   ;;  %s1694_s20 = smov 64   ;;  %s1982_s0 = inlined_call_operand.vmem [shape: bf16[2,5,5,256], index: 0, kind: input, shape index: {}]   ;;  %s1983_s1 = inlined_call_operand.hbm [shape: bf16[2,2,256,128], index: 1, kind: input, shape index: {}]   ;;  %s1984_s2 = inlined_call_operand.vmem [shape: f32[1,128], index: 2, kind: input, shape index: {}]   ;;  %s1985_s3 = inlined_call_operand.vmem [shape: f32[1,128], index: 3, kind: input, shape index: {}]   ;;  %s1986_s4 = inlined_call_operand.vmem [shape: bf16[32,128], index: 4, kind: output, shape index: {}]  }
   0x1   :  { %s16_s17 = sshll.u32 %s1983_s1, 4  ;;  %s18_s19 = sshll.u32 %s1693_s18, 4  ;;  %s17_s17 = int_to_ptr.hbm [resolvable:$true] %s16_s17  ;;  %s19_s19 = int_to_ptr.vmem [resolvable:$true] %s18_s19 }
   0x2   :  { %s1695_s21 = smov 4  }
   0x3   :  { %24 = dma.hbm_to_vmem [thread:$0]  %s17_s17, 8192, %s19_s19, [#allocation3], %s1694_s20, %s1694_s20, %s1695_s21  }
   0x4   :  { %1691 = dma.done.wait [#allocation3], 8192  }
   0x5   :  { %1692 = vsyncadd [#allocation3], 4294959104  ;;  %v1610_v0 = vld [vmem:[#allocation2 + $0xb8] sm:$0xff]  ;;  %v1609_v4 = vld [vmem:[#allocation2 + $0xb0] sm:$0xff]  ;;  %vm57_vm0 = vcmask 1041408   ;;  %vm141_vm1 = vcmask 1043458  }
   0x6   :  { %v1618_v1 = vld [vmem:[#allocation2 + $0xf8] sm:$0xff]  ;;  %458 = vmatpush.bf16.msra.mxu0 %v1610_v0  ;;  %v1617_v5 = vld [vmem:[#allocation2 + $0xf0] sm:$0xff]  ;;  %v1608_v8 = vld [vmem:[#allocation2 + $0xa8] sm:$0xff]  ;;  %vm187_vm2 = vsmask.f32 1280 }
   0x7   :  { %v1594_v2 = vld [vmem:[#allocation2 + $0x38] sm:$0xff]  ;;  %477 = vmatpush.bf16.msra.mxu1 %v1618_v1  ;;  %v1593_v6 = vld [vmem:[#allocation2 + $0x30] sm:$0xff]  ;;  %v1616_v9 = vld [vmem:[#allocation2 + $0xe8] sm:$0xff]  ;;  %vm188_vm3 = vsmask.f32 3336 }
   0x8   :  { %v1602_v3 = vld [vmem:[#allocation2 + $0x78] sm:$0xff]  ;;  %615 = vmatpush.bf16.msra.mxu2 %v1594_v2  ;;  %v1601_v7 = vld [vmem:[#allocation2 + $0x70] sm:$0xff]  ;;  %v1592_v10 = vld [vmem:[#allocation2 + $0x28] sm:$0xff]  ;;  %vm190_vm4 = vsmask.f32 5392 }
   0x9   :  { %634 = vmatpush.bf16.msra.mxu3 %v1602_v3  ;;  %v1600_v11 = vld [vmem:[#allocation2 + $0x68] sm:$0xff]  ;;  %v1607_v12 = vld [vmem:[#allocation2 + $0xa0] sm:$0xff]  ;;  %v114_v16 = vld [vmem:[%s1982_s0] sm:$0x77]  ;;  %vm192_vm5 = vsmask.f32 7448 }
   0xa   :  { %459 = vmatpush.bf16.msra.mxu0 %v1609_v4  ;;  %v1615_v13 = vld [vmem:[#allocation2 + $0xe0] sm:$0xff]  ;;  %v116_v18 = vld [vmem:[%s1982_s0 + $0x10] sm:$0x77]  ;;  %v117_v19 = vld [vmem:[%s1982_s0 + $0x18] sm:$0x77]  ;;  %v130_v20 = vrot.slane %v114_v16, 2 }
   0xb   :  { %478 = vmatpush.bf16.msra.mxu1 %v1617_v5  ;;  %v1591_v14 = vld [vmem:[#allocation2 + $0x20] sm:$0xff]  ;;  %v132_v22 = vrot.slane %v116_v18, 2  ;;  %v133_v23 = vrot.slane %v117_v19, 2  ;;  %v1606_v24 = vld [vmem:[#allocation2 + $0x98] sm:$0xff]  ;;  %vm1746_vm6 = vmor %vm187_vm2, %vm188_vm3 }
   0xc   :  { %616 = vmatpush.bf16.msra.mxu2 %v1593_v6  ;;  %v1599_v15 = vld [vmem:[#allocation2 + $0x60] sm:$0xff]  ;;  %v1614_v25 = vld [vmem:[#allocation2 + $0xd8] sm:$0xff]  ;;  %v140_v26 = vsel %vm57_vm0, %v114_v16, %v130_v20  ;;  %v142_v27 = vsel %vm141_vm1, %v114_v16, %v130_v20  ;;  %v1605_v44 = vld [vmem:[#allocation2 + $0x90] sm:$0xff] }
   0xd   :  { %635 = vmatpush.bf16.msra.mxu3 %v1601_v7  ;;  %v115_v17 = vld [vmem:[%s1982_s0 + $0x8] sm:$0x77]  ;;  %v1590_v29 = vld [vmem:[#allocation2 + $0x18] sm:$0xff]  ;;  %v144_v31 = vrot.slane %v142_v27, 2  ;;  %v153_v33 = vsel %vm57_vm0, %v116_v18, %v132_v22  ;;  %v154_v34 = vsel %vm141_vm1, %v116_v18, %v132_v22  ;;  %v159_v37 = vsel %vm57_vm0, %v117_v19, %v133_v23  ;;  %v1613_v45 = vld [vmem:[#allocation2 + $0xd0] sm:$0xff] }
   0xe   :  { %460 = vmatpush.bf16.msra.mxu0 %v1608_v8  ;;  %v131_v21 = vrot.slane %v115_v17, 2  ;;  %v1598_v30 = vld [vmem:[#allocation2 + $0x58] sm:$0xff]  ;;  %v156_v36 = vrot.slane %v154_v34, 2  ;;  %v160_v38 = vsel %vm141_vm1, %v117_v19, %v133_v23  ;;  %v194_v41 = vshrl.u32 %v140_v26, 16  ;;  %v1589_v50 = vld [vmem:[#allocation2 + $0x10] sm:$0xff]  ;;  %vm1753_vm7 = vmor %vm1746_vm6, %vm190_vm4 }
   0xf   :  { %479 = vmatpush.bf16.msra.mxu1 %v1616_v9  ;;  %v162_v40 = vrot.slane %v160_v38, 2  ;;  %v197_v42 = vshll.u32 %v140_v26, 16  ;;  %v203_v43 = vshll.u32 %v144_v31, 16  ;;  %v220_v49 = vshrl.u32 %v153_v33, 16  ;;  %v1597_v51 = vld [vmem:[#allocation2 + $0x50] sm:$0xff]  ;;  %v1604_v56 = vld [vmem:[#allocation2 + $0x88] sm:$0xff]  ;;  %vm1763_vm8 = vmor %vm1753_vm7, %vm192_vm5 }
  0x10   :  { %617 = vmatpush.bf16.msra.mxu2 %v1592_v10  ;;  %v147_v28 = vsel %vm57_vm0, %v115_v17, %v131_v21  ;;  %v148_v32 = vsel %vm141_vm1, %v115_v17, %v131_v21  ;;  %v196_v53 = vrot.slane %v194_v41, 6  ;;  %v223_v55 = vshll.u32 %v153_v33, 16  ;;  %v1612_v61 = vld [vmem:[#allocation2 + $0xc8] sm:$0xff]  ;;  %v33_v2 = vld [vmem:[%s1982_s0] sm:$0x33]  ;;  %v1603_v16 = vld [vmem:[#allocation2 + $0x80] sm:$0xff] }
  0x11   :  { %636 = vmatpush.bf16.msra.mxu3 %v1600_v11  ;;  %v150_v35 = vrot.slane %v148_v32, 2  ;;  %v207_v46 = vshrl.u32 %v147_v28, 16  ;;  %v210_v47 = vshll.u32 %v147_v28, 16  ;;  %v199_v54 = vrot.slane %v197_v42, 7  ;;  %v1588_v3 = vld [vmem:[#allocation2 + $0x8] sm:$0xff]  ;;  %v1611_v17 = vld [vmem:[#allocation2 + $0xc0] sm:$0xff] }
  0x12   :  { %461 = vmatpush.bf16.msra.mxu0 %v1607_v12  ;;  %v205_v57 = vrot.slane %v203_v43, 7  ;;  %v222_v60 = vrot.slane %v220_v49, 6  ;;  %v225_v63 = vrot.slane %v223_v55, 7  ;;  %v229_v0 = vshll.u32 %v156_v36, 16  ;;  %v34_v9 = vld [vmem:[%s1982_s0 + $0x8] sm:$0x33] }
  0x13   :  { %480 = vmatpush.bf16.msra.mxu1 %v1615_v13  ;;  %v216_v48 = vshll.u32 %v150_v35, 16  ;;  %v209_v58 = vrot.slane %v207_v46, 6  ;;  %v212_v59 = vrot.slane %v210_v47, 7  ;;  %v200_v62 = vor.u32 %v199_v54, %v196_v53  ;;  %v1596_v10 = vld [vmem:[#allocation2 + $0x48] sm:$0xff]  ;;  %v1778_v20 = vld [vmem:[%s1982_s0 + $0x18] sm:$0x33] }
  0x14   :  { %618 = vmatpush.bf16.msra.mxu2 %v1591_v14  ;;  %v233_v1 = vshrl.u32 %v159_v37, 16  ;;  %v236_v7 = vshll.u32 %v159_v37, 16  ;;  %v242_v8 = vshll.u32 %v162_v40, 16  ;;  %v226_v12 = vor.u32 %v225_v63, %v222_v60  ;;  %v118_v22 = vld [vmem:[%s1982_s0 + $0x28] sm:$0x77]  ;;  %v1642_v33 = vld [vmem:[#allocation2 + $0x1b8] sm:$0xff] }
  0x15   :  { %637 = vmatpush.bf16.msra.mxu3 %v1599_v15  ;;  %v213_v5 = vor.u32 %v212_v59, %v209_v58  ;;  %v218_v6 = vrot.slane %v216_v48, 7  ;;  %v201_v11 = vrot.slane %v200_v62, 2  ;;  %v231_v13 = vrot.slane %v229_v0, 7  ;;  %v1773_v15 = vld [vmem:[%s1982_s0 + $0x10] sm:$0x33]  ;;  %v1587_v23 = vld [vmem:[#allocation2] sm:$0xff] }
  0x16   :  { %462 = vmatpush.bf16.msra.mxu0 %v1606_v24  ;;  %v235_v14 = vrot.slane %v233_v1, 6  ;;  %v238_v19 = vrot.slane %v236_v7, 7  ;;  %v49_v21 = vrot.slane %v33_v2, 2  ;;  %v1595_v24 = vld [vmem:[#allocation2 + $0x40] sm:$0xff]  ;;  %v227_v26 = vrot.slane %v226_v12, 2  ;;  %v1650_v37 = vld [vmem:[#allocation2 + $0x1f8] sm:$0xff] }
  0x17   :  { %481 = vmatpush.bf16.msra.mxu1 %v1614_v25  ;;  %v214_v18 = vrot.slane %v213_v5, 2  ;;  %v206_v25 = vsel %vm1763_vm8, %v201_v11, %v205_v57  ;;  %v50_v27 = vrot.slane %v34_v9, 2  ;;  %v119_v28 = vld [vmem:[%s1982_s0 + $0x30] sm:$0x77]  ;;  %v244_v32 = vrot.slane %v242_v8, 7  ;;  %v1626_v46 = vld [vmem:[#allocation2 + $0x138] sm:$0xff] }
  0x18   :  { %619 = vmatpush.bf16.msra.mxu2 %v1590_v29  ;;  %v120_v29 = vld [vmem:[%s1982_s0 + $0x38] sm:$0x77]  ;;  %v239_v31 = vor.u32 %v238_v19, %v235_v14  ;;  %332 = vst [vmem:[#allocation1] ss:$4 sm:$0xff] %v206_v25  ;;  %v121_v34 = vld [vmem:[%s1982_s0 + $0x40] sm:$0x77]  ;;  %v232_v35 = vsel %vm1763_vm8, %v227_v26, %v231_v13 }
  0x19   :  { %638 = vmatpush.bf16.msra.mxu3 %v1598_v30  ;;  %v219_v30 = vsel %vm1763_vm8, %v214_v18, %v218_v6  ;;  %v51_v36 = vrot.slane %v1773_v15, 2  ;;  %v1802_v38 = vld [vmem:[%s1982_s0 + $0x28] sm:$0x33]  ;;  %338 = vst [vmem:[#allocation1 + $0x2] ss:$4 sm:$0xff] %v232_v35  ;;  %v134_v40 = vrot.slane %v118_v22, 2 }
  0x1a   :  { %463 = vmatpush.bf16.msra.mxu0 %v1605_v44  ;;  %335 = vst [vmem:[#allocation1 + $0x1] ss:$4 sm:$0xff] %v219_v30  ;;  %v240_v39 = vrot.slane %v239_v31, 2  ;;  %v135_v41 = vrot.slane %v119_v28, 2  ;;  %v136_v42 = vrot.slane %v120_v29, 2  ;;  %v52_v43 = vrot.slane %v1778_v20, 2 }
  0x1b   :  { %482 = vmatpush.bf16.msra.mxu1 %v1613_v45  ;;  %v1806_v44 = vsel %vm57_vm0, %v33_v2, %v49_v21  ;;  %v1809_v45 = vsel %vm57_vm0, %v34_v9, %v50_v27  ;;  %v1634_v47 = vld [vmem:[#allocation2 + $0x178] sm:$0xff]  ;;  %v137_v48 = vrot.slane %v121_v34, 2  ;;  %v53_v52 = vrot.slane %v1802_v38, 2  ;;  %v1641_v57 = vld [vmem:[#allocation2 + $0x1b0] sm:$0xff]  ;;  %v1640_v6 = vld [vmem:[#allocation2 + $0x1a8] sm:$0xff] }
  0x1c   :  { %620 = vmatpush.bf16.msra.mxu2 %v1589_v50  ;;  %v245_v49 = vsel %vm1763_vm8, %v240_v39, %v244_v32  ;;  %v165_v50 = vsel %vm57_vm0, %v118_v22, %v134_v40  ;;  %v171_v54 = vsel %vm57_vm0, %v119_v28, %v135_v41  ;;  %v172_v55 = vsel %vm141_vm1, %v119_v28, %v135_v41  ;;  %v1649_v58 = vld [vmem:[#allocation2 + $0x1f0] sm:$0xff]  ;;  %v1648_v11 = vld [vmem:[#allocation2 + $0x1e8] sm:$0xff]  ;;  %v1647_v35 = vld [vmem:[#allocation2 + $0x1e0] sm:$0xff] }
  0x1d   :  { %639 = vmatpush.bf16.msra.mxu3 %v1597_v51  ;;  %v166_v51 = vsel %vm141_vm1, %v118_v22, %v134_v40  ;;  %341 = vst [vmem:[#allocation1 + $0x3] ss:$4 sm:$0xff] %v245_v49  ;;  %v174_v59 = vrot.slane %v172_v55, 2  ;;  %v177_v60 = vsel %vm57_vm0, %v120_v29, %v136_v42  ;;  %v1821_v62 = vsel %vm57_vm0, %v121_v34, %v137_v48  ;;  %v1625_v63 = vld [vmem:[#allocation2 + $0x130] sm:$0xff]  ;;  %v1624_v12 = vld [vmem:[#allocation2 + $0x128] sm:$0xff] }
  0x1e   :  { %464 = vmatpush.bf16.msra.mxu0 %v1604_v56  ;;  %v168_v53 = vrot.slane %v166_v51, 2  ;;  %v246_v56 = vshrl.u32 %v165_v50, 16  ;;  %v1633_v0 = vld [vmem:[#allocation2 + $0x170] sm:$0xff]  ;;  %v184_v2 = vsel %vm141_vm1, %v121_v34, %v137_v48  ;;  %v249_v5 = vshll.u32 %v165_v50, 16  ;;  %v1639_v34 = vld [vmem:[#allocation2 + $0x1a0] sm:$0xff] }
  0x1f   :  { %483 = vmatpush.bf16.msra.mxu1 %v1612_v61  ;;  %v178_v61 = vsel %vm141_vm1, %v120_v29, %v136_v42  ;;  %v186_v7 = vrot.slane %v184_v2, 2  ;;  %v259_v9 = vshrl.u32 %v171_v54, 16  ;;  %v268_v14 = vshll.u32 %v174_v59, 16  ;;  %v1832_v29 = vld [vmem:[%s1982_s0 + $0x38] sm:$0x33]  ;;  %v1622_v2 = vld [vmem:[#allocation2 + $0x118] sm:$0xff] }
  0x20   :  { %621 = vmatpush.bf16.msra.mxu2 %v1588_v3  ;;  %v180_v1 = vrot.slane %v178_v61, 2  ;;  %v248_v3 = vrot.slane %v246_v56, 6  ;;  %v255_v8 = vshll.u32 %v168_v53, 16  ;;  %v251_v13 = vrot.slane %v249_v5, 7  ;;  %v1845_v39 = vld [vmem:[%s1982_s0 + $0x40] sm:$0x33] }
  0x21   :  { %640 = vmatpush.bf16.msra.mxu3 %v1596_v10  ;;  %v262_v10 = vshll.u32 %v171_v54, 16  ;;  %v261_v19 = vrot.slane %v259_v9, 6  ;;  %v270_v26 = vrot.slane %v268_v14, 7  ;;  %v66_v32 = vsel %vm57_vm0, %v1773_v15, %v51_v36  ;;  %v1443_v40 = vld [vmem:[%s1982_s0 + $0x8] sm:$0x33]  ;;  %v1638_v61 = vld [vmem:[#allocation2 + $0x198] sm:$0xff] }
  0x22   :  { %465 = vmatpush.bf16.msra.mxu0 %v1603_v16  ;;  %v272_v16 = vshrl.u32 %v177_v60, 16  ;;  %v257_v18 = vrot.slane %v255_v8, 7  ;;  %v281_v22 = vshll.u32 %v180_v1, 16  ;;  %v252_v25 = vor.u32 %v251_v13, %v248_v3  ;;  %v1623_v15 = vld [vmem:[#allocation2 + $0x120] sm:$0xff]  ;;  %v1446_v3 = vld [vmem:[%s1982_s0 + $0x20] sm:$0x33] }
  0x23   :  { %484 = vmatpush.bf16.msra.mxu1 %v1611_v17  ;;  %v275_v17 = vshll.u32 %v177_v60, 16  ;;  %v264_v21 = vrot.slane %v262_v10, 7  ;;  %v1631_v36 = vld [vmem:[#allocation2 + $0x160] sm:$0xff]  ;;  %v294_v48 = vshll.u32 %v186_v7, 16  ;;  %v55_v56 = vrot.slane %v1832_v29, 2  ;;  %v1637_v14 = vld [vmem:[#allocation2 + $0x190] sm:$0xff] }
  0x24   :  { %622 = vmatpush.bf16.msra.mxu2 %v1587_v23  ;;  %v1827_v23 = vld [vmem:[%s1982_s0 + $0x30] sm:$0x33]  ;;  %v274_v27 = vrot.slane %v272_v16, 6  ;;  %v354_v30 = vld.sshfl [vmem:[#allocation1] sm:$0xff pattern:$0x73625140]  ;;  %v1882_v5 = vsel %vm57_vm0, %v1802_v38, %v53_v52 }
  0x25   :  { %641 = vmatpush.bf16.msra.mxu3 %v1595_v24  ;;  %v1632_v24 = vld [vmem:[#allocation2 + $0x168] sm:$0xff]  ;;  %v277_v28 = vrot.slane %v275_v17, 7  ;;  %v355_v31 = vld.sshfl [vmem:[#allocation1 + $0x8] sm:$0xff pattern:$0x73625140]  ;;  %466 = vmatmul.bf16.vlgmr.msra.gmra.mxu0 %v354_v30  ;;  %v253_v41 = vrot.slane %v252_v25, 2 }
  0x26   :  { %854 = vmatpush.bf16.msrb.mxu0 %v1626_v46  ;;  %485 = vmatmul.bf16.vlgmr.msra.gmra.mxu1 %v355_v31  ;;  %496 = vst [vmem:[#allocation1] ss:$4 sm:$0xff] %v1806_v44  ;;  %v283_v42 = vrot.slane %v281_v22, 7  ;;  %v54_v49 = vrot.slane %v1827_v23, 2  ;;  %v1515_v53 = vld [vmem:[%s1982_s0 + $0x8] sm:$0x77] }
  0x27   :  { %873 = vmatpush.bf16.msrb.mxu1 %v1634_v47  ;;  %498 = vst [vmem:[#allocation1 + $0x1] ss:$4 sm:$0xff] %v1809_v45  ;;  %v288_v47 = vshll.u32 %v1821_v62, 16  ;;  %v258_v44 = vsel %vm1763_vm8, %v253_v41, %v257_v18  ;;  %v1444_v45 = vld [vmem:[%s1982_s0 + $0x10] sm:$0x33]  ;;  %v56_v60 = vrot.slane %v1845_v39, 2 }
  0x28   :  { %1232 = vmatpush.bf16.msrb.mxu2 %v1642_v33  ;;  %v69_v33 = vsel %vm57_vm0, %v1778_v20, %v52_v43  ;;  %v278_v20 = vor.u32 %v277_v28, %v274_v27  ;;  %v285_v43 = vshrl.u32 %v1821_v62, 16  ;;  %500 = vst [vmem:[#allocation1 + $0x2] ss:$4 sm:$0xff] %v66_v32  ;;  %v1646_v62 = vld [vmem:[#allocation2 + $0x1d8] sm:$0xff]  ;;  %v296_v1 = vrot.slane %v294_v48, 7  ;;  %v1645_v22 = vld [vmem:[#allocation2 + $0x1d0] sm:$0xff] }
  0x29   :  { %1251 = vmatpush.bf16.msrb.mxu3 %v1650_v37  ;;  %v265_v37 = vor.u32 %v264_v21, %v261_v19  ;;  %502 = vst [vmem:[#allocation1 + $0x3] ss:$4 sm:$0xff] %v69_v33  ;;  %v290_v55 = vrot.slane %v288_v47, 7  ;;  %v671_v7 = vrot.slane %v1444_v45, 2  ;;  %v673_v9 = vrot.slane %v1446_v3, 2  ;;  %v1620_v41 = vld [vmem:[#allocation2 + $0x108] sm:$0xff] }
  0x2a   :  { %855 = vmatpush.bf16.msrb.mxu0 %v1625_v63  ;;  %v279_v50 = vrot.slane %v278_v20, 2  ;;  %v287_v51 = vrot.slane %v285_v43, 6  ;;  %344 = vst [vmem:[#allocation1 + $0x20] ss:$4 sm:$0xff] %v258_v44  ;;  %v670_v63 = vrot.slane %v1443_v40, 2  ;;  %v912_v52 = vrot.slane %v1515_v53, 2 }
  0x2b   :  { %874 = vmatpush.bf16.msrb.mxu1 %v1633_v0  ;;  %v266_v46 = vrot.slane %v265_v37, 2  ;;  %v1517_v13 = vld [vmem:[%s1982_s0 + $0x18] sm:$0x77]  ;;  %v1518_v38 = vld [vmem:[%s1982_s0 + $0x20] sm:$0x77]  ;;  %v683_v16 = vsel %vm57_vm0, %v1444_v45, %v671_v7  ;;  %v689_v18 = vsel %vm57_vm0, %v1446_v3, %v673_v9  ;;  %v1628_v20 = vld [vmem:[#allocation2 + $0x148] sm:$0xff] }
  0x2c   :  { %1233 = vmatpush.bf16.msrb.mxu2 %v1641_v57  ;;  %v1445_v57 = vld [vmem:[%s1982_s0 + $0x18] sm:$0x33]  ;;  %v284_v59 = vsel %vm1763_vm8, %v279_v50, %v283_v42  ;;  %v291_v0 = vor.u32 %v290_v55, %v287_v51  ;;  %v914_v25 = vrot.slane %v1517_v13, 2  ;;  %v922_v27 = vsel %vm57_vm0, %v1515_v53, %v912_v52  ;;  %v1635_v55 = vld [vmem:[#allocation2 + $0x180] sm:$0xff] }
  0x2d   :  { %1252 = vmatpush.bf16.msrb.mxu3 %v1649_v58  ;;  %v271_v54 = vsel %vm1763_vm8, %v266_v46, %v270_v26  ;;  %v1516_v58 = vld [vmem:[%s1982_s0 + $0x10] sm:$0x77]  ;;  %350 = vst [vmem:[#allocation1 + $0x22] ss:$4 sm:$0xff] %v284_v59  ;;  %v672_v8 = vrot.slane %v1445_v57, 2  ;;  %v915_v26 = vrot.slane %v1518_v38, 2  ;;  %v923_v31 = vsel %vm141_vm1, %v1515_v53, %v912_v52 }
  0x2e   :  { %856 = vmatpush.bf16.msrb.mxu0 %v1624_v12  ;;  %347 = vst [vmem:[#allocation1 + $0x21] ss:$4 sm:$0xff] %v271_v54  ;;  %v292_v10 = vrot.slane %v291_v0, 2  ;;  %v680_v12 = vsel %vm57_vm0, %v1443_v40, %v670_v63  ;;  %v913_v19 = vrot.slane %v1516_v58, 2  ;;  %v925_v37 = vrot.slane %v923_v31, 2  ;;  %v1619_v63 = vld [vmem:[#allocation2 + $0x100] sm:$0xff] }
  0x2f   :  { %875 = vmatpush.bf16.msrb.mxu1 %v1632_v24  ;;  %v686_v17 = vsel %vm57_vm0, %v1445_v57, %v672_v8  ;;  %v1629_v24 = vld [vmem:[#allocation2 + $0x150] sm:$0xff]  ;;  %v940_v43 = vsel %vm57_vm0, %v1518_v38, %v915_v26  ;;  %v941_v46 = vsel %vm141_vm1, %v1518_v38, %v915_v26  ;;  %v968_v47 = vshrl.u32 %v922_v27, 16 }
  0x30   :  { %1234 = vmatpush.bf16.msrb.mxu2 %v1640_v6  ;;  %v1630_v6 = vld [vmem:[#allocation2 + $0x158] sm:$0xff]  ;;  %v297_v21 = vsel %vm1763_vm8, %v292_v10, %v296_v1  ;;  %v512_v30 = vld.sshfl [vmem:[#allocation1 + $0x8] sm:$0xff pattern:$0x73625140]  ;;  %v928_v32 = vsel %vm57_vm0, %v1516_v58, %v913_v19  ;;  %v929_v33 = vsel %vm141_vm1, %v1516_v58, %v913_v19  ;;  %v943_v48 = vrot.slane %v941_v46, 2 }
  0x31   :  { %1253 = vmatpush.bf16.msrb.mxu3 %v1648_v11  ;;  %v1886_v11 = vsel %vm57_vm0, %v1827_v23, %v54_v49  ;;  %v1621_v23 = vld [vmem:[#allocation2 + $0x110] sm:$0xff]  ;;  %v511_v28 = vld.sshfl [vmem:[#allocation1] sm:$0xff pattern:$0x73625140]  ;;  %353 = vst [vmem:[#allocation1 + $0x23] ss:$4 sm:$0xff] %v297_v21  ;;  %v78_v52 = vsel %vm57_vm0, %v1832_v29, %v55_v56 }
  0x32   :  { %857 = vmatpush.bf16.msrb.mxu0 %v1623_v15  ;;  %623 = vmatmul.bf16.vlgmr.msra.gmra.mxu2 %v511_v28  ;;  %v931_v40 = vrot.slane %v929_v33, 2  ;;  %v934_v15 = vsel %vm57_vm0, %v1517_v13, %v914_v25  ;;  %735 = vst [vmem:[#allocation1] ss:$4 sm:$0xff] %v680_v12  ;;  %v971_v49 = vshll.u32 %v922_v27, 16  ;;  %v977_v44 = vshll.u32 %v925_v37, 16 }
  0x33   :  { %876 = vmatpush.bf16.msrb.mxu1 %v1631_v36  ;;  %642 = vmatmul.bf16.vlgmr.msra.gmra.mxu3 %v512_v30  ;;  %v935_v36 = vsel %vm141_vm1, %v1517_v13, %v914_v25  ;;  %737 = vst [vmem:[#allocation1 + $0x1] ss:$4 sm:$0xff] %v683_v16  ;;  %v981_v50 = vshrl.u32 %v928_v32, 16  ;;  %v970_v51 = vrot.slane %v968_v47, 6  ;;  %v984_v45 = vshll.u32 %v928_v32, 16 }
  0x34   :  { %1235 = vmatpush.bf16.msrb.mxu2 %v1639_v34  ;;  %v1636_v34 = vld [vmem:[#allocation2 + $0x188] sm:$0xff]  ;;  %v937_v42 = vrot.slane %v935_v36, 2  ;;  %739 = vst [vmem:[#allocation1 + $0x2] ss:$4 sm:$0xff] %v686_v17  ;;  %v990_v53 = vshll.u32 %v931_v40, 16  ;;  %v994_v54 = vshrl.u32 %v934_v15, 16 }
  0x35   :  { %1254 = vmatpush.bf16.msrb.mxu3 %v1647_v35  ;;  %v1644_v35 = vld [vmem:[#allocation2 + $0x1c8] sm:$0xff]  ;;  %741 = vst [vmem:[#allocation1 + $0x3] ss:$4 sm:$0xff] %v689_v18  ;;  %v973_v57 = vrot.slane %v971_v49, 7  ;;  %v979_v58 = vrot.slane %v977_v44, 7  ;;  %v983_v59 = vrot.slane %v981_v50, 6 }
  0x36   :  { %858 = vmatpush.bf16.msrb.mxu0 %v1622_v2  ;;  %v986_v0 = vrot.slane %v984_v45, 7  ;;  %v992_v1 = vrot.slane %v990_v53, 7  ;;  %v996_v2 = vrot.slane %v994_v54, 6  ;;  %v1003_v3 = vshll.u32 %v937_v42, 16  ;;  %v1447_v12 = vld [vmem:[%s1982_s0 + $0x30] sm:$0x33] }
  0x37   :  { %877 = vmatpush.bf16.msrb.mxu1 %v1630_v6  ;;  %v1627_v6 = vld [vmem:[#allocation2 + $0x140] sm:$0xff]  ;;  %v974_v7 = vor.u32 %v973_v57, %v970_v51  ;;  %v1007_v9 = vshrl.u32 %v940_v43, 16  ;;  %v1010_v10 = vshll.u32 %v940_v43, 16  ;;  %v1448_v17 = vld [vmem:[%s1982_s0 + $0x38] sm:$0x33]  ;;  %v674_v26 = vrot.slane %v1447_v12, 2 }
  0x38   :  { %1236 = vmatpush.bf16.msrb.mxu2 %v1638_v61  ;;  %v997_v61 = vshll.u32 %v934_v15, 16  ;;  %v356_v13 = vld.sshfl [vmem:[#allocation1 + $0x20] sm:$0xff pattern:$0x73625140]  ;;  %v987_v16 = vor.u32 %v986_v0, %v983_v59  ;;  %v1005_v21 = vrot.slane %v1003_v3, 7 }
  0x39   :  { %1255 = vmatpush.bf16.msrb.mxu3 %v1646_v62  ;;  %v1643_v62 = vld [vmem:[#allocation2 + $0x1c0] sm:$0xff]  ;;  %471 = vmatmul.bf16.gmra.mxu0 %v356_v13  ;;  %v975_v18 = vrot.slane %v974_v7, 2  ;;  %v1009_v29 = vrot.slane %v1007_v9, 6  ;;  %v1519_v56 = vld [vmem:[%s1982_s0 + $0x30] sm:$0x77]  ;;  %v692_v46 = vsel %vm57_vm0, %v1447_v12, %v674_v26 }
  0x3a   :  { %859 = vmatpush.bf16.msrb.mxu0 %v1621_v23  ;;  %v999_v8 = vrot.slane %v997_v61, 7  ;;  %v357_v38 = vld.sshfl [vmem:[#allocation1 + $0x28] sm:$0xff pattern:$0x73625140]  ;;  %v1449_v23 = vld [vmem:[%s1982_s0 + $0x40] sm:$0x33] }
  0x3b   :  { %878 = vmatpush.bf16.msrb.mxu1 %v1629_v24  ;;  %504 = vst [vmem:[#allocation1 + $0x20] ss:$4 sm:$0xff] %v1882_v5  ;;  %v1520_v5 = vld [vmem:[%s1982_s0 + $0x38] sm:$0x77]  ;;  %v980_v24 = vsel %vm1763_vm8, %v975_v18, %v979_v58  ;;  %v1522_v40 = vld [vmem:[%s1982_s0 + $0x48] sm:$0x77] }
  0x3c   :  { %1237 = vmatpush.bf16.msrb.mxu2 %v1637_v14  ;;  %v81_v14 = vsel %vm57_vm0, %v1845_v39, %v56_v60  ;;  %490 = vmatmul.bf16.gmra.mxu1 %v357_v38  ;;  %v1000_v19 = vor.u32 %v999_v8, %v996_v2  ;;  %506 = vst [vmem:[#allocation1 + $0x21] ss:$4 sm:$0xff] %v1886_v11  ;;  %v988_v39 = vrot.slane %v987_v16, 2  ;;  %v1012_v60 = vrot.slane %v1010_v10, 7  ;;  %v1450_v11 = vld [vmem:[%s1982_s0 + $0x48] sm:$0x33] }
  0x3d   :  { %1256 = vmatpush.bf16.msrb.mxu3 %v1645_v22  ;;  %v1016_v22 = vshll.u32 %v943_v48, 16  ;;  %508 = vst [vmem:[#allocation1 + $0x22] ss:$4 sm:$0xff] %v78_v52  ;;  %v750_v27 = vld.sshfl [vmem:[#allocation1] sm:$0xff pattern:$0x73625140] }
  0x3e   :  { %860 = vmatpush.bf16.msrb.mxu0 %v1620_v41  ;;  %v1001_v25 = vrot.slane %v1000_v19, 2  ;;  %510 = vst [vmem:[#allocation1 + $0x23] ss:$4 sm:$0xff] %v81_v14  ;;  %v993_v28 = vsel %vm1763_vm8, %v988_v39, %v992_v1  ;;  %v1013_v30 = vor.u32 %v1012_v60, %v1009_v29  ;;  %v751_v32 = vld.sshfl [vmem:[#allocation1 + $0x8] sm:$0xff pattern:$0x73625140] }
  0x3f   :  { %879 = vmatpush.bf16.msrb.mxu1 %v1628_v20  ;;  %v1018_v31 = vrot.slane %v1016_v22, 7  ;;  %1106 = vst [vmem:[#allocation1] ss:$4 sm:$0xff] %v980_v24  ;;  %v916_v15 = vrot.slane %v1519_v56, 2  ;;  %v676_v36 = vrot.slane %v1449_v23, 2  ;;  %v677_v41 = vrot.slane %v1450_v11, 2 }
  0x40   :  { %1238 = vmatpush.bf16.msrb.mxu2 %v1636_v34  ;;  %v1006_v33 = vsel %vm1763_vm8, %v1001_v25, %v1005_v21  ;;  %v675_v34 = vrot.slane %v1448_v17, 2  ;;  %v1014_v37 = vrot.slane %v1013_v30, 2  ;;  %1109 = vst [vmem:[#allocation1 + $0x1] ss:$4 sm:$0xff] %v993_v28  ;;  %v917_v20 = vrot.slane %v1520_v5, 2 }
  0x41   :  { %1257 = vmatpush.bf16.msrb.mxu3 %v1644_v35  ;;  %v1521_v35 = vld [vmem:[%s1982_s0 + $0x40] sm:$0x77]  ;;  %1112 = vst [vmem:[#allocation1 + $0x2] ss:$4 sm:$0xff] %v1006_v33  ;;  %v919_v47 = vrot.slane %v1522_v40, 2  ;;  %v947_v48 = vsel %vm141_vm1, %v1519_v56, %v916_v15  ;;  %v946_v44 = vsel %vm57_vm0, %v1519_v56, %v916_v15  ;;  %v698_v59 = vsel %vm57_vm0, %v1449_v23, %v676_v36 }
  0x42   :  { %861 = vmatpush.bf16.msrb.mxu0 %v1619_v63  ;;  %v918_v42 = vrot.slane %v1521_v35, 2  ;;  %v1019_v43 = vsel %vm1763_vm8, %v1014_v37, %v1018_v31  ;;  %v695_v49 = vsel %vm57_vm0, %v1448_v17, %v675_v34  ;;  %v949_v50 = vrot.slane %v947_v48, 2 }
  0x43   :  { %880 = vmatpush.bf16.msrb.mxu1 %v1627_v6  ;;  %1115 = vst [vmem:[#allocation1 + $0x3] ss:$4 sm:$0xff] %v1019_v43  ;;  %v953_v51 = vsel %vm141_vm1, %v1520_v5, %v917_v20  ;;  %v952_v45 = vsel %vm57_vm0, %v1520_v5, %v917_v20  ;;  %v701_v61 = vsel %vm57_vm0, %v1450_v11, %v677_v41  ;;  %v1020_v1 = vshrl.u32 %v946_v44, 16 }
  0x44   :  { %1239 = vmatpush.bf16.msrb.mxu2 %v1635_v55  ;;  %v955_v53 = vrot.slane %v953_v51, 2  ;;  %v959_v54 = vsel %vm141_vm1, %v1521_v35, %v918_v42  ;;  %v965_v55 = vsel %vm141_vm1, %v1522_v40, %v919_v47  ;;  %v1023_v2 = vshll.u32 %v946_v44, 16 }
  0x45   :  { %1258 = vmatpush.bf16.msrb.mxu3 %v1643_v62  ;;  %v513_v57 = vld.sshfl [vmem:[#allocation1 + $0x20] sm:$0xff pattern:$0x73625140]  ;;  %v514_v58 = vld.sshfl [vmem:[#allocation1 + $0x28] sm:$0xff pattern:$0x73625140]  ;;  %v958_v62 = vsel %vm57_vm0, %v1521_v35, %v918_v42  ;;  %v964_v38 = vsel %vm57_vm0, %v1522_v40, %v919_v47 }
  0x46   :  { %628 = vmatmul.bf16.gmra.mxu2 %v513_v57  ;;  %647 = vmatmul.bf16.gmra.mxu3 %v514_v58  ;;  %743 = vst [vmem:[#allocation1 + $0x20] ss:$4 sm:$0xff] %v692_v46  ;;  %v961_v63 = vrot.slane %v959_v54, 2  ;;  %v967_v0 = vrot.slane %v965_v55, 2  ;;  %v1029_v3 = vshll.u32 %v949_v50, 16  ;;  %v1033_v6 = vshrl.u32 %v952_v45, 16 }
  0x47   :  { %745 = vst [vmem:[#allocation1 + $0x21] ss:$4 sm:$0xff] %v695_v49  ;;  %v1036_v7 = vshll.u32 %v952_v45, 16  ;;  %v1042_v8 = vshll.u32 %v955_v53, 16  ;;  %v1022_v9 = vrot.slane %v1020_v1, 6  ;;  %v1025_v10 = vrot.slane %v1023_v2, 7 }
  0x48   :  { %747 = vst [vmem:[#allocation1 + $0x22] ss:$4 sm:$0xff] %v698_v59  ;;  %v1046_v12 = vshrl.u32 %v958_v62, 16  ;;  %v1049_v13 = vshll.u32 %v958_v62, 16  ;;  %v1035_v52 = vrot.slane %v1033_v6, 6  ;;  %v1031_v17 = vrot.slane %v1029_v3, 7 }
  0x49   :  { %749 = vst [vmem:[#allocation1 + $0x23] ss:$4 sm:$0xff] %v701_v61  ;;  %v1038_v14 = vrot.slane %v1036_v7, 7  ;;  %v1026_v16 = vor.u32 %v1025_v10, %v1022_v9  ;;  %v1044_v18 = vrot.slane %v1042_v8, 7  ;;  %862 = vmatmul.bf16.vlgmr.msrb.gmra.mxu0 %v750_v27  ;;  %v1055_v56 = vshll.u32 %v961_v63, 16 }
  0x4a   :  { %v1048_v21 = vrot.slane %v1046_v12, 6  ;;  %v1051_v29 = vrot.slane %v1049_v13, 7  ;;  %v1059_v60 = vshrl.u32 %v964_v38, 16  ;;  %v1062_v22 = vshll.u32 %v964_v38, 16  ;;  %v1665_v38 = vld [vmem:[%s1984_s2] ss:$0 sm:$0xff] }
  0x4b   :  { %v1039_v19 = vor.u32 %v1038_v14, %v1035_v52  ;;  %v1027_v39 = vrot.slane %v1026_v16, 2  ;;  %v1068_v23 = vshll.u32 %v967_v0, 16  ;;  %v1057_v25 = vrot.slane %v1055_v56, 7  ;;  %v1128_v37 = vld.sshfl [vmem:[#allocation1] sm:$0xff pattern:$0x73625140] }
  0x4c   :  { %881 = vmatmul.bf16.vlgmr.msrb.gmra.mxu1 %v751_v32  ;;  %v1052_v24 = vor.u32 %v1051_v29, %v1048_v21  ;;  %v1061_v26 = vrot.slane %v1059_v60, 6  ;;  %v1064_v28 = vrot.slane %v1062_v22, 7  ;;  %v1129_v15 = vld.sshfl [vmem:[#allocation1 + $0x8] sm:$0xff pattern:$0x73625140] }
  0x4d   :  { %v1040_v5 = vrot.slane %v1039_v19, 2  ;;  %v1032_v11 = vsel %vm1763_vm8, %v1027_v39, %v1031_v17  ;;  %v1070_v31 = vrot.slane %v1068_v23, 7 }
  0x4e   :  { %v1053_v30 = vrot.slane %v1052_v24, 2  ;;  %v1065_v34 = vor.u32 %v1064_v28, %v1061_v26 }
  0x4f   :  { %v1045_v27 = vsel %vm1763_vm8, %v1040_v5, %v1044_v18  ;;  %v1666_v18 = vld [vmem:[%s1985_s3] ss:$0 sm:$0xff] }
  0x50   :  { %v752_v32 = vld.sshfl [vmem:[#allocation1 + $0x20] sm:$0xff pattern:$0x73625140]  ;;  %v753_v33 = vld.sshfl [vmem:[#allocation1 + $0x28] sm:$0xff pattern:$0x73625140]  ;;  %v1058_v35 = vsel %vm1763_vm8, %v1053_v30, %v1057_v25 }
  0x51   :  { %1118 = vst [vmem:[#allocation1 + $0x20] ss:$4 sm:$0xff] %v1032_v11  ;;  %v1066_v40 = vrot.slane %v1065_v34, 2 }
  0x52   :  { %1121 = vst [vmem:[#allocation1 + $0x21] ss:$4 sm:$0xff] %v1045_v27 }
  0x53   :  { %1124 = vst [vmem:[#allocation1 + $0x22] ss:$4 sm:$0xff] %v1058_v35  ;;  %v1071_v36 = vsel %vm1763_vm8, %v1066_v40, %v1070_v31 }
  0x54   :  { %1127 = vst [vmem:[#allocation1 + $0x23] ss:$4 sm:$0xff] %v1071_v36 }
  0x56   :  { %1240 = vmatmul.bf16.vlgmr.msrb.gmra.mxu2 %v1128_v37  ;;  %1259 = vmatmul.bf16.vlgmr.msrb.gmra.mxu3 %v1129_v15 }
  0x59   :  { %867 = vmatmul.bf16.gmra.mxu0 %v752_v32 }
  0x5b   :  { %v1130_v41 = vld.sshfl [vmem:[#allocation1 + $0x20] sm:$0xff pattern:$0x73625140]  ;;  %v1131_v20 = vld.sshfl [vmem:[#allocation1 + $0x28] sm:$0xff pattern:$0x73625140] }
  0x5c   :  { %886 = vmatmul.bf16.gmra.mxu1 %v753_v33 }
  0x66   :  { %1245 = vmatmul.bf16.gmra.mxu2 %v1130_v41  ;;  %1264 = vmatmul.bf16.gmra.mxu3 %v1131_v20 }
  0xa2   :  { %v467_v42 = vpop.f32.mrf.mxu0 }
  0xa3   :  { %v486_v43 = vpop.f32.mrf.mxu1 }
  0xa4   :  { %v487_v59 = vadd.f32 %v486_v43, %v467_v42 }
  0xaa   :  { %v469_v46 = vpop.f32.mrf.mxu0 }
  0xab   :  { %v488_v47 = vpop.f32.mrf.mxu1 }
  0xac   :  { %v489_v8 = vadd.f32 %v488_v47, %v469_v46 }
  0xb5   :  { %v624_v48 = vpop.f32.mrf.mxu2 }
  0xb6   :  { %v643_v49 = vpop.f32.mrf.mxu3  ;;  %v472_v44 = vpop.f32.mrf.mxu0  ;;  %v625_v63 = vadd.f32 %v624_v48, %v487_v59 }
  0xb8   :  { %v644_v3 = vadd.f32 %v643_v49, %v625_v63 }
  0xb9   :  { %v491_v50 = vpop.f32.mrf.mxu1 }
  0xba   :  { %v492_v16 = vadd.f32 %v491_v50, %v472_v44 }
  0xbd   :  { %v626_v51 = vpop.f32.mrf.mxu2 }
  0xbe   :  { %v645_v4 = vpop.f32.mrf.mxu3  ;;  %v474_v45 = vpop.f32.mrf.mxu0  ;;  %v627_v12 = vadd.f32 %v626_v51, %v489_v8 }
  0xc0   :  { %v646_v14 = vadd.f32 %v645_v4, %v627_v12 }
  0xc1   :  { %v493_v53 = vpop.f32.mrf.mxu1 }
  0xc2   :  { %v494_v27 = vadd.f32 %v493_v53, %v474_v45 }
  0xc6   :  { %v863_v57 = vpop.f32.mrf.mxu0 }
  0xc9   :  { %v629_v54 = vpop.f32.mrf.mxu2  ;;  %v648_v55 = vpop.f32.mrf.mxu3 }
  0xca   :  { %v882_v58 = vpop.f32.mrf.mxu1  ;;  %v630_v22 = vadd.f32 %v629_v54, %v492_v16 }
  0xcb   :  { %v883_v0 = vadd.f32 %v882_v58, %v863_v57 }
  0xcc   :  { %v649_v11 = vadd.f32 %v648_v55, %v630_v22 }
  0xcd   :  { %v892_v9 = vadd.f32 %v883_v0, %v644_v3 }
  0xce   :  { %v865_v1 = vpop.f32.mrf.mxu0 }
  0xd1   :  { %v631_v61 = vpop.f32.mrf.mxu2  ;;  %v650_v62 = vpop.f32.mrf.mxu3 }
  0xd2   :  { %v884_v2 = vpop.f32.mrf.mxu1  ;;  %v632_v40 = vadd.f32 %v631_v61, %v494_v27 }
  0xd3   :  { %v885_v52 = vadd.f32 %v884_v2, %v865_v1 }
  0xd4   :  { %v651_v43 = vadd.f32 %v650_v62, %v632_v40 }
  0xd5   :  { %v893_v39 = vadd.f32 %v885_v52, %v646_v14 }
  0xd6   :  { %v868_v19 = vpop.f32.mrf.mxu0 }
  0xd9   :  { %v1241_v6 = vpop.f32.mrf.mxu2  ;;  %v1260_v7 = vpop.f32.mrf.mxu3 }
  0xda   :  { %v1261_v10 = vadd.f32 %v1260_v7, %v1241_v6  ;;  %v887_v21 = vpop.f32.mrf.mxu1 }
  0xdb   :  { %v888_v25 = vadd.f32 %v887_v21, %v868_v19 }
  0xdc   :  { %v1270_v13 = vadd.f32 %v1261_v10, %v892_v9 }
  0xdd   :  { %v894_v33 = vadd.f32 %v888_v25, %v649_v11 }
  0xde   :  { %v1278_v17 = vmul.f32 %v1665_v38, %v1270_v13  ;;  %v870_v35 = vpop.f32.mrf.mxu0 }
  0xe0   :  { %v1286_v23 = vadd.f32 %v1666_v18, %v1278_v17 }
  0xe1   :  { %v1243_v29 = vpop.f32.mrf.mxu2  ;;  %v1262_v56 = vpop.f32.mrf.mxu3 }
  0xe2   :  { %v1263_v60 = vadd.f32 %v1262_v56, %v1243_v29  ;;  %v1294_v26 = vmul.f32 0.1, %v1286_v23  ;;  %vm1290_vm9 = vcmp.ge.f32.partialorder %v1286_v23, 0.0  ;;  %v889_v37 = vpop.f32.mrf.mxu1 }
  0xe3   :  { %v890_v42 = vadd.f32 %v889_v37, %v870_v35 }
  0xe4   :  { %v1271_v5 = vadd.f32 %v1263_v60, %v893_v39  ;;  %v1298_v15 = vsel %vm1290_vm9, %v1286_v23, %v1294_v26 }
  0xe5   :  { %v895_v49 = vadd.f32 %v890_v42, %v651_v43 }
  0xe6   :  { %v1279_v24 = vmul.f32 %v1665_v38, %v1271_v5 }
  0xe8   :  { %v1287_v28 = vadd.f32 %v1666_v18, %v1279_v24 }
  0xe9   :  { %v1246_v30 = vpop.f32.mrf.mxu2  ;;  %v1265_v31 = vpop.f32.mrf.mxu3 }
  0xea   :  { %vm1291_vm10 = vcmp.ge.f32.partialorder %v1287_v28, 0.0  ;;  %v1295_v32 = vmul.f32 0.1, %v1287_v28  ;;  %v1266_v34 = vadd.f32 %v1265_v31, %v1246_v30 }
  0xec   :  { %v1299_v36 = vsel %vm1291_vm10, %v1287_v28, %v1295_v32  ;;  %v1272_v41 = vadd.f32 %v1266_v34, %v894_v33 }
  0xed   :  { %v1654_v20 = vpack.c.bf16 %v1299_v36, %v1298_v15 }
  0xee   :  { %v1280_v46 = vmul.f32 %v1665_v38, %v1272_v41 }
  0xef   :  { %1655 = vst [vmem:[%s1986_s4] sm:$0xff] %v1654_v20  }
  0xf0   :  { %v1288_v50 = vadd.f32 %v1666_v18, %v1280_v46 }
  0xf1   :  { %v1248_v47 = vpop.f32.mrf.mxu2  ;;  %v1267_v48 = vpop.f32.mrf.mxu3 }
  0xf2   :  { %v1268_v44 = vadd.f32 %v1267_v48, %v1248_v47  ;;  %v1296_v45 = vmul.f32 0.1, %v1288_v50  ;;  %vm1292_vm11 = vcmp.ge.f32.partialorder %v1288_v50, 0.0 }
  0xf4   :  { %v1273_v51 = vadd.f32 %v1268_v44, %v895_v49  ;;  %v1300_v55 = vsel %vm1292_vm11, %v1288_v50, %v1296_v45 }
  0xf6   :  { %v1281_v4 = vmul.f32 %v1665_v38, %v1273_v51 }
  0xf8   :  { %v1289_v53 = vadd.f32 %v1666_v18, %v1281_v4 }
  0xfa   :  { %vm1293_vm12 = vcmp.ge.f32.partialorder %v1289_v53, 0.0  ;;  %v1297_v54 = vmul.f32 0.1, %v1289_v53 }
  0xfc   :  { %v1301_v57 = vsel %vm1293_vm12, %v1289_v53, %v1297_v54 }
  0xfd   :  { %v1659_v58 = vpack.c.bf16 %v1301_v57, %v1300_v55 }
  0xff   :  { %1661 = vst [vmem:[%s1986_s4 + $0x8] sm:$0xff] %v1659_v58  }
 0x100   :  { %1314 = vsyncpa [#allocation3], 1 }

// kernel: discriminator_forward.5
= control target key start
LH: loop header
LB: loop body
LE: loop exit
PB: predicated region body
PF: predicated region fallthrough
CT: control target
= control target key end

     0   :  { %vm192_vm0 = vcmask 1041409   ;;  %vm5054_vm11 = vcmask 1041408   ;;  %vm5065_vm12 = vcmask 1024   ;;  %s11709_s1 = inlined_call_operand.vmem [shape: bf16[2,2,512,256], index: 1, kind: input, shape index: {}]   ;;  %s11710_s0 = inlined_call_operand.vmem [shape: bf16[2,3,3,512], index: 0, kind: input, shape index: {}]   ;;  %s11711_s4 = inlined_call_operand.vmem [shape: bf16[2,2,256,256], index: 4, kind: input, shape index: {}]   ;;  %s11712_s2 = inlined_call_operand.vmem [shape: f32[1,256], index: 2, kind: input, shape index: {}]   ;;  %s11713_s3 = inlined_call_operand.vmem [shape: f32[1,256], index: 3, kind: input, shape index: {}]   ;;  %s11714_s7 = inlined_call_operand.<no memory space> [shape: f32[1,1], index: 7, kind: input, shape index: {}]   ;;  %s11715_s5 = inlined_call_operand.vmem [shape: f32[1,256], index: 5, kind: input, shape index: {}]   ;;  %s11716_s6 = inlined_call_operand.vmem [shape: f32[1,256], index: 6, kind: input, shape index: {}]   ;;  %s11717_s8 = inlined_call_operand.vmem [shape: f32[2,1], index: 8, kind: output, shape index: {}]  }
   0x1   :  { %v5193_v0 = vld [vmem:[%s11709_s1 + $0x270] sm:$0xf]  ;;  %v6986_v1 = vld [vmem:[%s11709_s1 + $0x274] sm:$0xf0]  ;;  %v5185_v11 = vld [vmem:[%s11709_s1 + $0x260] sm:$0xf] }
   0x2   :  { %v5257_v2 = vld [vmem:[%s11709_s1 + $0x2f0] sm:$0xf]  ;;  %v7346_v3 = vor.u32 %v6986_v1, %v5193_v0  ;;  %v7002_v4 = vld [vmem:[%s11709_s1 + $0x2f4] sm:$0xf0]  ;;  %v6984_v13 = vld [vmem:[%s11709_s1 + $0x264] sm:$0xf0] }
   0x3   :  { %v5321_v5 = vld [vmem:[%s11709_s1 + $0x370] sm:$0xf]  ;;  %v7018_v6 = vld [vmem:[%s11709_s1 + $0x374] sm:$0xf0]  ;;  %v7357_v7 = vor.u32 %v7002_v4, %v5257_v2  ;;  %v5249_v14 = vld [vmem:[%s11709_s1 + $0x2e0] sm:$0xf]  ;;  %v7384_v16 = vor.u32 %v6984_v13, %v5185_v11 }
   0x4   :  { %v7359_v8 = vor.u32 %v7018_v6, %v5321_v5  ;;  %v5385_v9 = vld [vmem:[%s11709_s1 + $0x3f0] sm:$0xf]  ;;  %v7034_v10 = vld [vmem:[%s11709_s1 + $0x3f4] sm:$0xf0]  ;;  %528 = vmatpush.bf16.msra.mxu0 %v7346_v3  ;;  %v7000_v15 = vld [vmem:[%s11709_s1 + $0x2e4] sm:$0xf0] }
   0x5   :  { %12213 = vst [vmem:[#allocation3_spill] sm:$0xff] %v7357_v7  ;;  %v7371_v12 = vor.u32 %v7034_v10, %v5385_v9  ;;  %541 = vmatpush.bf16.msra.mxu1 %v7357_v7  ;;  %v7386_v17 = vor.u32 %v7000_v15, %v5249_v14  ;;  %v5313_v18 = vld [vmem:[%s11709_s1 + $0x360] sm:$0xf]  ;;  %v7016_v19 = vld [vmem:[%s11709_s1 + $0x364] sm:$0xf0] }
   0x6   :  { %554 = vmatpush.bf16.msra.mxu2 %v7359_v8  ;;  %v5377_v20 = vld [vmem:[%s11709_s1 + $0x3e0] sm:$0xf]  ;;  %v7398_v21 = vor.u32 %v7016_v19, %v5313_v18  ;;  %v7032_v22 = vld [vmem:[%s11709_s1 + $0x3e4] sm:$0xf0]  ;;  %v5177_v23 = vld [vmem:[%s11709_s1 + $0x250] sm:$0xf] }
   0x7   :  { %12214 = vst [vmem:[#allocation4_spill] sm:$0xff] %v7371_v12  ;;  %567 = vmatpush.bf16.msra.mxu3 %v7371_v12  ;;  %v6982_v24 = vld [vmem:[%s11709_s1 + $0x254] sm:$0xf0]  ;;  %v7409_v25 = vor.u32 %v7032_v22, %v5377_v20  ;;  %v5241_v26 = vld [vmem:[%s11709_s1 + $0x2d0] sm:$0xf] }
   0x8   :  { %12215 = vst [vmem:[#allocation5_spill] sm:$0xff] %v7386_v17  ;;  %v6998_v27 = vld [vmem:[%s11709_s1 + $0x2d4] sm:$0xf0]  ;;  %v5305_v28 = vld [vmem:[%s11709_s1 + $0x350] sm:$0xf]  ;;  %529 = vmatpush.bf16.msra.mxu0 %v7384_v16  ;;  %v7421_v29 = vor.u32 %v6982_v24, %v5177_v23 }
   0x9   :  { %12216 = vst [vmem:[#allocation6_spill] sm:$0xff] %v7409_v25  ;;  %v7014_v30 = vld [vmem:[%s11709_s1 + $0x354] sm:$0xf0]  ;;  %v5369_v31 = vld [vmem:[%s11709_s1 + $0x3d0] sm:$0xf]  ;;  %542 = vmatpush.bf16.msra.mxu1 %v7386_v17  ;;  %v7434_v33 = vor.u32 %v6998_v27, %v5241_v26 }
   0xa   :  { %v7030_v32 = vld [vmem:[%s11709_s1 + $0x3d4] sm:$0xf0]  ;;  %555 = vmatpush.bf16.msra.mxu2 %v7398_v21  ;;  %v7436_v34 = vor.u32 %v7014_v30, %v5305_v28  ;;  %v5169_v35 = vld [vmem:[%s11709_s1 + $0x240] sm:$0xf]  ;;  %v6980_v36 = vld [vmem:[%s11709_s1 + $0x244] sm:$0xf0] }
   0xb   :  { %12217 = vst [vmem:[#allocation7_spill] sm:$0xff] %v7434_v33  ;;  %v5233_v37 = vld [vmem:[%s11709_s1 + $0x2c0] sm:$0xf]  ;;  %568 = vmatpush.bf16.msra.mxu3 %v7409_v25  ;;  %v7448_v38 = vor.u32 %v7030_v32, %v5369_v31  ;;  %v6996_v39 = vld [vmem:[%s11709_s1 + $0x2c4] sm:$0xf0]  ;;  %v7466_v44 = vor.u32 %v6980_v36, %v5169_v35 }
   0xc   :  { %v5297_v40 = vld [vmem:[%s11709_s1 + $0x340] sm:$0xf]  ;;  %v7012_v41 = vld [vmem:[%s11709_s1 + $0x344] sm:$0xf0]  ;;  %530 = vmatpush.bf16.msra.mxu0 %v7421_v29  ;;  %v7470_v45 = vor.u32 %v6996_v39, %v5233_v37  ;;  %v5161_v47 = vld [vmem:[%s11709_s1 + $0x230] sm:$0xf] }
   0xd   :  { %12218 = vst [vmem:[#allocation8_spill] sm:$0xff] %v7448_v38  ;;  %v5361_v42 = vld [vmem:[%s11709_s1 + $0x3c0] sm:$0xf]  ;;  %v7028_v43 = vld [vmem:[%s11709_s1 + $0x3c4] sm:$0xf0]  ;;  %543 = vmatpush.bf16.msra.mxu1 %v7434_v33  ;;  %v7472_v46 = vor.u32 %v7012_v41, %v5297_v40 }
   0xe   :  { %556 = vmatpush.bf16.msra.mxu2 %v7436_v34  ;;  %12219 = vst [vmem:[#allocation9_spill] sm:$0xff] %v7470_v45  ;;  %v6978_v48 = vld [vmem:[%s11709_s1 + $0x234] sm:$0xf0]  ;;  %v5225_v49 = vld [vmem:[%s11709_s1 + $0x2b0] sm:$0xf]  ;;  %v7484_v50 = vor.u32 %v7028_v43, %v5361_v42 }
   0xf   :  { %569 = vmatpush.bf16.msra.mxu3 %v7448_v38  ;;  %v6994_v51 = vld [vmem:[%s11709_s1 + $0x2b4] sm:$0xf0]  ;;  %v5289_v52 = vld [vmem:[%s11709_s1 + $0x330] sm:$0xf]  ;;  %v7502_v56 = vor.u32 %v6978_v48, %v5161_v47  ;;  %v5153_v59 = vld [vmem:[%s11709_s1 + $0x220] sm:$0xf] }
  0x10   :  { %12220 = vst [vmem:[#allocation10_spill] sm:$0xff] %v7484_v50  ;;  %v7010_v53 = vld [vmem:[%s11709_s1 + $0x334] sm:$0xf0]  ;;  %v5353_v54 = vld [vmem:[%s11709_s1 + $0x3b0] sm:$0xf]  ;;  %531 = vmatpush.bf16.msra.mxu0 %v7466_v44  ;;  %v7506_v57 = vor.u32 %v6994_v51, %v5225_v49 }
  0x11   :  { %v7026_v55 = vld [vmem:[%s11709_s1 + $0x3b4] sm:$0xf0]  ;;  %544 = vmatpush.bf16.msra.mxu1 %v7470_v45  ;;  %v7508_v58 = vor.u32 %v7010_v53, %v5289_v52  ;;  %v6976_v60 = vld [vmem:[%s11709_s1 + $0x224] sm:$0xf0]  ;;  %v5217_v61 = vld [vmem:[%s11709_s1 + $0x2a0] sm:$0xf] }
  0x12   :  { %557 = vmatpush.bf16.msra.mxu2 %v7472_v46  ;;  %12221 = vst [vmem:[#allocation11_spill] sm:$0xff] %v7506_v57  ;;  %v7520_v62 = vor.u32 %v7026_v55, %v5353_v54  ;;  %v6992_v63 = vld [vmem:[%s11709_s1 + $0x2a4] sm:$0xf0]  ;;  %v5281_v0 = vld [vmem:[%s11709_s1 + $0x320] sm:$0xf]  ;;  %v7538_v5 = vor.u32 %v6976_v60, %v5153_v59 }
  0x13   :  { %12222 = vst [vmem:[#allocation12_spill] sm:$0xff] %v7508_v58  ;;  %570 = vmatpush.bf16.msra.mxu3 %v7484_v50  ;;  %v7008_v1 = vld [vmem:[%s11709_s1 + $0x324] sm:$0xf0]  ;;  %v5345_v2 = vld [vmem:[%s11709_s1 + $0x3a0] sm:$0xf]  ;;  %v7542_v6 = vor.u32 %v6992_v63, %v5217_v61 }
  0x14   :  { %12223 = vst [vmem:[#allocation13_spill] sm:$0xff] %v7520_v62  ;;  %v7024_v4 = vld [vmem:[%s11709_s1 + $0x3a4] sm:$0xf0]  ;;  %532 = vmatpush.bf16.msra.mxu0 %v7502_v56  ;;  %v7544_v9 = vor.u32 %v7008_v1, %v5281_v0  ;;  %v5145_v10 = vld [vmem:[%s11709_s1 + $0x210] sm:$0xf] }
  0x15   :  { %545 = vmatpush.bf16.msra.mxu1 %v7506_v57  ;;  %12224 = vst [vmem:[#allocation14_spill] sm:$0xff] %v7542_v6  ;;  %v6974_v11 = vld [vmem:[%s11709_s1 + $0x214] sm:$0xf0]  ;;  %v5209_v13 = vld [vmem:[%s11709_s1 + $0x290] sm:$0xf]  ;;  %v7556_v14 = vor.u32 %v7024_v4, %v5345_v2 }
  0x16   :  { %558 = vmatpush.bf16.msra.mxu2 %v7508_v58  ;;  %12225 = vst [vmem:[#allocation15_spill] sm:$0xff] %v7544_v9  ;;  %v6990_v15 = vld [vmem:[%s11709_s1 + $0x294] sm:$0xf0]  ;;  %v5273_v18 = vld [vmem:[%s11709_s1 + $0x310] sm:$0xf]  ;;  %v7574_v23 = vor.u32 %v6974_v11, %v5145_v10 }
  0x17   :  { %571 = vmatpush.bf16.msra.mxu3 %v7520_v62  ;;  %12226 = vst [vmem:[#allocation16_spill] sm:$0xff] %v7556_v14  ;;  %v7006_v19 = vld [vmem:[%s11709_s1 + $0x314] sm:$0xf0]  ;;  %v5337_v20 = vld [vmem:[%s11709_s1 + $0x390] sm:$0xf]  ;;  %v7584_v27 = vor.u32 %v6990_v15, %v5209_v13 }
  0x18   :  { %v7022_v22 = vld [vmem:[%s11709_s1 + $0x394] sm:$0xf0]  ;;  %533 = vmatpush.bf16.msra.mxu0 %v7538_v5  ;;  %v5137_v24 = vld [vmem:[%s11709_s1 + $0x200] sm:$0xf]  ;;  %v6972_v26 = vld [vmem:[%s11709_s1 + $0x204] sm:$0xf0]  ;;  %v7586_v28 = vor.u32 %v7006_v19, %v5273_v18 }
  0x19   :  { %546 = vmatpush.bf16.msra.mxu1 %v7542_v6  ;;  %12227 = vst [vmem:[#allocation17_spill] sm:$0xff] %v7584_v27  ;;  %v5201_v30 = vld [vmem:[%s11709_s1 + $0x280] sm:$0xf]  ;;  %v6988_v31 = vld [vmem:[%s11709_s1 + $0x284] sm:$0xf0]  ;;  %v7598_v35 = vor.u32 %v7022_v22, %v5337_v20  ;;  %v7619_v43 = vor.u32 %v6972_v26, %v5137_v24 }
  0x1a   :  { %559 = vmatpush.bf16.msra.mxu2 %v7544_v9  ;;  %12228 = vst [vmem:[#allocation18_spill] sm:$0xff] %v7586_v28  ;;  %v5265_v32 = vld [vmem:[%s11709_s1 + $0x300] sm:$0xf]  ;;  %v7004_v36 = vld [vmem:[%s11709_s1 + $0x304] sm:$0xf0]  ;;  %v7632_v51 = vor.u32 %v6988_v31, %v5201_v30 }
  0x1b   :  { %572 = vmatpush.bf16.msra.mxu3 %v7556_v14  ;;  %12229 = vst [vmem:[#allocation19_spill] sm:$0xff] %v7598_v35  ;;  %v5329_v37 = vld [vmem:[%s11709_s1 + $0x380] sm:$0xf]  ;;  %v7020_v39 = vld [vmem:[%s11709_s1 + $0x384] sm:$0xf0]  ;;  %v7634_v52 = vor.u32 %v7004_v36, %v5265_v32 }
  0x1c   :  { %v6985_v40 = vld [vmem:[%s11709_s1 + $0x274] sm:$0xf]  ;;  %v5195_v41 = vld [vmem:[%s11709_s1 + $0x278] sm:$0xf0]  ;;  %534 = vmatpush.bf16.msra.mxu0 %v7574_v23  ;;  %12230 = vst [vmem:[#allocation20_spill] sm:$0xff] %v7619_v43  ;;  %v7643_v55 = vor.u32 %v7020_v39, %v5329_v37 }
  0x1d   :  { %v7001_v42 = vld [vmem:[%s11709_s1 + $0x2f4] sm:$0xf]  ;;  %v5259_v47 = vld [vmem:[%s11709_s1 + $0x2f8] sm:$0xf0]  ;;  %547 = vmatpush.bf16.msra.mxu1 %v7584_v27  ;;  %12231 = vst [vmem:[#allocation21_spill] sm:$0xff] %v7632_v51  ;;  %v7645_v59 = vor.u32 %v6985_v40, %v5195_v41 }
  0x1e   :  { %v7017_v48 = vld [vmem:[%s11709_s1 + $0x374] sm:$0xf]  ;;  %v5323_v49 = vld [vmem:[%s11709_s1 + $0x378] sm:$0xf0]  ;;  %560 = vmatpush.bf16.msra.mxu2 %v7586_v28  ;;  %12232 = vst [vmem:[#allocation22_spill] sm:$0xff] %v7634_v52  ;;  %v7647_v60 = vor.u32 %v7001_v42, %v5259_v47 }
  0x1f   :  { %v7033_v53 = vld [vmem:[%s11709_s1 + $0x3f4] sm:$0xf]  ;;  %v5387_v54 = vld [vmem:[%s11709_s1 + $0x3f8] sm:$0xf0]  ;;  %573 = vmatpush.bf16.msra.mxu3 %v7598_v35  ;;  %12233 = vst [vmem:[#allocation23_spill] sm:$0xff] %v7643_v55  ;;  %v7649_v61 = vor.u32 %v7017_v48, %v5323_v49 }
  0x20   :  { %12234 = vst [vmem:[#allocation24_spill] sm:$0xff] %v7645_v59  ;;  %v6983_v63 = vld [vmem:[%s11709_s1 + $0x264] sm:$0xf]  ;;  %v5187_v0 = vld [vmem:[%s11709_s1 + $0x268] sm:$0xf0]  ;;  %535 = vmatpush.bf16.msra.mxu0 %v7619_v43  ;;  %v7661_v2 = vor.u32 %v7033_v53, %v5387_v54 }
  0x21   :  { %12235 = vst [vmem:[#allocation25_spill] sm:$0xff] %v7647_v60  ;;  %v6999_v1 = vld [vmem:[%s11709_s1 + $0x2e4] sm:$0xf]  ;;  %v5251_v4 = vld [vmem:[%s11709_s1 + $0x2e8] sm:$0xf0]  ;;  %548 = vmatpush.bf16.msra.mxu1 %v7632_v51  ;;  %v7682_v18 = vor.u32 %v6983_v63, %v5187_v0 }
  0x22   :  { %12236 = vst [vmem:[#allocation26_spill] sm:$0xff] %v7649_v61  ;;  %v7015_v10 = vld [vmem:[%s11709_s1 + $0x364] sm:$0xf]  ;;  %v5315_v11 = vld [vmem:[%s11709_s1 + $0x368] sm:$0xf0]  ;;  %561 = vmatpush.bf16.msra.mxu2 %v7634_v52  ;;  %v7686_v19 = vor.u32 %v6999_v1, %v5251_v4 }
  0x23   :  { %12237 = vst [vmem:[#allocation27_spill] sm:$0xff] %v7661_v2  ;;  %v7031_v13 = vld [vmem:[%s11709_s1 + $0x3e4] sm:$0xf]  ;;  %v5379_v15 = vld [vmem:[%s11709_s1 + $0x3e8] sm:$0xf0]  ;;  %574 = vmatpush.bf16.msra.mxu3 %v7643_v55  ;;  %v7688_v20 = vor.u32 %v7015_v10, %v5315_v11 }
  0x24   :  { %580 = vmatpush.bf16.msrb.mxu0 %v7645_v59  ;;  %12238 = vst [vmem:[#allocation28_spill] sm:$0xff] %v7682_v18  ;;  %v6981_v22 = vld [vmem:[%s11709_s1 + $0x254] sm:$0xf]  ;;  %v5179_v24 = vld [vmem:[%s11709_s1 + $0x258] sm:$0xf0]  ;;  %v7700_v30 = vor.u32 %v7031_v13, %v5379_v15 }
  0x25   :  { %593 = vmatpush.bf16.msrb.mxu1 %v7647_v60  ;;  %12239 = vst [vmem:[#allocation29_spill] sm:$0xff] %v7686_v19  ;;  %v6997_v26 = vld [vmem:[%s11709_s1 + $0x2d4] sm:$0xf]  ;;  %v5243_v31 = vld [vmem:[%s11709_s1 + $0x2d8] sm:$0xf0]  ;;  %v7721_v41 = vor.u32 %v6981_v22, %v5179_v24 }
  0x26   :  { %606 = vmatpush.bf16.msrb.mxu2 %v7649_v61  ;;  %12240 = vst [vmem:[#allocation30_spill] sm:$0xff] %v7688_v20  ;;  %v7013_v32 = vld [vmem:[%s11709_s1 + $0x354] sm:$0xf]  ;;  %v5307_v36 = vld [vmem:[%s11709_s1 + $0x358] sm:$0xf0]  ;;  %v7738_v49 = vor.u32 %v6997_v26, %v5243_v31 }
  0x27   :  { %619 = vmatpush.bf16.msrb.mxu3 %v7661_v2  ;;  %12241 = vst [vmem:[#allocation31_spill] sm:$0xff] %v7700_v30  ;;  %v7029_v37 = vld [vmem:[%s11709_s1 + $0x3d4] sm:$0xf]  ;;  %v5371_v39 = vld [vmem:[%s11709_s1 + $0x3d8] sm:$0xf0]  ;;  %v7740_v53 = vor.u32 %v7013_v32, %v5307_v36 }
  0x28   :  { %v6979_v40 = vld [vmem:[%s11709_s1 + $0x244] sm:$0xf]  ;;  %581 = vmatpush.bf16.msrb.mxu0 %v7682_v18  ;;  %12242 = vst [vmem:[#allocation32_spill] sm:$0xff] %v7721_v41  ;;  %v5171_v42 = vld [vmem:[%s11709_s1 + $0x248] sm:$0xf0]  ;;  %v7750_v0 = vor.u32 %v7029_v37, %v5371_v39 }
  0x29   :  { %v7729_v47 = vld [vmem:[%s11710_s0] sm:$0x55]  ;;  %v7734_v48 = vld [vmem:[%s11710_s0 + $0x18] sm:$0x55]  ;;  %594 = vmatpush.bf16.msrb.mxu1 %v7686_v19  ;;  %12243 = vst [vmem:[#allocation33_spill] sm:$0xff] %v7738_v49  ;;  %v7766_v13 = vor.u32 %v6979_v40, %v5171_v42 }
  0x2a   :  { %607 = vmatpush.bf16.msrb.mxu2 %v7688_v20  ;;  %12244 = vst [vmem:[#allocation34_spill] sm:$0xff] %v7740_v53  ;;  %v6995_v54 = vld [vmem:[%s11709_s1 + $0x2c4] sm:$0xf]  ;;  %v5235_v63 = vld [vmem:[%s11709_s1 + $0x2c8] sm:$0xf0] }
  0x2b   :  { %163 = vst [vmem:[#allocation1] ss:$4 sm:$0xff] %v7729_v47  ;;  %620 = vmatpush.bf16.msrb.mxu3 %v7700_v30  ;;  %v7011_v1 = vld [vmem:[%s11709_s1 + $0x344] sm:$0xf]  ;;  %v5299_v4 = vld [vmem:[%s11709_s1 + $0x348] sm:$0xf0]  ;;  %v7776_v24 = vor.u32 %v6995_v54, %v5235_v63 }
  0x2c   :  { %12245 = vst [vmem:[#allocation35_spill] sm:$0xff] %v7750_v0  ;;  %v7027_v10 = vld [vmem:[%s11709_s1 + $0x3c4] sm:$0xf]  ;;  %v5363_v11 = vld [vmem:[%s11709_s1 + $0x3c8] sm:$0xf0]  ;;  %582 = vmatpush.bf16.msrb.mxu0 %v7721_v41  ;;  %v7778_v26 = vor.u32 %v7011_v1, %v5299_v4 }
  0x2d   :  { %174 = vst [vmem:[#allocation1 + $0x20] ss:$4 sm:$0xff] %v7734_v48  ;;  %v6977_v15 = vld [vmem:[%s11709_s1 + $0x234] sm:$0xf]  ;;  %v5163_v22 = vld [vmem:[%s11709_s1 + $0x238] sm:$0xf0]  ;;  %595 = vmatpush.bf16.msrb.mxu1 %v7738_v49  ;;  %v7790_v37 = vor.u32 %v7027_v10, %v5363_v11 }
  0x2e   :  { %12246 = vst [vmem:[#allocation36_spill] sm:$0xff] %v7766_v13  ;;  %608 = vmatpush.bf16.msrb.mxu2 %v7740_v53  ;;  %v6993_v31 = vld [vmem:[%s11709_s1 + $0x2b4] sm:$0xf]  ;;  %v5227_v32 = vld [vmem:[%s11709_s1 + $0x2b8] sm:$0xf0] }
  0x2f   :  { %12247 = vst [vmem:[#allocation37_spill] sm:$0xff] %v7776_v24  ;;  %v7009_v36 = vld [vmem:[%s11709_s1 + $0x334] sm:$0xf]  ;;  %621 = vmatpush.bf16.msrb.mxu3 %v7750_v0  ;;  %v5291_v39 = vld [vmem:[%s11709_s1 + $0x338] sm:$0xf0]  ;;  %v7820_v0 = vor.u32 %v6977_v15, %v5163_v22  ;;  %v7824_v41 = vor.u32 %v6993_v31, %v5227_v32 }
  0x30   :  { %12248 = vst [vmem:[#allocation38_spill] sm:$0xff] %v7778_v26  ;;  %v7025_v40 = vld [vmem:[%s11709_s1 + $0x3b4] sm:$0xf]  ;;  %v5355_v42 = vld [vmem:[%s11709_s1 + $0x3b8] sm:$0xf0]  ;;  %583 = vmatpush.bf16.msrb.mxu0 %v7766_v13  ;;  %v7826_v30 = vor.u32 %v7009_v36, %v5291_v39 }
  0x31   :  { %12249 = vst [vmem:[#allocation39_spill] sm:$0xff] %v7790_v37  ;;  %v6975_v54 = vld [vmem:[%s11709_s1 + $0x224] sm:$0xf]  ;;  %v5155_v63 = vld [vmem:[%s11709_s1 + $0x228] sm:$0xf0]  ;;  %596 = vmatpush.bf16.msrb.mxu1 %v7776_v24  ;;  %v7835_v24 = vor.u32 %v7025_v40, %v5355_v42 }
  0x32   :  { %v6991_v1 = vld [vmem:[%s11709_s1 + $0x2a4] sm:$0xf]  ;;  %v5219_v4 = vld [vmem:[%s11709_s1 + $0x2a8] sm:$0xf0]  ;;  %12250 = vst [vmem:[#allocation40_spill] sm:$0xff] %v7820_v0  ;;  %609 = vmatpush.bf16.msrb.mxu2 %v7778_v26  ;;  %v7844_v40 = vor.u32 %v6975_v54, %v5155_v63 }
  0x33   :  { %v7007_v10 = vld [vmem:[%s11709_s1 + $0x324] sm:$0xf]  ;;  %v5283_v11 = vld [vmem:[%s11709_s1 + $0x328] sm:$0xf0]  ;;  %12251 = vst [vmem:[#allocation41_spill] sm:$0xff] %v7824_v41  ;;  %622 = vmatpush.bf16.msrb.mxu3 %v7790_v37 }
  0x34   :  { %v168_v53 = vld.sshfl [vmem:[#allocation1 + $0x10] sm:$0xff pattern:$0x73625140]  ;;  %v170_v49 = vld.sshfl [vmem:[#allocation1 + $0x18] sm:$0xff pattern:$0x73625140]  ;;  %584 = vmatpush.bf16.msrb.mxu0 %v7820_v0  ;;  %v7848_v42 = vor.u32 %v7007_v10, %v5283_v11 }
  0x35   :  { %12252 = vst [vmem:[#allocation42_spill] sm:$0xff] %v7826_v30  ;;  %v7023_v20 = vld [vmem:[%s11709_s1 + $0x3a4] sm:$0xf]  ;;  %v5347_v13 = vld [vmem:[%s11709_s1 + $0x3a8] sm:$0xf0]  ;;  %v185_v22 = vunpack.c.l.b16 %v168_v53  ;;  %v186_v18 = vunpack.c.l.b16 %v170_v49  ;;  %597 = vmatpush.bf16.msrb.mxu1 %v7824_v41 }
  0x36   :  { %v179_v15 = vld.sshfl [vmem:[#allocation1 + $0x30] sm:$0xff pattern:$0x73625140]  ;;  %v181_v19 = vld.sshfl [vmem:[#allocation1 + $0x38] sm:$0xff pattern:$0x73625140]  ;;  %610 = vmatpush.bf16.msrb.mxu2 %v7826_v30 }
  0x37   :  { %12253 = vst [vmem:[#allocation43_spill] sm:$0xff] %v7835_v24  ;;  %v189_v31 = vunpack.c.l.b16 %v179_v15  ;;  %v190_v32 = vunpack.c.l.b16 %v181_v19  ;;  %v164_v36 = vld.sshfl [vmem:[#allocation1] sm:$0xff pattern:$0x73625140]  ;;  %v196_v26 = vrot.slane %v185_v22, 1  ;;  %v198_v2 = vrot.slane %v186_v18, 1  ;;  %623 = vmatpush.bf16.msrb.mxu3 %v7835_v24 }
  0x38   :  { %v175_v39 = vld.sshfl [vmem:[#allocation1 + $0x20] sm:$0xff pattern:$0x73625140]  ;;  %v6973_v61 = vld [vmem:[%s11709_s1 + $0x214] sm:$0xf]  ;;  %v183_v60 = vunpack.c.l.b16 %v164_v36  ;;  %12254 = vst [vmem:[#allocation44_spill] sm:$0xff] %v7844_v40  ;;  %v7846_v19 = vor.u32 %v6991_v1, %v5219_v4  ;;  %585 = vmatpush.bf16.msrb.mxu0 %v7844_v40 }
  0x39   :  { %v5147_v53 = vld [vmem:[%s11709_s1 + $0x218] sm:$0xf0]  ;;  %v187_v49 = vunpack.c.l.b16 %v175_v39  ;;  %v166_v59 = vld.sshfl [vmem:[#allocation1 + $0x8] sm:$0xff pattern:$0x73625140]  ;;  %12256 = vst [vmem:[#allocation46_spill] sm:$0xff] %v7848_v42  ;;  %v197_v36 = vsel %vm192_vm0, %v189_v31, %v196_v26  ;;  %v199_v54 = vsel %vm192_vm0, %v190_v32, %v198_v2 }
  0x3a   :  { %12255 = vst [vmem:[#allocation45_spill] sm:$0xff] %v7846_v19  ;;  %v6989_v18 = vld [vmem:[%s11709_s1 + $0x294] sm:$0xf]  ;;  %v177_v15 = vld.sshfl [vmem:[#allocation1 + $0x28] sm:$0xff pattern:$0x73625140]  ;;  %v184_v22 = vunpack.c.l.b16 %v166_v59  ;;  %v7863_v59 = vor.u32 %v7023_v20, %v5347_v13  ;;  %v7865_v10 = vpack.c.b16 %v197_v36, %v197_v36  ;;  %v7873_v31 = vpack.c.b16 %v199_v54, %v199_v54  ;;  %598 = vmatpush.bf16.msrb.mxu1 %v7846_v19 }
  0x3b   :  { %632 = vst [vmem:[#allocation1] ss:$4 sm:$0xff] %v7729_v47  ;;  %v5211_v63 = vld [vmem:[%s11709_s1 + $0x298] sm:$0xf0]  ;;  %v191_v1 = vrot.slane %v183_v60, 1  ;;  %v188_v4 = vunpack.c.l.b16 %v177_v15  ;;  %v7884_v32 = vor.u32 %v6973_v61, %v5147_v53  ;;  %611 = vmatpush.bf16.msrb.mxu2 %v7848_v42 }
  0x3c   :  { %642 = vst [vmem:[#allocation1 + $0x20] ss:$4 sm:$0xff] %v7734_v48  ;;  %v7005_v26 = vld [vmem:[%s11709_s1 + $0x314] sm:$0xf]  ;;  %v5275_v2 = vld [vmem:[%s11709_s1 + $0x318] sm:$0xf0]  ;;  %562 = vmatmul.bf16.vlgmr.msra.gmra.mxu2 %v7865_v10  ;;  %624 = vmatpush.bf16.msrb.mxu3 %v7863_v59 }
  0x3d   :  { %12257 = vst [vmem:[#allocation47_spill] sm:$0xff] %v7863_v59  ;;  %v194_v11 = vrot.slane %v184_v22, 1  ;;  %v7021_v60 = vld [vmem:[%s11709_s1 + $0x394] sm:$0xf]  ;;  %v5339_v20 = vld [vmem:[%s11709_s1 + $0x398] sm:$0xf0]  ;;  %v193_v13 = vsel %vm192_vm0, %v187_v49, %v191_v1  ;;  %v7897_v49 = vor.u32 %v6989_v18, %v5211_v63  ;;  %v7899_v61 = vor.u32 %v7005_v26, %v5275_v2  ;;  %575 = vmatmul.bf16.vlgmr.msra.gmra.mxu3 %v7873_v31 }
  0x3e   :  { %12258 = vst [vmem:[#allocation48_spill] sm:$0xff] %v7884_v32  ;;  %v7886_v39 = vpack.c.b16 %v193_v13, %v193_v13  ;;  %v6971_v22 = vld [vmem:[%s11709_s1 + $0x204] sm:$0xf]  ;;  %v5139_v36 = vld [vmem:[%s11709_s1 + $0x208] sm:$0xf0]  ;;  %v7913_v18 = vor.u32 %v7021_v60, %v5339_v20  ;;  %586 = vmatpush.bf16.msrb.mxu0 %v7884_v32 }
  0x3f   :  { %v195_v15 = vsel %vm192_vm0, %v188_v4, %v194_v11  ;;  %12259 = vst [vmem:[#allocation49_spill] sm:$0xff] %v7897_v49  ;;  %v6987_v54 = vld [vmem:[%s11709_s1 + $0x284] sm:$0xf]  ;;  %v5203_v1 = vld [vmem:[%s11709_s1 + $0x288] sm:$0xf0]  ;;  %v7937_v13 = vor.u32 %v6971_v22, %v5139_v36  ;;  %599 = vmatpush.bf16.msrb.mxu1 %v7897_v49  ;;  %612 = vmatpush.bf16.msrb.mxu2 %v7899_v61 }
  0x40   :  { %12260 = vst [vmem:[#allocation50_spill] sm:$0xff] %v7899_v61  ;;  %v7901_v53 = vpack.c.b16 %v195_v15, %v195_v15  ;;  %v7003_v4 = vld [vmem:[%s11709_s1 + $0x304] sm:$0xf]  ;;  %536 = vmatmul.bf16.vlgmr.msra.gmra.mxu0 %v7886_v39  ;;  %v5267_v63 = vld [vmem:[%s11709_s1 + $0x308] sm:$0xf0]  ;;  %v7950_v19 = vor.u32 %v6987_v54, %v5203_v1  ;;  %625 = vmatpush.bf16.msrb.mxu3 %v7913_v18 }
  0x41   :  { %12261 = vst [vmem:[#allocation51_spill] sm:$0xff] %v7913_v18  ;;  %v7019_v26 = vld [vmem:[%s11709_s1 + $0x384] sm:$0xf]  ;;  %v5331_v2 = vld [vmem:[%s11709_s1 + $0x388] sm:$0xf0]  ;;  %v7952_v22 = vor.u32 %v7003_v4, %v5267_v63 }
  0x42   :  { %549 = vmatmul.bf16.vlgmr.msra.gmra.mxu1 %v7901_v53  ;;  %v5449_v11 = vld [vmem:[%s11709_s1 + $0x70] sm:$0xf]  ;;  %v6922_v60 = vld [vmem:[%s11709_s1 + $0x74] sm:$0xf0]  ;;  %12262 = vst [vmem:[#allocation52_spill] sm:$0xff] %v7937_v13  ;;  %v7961_v40 = vor.u32 %v7019_v26, %v5331_v2  ;;  %587 = vmatpush.bf16.msrb.mxu0 %v7937_v13 }
  0x43   :  { %v5513_v20 = vld [vmem:[%s11709_s1 + $0xf0] sm:$0xf]  ;;  %v6938_v15 = vld [vmem:[%s11709_s1 + $0xf4] sm:$0xf0]  ;;  %12263 = vst [vmem:[#allocation53_spill] sm:$0xff] %v7950_v19  ;;  %v7963_v24 = vor.u32 %v6922_v60, %v5449_v11  ;;  %600 = vmatpush.bf16.msrb.mxu1 %v7950_v19  ;;  %613 = vmatpush.bf16.msrb.mxu2 %v7952_v22 }
  0x44   :  { %v5577_v59 = vld [vmem:[%s11709_s1 + $0x170] sm:$0xf]  ;;  %v6954_v42 = vld [vmem:[%s11709_s1 + $0x174] sm:$0xf0]  ;;  %12264 = vst [vmem:[#allocation54_spill] sm:$0xff] %v7952_v22  ;;  %v7965_v49 = vor.u32 %v6938_v15, %v5513_v20  ;;  %626 = vmatpush.bf16.msrb.mxu3 %v7961_v40 }
  0x45   :  { %v5641_v36 = vld [vmem:[%s11709_s1 + $0x1f0] sm:$0xf]  ;;  %v6970_v32 = vld [vmem:[%s11709_s1 + $0x1f4] sm:$0xf0]  ;;  %12265 = vst [vmem:[#allocation55_spill] sm:$0xff] %v7961_v40  ;;  %v7967_v54 = vor.u32 %v6954_v42, %v5577_v59 }
  0x46   :  { %12266 = vst [vmem:[#allocation56_spill] sm:$0xff] %v7963_v24  ;;  %v5441_v1 = vld [vmem:[%s11709_s1 + $0x60] sm:$0xf]  ;;  %v6920_v4 = vld [vmem:[%s11709_s1 + $0x64] sm:$0xf0]  ;;  %v7979_v26 = vor.u32 %v6970_v32, %v5641_v36  ;;  %995 = vmatpush.bf16.msra.mxu0 %v7963_v24 }
  0x47   :  { %12267 = vst [vmem:[#allocation57_spill] sm:$0xff] %v7965_v49  ;;  %v5505_v63 = vld [vmem:[%s11709_s1 + $0xe0] sm:$0xf]  ;;  %v6936_v42 = vld [vmem:[%s11709_s1 + $0xe4] sm:$0xf0]  ;;  %v8000_v60 = vor.u32 %v6920_v4, %v5441_v1  ;;  %1008 = vmatpush.bf16.msra.mxu1 %v7965_v49  ;;  %1021 = vmatpush.bf16.msra.mxu2 %v7967_v54 }
  0x48   :  { %12268 = vst [vmem:[#allocation58_spill] sm:$0xff] %v7967_v54  ;;  %v5569_v59 = vld [vmem:[%s11709_s1 + $0x160] sm:$0xf]  ;;  %v6952_v2 = vld [vmem:[%s11709_s1 + $0x164] sm:$0xf0]  ;;  %v8004_v20 = vor.u32 %v6936_v42, %v5505_v63  ;;  %1034 = vmatpush.bf16.msra.mxu3 %v7979_v26 }
  0x49   :  { %12269 = vst [vmem:[#allocation59_spill] sm:$0xff] %v7979_v26  ;;  %v5633_v32 = vld [vmem:[%s11709_s1 + $0x1e0] sm:$0xf]  ;;  %v6968_v11 = vld [vmem:[%s11709_s1 + $0x1e4] sm:$0xf0]  ;;  %v8006_v15 = vor.u32 %v6952_v2, %v5569_v59 }
  0x4a   :  { %12270 = vst [vmem:[#allocation60_spill] sm:$0xff] %v8000_v60  ;;  %v5433_v36 = vld [vmem:[%s11709_s1 + $0x50] sm:$0xf]  ;;  %v6918_v40 = vld [vmem:[%s11709_s1 + $0x54] sm:$0xf0]  ;;  %v8018_v4 = vor.u32 %v6968_v11, %v5633_v32  ;;  %996 = vmatpush.bf16.msra.mxu0 %v8000_v60 }
  0x4b   :  { %12271 = vst [vmem:[#allocation61_spill] sm:$0xff] %v8004_v20  ;;  %v5497_v1 = vld [vmem:[%s11709_s1 + $0xd0] sm:$0xf]  ;;  %v6934_v63 = vld [vmem:[%s11709_s1 + $0xd4] sm:$0xf0]  ;;  %v8036_v11 = vor.u32 %v6918_v40, %v5433_v36  ;;  %1009 = vmatpush.bf16.msra.mxu1 %v8004_v20  ;;  %1022 = vmatpush.bf16.msra.mxu2 %v8006_v15 }
  0x4c   :  { %12272 = vst [vmem:[#allocation62_spill] sm:$0xff] %v8006_v15  ;;  %v5561_v42 = vld [vmem:[%s11709_s1 + $0x150] sm:$0xf]  ;;  %v6950_v59 = vld [vmem:[%s11709_s1 + $0x154] sm:$0xf0]  ;;  %v8040_v26 = vor.u32 %v6934_v63, %v5497_v1  ;;  %1035 = vmatpush.bf16.msra.mxu3 %v8018_v4  ;;  %614 = vmatmul.bf16.vlgmr.msrb.gmra.mxu2 %v7865_v10 }
  0x4d   :  { %12273 = vst [vmem:[#allocation63_spill] sm:$0xff] %v8018_v4  ;;  %v5625_v2 = vld [vmem:[%s11709_s1 + $0x1d0] sm:$0xf]  ;;  %v6966_v32 = vld [vmem:[%s11709_s1 + $0x1d4] sm:$0xf0]  ;;  %v8042_v54 = vor.u32 %v6950_v59, %v5561_v42  ;;  %627 = vmatmul.bf16.vlgmr.msrb.gmra.mxu3 %v7873_v31 }
  0x4e   :  { %12274 = vst [vmem:[#allocation64_spill] sm:$0xff] %v8036_v11  ;;  %v5425_v49 = vld [vmem:[%s11709_s1 + $0x40] sm:$0xf]  ;;  %v6916_v24 = vld [vmem:[%s11709_s1 + $0x44] sm:$0xf0]  ;;  %v8054_v36 = vor.u32 %v6966_v32, %v5625_v2  ;;  %997 = vmatpush.bf16.msra.mxu0 %v8036_v11 }
  0x4f   :  { %12275 = vst [vmem:[#allocation65_spill] sm:$0xff] %v8040_v26  ;;  %v5489_v40 = vld [vmem:[%s11709_s1 + $0xc0] sm:$0xf]  ;;  %v6932_v1 = vld [vmem:[%s11709_s1 + $0xc4] sm:$0xf0]  ;;  %v8073_v32 = vor.u32 %v6916_v24, %v5425_v49  ;;  %1010 = vmatpush.bf16.msra.mxu1 %v8040_v26  ;;  %1023 = vmatpush.bf16.msra.mxu2 %v8042_v54 }
  0x50   :  { %12276 = vst [vmem:[#allocation66_spill] sm:$0xff] %v8042_v54  ;;  %v5553_v63 = vld [vmem:[%s11709_s1 + $0x140] sm:$0xf]  ;;  %v6948_v42 = vld [vmem:[%s11709_s1 + $0x144] sm:$0xf0]  ;;  %v8077_v4 = vor.u32 %v6932_v1, %v5489_v40  ;;  %1036 = vmatpush.bf16.msra.mxu3 %v8054_v36  ;;  %588 = vmatmul.bf16.vlgmr.msrb.gmra.mxu0 %v7886_v39 }
  0x51   :  { %12277 = vst [vmem:[#allocation67_spill] sm:$0xff] %v8054_v36  ;;  %v5617_v59 = vld [vmem:[%s11709_s1 + $0x1c0] sm:$0xf]  ;;  %v6964_v2 = vld [vmem:[%s11709_s1 + $0x1c4] sm:$0xf0]  ;;  %v8079_v15 = vor.u32 %v6948_v42, %v5553_v63 }
  0x52   :  { %12278 = vst [vmem:[#allocation68_spill] sm:$0xff] %v8073_v32  ;;  %v5417_v10 = vld [vmem:[%s11709_s1 + $0x30] sm:$0xf]  ;;  %v6914_v20 = vld [vmem:[%s11709_s1 + $0x34] sm:$0xf0]  ;;  %v8091_v49 = vor.u32 %v6964_v2, %v5617_v59  ;;  %601 = vmatmul.bf16.vlgmr.msrb.gmra.mxu1 %v7901_v53  ;;  %998 = vmatpush.bf16.msra.mxu0 %v8073_v32 }
  0x53   :  { %12279 = vst [vmem:[#allocation69_spill] sm:$0xff] %v8077_v4  ;;  %v5481_v24 = vld [vmem:[%s11709_s1 + $0xb0] sm:$0xf]  ;;  %v6930_v40 = vld [vmem:[%s11709_s1 + $0xb4] sm:$0xf0]  ;;  %v8115_v2 = vor.u32 %v6914_v20, %v5417_v10  ;;  %1011 = vmatpush.bf16.msra.mxu1 %v8077_v4  ;;  %1024 = vmatpush.bf16.msra.mxu2 %v8079_v15 }
  0x54   :  { %12280 = vst [vmem:[#allocation70_spill] sm:$0xff] %v8079_v15  ;;  %v5545_v1 = vld [vmem:[%s11709_s1 + $0x130] sm:$0xf]  ;;  %v6946_v63 = vld [vmem:[%s11709_s1 + $0x134] sm:$0xf0]  ;;  %v8128_v53 = vor.u32 %v6930_v40, %v5481_v24  ;;  %1037 = vmatpush.bf16.msra.mxu3 %v8091_v49 }
  0x55   :  { %12281 = vst [vmem:[#allocation71_spill] sm:$0xff] %v8091_v49  ;;  %v5609_v42 = vld [vmem:[%s11709_s1 + $0x1b0] sm:$0xf]  ;;  %v6962_v39 = vld [vmem:[%s11709_s1 + $0x1b4] sm:$0xf0]  ;;  %v8130_v20 = vor.u32 %v6946_v63, %v5545_v1 }
  0x56   :  { %v5409_v59 = vld [vmem:[%s11709_s1 + $0x20] sm:$0xf]  ;;  %12282 = vst [vmem:[#allocation72_spill] sm:$0xff] %v8115_v2  ;;  %v6912_v36 = vld [vmem:[%s11709_s1 + $0x24] sm:$0xf0]  ;;  %v8142_v4 = vor.u32 %v6962_v39, %v5609_v42  ;;  %999 = vmatpush.bf16.msra.mxu0 %v8115_v2 }
  0x57   :  { %v5473_v54 = vld [vmem:[%s11709_s1 + $0xa0] sm:$0xf]  ;;  %v6928_v31 = vld [vmem:[%s11709_s1 + $0xa4] sm:$0xf0]  ;;  %12283 = vst [vmem:[#allocation73_spill] sm:$0xff] %v8128_v53  ;;  %v8160_v49 = vor.u32 %v6912_v36, %v5409_v59  ;;  %1012 = vmatpush.bf16.msra.mxu1 %v8128_v53  ;;  %1025 = vmatpush.bf16.msra.mxu2 %v8130_v20 }
  0x58   :  { %12284 = vst [vmem:[#allocation74_spill] sm:$0xff] %v8130_v20  ;;  %v5537_v10 = vld [vmem:[%s11709_s1 + $0x120] sm:$0xf]  ;;  %v6944_v32 = vld [vmem:[%s11709_s1 + $0x124] sm:$0xf0]  ;;  %v8167_v22 = vor.u32 %v6928_v31, %v5473_v54  ;;  %1038 = vmatpush.bf16.msra.mxu3 %v8142_v4 }
  0x59   :  { %v5601_v26 = vld [vmem:[%s11709_s1 + $0x1a0] sm:$0xf]  ;;  %12285 = vst [vmem:[#allocation75_spill] sm:$0xff] %v8142_v4  ;;  %v6960_v24 = vld [vmem:[%s11709_s1 + $0x1a4] sm:$0xf0]  ;;  %v8169_v19 = vor.u32 %v6944_v32, %v5537_v10 }
  0x5a   :  { %v643_v40 = vld.sshfl [vmem:[#allocation1 + $0x20] sm:$0xff pattern:$0x73625140]  ;;  %v5401_v1 = vld [vmem:[%s11709_s1 + $0x10] sm:$0xf]  ;;  %12286 = vst [vmem:[#allocation76_spill] sm:$0xff] %v8160_v49  ;;  %v8181_v20 = vor.u32 %v6960_v24, %v5601_v26  ;;  %1000 = vmatpush.bf16.msra.mxu0 %v8160_v49 }
  0x5b   :  { %v6910_v63 = vld [vmem:[%s11709_s1 + $0x14] sm:$0xf0]  ;;  %v5465_v15 = vld [vmem:[%s11709_s1 + $0x90] sm:$0xf]  ;;  %12287 = vst [vmem:[#allocation77_spill] sm:$0xff] %v8167_v22  ;;  %v655_v2 = vunpack.c.l.b16 %v643_v40  ;;  %1013 = vmatpush.bf16.msra.mxu1 %v8167_v22  ;;  %1026 = vmatpush.bf16.msra.mxu2 %v8169_v19 }
  0x5c   :  { %v6926_v42 = vld [vmem:[%s11709_s1 + $0x94] sm:$0xf0]  ;;  %v647_v39 = vld.sshfl [vmem:[#allocation1 + $0x30] sm:$0xff pattern:$0x73625140]  ;;  %12288 = vst [vmem:[#allocation78_spill] sm:$0xff] %v8169_v19  ;;  %v8190_v40 = vor.u32 %v6910_v63, %v5401_v1  ;;  %1039 = vmatpush.bf16.msra.mxu3 %v8181_v20 }
  0x5d   :  { %v5529_v11 = vld [vmem:[%s11709_s1 + $0x110] sm:$0xf]  ;;  %v645_v60 = vld.sshfl [vmem:[#allocation1 + $0x28] sm:$0xff pattern:$0x73625140]  ;;  %12289 = vst [vmem:[#allocation79_spill] sm:$0xff] %v8181_v20  ;;  %v657_v32 = vunpack.c.l.b16 %v647_v39  ;;  %v8192_v26 = vor.u32 %v6926_v42, %v5465_v15 }
  0x5e   :  { %v6942_v13 = vld [vmem:[%s11709_s1 + $0x114] sm:$0xf0]  ;;  %v5593_v36 = vld [vmem:[%s11709_s1 + $0x190] sm:$0xf]  ;;  %v656_v31 = vunpack.c.l.b16 %v645_v60  ;;  %v5393_v53 = vld [vmem:[%s11709_s1] sm:$0xf]  ;;  %1001 = vmatpush.bf16.msra.mxu0 %v8190_v40 }
  0x5f   :  { %v6958_v59 = vld [vmem:[%s11709_s1 + $0x194] sm:$0xf0]  ;;  %v633_v54 = vld.sshfl [vmem:[#allocation1] sm:$0xff pattern:$0x73625140]  ;;  %12290 = vst [vmem:[#allocation80_spill] sm:$0xff] %v8190_v40  ;;  %v8205_v1 = vor.u32 %v6942_v13, %v5529_v11  ;;  %1014 = vmatpush.bf16.msra.mxu1 %v8192_v26 }
  0x60   :  { %v649_v10 = vld.sshfl [vmem:[#allocation1 + $0x38] sm:$0xff pattern:$0x73625140]  ;;  %v6908_v18 = vld [vmem:[%s11709_s1 + $0x4] sm:$0xf0]  ;;  %12291 = vst [vmem:[#allocation81_spill] sm:$0xff] %v8192_v26  ;;  %v8207_v15 = vor.u32 %v6958_v59, %v5593_v36 }
  0x61   :  { %v637_v61 = vld.sshfl [vmem:[#allocation1 + $0x10] sm:$0xff pattern:$0x73625140]  ;;  %v635_v30 = vld.sshfl [vmem:[#allocation1 + $0x8] sm:$0xff pattern:$0x73625140]  ;;  %v658_v41 = vunpack.c.l.b16 %v649_v10  ;;  %v651_v10 = vunpack.c.l.b16 %v633_v54  ;;  %v8229_v37 = vor.u32 %v6908_v18, %v5393_v53  ;;  %1027 = vmatpush.bf16.msra.mxu2 %v8205_v1 }
  0x62   :  { %v5457_v60 = vld [vmem:[%s11709_s1 + $0x80] sm:$0xf]  ;;  %v6924_v24 = vld [vmem:[%s11709_s1 + $0x84] sm:$0xf0]  ;;  %12292 = vst [vmem:[#allocation82_spill] sm:$0xff] %v8205_v1  ;;  %v659_v49 = vrot.slane %v655_v2, 7  ;;  %v653_v11 = vunpack.c.l.b16 %v637_v61  ;;  %v652_v59 = vunpack.c.l.b16 %v635_v30  ;;  %1040 = vmatpush.bf16.msra.mxu3 %v8207_v15 }
  0x63   :  { %v5521_v39 = vld [vmem:[%s11709_s1 + $0x100] sm:$0xf]  ;;  %v639_v4 = vld.sshfl [vmem:[#allocation1 + $0x18] sm:$0xff pattern:$0x73625140]  ;;  %12293 = vst [vmem:[#allocation83_spill] sm:$0xff] %v8207_v15  ;;  %1002 = vmatpush.bf16.msra.mxu0 %v8229_v37 }
  0x64   :  { %v6940_v63 = vld [vmem:[%s11709_s1 + $0x104] sm:$0xf0]  ;;  %v5585_v42 = vld [vmem:[%s11709_s1 + $0x180] sm:$0xf]  ;;  %v6921_v13 = vld [vmem:[%s11709_s1 + $0x74] sm:$0xf]  ;;  %v654_v54 = vunpack.c.l.b16 %v639_v4 }
  0x65   :  { %v6956_v19 = vld [vmem:[%s11709_s1 + $0x184] sm:$0xf0]  ;;  %v663_v36 = vrot.slane %v657_v32, 7  ;;  %v661_v22 = vrot.slane %v656_v31, 7  ;;  %v5451_v0 = vld [vmem:[%s11709_s1 + $0x78] sm:$0xf0]  ;;  %v8244_v18 = vor.u32 %v6940_v63, %v5521_v39  ;;  %v660_v31 = vsel %vm192_vm0, %v659_v49, %v651_v10 }
  0x66   :  { %v6937_v2 = vld [vmem:[%s11709_s1 + $0xf4] sm:$0xf]  ;;  %v665_v20 = vrot.slane %v658_v41, 7  ;;  %12294 = vst [vmem:[#allocation84_spill] sm:$0xff] %v8229_v37  ;;  %v5515_v61 = vld [vmem:[%s11709_s1 + $0xf8] sm:$0xf0]  ;;  %v8242_v41 = vor.u32 %v6924_v24, %v5457_v60  ;;  %v8254_v40 = vor.u32 %v6956_v19, %v5585_v42  ;;  %v8256_v26 = vor.u32 %v6921_v13, %v5451_v0 }
  0x67   :  { %v6953_v30 = vld [vmem:[%s11709_s1 + $0x174] sm:$0xf]  ;;  %v5579_v32 = vld [vmem:[%s11709_s1 + $0x178] sm:$0xf0]  ;;  %12296 = vst [vmem:[#allocation86_spill] sm:$0xff] %v8244_v18  ;;  %v664_v60 = vsel %vm192_vm0, %v663_v36, %v653_v11  ;;  %v662_v24 = vsel %vm192_vm0, %v661_v22, %v652_v59  ;;  %v8260_v39 = vor.u32 %v6937_v2, %v5515_v61  ;;  %v8277_v42 = vpack.c.b16 %v660_v31, %v660_v31 }
  0x68   :  { %12295 = vst [vmem:[#allocation85_spill] sm:$0xff] %v8242_v41  ;;  %v6969_v4 = vld [vmem:[%s11709_s1 + $0x1f4] sm:$0xf]  ;;  %v5643_v53 = vld [vmem:[%s11709_s1 + $0x1f8] sm:$0xf0]  ;;  %v8262_v63 = vor.u32 %v6953_v30, %v5579_v32  ;;  %v666_v1 = vsel %vm192_vm0, %v665_v20, %v654_v54  ;;  %1015 = vmatpush.bf16.msra.mxu1 %v8242_v41  ;;  %1028 = vmatpush.bf16.msra.mxu2 %v8244_v18 }
  0x69   :  { %12297 = vst [vmem:[#allocation87_spill] sm:$0xff] %v8254_v40  ;;  %v6919_v49 = vld [vmem:[%s11709_s1 + $0x64] sm:$0xf]  ;;  %v5443_v19 = vld [vmem:[%s11709_s1 + $0x68] sm:$0xf0]  ;;  %v8275_v22 = vor.u32 %v6969_v4, %v5643_v53  ;;  %v8290_v11 = vpack.c.b16 %v664_v60, %v664_v60  ;;  %v8292_v36 = vpack.c.b16 %v662_v24, %v662_v24  ;;  %1041 = vmatpush.bf16.msra.mxu3 %v8254_v40 }
  0x6a   :  { %12298 = vst [vmem:[#allocation88_spill] sm:$0xff] %v8256_v26  ;;  %v6935_v0 = vld [vmem:[%s11709_s1 + $0xe4] sm:$0xf]  ;;  %v5507_v20 = vld [vmem:[%s11709_s1 + $0xe8] sm:$0xf0]  ;;  %1047 = vmatpush.bf16.msrb.mxu0 %v8256_v26  ;;  %v8302_v54 = vpack.c.b16 %v666_v1, %v666_v1  ;;  %v8304_v61 = vor.u32 %v6919_v49, %v5443_v19 }
  0x6b   :  { %12299 = vst [vmem:[#allocation89_spill] sm:$0xff] %v8260_v39  ;;  %v6951_v10 = vld [vmem:[%s11709_s1 + $0x164] sm:$0xf]  ;;  %v5571_v13 = vld [vmem:[%s11709_s1 + $0x168] sm:$0xf0]  ;;  %v8308_v30 = vor.u32 %v6935_v0, %v5507_v20  ;;  %1003 = vmatmul.bf16.vlgmr.msra.gmra.mxu0 %v8277_v42  ;;  %1029 = vmatmul.bf16.vlgmr.msra.gmra.mxu2 %v8290_v11 }
  0x6c   :  { %12300 = vst [vmem:[#allocation90_spill] sm:$0xff] %v8262_v63  ;;  %v6967_v59 = vld [vmem:[%s11709_s1 + $0x1e4] sm:$0xf]  ;;  %v5635_v2 = vld [vmem:[%s11709_s1 + $0x1e8] sm:$0xf0]  ;;  %1060 = vmatpush.bf16.msrb.mxu1 %v8260_v39  ;;  %1073 = vmatpush.bf16.msrb.mxu2 %v8262_v63  ;;  %v8310_v32 = vor.u32 %v6951_v10, %v5571_v13 }
  0x6d   :  { %12301 = vst [vmem:[#allocation91_spill] sm:$0xff] %v8275_v22  ;;  %v6917_v4 = vld [vmem:[%s11709_s1 + $0x54] sm:$0xf]  ;;  %v5435_v53 = vld [vmem:[%s11709_s1 + $0x58] sm:$0xf0]  ;;  %1086 = vmatpush.bf16.msrb.mxu3 %v8275_v22  ;;  %v8323_v31 = vor.u32 %v6967_v59, %v5635_v2  ;;  %1016 = vmatmul.bf16.vlgmr.msra.gmra.mxu1 %v8292_v36 }
  0x6e   :  { %12302 = vst [vmem:[#allocation92_spill] sm:$0xff] %v8304_v61  ;;  %v6933_v1 = vld [vmem:[%s11709_s1 + $0xd4] sm:$0xf]  ;;  %v5499_v60 = vld [vmem:[%s11709_s1 + $0xd8] sm:$0xf0]  ;;  %1042 = vmatmul.bf16.vlgmr.msra.gmra.mxu3 %v8302_v54  ;;  %1048 = vmatpush.bf16.msrb.mxu0 %v8304_v61  ;;  %v8344_v20 = vor.u32 %v6917_v4, %v5435_v53 }
  0x6f   :  { %12303 = vst [vmem:[#allocation93_spill] sm:$0xff] %v8308_v30  ;;  %v6949_v24 = vld [vmem:[%s11709_s1 + $0x154] sm:$0xf]  ;;  %v5563_v49 = vld [vmem:[%s11709_s1 + $0x158] sm:$0xf0]  ;;  %v8348_v10 = vor.u32 %v6933_v1, %v5499_v60 }
  0x70   :  { %12304 = vst [vmem:[#allocation94_spill] sm:$0xff] %v8310_v32  ;;  %v6965_v19 = vld [vmem:[%s11709_s1 + $0x1d4] sm:$0xf]  ;;  %v5627_v0 = vld [vmem:[%s11709_s1 + $0x1d8] sm:$0xf0]  ;;  %1061 = vmatpush.bf16.msrb.mxu1 %v8308_v30  ;;  %1074 = vmatpush.bf16.msrb.mxu2 %v8310_v32  ;;  %v8350_v13 = vor.u32 %v6949_v24, %v5563_v49 }
  0x71   :  { %12305 = vst [vmem:[#allocation95_spill] sm:$0xff] %v8323_v31  ;;  %v6915_v59 = vld [vmem:[%s11709_s1 + $0x44] sm:$0xf]  ;;  %v5427_v2 = vld [vmem:[%s11709_s1 + $0x48] sm:$0xf0]  ;;  %1087 = vmatpush.bf16.msrb.mxu3 %v8323_v31  ;;  %v8362_v53 = vor.u32 %v6965_v19, %v5627_v0 }
  0x72   :  { %12306 = vst [vmem:[#allocation96_spill] sm:$0xff] %v8344_v20  ;;  %v6931_v4 = vld [vmem:[%s11709_s1 + $0xc4] sm:$0xf]  ;;  %v5491_v1 = vld [vmem:[%s11709_s1 + $0xc8] sm:$0xf0]  ;;  %1049 = vmatpush.bf16.msrb.mxu0 %v8344_v20  ;;  %v8380_v0 = vor.u32 %v6915_v59, %v5427_v2 }
  0x73   :  { %12307 = vst [vmem:[#allocation97_spill] sm:$0xff] %v8348_v10  ;;  %v6947_v60 = vld [vmem:[%s11709_s1 + $0x144] sm:$0xf]  ;;  %v5555_v24 = vld [vmem:[%s11709_s1 + $0x148] sm:$0xf0]  ;;  %v8384_v31 = vor.u32 %v6931_v4, %v5491_v1 }
  0x74   :  { %12308 = vst [vmem:[#allocation98_spill] sm:$0xff] %v8350_v13  ;;  %v6963_v49 = vld [vmem:[%s11709_s1 + $0x1c4] sm:$0xf]  ;;  %v5619_v19 = vld [vmem:[%s11709_s1 + $0x1c8] sm:$0xf0]  ;;  %1062 = vmatpush.bf16.msrb.mxu1 %v8348_v10  ;;  %1075 = vmatpush.bf16.msrb.mxu2 %v8350_v13  ;;  %v8386_v32 = vor.u32 %v6947_v60, %v5555_v24 }
  0x75   :  { %12309 = vst [vmem:[#allocation99_spill] sm:$0xff] %v8362_v53  ;;  %v6913_v30 = vld [vmem:[%s11709_s1 + $0x34] sm:$0xf]  ;;  %v5419_v61 = vld [vmem:[%s11709_s1 + $0x38] sm:$0xf0]  ;;  %1088 = vmatpush.bf16.msrb.mxu3 %v8362_v53  ;;  %v8398_v2 = vor.u32 %v6963_v49, %v5619_v19 }
  0x76   :  { %12310 = vst [vmem:[#allocation100_spill] sm:$0xff] %v8380_v0  ;;  %v6929_v59 = vld [vmem:[%s11709_s1 + $0xb4] sm:$0xf]  ;;  %v5483_v4 = vld [vmem:[%s11709_s1 + $0xb8] sm:$0xf0]  ;;  %1050 = vmatpush.bf16.msrb.mxu0 %v8380_v0  ;;  %v8416_v19 = vor.u32 %v6913_v30, %v5419_v61 }
  0x77   :  { %12311 = vst [vmem:[#allocation101_spill] sm:$0xff] %v8384_v31  ;;  %v6945_v1 = vld [vmem:[%s11709_s1 + $0x134] sm:$0xf]  ;;  %v5547_v60 = vld [vmem:[%s11709_s1 + $0x138] sm:$0xf0]  ;;  %v8420_v53 = vor.u32 %v6929_v59, %v5483_v4 }
  0x78   :  { %12312 = vst [vmem:[#allocation102_spill] sm:$0xff] %v8386_v32  ;;  %v6961_v24 = vld [vmem:[%s11709_s1 + $0x1b4] sm:$0xf]  ;;  %v5611_v49 = vld [vmem:[%s11709_s1 + $0x1b8] sm:$0xf0]  ;;  %1063 = vmatpush.bf16.msrb.mxu1 %v8384_v31  ;;  %1076 = vmatpush.bf16.msrb.mxu2 %v8386_v32  ;;  %v8422_v13 = vor.u32 %v6945_v1, %v5547_v60 }
  0x79   :  { %12313 = vst [vmem:[#allocation103_spill] sm:$0xff] %v8398_v2  ;;  %v6911_v10 = vld [vmem:[%s11709_s1 + $0x24] sm:$0xf]  ;;  %v5411_v20 = vld [vmem:[%s11709_s1 + $0x28] sm:$0xf0]  ;;  %1089 = vmatpush.bf16.msrb.mxu3 %v8398_v2  ;;  %v8434_v30 = vor.u32 %v6961_v24, %v5611_v49 }
  0x7a   :  { %12314 = vst [vmem:[#allocation104_spill] sm:$0xff] %v8416_v19  ;;  %v6927_v61 = vld [vmem:[%s11709_s1 + $0xa4] sm:$0xf]  ;;  %v5475_v59 = vld [vmem:[%s11709_s1 + $0xa8] sm:$0xf0]  ;;  %1051 = vmatpush.bf16.msrb.mxu0 %v8416_v19  ;;  %v8452_v49 = vor.u32 %v6911_v10, %v5411_v20 }
  0x7b   :  { %12315 = vst [vmem:[#allocation105_spill] sm:$0xff] %v8420_v53  ;;  %v6943_v4 = vld [vmem:[%s11709_s1 + $0x124] sm:$0xf]  ;;  %v5539_v1 = vld [vmem:[%s11709_s1 + $0x128] sm:$0xf0]  ;;  %v8456_v2 = vor.u32 %v6927_v61, %v5475_v59 }
  0x7c   :  { %12316 = vst [vmem:[#allocation106_spill] sm:$0xff] %v8422_v13  ;;  %v6959_v60 = vld [vmem:[%s11709_s1 + $0x1a4] sm:$0xf]  ;;  %v5603_v24 = vld [vmem:[%s11709_s1 + $0x1a8] sm:$0xf0]  ;;  %1064 = vmatpush.bf16.msrb.mxu1 %v8420_v53  ;;  %1077 = vmatpush.bf16.msrb.mxu2 %v8422_v13  ;;  %v8458_v32 = vor.u32 %v6943_v4, %v5539_v1 }
  0x7d   :  { %12317 = vst [vmem:[#allocation107_spill] sm:$0xff] %v8434_v30  ;;  %v6909_v31 = vld [vmem:[%s11709_s1 + $0x14] sm:$0xf]  ;;  %v5403_v0 = vld [vmem:[%s11709_s1 + $0x18] sm:$0xf0]  ;;  %1090 = vmatpush.bf16.msrb.mxu3 %v8434_v30  ;;  %v8470_v10 = vor.u32 %v6959_v60, %v5603_v24 }
  0x7e   :  { %12318 = vst [vmem:[#allocation108_spill] sm:$0xff] %v8452_v49  ;;  %v6925_v20 = vld [vmem:[%s11709_s1 + $0x94] sm:$0xf]  ;;  %v5467_v61 = vld [vmem:[%s11709_s1 + $0x98] sm:$0xf0]  ;;  %1052 = vmatpush.bf16.msrb.mxu0 %v8452_v49  ;;  %v8488_v24 = vor.u32 %v6909_v31, %v5403_v0 }
  0x7f   :  { %12319 = vst [vmem:[#allocation109_spill] sm:$0xff] %v8456_v2  ;;  %v6941_v59 = vld [vmem:[%s11709_s1 + $0x114] sm:$0xf]  ;;  %v5531_v4 = vld [vmem:[%s11709_s1 + $0x118] sm:$0xf0]  ;;  %v8498_v53 = vor.u32 %v6925_v20, %v5467_v61 }
  0x80   :  { %12320 = vst [vmem:[#allocation110_spill] sm:$0xff] %v8458_v32  ;;  %v6957_v1 = vld [vmem:[%s11709_s1 + $0x194] sm:$0xf]  ;;  %v5595_v60 = vld [vmem:[%s11709_s1 + $0x198] sm:$0xf0]  ;;  %1065 = vmatpush.bf16.msrb.mxu1 %v8456_v2  ;;  %1078 = vmatpush.bf16.msrb.mxu2 %v8458_v32  ;;  %v8500_v19 = vor.u32 %v6941_v59, %v5531_v4 }
  0x81   :  { %12321 = vst [vmem:[#allocation111_spill] sm:$0xff] %v8470_v10  ;;  %v6907_v30 = vld [vmem:[%s11709_s1 + $0x4] sm:$0xf]  ;;  %v5395_v13 = vld [vmem:[%s11709_s1 + $0x8] sm:$0xf0]  ;;  %1091 = vmatpush.bf16.msrb.mxu3 %v8470_v10  ;;  %v8512_v2 = vor.u32 %v6957_v1, %v5595_v60 }
  0x82   :  { %12322 = vst [vmem:[#allocation112_spill] sm:$0xff] %v8488_v24  ;;  %v6923_v31 = vld [vmem:[%s11709_s1 + $0x84] sm:$0xf]  ;;  %v5459_v0 = vld [vmem:[%s11709_s1 + $0x88] sm:$0xf0]  ;;  %1053 = vmatpush.bf16.msrb.mxu0 %v8488_v24  ;;  %v8533_v10 = vor.u32 %v6907_v30, %v5395_v13 }
  0x83   :  { %12323 = vst [vmem:[#allocation113_spill] sm:$0xff] %v8498_v53  ;;  %v6939_v49 = vld [vmem:[%s11709_s1 + $0x104] sm:$0xf]  ;;  %v5523_v20 = vld [vmem:[%s11709_s1 + $0x108] sm:$0xf0]  ;;  %v8546_v39 = vor.u32 %v6923_v31, %v5459_v0 }
  0x84   :  { %12324 = vst [vmem:[#allocation114_spill] sm:$0xff] %v8500_v19  ;;  %v6955_v61 = vld [vmem:[%s11709_s1 + $0x184] sm:$0xf]  ;;  %v5587_v59 = vld [vmem:[%s11709_s1 + $0x188] sm:$0xf0]  ;;  %1066 = vmatpush.bf16.msrb.mxu1 %v8498_v53  ;;  %1079 = vmatpush.bf16.msrb.mxu2 %v8500_v19  ;;  %v8548_v13 = vor.u32 %v6939_v49, %v5523_v20 }
  0x85   :  { %12325 = vst [vmem:[#allocation115_spill] sm:$0xff] %v8512_v2  ;;  %v5771_v4 = vld [vmem:[%s11709_s1 + $0x470] sm:$0xf]  ;;  %v7050_v1 = vld [vmem:[%s11709_s1 + $0x474] sm:$0xf0]  ;;  %1092 = vmatpush.bf16.msrb.mxu3 %v8512_v2  ;;  %v8557_v26 = vor.u32 %v6955_v61, %v5587_v59 }
  0x86   :  { %v5835_v60 = vld [vmem:[%s11709_s1 + $0x4f0] sm:$0xf]  ;;  %12326 = vst [vmem:[#allocation116_spill] sm:$0xff] %v8533_v10  ;;  %v7066_v32 = vld [vmem:[%s11709_s1 + $0x4f4] sm:$0xf0]  ;;  %v8559_v40 = vor.u32 %v7050_v1, %v5771_v4  ;;  %1054 = vmatpush.bf16.msrb.mxu0 %v8533_v10 }
  0x87   :  { %v5899_v22 = vld [vmem:[%s11709_s1 + $0x570] sm:$0xf]  ;;  %v7082_v63 = vld [vmem:[%s11709_s1 + $0x574] sm:$0xf0]  ;;  %12327 = vst [vmem:[#allocation117_spill] sm:$0xff] %v8546_v39  ;;  %v8561_v53 = vor.u32 %v7066_v32, %v5835_v60 }
  0x88   :  { %12328 = vst [vmem:[#allocation118_spill] sm:$0xff] %v8548_v13  ;;  %v5963_v30 = vld [vmem:[%s11709_s1 + $0x5f0] sm:$0xf]  ;;  %v7098_v24 = vld [vmem:[%s11709_s1 + $0x5f4] sm:$0xf0]  ;;  %v8563_v31 = vor.u32 %v7082_v63, %v5899_v22  ;;  %1067 = vmatpush.bf16.msrb.mxu1 %v8546_v39  ;;  %1080 = vmatpush.bf16.msrb.mxu2 %v8548_v13 }
  0x89   :  { %12329 = vst [vmem:[#allocation119_spill] sm:$0xff] %v8557_v26  ;;  %v5763_v49 = vld [vmem:[%s11709_s1 + $0x460] sm:$0xf]  ;;  %v7048_v0 = vld [vmem:[%s11709_s1 + $0x464] sm:$0xf0]  ;;  %v8575_v61 = vor.u32 %v7098_v24, %v5963_v30  ;;  %1093 = vmatpush.bf16.msrb.mxu3 %v8557_v26  ;;  %1055 = vmatmul.bf16.vlgmr.msrb.gmra.mxu0 %v8277_v42 }
  0x8a   :  { %12330 = vst [vmem:[#allocation120_spill] sm:$0xff] %v8559_v40  ;;  %v5827_v20 = vld [vmem:[%s11709_s1 + $0x4e0] sm:$0xf]  ;;  %v7064_v63 = vld [vmem:[%s11709_s1 + $0x4e4] sm:$0xf0]  ;;  %1532 = vmatpush.bf16.msra.mxu0 %v8559_v40  ;;  %v8596_v4 = vor.u32 %v7048_v0, %v5763_v49 }
  0x8b   :  { %12331 = vst [vmem:[#allocation121_spill] sm:$0xff] %v8561_v53  ;;  %v5891_v22 = vld [vmem:[%s11709_s1 + $0x560] sm:$0xf]  ;;  %v7080_v32 = vld [vmem:[%s11709_s1 + $0x564] sm:$0xf0]  ;;  %v8609_v26 = vor.u32 %v7064_v63, %v5827_v20  ;;  %1081 = vmatmul.bf16.vlgmr.msrb.gmra.mxu2 %v8290_v11  ;;  %1068 = vmatmul.bf16.vlgmr.msrb.gmra.mxu1 %v8292_v36 }
  0x8c   :  { %12332 = vst [vmem:[#allocation122_spill] sm:$0xff] %v8563_v31  ;;  %v5955_v24 = vld [vmem:[%s11709_s1 + $0x5e0] sm:$0xf]  ;;  %v7096_v59 = vld [vmem:[%s11709_s1 + $0x5e4] sm:$0xf0]  ;;  %1545 = vmatpush.bf16.msra.mxu1 %v8561_v53  ;;  %1558 = vmatpush.bf16.msra.mxu2 %v8563_v31  ;;  %v8611_v49 = vor.u32 %v7080_v32, %v5891_v22 }
  0x8d   :  { %12333 = vst [vmem:[#allocation123_spill] sm:$0xff] %v8575_v61  ;;  %v5755_v1 = vld [vmem:[%s11709_s1 + $0x450] sm:$0xf]  ;;  %v7046_v60 = vld [vmem:[%s11709_s1 + $0x454] sm:$0xf0]  ;;  %1571 = vmatpush.bf16.msra.mxu3 %v8575_v61  ;;  %v8626_v20 = vor.u32 %v7096_v59, %v5955_v24 }
  0x8e   :  { %12334 = vst [vmem:[#allocation124_spill] sm:$0xff] %v8596_v4  ;;  %v5819_v30 = vld [vmem:[%s11709_s1 + $0x4d0] sm:$0xf]  ;;  %v7062_v0 = vld [vmem:[%s11709_s1 + $0x4d4] sm:$0xf0]  ;;  %1094 = vmatmul.bf16.vlgmr.msrb.gmra.mxu3 %v8302_v54  ;;  %1533 = vmatpush.bf16.msra.mxu0 %v8596_v4  ;;  %v8648_v24 = vor.u32 %v7046_v60, %v5755_v1 }
  0x8f   :  { %12335 = vst [vmem:[#allocation125_spill] sm:$0xff] %v8609_v26  ;;  %v5883_v40 = vld [vmem:[%s11709_s1 + $0x550] sm:$0xf]  ;;  %v8622_v13 = vld [vmem:[%s11710_s0 + $0x8] sm:$0x55]  ;;  %v8652_v11 = vor.u32 %v7062_v0, %v5819_v30 }
  0x90   :  { %12336 = vst [vmem:[#allocation126_spill] sm:$0xff] %v8611_v49  ;;  %v7078_v63 = vld [vmem:[%s11709_s1 + $0x554] sm:$0xf0]  ;;  %v8634_v22 = vld [vmem:[%s11710_s0 + $0x20] sm:$0x55]  ;;  %1546 = vmatpush.bf16.msra.mxu1 %v8609_v26  ;;  %1559 = vmatpush.bf16.msra.mxu2 %v8611_v49 }
  0x91   :  { %12337 = vst [vmem:[#allocation127_spill] sm:$0xff] %v8622_v13  ;;  %v5947_v42 = vld [vmem:[%s11709_s1 + $0x5d0] sm:$0xf]  ;;  %v7094_v32 = vld [vmem:[%s11709_s1 + $0x5d4] sm:$0xf0]  ;;  %v8654_v36 = vor.u32 %v7078_v63, %v5883_v40  ;;  %1572 = vmatpush.bf16.msra.mxu3 %v8626_v20 }
  0x92   :  { %12338 = vst [vmem:[#allocation128_spill] sm:$0xff] %v8626_v20  ;;  %v5747_v59 = vld [vmem:[%s11709_s1 + $0x440] sm:$0xf]  ;;  %v7044_v54 = vld [vmem:[%s11709_s1 + $0x444] sm:$0xf0]  ;;  %v8666_v60 = vor.u32 %v7094_v32, %v5947_v42  ;;  %1534 = vmatpush.bf16.msra.mxu0 %v8648_v24 }
  0x93   :  { %12339 = vst [vmem:[#allocation129_spill] sm:$0xff] %v8634_v22  ;;  %v5811_v1 = vld [vmem:[%s11709_s1 + $0x4c0] sm:$0xf]  ;;  %v7060_v40 = vld [vmem:[%s11709_s1 + $0x4c4] sm:$0xf0]  ;;  %v8684_v32 = vor.u32 %v7044_v54, %v5747_v59 }
  0x94   :  { %1168 = vst [vmem:[#allocation1] ss:$4 sm:$0xff] %v8622_v13  ;;  %v5875_v30 = vld [vmem:[%s11709_s1 + $0x540] sm:$0xf]  ;;  %v7076_v0 = vld [vmem:[%s11709_s1 + $0x544] sm:$0xf0]  ;;  %1547 = vmatpush.bf16.msra.mxu1 %v8652_v11  ;;  %1560 = vmatpush.bf16.msra.mxu2 %v8654_v36 }
  0x95   :  { %1179 = vst [vmem:[#allocation1 + $0x20] ss:$4 sm:$0xff] %v8634_v22  ;;  %v5939_v63 = vld [vmem:[%s11709_s1 + $0x5c0] sm:$0xf]  ;;  %v7092_v42 = vld [vmem:[%s11709_s1 + $0x5c4] sm:$0xf0]  ;;  %v8688_v22 = vor.u32 %v7060_v40, %v5811_v1  ;;  %v8690_v13 = vor.u32 %v7076_v0, %v5875_v30  ;;  %1573 = vmatpush.bf16.msra.mxu3 %v8666_v60 }
  0x96   :  { %12340 = vst [vmem:[#allocation130_spill] sm:$0xff] %v8648_v24  ;;  %v5739_v20 = vld [vmem:[%s11709_s1 + $0x430] sm:$0xf]  ;;  %v7042_v49 = vld [vmem:[%s11709_s1 + $0x434] sm:$0xf0]  ;;  %v8702_v54 = vor.u32 %v7092_v42, %v5939_v63  ;;  %1535 = vmatpush.bf16.msra.mxu0 %v8684_v32 }
  0x97   :  { %12341 = vst [vmem:[#allocation131_spill] sm:$0xff] %v8652_v11  ;;  %v5803_v59 = vld [vmem:[%s11709_s1 + $0x4b0] sm:$0xf]  ;;  %v7058_v1 = vld [vmem:[%s11709_s1 + $0x4b4] sm:$0xf0] }
  0x98   :  { %12342 = vst [vmem:[#allocation132_spill] sm:$0xff] %v8654_v36  ;;  %v5867_v40 = vld [vmem:[%s11709_s1 + $0x530] sm:$0xf]  ;;  %v7074_v30 = vld [vmem:[%s11709_s1 + $0x534] sm:$0xf0]  ;;  %1548 = vmatpush.bf16.msra.mxu1 %v8688_v22  ;;  %1561 = vmatpush.bf16.msra.mxu2 %v8690_v13  ;;  %v8736_v26 = vor.u32 %v7058_v1, %v5803_v59 }
  0x99   :  { %12343 = vst [vmem:[#allocation133_spill] sm:$0xff] %v8666_v60  ;;  %v5931_v0 = vld [vmem:[%s11709_s1 + $0x5b0] sm:$0xf]  ;;  %v7090_v63 = vld [vmem:[%s11709_s1 + $0x5b4] sm:$0xf0]  ;;  %v8723_v60 = vor.u32 %v7042_v49, %v5739_v20  ;;  %v8738_v49 = vor.u32 %v7074_v30, %v5867_v40  ;;  %1574 = vmatpush.bf16.msra.mxu3 %v8702_v54 }
  0x9a   :  { %12344 = vst [vmem:[#allocation134_spill] sm:$0xff] %v8684_v32  ;;  %v5731_v42 = vld [vmem:[%s11709_s1 + $0x420] sm:$0xf]  ;;  %v7040_v36 = vld [vmem:[%s11709_s1 + $0x424] sm:$0xf0] }
  0x9b   :  { %12345 = vst [vmem:[#allocation135_spill] sm:$0xff] %v8688_v22  ;;  %v5795_v11 = vld [vmem:[%s11709_s1 + $0x4a0] sm:$0xf]  ;;  %v7056_v24 = vld [vmem:[%s11709_s1 + $0x4a4] sm:$0xf0]  ;;  %v8750_v22 = vor.u32 %v7090_v63, %v5931_v0  ;;  %1536 = vmatpush.bf16.msra.mxu0 %v8723_v60  ;;  %v8765_v63 = vor.u32 %v7040_v36, %v5731_v42 }
  0x9c   :  { %12346 = vst [vmem:[#allocation136_spill] sm:$0xff] %v8690_v13  ;;  %v5859_v20 = vld [vmem:[%s11709_s1 + $0x520] sm:$0xf]  ;;  %v7072_v32 = vld [vmem:[%s11709_s1 + $0x524] sm:$0xf0]  ;;  %1549 = vmatpush.bf16.msra.mxu1 %v8736_v26  ;;  %1562 = vmatpush.bf16.msra.mxu2 %v8738_v49  ;;  %v8772_v53 = vor.u32 %v7056_v24, %v5795_v11 }
  0x9d   :  { %12347 = vst [vmem:[#allocation137_spill] sm:$0xff] %v8702_v54  ;;  %v5923_v4 = vld [vmem:[%s11709_s1 + $0x5a0] sm:$0xf]  ;;  %v7088_v59 = vld [vmem:[%s11709_s1 + $0x5a4] sm:$0xf0]  ;;  %v8774_v39 = vor.u32 %v7072_v32, %v5859_v20  ;;  %1575 = vmatpush.bf16.msra.mxu3 %v8750_v22 }
  0x9e   :  { %12348 = vst [vmem:[#allocation138_spill] sm:$0xff] %v8723_v60  ;;  %v1184_v1 = vld.sshfl [vmem:[#allocation1 + $0x30] sm:$0xff pattern:$0x73625140]  ;;  %v7038_v30 = vld [vmem:[%s11709_s1 + $0x414] sm:$0xf0] }
  0x9f   :  { %12349 = vst [vmem:[#allocation139_spill] sm:$0xff] %v8736_v26  ;;  %v5723_v40 = vld [vmem:[%s11709_s1 + $0x410] sm:$0xf]  ;;  %v1186_v54 = vld.sshfl [vmem:[#allocation1 + $0x38] sm:$0xff pattern:$0x73625140]  ;;  %v1194_v60 = vunpack.c.l.b16 %v1184_v1  ;;  %1537 = vmatpush.bf16.msra.mxu0 %v8765_v63 }
  0xa0   :  { %12350 = vst [vmem:[#allocation140_spill] sm:$0xff] %v8738_v49  ;;  %v5787_v13 = vld [vmem:[%s11709_s1 + $0x490] sm:$0xf]  ;;  %v1180_v0 = vld.sshfl [vmem:[#allocation1 + $0x20] sm:$0xff pattern:$0x73625140]  ;;  %v8786_v49 = vor.u32 %v7088_v59, %v5923_v4  ;;  %v1195_v32 = vunpack.c.l.b16 %v1186_v54  ;;  %v8798_v4 = vor.u32 %v7038_v30, %v5723_v40  ;;  %1550 = vmatpush.bf16.msra.mxu1 %v8772_v53  ;;  %1563 = vmatpush.bf16.msra.mxu2 %v8774_v39 }
  0xa1   :  { %12351 = vst [vmem:[#allocation141_spill] sm:$0xff] %v8750_v22  ;;  %v7054_v61 = vld [vmem:[%s11709_s1 + $0x494] sm:$0xf0]  ;;  %v1182_v31 = vld.sshfl [vmem:[#allocation1 + $0x28] sm:$0xff pattern:$0x73625140]  ;;  %v1192_v20 = vunpack.c.l.b16 %v1180_v0 }
  0xa2   :  { %12352 = vst [vmem:[#allocation142_spill] sm:$0xff] %v8765_v63  ;;  %v5851_v10 = vld [vmem:[%s11709_s1 + $0x510] sm:$0xf]  ;;  %v7070_v36 = vld [vmem:[%s11709_s1 + $0x514] sm:$0xf0]  ;;  %v1193_v22 = vunpack.c.l.b16 %v1182_v31  ;;  %v8800_v59 = vor.u32 %v7054_v61, %v5787_v13  ;;  %v1200_v63 = vrot.slane %v1194_v60, 7  ;;  %1576 = vmatpush.bf16.msra.mxu3 %v8786_v49 }
  0xa3   :  { %12353 = vst [vmem:[#allocation143_spill] sm:$0xff] %v8772_v53  ;;  %v5915_v42 = vld [vmem:[%s11709_s1 + $0x590] sm:$0xf]  ;;  %v7086_v24 = vld [vmem:[%s11709_s1 + $0x594] sm:$0xf0]  ;;  %v8813_v31 = vor.u32 %v7070_v36, %v5851_v10  ;;  %v1196_v53 = vrot.slane %v1192_v20, 7  ;;  %1538 = vmatpush.bf16.msra.mxu0 %v8798_v4 }
  0xa4   :  { %12354 = vst [vmem:[#allocation144_spill] sm:$0xff] %v8774_v39  ;;  %v1173_v11 = vld.sshfl [vmem:[#allocation1 + $0x10] sm:$0xff pattern:$0x73625140]  ;;  %v5715_v26 = vld [vmem:[%s11709_s1 + $0x400] sm:$0xf]  ;;  %v8815_v13 = vor.u32 %v7086_v24, %v5915_v42  ;;  %1551 = vmatpush.bf16.msra.mxu1 %v8800_v59 }
  0xa5   :  { %12355 = vst [vmem:[#allocation145_spill] sm:$0xff] %v8786_v49  ;;  %v7036_v2 = vld [vmem:[%s11709_s1 + $0x404] sm:$0xf0]  ;;  %v1175_v1 = vld.sshfl [vmem:[#allocation1 + $0x18] sm:$0xff pattern:$0x73625140]  ;;  %v1190_v30 = vunpack.c.l.b16 %v1173_v11  ;;  %1564 = vmatpush.bf16.msra.mxu2 %v8813_v31 }
  0xa6   :  { %v1169_v19 = vld.sshfl [vmem:[#allocation1] sm:$0xff pattern:$0x73625140]  ;;  %12356 = vst [vmem:[#allocation146_spill] sm:$0xff] %v8798_v4  ;;  %v7052_v0 = vld [vmem:[%s11709_s1 + $0x484] sm:$0xf0]  ;;  %v1191_v36 = vunpack.c.l.b16 %v1175_v1  ;;  %v8837_v15 = vor.u32 %v7036_v2, %v5715_v26  ;;  %1577 = vmatpush.bf16.msra.mxu3 %v8815_v13 }
  0xa7   :  { %12357 = vst [vmem:[#allocation147_spill] sm:$0xff] %v8800_v59  ;;  %v5779_v54 = vld [vmem:[%s11709_s1 + $0x480] sm:$0xf]  ;;  %v1171_v41 = vld.sshfl [vmem:[#allocation1 + $0x8] sm:$0xff pattern:$0x73625140]  ;;  %v1188_v24 = vunpack.c.l.b16 %v1169_v19  ;;  %v1201_v1 = vsel %vm192_vm0, %v1200_v63, %v1190_v30 }
  0xa8   :  { %v5843_v18 = vld [vmem:[%s11709_s1 + $0x500] sm:$0xf]  ;;  %12358 = vst [vmem:[#allocation148_spill] sm:$0xff] %v8813_v31  ;;  %v7068_v61 = vld [vmem:[%s11709_s1 + $0x504] sm:$0xf0]  ;;  %v1202_v42 = vrot.slane %v1195_v32, 7  ;;  %v1189_v11 = vunpack.c.l.b16 %v1171_v41  ;;  %v8850_v41 = vor.u32 %v7052_v0, %v5779_v54  ;;  %1539 = vmatpush.bf16.msra.mxu0 %v8837_v15 }
  0xa9   :  { %12359 = vst [vmem:[#allocation149_spill] sm:$0xff] %v8815_v13  ;;  %v5907_v40 = vld [vmem:[%s11709_s1 + $0x580] sm:$0xf]  ;;  %v7084_v39 = vld [vmem:[%s11709_s1 + $0x584] sm:$0xf0]  ;;  %v1198_v49 = vrot.slane %v1193_v22, 7  ;;  %v8852_v26 = vor.u32 %v7068_v61, %v5843_v18  ;;  %v1197_v18 = vsel %vm192_vm0, %v1196_v53, %v1188_v24 }
  0xaa   :  { %v7049_v10 = vld [vmem:[%s11709_s1 + $0x474] sm:$0xf]  ;;  %v5773_v37 = vld [vmem:[%s11709_s1 + $0x478] sm:$0xf0]  ;;  %12360 = vst [vmem:[#allocation150_spill] sm:$0xff] %v8837_v15  ;;  %v8862_v4 = vor.u32 %v7084_v39, %v5907_v40  ;;  %v1203_v54 = vsel %vm192_vm0, %v1202_v42, %v1191_v36  ;;  %v8885_v40 = vpack.c.b16 %v1201_v1, %v1201_v1  ;;  %1552 = vmatpush.bf16.msra.mxu1 %v8850_v41 }
  0xab   :  { %v7065_v60 = vld [vmem:[%s11709_s1 + $0x4f4] sm:$0xf]  ;;  %v5837_v32 = vld [vmem:[%s11709_s1 + $0x4f8] sm:$0xf0]  ;;  %12361 = vst [vmem:[#allocation151_spill] sm:$0xff] %v8850_v41  ;;  %v8864_v59 = vor.u32 %v7049_v10, %v5773_v37  ;;  %v1199_v39 = vsel %vm192_vm0, %v1198_v49, %v1189_v11  ;;  %1565 = vmatpush.bf16.msra.mxu2 %v8852_v26  ;;  %v8898_v49 = vpack.c.b16 %v1203_v54, %v1203_v54 }
  0xac   :  { %v7081_v19 = vld [vmem:[%s11709_s1 + $0x574] sm:$0xf]  ;;  %v5901_v20 = vld [vmem:[%s11709_s1 + $0x578] sm:$0xf0]  ;;  %12362 = vst [vmem:[#allocation152_spill] sm:$0xff] %v8852_v26  ;;  %v8868_v0 = vor.u32 %v7065_v60, %v5837_v32  ;;  %v8906_v60 = vpack.c.b16 %v1197_v18, %v1197_v18  ;;  %1578 = vmatpush.bf16.msra.mxu3 %v8862_v4  ;;  %v8912_v32 = vpack.c.b16 %v1199_v39, %v1199_v39 }
  0xad   :  { %v7097_v2 = vld [vmem:[%s11709_s1 + $0x5f4] sm:$0xf]  ;;  %v5965_v22 = vld [vmem:[%s11709_s1 + $0x5f8] sm:$0xf0]  ;;  %12363 = vst [vmem:[#allocation153_spill] sm:$0xff] %v8862_v4  ;;  %v8870_v61 = vor.u32 %v7081_v19, %v5901_v20  ;;  %1584 = vmatpush.bf16.msrb.mxu0 %v8864_v59 }
  0xae   :  { %12364 = vst [vmem:[#allocation154_spill] sm:$0xff] %v8864_v59  ;;  %v7047_v31 = vld [vmem:[%s11709_s1 + $0x464] sm:$0xf]  ;;  %v5765_v63 = vld [vmem:[%s11709_s1 + $0x468] sm:$0xf0]  ;;  %v8883_v53 = vor.u32 %v7097_v2, %v5965_v22  ;;  %1597 = vmatpush.bf16.msrb.mxu1 %v8868_v0  ;;  %1566 = vmatmul.bf16.vlgmr.msra.gmra.mxu2 %v8885_v40 }
  0xaf   :  { %12365 = vst [vmem:[#allocation155_spill] sm:$0xff] %v8868_v0  ;;  %v7063_v37 = vld [vmem:[%s11709_s1 + $0x4e4] sm:$0xf]  ;;  %v5829_v30 = vld [vmem:[%s11709_s1 + $0x4e8] sm:$0xf0]  ;;  %v8910_v11 = vor.u32 %v7047_v31, %v5765_v63  ;;  %1610 = vmatpush.bf16.msrb.mxu2 %v8870_v61  ;;  %1579 = vmatmul.bf16.vlgmr.msra.gmra.mxu3 %v8898_v49 }
  0xb0   :  { %12366 = vst [vmem:[#allocation156_spill] sm:$0xff] %v8870_v61  ;;  %v7079_v10 = vld [vmem:[%s11709_s1 + $0x564] sm:$0xf]  ;;  %v5893_v36 = vld [vmem:[%s11709_s1 + $0x568] sm:$0xf0]  ;;  %v8916_v19 = vor.u32 %v7063_v37, %v5829_v30  ;;  %1623 = vmatpush.bf16.msrb.mxu3 %v8883_v53  ;;  %1540 = vmatmul.bf16.vlgmr.msra.gmra.mxu0 %v8906_v60 }
  0xb1   :  { %12367 = vst [vmem:[#allocation157_spill] sm:$0xff] %v8883_v53  ;;  %v7095_v42 = vld [vmem:[%s11709_s1 + $0x5e4] sm:$0xf]  ;;  %v5957_v24 = vld [vmem:[%s11709_s1 + $0x5e8] sm:$0xf0]  ;;  %v8918_v20 = vor.u32 %v7079_v10, %v5893_v36  ;;  %1585 = vmatpush.bf16.msrb.mxu0 %v8910_v11  ;;  %1553 = vmatmul.bf16.vlgmr.msra.gmra.mxu1 %v8912_v32 }
  0xb2   :  { %12368 = vst [vmem:[#allocation158_spill] sm:$0xff] %v8910_v11  ;;  %v7045_v2 = vld [vmem:[%s11709_s1 + $0x454] sm:$0xf]  ;;  %v5757_v22 = vld [vmem:[%s11709_s1 + $0x458] sm:$0xf0]  ;;  %v8931_v1 = vor.u32 %v7095_v42, %v5957_v24  ;;  %1598 = vmatpush.bf16.msrb.mxu1 %v8916_v19 }
  0xb3   :  { %12369 = vst [vmem:[#allocation159_spill] sm:$0xff] %v8916_v19  ;;  %v7061_v31 = vld [vmem:[%s11709_s1 + $0x4d4] sm:$0xf]  ;;  %v5821_v54 = vld [vmem:[%s11709_s1 + $0x4d8] sm:$0xf0]  ;;  %v8952_v30 = vor.u32 %v7045_v2, %v5757_v22  ;;  %1611 = vmatpush.bf16.msrb.mxu2 %v8918_v20 }
  0xb4   :  { %12370 = vst [vmem:[#allocation160_spill] sm:$0xff] %v8918_v20  ;;  %v7077_v18 = vld [vmem:[%s11709_s1 + $0x554] sm:$0xf]  ;;  %v5885_v63 = vld [vmem:[%s11709_s1 + $0x558] sm:$0xf0]  ;;  %v8956_v10 = vor.u32 %v7061_v31, %v5821_v54  ;;  %1624 = vmatpush.bf16.msrb.mxu3 %v8931_v1 }
  0xb5   :  { %12371 = vst [vmem:[#allocation161_spill] sm:$0xff] %v8931_v1  ;;  %v7093_v37 = vld [vmem:[%s11709_s1 + $0x5d4] sm:$0xf]  ;;  %v5949_v39 = vld [vmem:[%s11709_s1 + $0x5d8] sm:$0xf0]  ;;  %v8958_v36 = vor.u32 %v7077_v18, %v5885_v63  ;;  %1586 = vmatpush.bf16.msrb.mxu0 %v8952_v30 }
  0xb6   :  { %12372 = vst [vmem:[#allocation162_spill] sm:$0xff] %v8952_v30  ;;  %v7043_v42 = vld [vmem:[%s11709_s1 + $0x444] sm:$0xf]  ;;  %v5749_v24 = vld [vmem:[%s11709_s1 + $0x448] sm:$0xf0]  ;;  %v8970_v22 = vor.u32 %v7093_v37, %v5949_v39  ;;  %1599 = vmatpush.bf16.msrb.mxu1 %v8956_v10 }
  0xb7   :  { %12373 = vst [vmem:[#allocation163_spill] sm:$0xff] %v8956_v10  ;;  %v7059_v2 = vld [vmem:[%s11709_s1 + $0x4c4] sm:$0xf]  ;;  %v5813_v31 = vld [vmem:[%s11709_s1 + $0x4c8] sm:$0xf0]  ;;  %v8988_v39 = vor.u32 %v7043_v42, %v5749_v24  ;;  %1612 = vmatpush.bf16.msrb.mxu2 %v8958_v36 }
  0xb8   :  { %12374 = vst [vmem:[#allocation164_spill] sm:$0xff] %v8958_v36  ;;  %v7075_v54 = vld [vmem:[%s11709_s1 + $0x544] sm:$0xf]  ;;  %v5877_v18 = vld [vmem:[%s11709_s1 + $0x548] sm:$0xf0]  ;;  %v8992_v1 = vor.u32 %v7059_v2, %v5813_v31  ;;  %1625 = vmatpush.bf16.msrb.mxu3 %v8970_v22 }
  0xb9   :  { %12375 = vst [vmem:[#allocation165_spill] sm:$0xff] %v8970_v22  ;;  %v7091_v63 = vld [vmem:[%s11709_s1 + $0x5c4] sm:$0xf]  ;;  %v5941_v37 = vld [vmem:[%s11709_s1 + $0x5c8] sm:$0xf0]  ;;  %v8994_v20 = vor.u32 %v7075_v54, %v5877_v18  ;;  %1587 = vmatpush.bf16.msrb.mxu0 %v8988_v39 }
  0xba   :  { %12376 = vst [vmem:[#allocation166_spill] sm:$0xff] %v8988_v39  ;;  %v7041_v19 = vld [vmem:[%s11709_s1 + $0x434] sm:$0xf]  ;;  %v5741_v11 = vld [vmem:[%s11709_s1 + $0x438] sm:$0xf0]  ;;  %v9006_v24 = vor.u32 %v7091_v63, %v5941_v37  ;;  %1600 = vmatpush.bf16.msrb.mxu1 %v8992_v1 }
  0xbb   :  { %12377 = vst [vmem:[#allocation167_spill] sm:$0xff] %v8992_v1  ;;  %v7057_v42 = vld [vmem:[%s11709_s1 + $0x4b4] sm:$0xf]  ;;  %v5805_v2 = vld [vmem:[%s11709_s1 + $0x4b8] sm:$0xf0]  ;;  %v9024_v37 = vor.u32 %v7041_v19, %v5741_v11  ;;  %1613 = vmatpush.bf16.msrb.mxu2 %v8994_v20 }
  0xbc   :  { %12378 = vst [vmem:[#allocation168_spill] sm:$0xff] %v8994_v20  ;;  %v7073_v31 = vld [vmem:[%s11709_s1 + $0x534] sm:$0xf]  ;;  %v5869_v54 = vld [vmem:[%s11709_s1 + $0x538] sm:$0xf0]  ;;  %v9028_v22 = vor.u32 %v7057_v42, %v5805_v2  ;;  %1626 = vmatpush.bf16.msrb.mxu3 %v9006_v24 }
  0xbd   :  { %12379 = vst [vmem:[#allocation169_spill] sm:$0xff] %v9006_v24  ;;  %v7089_v18 = vld [vmem:[%s11709_s1 + $0x5b4] sm:$0xf]  ;;  %v5933_v63 = vld [vmem:[%s11709_s1 + $0x5b8] sm:$0xf0]  ;;  %v9030_v36 = vor.u32 %v7073_v31, %v5869_v54  ;;  %1588 = vmatpush.bf16.msrb.mxu0 %v9024_v37 }
  0xbe   :  { %12380 = vst [vmem:[#allocation170_spill] sm:$0xff] %v9024_v37  ;;  %v7039_v10 = vld [vmem:[%s11709_s1 + $0x424] sm:$0xf]  ;;  %v5733_v30 = vld [vmem:[%s11709_s1 + $0x428] sm:$0xf0]  ;;  %v9042_v19 = vor.u32 %v7089_v18, %v5933_v63  ;;  %1601 = vmatpush.bf16.msrb.mxu1 %v9028_v22 }
  0xbf   :  { %12381 = vst [vmem:[#allocation171_spill] sm:$0xff] %v9028_v22  ;;  %v7055_v11 = vld [vmem:[%s11709_s1 + $0x4a4] sm:$0xf]  ;;  %v5797_v42 = vld [vmem:[%s11709_s1 + $0x4a8] sm:$0xf0]  ;;  %v9060_v63 = vor.u32 %v7039_v10, %v5733_v30  ;;  %1614 = vmatpush.bf16.msrb.mxu2 %v9030_v36 }
  0xc0   :  { %12382 = vst [vmem:[#allocation172_spill] sm:$0xff] %v9030_v36  ;;  %v7071_v2 = vld [vmem:[%s11709_s1 + $0x524] sm:$0xf]  ;;  %v5861_v31 = vld [vmem:[%s11709_s1 + $0x528] sm:$0xf0]  ;;  %v9072_v1 = vor.u32 %v7055_v11, %v5797_v42  ;;  %1627 = vmatpush.bf16.msrb.mxu3 %v9042_v19 }
  0xc1   :  { %12383 = vst [vmem:[#allocation173_spill] sm:$0xff] %v9042_v19  ;;  %v7087_v54 = vld [vmem:[%s11709_s1 + $0x5a4] sm:$0xf]  ;;  %v5925_v18 = vld [vmem:[%s11709_s1 + $0x5a8] sm:$0xf0]  ;;  %v9074_v39 = vor.u32 %v7071_v2, %v5861_v31  ;;  %1589 = vmatpush.bf16.msrb.mxu0 %v9060_v63 }
  0xc2   :  { %12384 = vst [vmem:[#allocation174_spill] sm:$0xff] %v9060_v63  ;;  %v7037_v24 = vld [vmem:[%s11709_s1 + $0x414] sm:$0xf]  ;;  %v9068_v20 = vld [vmem:[%s11710_s0 + $0x8] sm:$0x55]  ;;  %v9086_v22 = vor.u32 %v7087_v54, %v5925_v18  ;;  %1602 = vmatpush.bf16.msrb.mxu1 %v9072_v1 }
  0xc3   :  { %12385 = vst [vmem:[#allocation175_spill] sm:$0xff] %v9068_v20  ;;  %v5725_v30 = vld [vmem:[%s11709_s1 + $0x418] sm:$0xf0]  ;;  %v7053_v10 = vld [vmem:[%s11709_s1 + $0x494] sm:$0xf]  ;;  %1615 = vmatpush.bf16.msrb.mxu2 %v9074_v39 }
  0xc4   :  { %12386 = vst [vmem:[#allocation176_spill] sm:$0xff] %v9072_v1  ;;  %v5789_v37 = vld [vmem:[%s11709_s1 + $0x498] sm:$0xf0]  ;;  %v7069_v11 = vld [vmem:[%s11709_s1 + $0x514] sm:$0xf]  ;;  %v9107_v18 = vor.u32 %v7037_v24, %v5725_v30  ;;  %1628 = vmatpush.bf16.msrb.mxu3 %v9086_v22 }
  0xc5   :  { %12387 = vst [vmem:[#allocation177_spill] sm:$0xff] %v9074_v39  ;;  %v5853_v42 = vld [vmem:[%s11709_s1 + $0x518] sm:$0xf0]  ;;  %v7085_v2 = vld [vmem:[%s11709_s1 + $0x594] sm:$0xf]  ;;  %v9118_v53 = vor.u32 %v7053_v10, %v5789_v37 }
  0xc6   :  { %12388 = vst [vmem:[#allocation178_spill] sm:$0xff] %v9086_v22  ;;  %v5917_v31 = vld [vmem:[%s11709_s1 + $0x598] sm:$0xf0]  ;;  %v9103_v54 = vld [vmem:[%s11710_s0 + $0x20] sm:$0x55]  ;;  %v9120_v61 = vor.u32 %v7069_v11, %v5853_v42  ;;  %1590 = vmatpush.bf16.msrb.mxu0 %v9107_v18 }
  0xc7   :  { %12389 = vst [vmem:[#allocation179_spill] sm:$0xff] %v9103_v54  ;;  %v7035_v19 = vld [vmem:[%s11709_s1 + $0x404] sm:$0xf]  ;;  %v5717_v36 = vld [vmem:[%s11709_s1 + $0x408] sm:$0xf0]  ;;  %v9132_v1 = vor.u32 %v7085_v2, %v5917_v31  ;;  %1603 = vmatpush.bf16.msrb.mxu1 %v9118_v53 }
  0xc8   :  { %1706 = vst [vmem:[#allocation1] ss:$4 sm:$0xff] %v9068_v20  ;;  %v7051_v24 = vld [vmem:[%s11709_s1 + $0x484] sm:$0xf]  ;;  %v5781_v30 = vld [vmem:[%s11709_s1 + $0x488] sm:$0xf0]  ;;  %v9153_v22 = vor.u32 %v7035_v19, %v5717_v36  ;;  %1616 = vmatpush.bf16.msrb.mxu2 %v9120_v61 }
  0xc9   :  { %12390 = vst [vmem:[#allocation180_spill] sm:$0xff] %v9107_v18  ;;  %v7067_v63 = vld [vmem:[%s11709_s1 + $0x504] sm:$0xf]  ;;  %v5845_v37 = vld [vmem:[%s11709_s1 + $0x508] sm:$0xf0]  ;;  %v9166_v4 = vor.u32 %v7051_v24, %v5781_v30  ;;  %1629 = vmatpush.bf16.msrb.mxu3 %v9132_v1 }
  0xca   :  { %1717 = vst [vmem:[#allocation1 + $0x20] ss:$4 sm:$0xff] %v9103_v54  ;;  %v7083_v10 = vld [vmem:[%s11709_s1 + $0x584] sm:$0xf]  ;;  %v5909_v11 = vld [vmem:[%s11709_s1 + $0x588] sm:$0xf0]  ;;  %v9168_v36 = vor.u32 %v7067_v63, %v5845_v37  ;;  %1591 = vmatpush.bf16.msrb.mxu0 %v9153_v22 }
  0xcb   :  { %12391 = vst [vmem:[#allocation181_spill] sm:$0xff] %v9118_v53  ;;  %v6093_v42 = vld [vmem:[%s11709_s1 + $0x670] sm:$0xf]  ;;  %v7114_v2 = vld [vmem:[%s11709_s1 + $0x674] sm:$0xf0]  ;;  %v9177_v26 = vor.u32 %v7083_v10, %v5909_v11  ;;  %v537_v10 = vpop.f32.mrf.mxu0  ;;  %1604 = vmatpush.bf16.msrb.mxu1 %v9166_v4 }
  0xcc   :  { %12392 = vst [vmem:[#allocation182_spill] sm:$0xff] %v9120_v61  ;;  %v6157_v31 = vld [vmem:[%s11709_s1 + $0x6f0] sm:$0xf]  ;;  %v7130_v39 = vld [vmem:[%s11709_s1 + $0x6f4] sm:$0xf0]  ;;  %v9179_v41 = vor.u32 %v7114_v2, %v6093_v42  ;;  %v550_v42 = vpop.f32.mrf.mxu1  ;;  %1617 = vmatpush.bf16.msrb.mxu2 %v9168_v36 }
  0xcd   :  { %12393 = vst [vmem:[#allocation183_spill] sm:$0xff] %v9132_v1  ;;  %v6221_v0 = vld [vmem:[%s11709_s1 + $0x770] sm:$0xf]  ;;  %v7146_v59 = vld [vmem:[%s11709_s1 + $0x774] sm:$0xf0]  ;;  %v9181_v53 = vor.u32 %v7130_v39, %v6157_v31  ;;  %v551_v31 = vadd.f32 %v550_v42, %v537_v10  ;;  %1630 = vmatpush.bf16.msrb.mxu3 %v9177_v26  ;;  %1592 = vmatmul.bf16.vlgmr.msrb.gmra.mxu0 %v8906_v60 }
  0xce   :  { %12394 = vst [vmem:[#allocation184_spill] sm:$0xff] %v9153_v22  ;;  %v6285_v19 = vld [vmem:[%s11709_s1 + $0x7f0] sm:$0xf]  ;;  %v7162_v18 = vld [vmem:[%s11709_s1 + $0x7f4] sm:$0xf0]  ;;  %v9183_v24 = vor.u32 %v7146_v59, %v6221_v0  ;;  %2070 = vmatpush.bf16.msra.mxu0 %v9179_v41  ;;  %v563_v22 = vpop.f32.mrf.mxu2  ;;  %1605 = vmatmul.bf16.vlgmr.msrb.gmra.mxu1 %v8912_v32 }
  0xcf   :  { %12395 = vst [vmem:[#allocation185_spill] sm:$0xff] %v9166_v4  ;;  %v6085_v63 = vld [vmem:[%s11709_s1 + $0x660] sm:$0xf]  ;;  %v7112_v30 = vld [vmem:[%s11709_s1 + $0x664] sm:$0xf0]  ;;  %v9195_v11 = vor.u32 %v7162_v18, %v6285_v19  ;;  %2083 = vmatpush.bf16.msra.mxu1 %v9181_v53  ;;  %1618 = vmatmul.bf16.vlgmr.msrb.gmra.mxu2 %v8885_v40 }
  0xd0   :  { %12396 = vst [vmem:[#allocation186_spill] sm:$0xff] %v9168_v36  ;;  %v6149_v37 = vld [vmem:[%s11709_s1 + $0x6e0] sm:$0xf]  ;;  %v7128_v59 = vld [vmem:[%s11709_s1 + $0x6e4] sm:$0xf0]  ;;  %v9216_v19 = vor.u32 %v7112_v30, %v6085_v63  ;;  %2096 = vmatpush.bf16.msra.mxu2 %v9183_v24  ;;  %1631 = vmatmul.bf16.vlgmr.msrb.gmra.mxu3 %v8898_v49 }
  0xd1   :  { %12397 = vst [vmem:[#allocation187_spill] sm:$0xff] %v9177_v26  ;;  %v6213_v0 = vld [vmem:[%s11709_s1 + $0x760] sm:$0xf]  ;;  %v7144_v39 = vld [vmem:[%s11709_s1 + $0x764] sm:$0xf0]  ;;  %v9220_v36 = vor.u32 %v7128_v59, %v6149_v37  ;;  %2109 = vmatpush.bf16.msra.mxu3 %v9195_v11  ;;  %v564_v37 = vadd.f32 %v563_v22, %v551_v31 }
  0xd2   :  { %12398 = vst [vmem:[#allocation188_spill] sm:$0xff] %v9179_v41  ;;  %v6277_v18 = vld [vmem:[%s11709_s1 + $0x7e0] sm:$0xf]  ;;  %v7160_v2 = vld [vmem:[%s11709_s1 + $0x7e4] sm:$0xf0]  ;;  %v9222_v4 = vor.u32 %v7144_v39, %v6213_v0  ;;  %2071 = vmatpush.bf16.msra.mxu0 %v9216_v19 }
  0xd3   :  { %12399 = vst [vmem:[#allocation189_spill] sm:$0xff] %v9181_v53  ;;  %v6077_v1 = vld [vmem:[%s11709_s1 + $0x650] sm:$0xf]  ;;  %v7110_v10 = vld [vmem:[%s11709_s1 + $0x654] sm:$0xf0]  ;;  %v9235_v30 = vor.u32 %v7160_v2, %v6277_v18  ;;  %v576_v18 = vpop.f32.mrf.mxu3  ;;  %2084 = vmatpush.bf16.msra.mxu1 %v9220_v36 }
  0xd4   :  { %12400 = vst [vmem:[#allocation190_spill] sm:$0xff] %v9183_v24  ;;  %v6141_v63 = vld [vmem:[%s11709_s1 + $0x6d0] sm:$0xf]  ;;  %v7126_v59 = vld [vmem:[%s11709_s1 + $0x6d4] sm:$0xf0]  ;;  %v9256_v42 = vor.u32 %v7110_v10, %v6077_v1  ;;  %2097 = vmatpush.bf16.msra.mxu2 %v9222_v4  ;;  %v9264_v2 = vadd.f32 %v576_v18, %v564_v37  ;;  %v539_v10 = vpop.f32.mrf.mxu0 }
  0xd5   :  { %12401 = vst [vmem:[#allocation191_spill] sm:$0xff] %v9195_v11  ;;  %v6205_v0 = vld [vmem:[%s11709_s1 + $0x750] sm:$0xf]  ;;  %v7142_v39 = vld [vmem:[%s11709_s1 + $0x754] sm:$0xf0]  ;;  %v9260_v49 = vor.u32 %v7126_v59, %v6141_v63  ;;  %2110 = vmatpush.bf16.msra.mxu3 %v9235_v30 }
  0xd6   :  { %12402 = vst [vmem:[#allocation192_spill] sm:$0xff] %v9216_v19  ;;  %v6269_v40 = vld [vmem:[%s11709_s1 + $0x7d0] sm:$0xf]  ;;  %v7158_v22 = vld [vmem:[%s11709_s1 + $0x7d4] sm:$0xf0]  ;;  %v9262_v60 = vor.u32 %v7142_v39, %v6205_v0  ;;  %v552_v39 = vpop.f32.mrf.mxu1  ;;  %2072 = vmatpush.bf16.msra.mxu0 %v9256_v42 }
  0xd7   :  { %12403 = vst [vmem:[#allocation193_spill] sm:$0xff] %v9220_v36  ;;  %v6069_v31 = vld [vmem:[%s11709_s1 + $0x640] sm:$0xf]  ;;  %v7108_v32 = vld [vmem:[%s11709_s1 + $0x644] sm:$0xf0]  ;;  %v9276_v63 = vor.u32 %v7158_v22, %v6269_v40  ;;  %2085 = vmatpush.bf16.msra.mxu1 %v9260_v49  ;;  %v565_v39 = vpop.f32.mrf.mxu2 }
  0xd8   :  { %12404 = vst [vmem:[#allocation194_spill] sm:$0xff] %v9222_v4  ;;  %v6133_v1 = vld [vmem:[%s11709_s1 + $0x6c0] sm:$0xf]  ;;  %v7124_v37 = vld [vmem:[%s11709_s1 + $0x6c4] sm:$0xf0]  ;;  %v9294_v22 = vor.u32 %v7108_v32, %v6069_v31  ;;  %2098 = vmatpush.bf16.msra.mxu2 %v9262_v60 }
  0xd9   :  { %12405 = vst [vmem:[#allocation195_spill] sm:$0xff] %v9235_v30  ;;  %v6197_v59 = vld [vmem:[%s11709_s1 + $0x740] sm:$0xf]  ;;  %v7140_v0 = vld [vmem:[%s11709_s1 + $0x744] sm:$0xf0]  ;;  %v9298_v10 = vor.u32 %v7124_v37, %v6133_v1  ;;  %2111 = vmatpush.bf16.msra.mxu3 %v9276_v63 }
  0xda   :  { %12406 = vst [vmem:[#allocation196_spill] sm:$0xff] %v9256_v42  ;;  %v6261_v18 = vld [vmem:[%s11709_s1 + $0x7c0] sm:$0xf]  ;;  %v7156_v40 = vld [vmem:[%s11709_s1 + $0x7c4] sm:$0xf0]  ;;  %v9300_v30 = vor.u32 %v7140_v0, %v6197_v59  ;;  %2073 = vmatpush.bf16.msra.mxu0 %v9294_v22 }
  0xdb   :  { %12407 = vst [vmem:[#allocation197_spill] sm:$0xff] %v9260_v49  ;;  %v6061_v4 = vld [vmem:[%s11709_s1 + $0x630] sm:$0xf]  ;;  %v7106_v36 = vld [vmem:[%s11709_s1 + $0x634] sm:$0xf0]  ;;  %v9312_v32 = vor.u32 %v7156_v40, %v6261_v18  ;;  %2086 = vmatpush.bf16.msra.mxu1 %v9298_v10 }
  0xdc   :  { %12408 = vst [vmem:[#allocation198_spill] sm:$0xff] %v9262_v60  ;;  %v6125_v31 = vld [vmem:[%s11709_s1 + $0x6b0] sm:$0xf]  ;;  %v7122_v1 = vld [vmem:[%s11709_s1 + $0x6b4] sm:$0xf0]  ;;  %v9333_v39 = vor.u32 %v7106_v36, %v6061_v4  ;;  %2099 = vmatpush.bf16.msra.mxu2 %v9300_v30 }
  0xdd   :  { %12409 = vst [vmem:[#allocation199_spill] sm:$0xff] %v9276_v63  ;;  %v6189_v37 = vld [vmem:[%s11709_s1 + $0x730] sm:$0xf]  ;;  %v7138_v59 = vld [vmem:[%s11709_s1 + $0x734] sm:$0xf0]  ;;  %v578_v63 = vpop.f32.mrf.mxu3  ;;  %2112 = vmatpush.bf16.msra.mxu3 %v9312_v32 }
  0xde   :  { %12410 = vst [vmem:[#allocation200_spill] sm:$0xff] %v9294_v22  ;;  %v6253_v0 = vld [vmem:[%s11709_s1 + $0x7b0] sm:$0xf]  ;;  %v7154_v18 = vld [vmem:[%s11709_s1 + $0x7b4] sm:$0xf0]  ;;  %v9346_v22 = vor.u32 %v7122_v1, %v6125_v31  ;;  %v9348_v4 = vor.u32 %v7138_v59, %v6189_v37  ;;  %v589_v37 = vpop.f32.mrf.mxu0  ;;  %2074 = vmatpush.bf16.msra.mxu0 %v9333_v39  ;;  %v602_v53 = vpop.f32.mrf.mxu1 }
  0xdf   :  { %12411 = vst [vmem:[#allocation201_spill] sm:$0xff] %v9298_v10  ;;  %v6053_v40 = vld [vmem:[%s11709_s1 + $0x620] sm:$0xf]  ;;  %v7104_v60 = vld [vmem:[%s11709_s1 + $0x624] sm:$0xf0]  ;;  %v9360_v10 = vor.u32 %v7154_v18, %v6253_v0  ;;  %v603_v15 = vadd.f32 %v602_v53, %v589_v37 }
  0xe0   :  { %12412 = vst [vmem:[#allocation202_spill] sm:$0xff] %v9300_v30  ;;  %v6117_v49 = vld [vmem:[%s11709_s1 + $0x6a0] sm:$0xf]  ;;  %v7120_v42 = vld [vmem:[%s11709_s1 + $0x6a4] sm:$0xf0]  ;;  %v9375_v11 = vor.u32 %v7104_v60, %v6053_v40  ;;  %2087 = vmatpush.bf16.msra.mxu1 %v9346_v22  ;;  %2100 = vmatpush.bf16.msra.mxu2 %v9348_v4 }
  0xe1   :  { %12413 = vst [vmem:[#allocation203_spill] sm:$0xff] %v9312_v32  ;;  %v6181_v36 = vld [vmem:[%s11709_s1 + $0x720] sm:$0xf]  ;;  %v7136_v63 = vld [vmem:[%s11709_s1 + $0x724] sm:$0xf0]  ;;  %v9382_v26 = vor.u32 %v7120_v42, %v6117_v49  ;;  %2113 = vmatpush.bf16.msra.mxu3 %v9360_v10 }
  0xe2   :  { %12414 = vst [vmem:[#allocation204_spill] sm:$0xff] %v9333_v39  ;;  %v6245_v19 = vld [vmem:[%s11709_s1 + $0x7a0] sm:$0xf]  ;;  %v7152_v31 = vld [vmem:[%s11709_s1 + $0x7a4] sm:$0xf0]  ;;  %v9384_v61 = vor.u32 %v7136_v63, %v6181_v36  ;;  %2075 = vmatpush.bf16.msra.mxu0 %v9375_v11 }
  0xe3   :  { %12415 = vst [vmem:[#allocation205_spill] sm:$0xff] %v9346_v22  ;;  %v1711_v1 = vld.sshfl [vmem:[#allocation1 + $0x10] sm:$0xff pattern:$0x73625140]  ;;  %v7102_v30 = vld [vmem:[%s11709_s1 + $0x614] sm:$0xf0]  ;;  %v615_v22 = vpop.f32.mrf.mxu2  ;;  %v9396_v42 = vor.u32 %v7152_v31, %v6245_v19 }
  0xe4   :  { %12416 = vst [vmem:[#allocation206_spill] sm:$0xff] %v9348_v4  ;;  %v6045_v59 = vld [vmem:[%s11709_s1 + $0x610] sm:$0xf]  ;;  %v1713_v0 = vld.sshfl [vmem:[#allocation1 + $0x18] sm:$0xff pattern:$0x73625140]  ;;  %v1728_v13 = vunpack.c.l.b16 %v1711_v1  ;;  %v616_v1 = vadd.f32 %v615_v22, %v603_v15  ;;  %2088 = vmatpush.bf16.msra.mxu1 %v9382_v26  ;;  %2101 = vmatpush.bf16.msra.mxu2 %v9384_v61 }
  0xe5   :  { %12417 = vst [vmem:[#allocation207_spill] sm:$0xff] %v9360_v10  ;;  %v6109_v32 = vld [vmem:[%s11709_s1 + $0x690] sm:$0xf]  ;;  %v1707_v18 = vld.sshfl [vmem:[#allocation1] sm:$0xff pattern:$0x73625140]  ;;  %v1729_v63 = vunpack.c.l.b16 %v1713_v0  ;;  %v9408_v31 = vor.u32 %v7102_v30, %v6045_v59  ;;  %2114 = vmatpush.bf16.msra.mxu3 %v9396_v42 }
  0xe6   :  { %12418 = vst [vmem:[#allocation208_spill] sm:$0xff] %v9375_v11  ;;  %v7118_v24 = vld [vmem:[%s11709_s1 + $0x694] sm:$0xf0]  ;;  %v1709_v41 = vld.sshfl [vmem:[#allocation1 + $0x8] sm:$0xff pattern:$0x73625140]  ;;  %v1726_v4 = vunpack.c.l.b16 %v1707_v18 }
  0xe7   :  { %12419 = vst [vmem:[#allocation209_spill] sm:$0xff] %v9382_v26  ;;  %v6173_v39 = vld [vmem:[%s11709_s1 + $0x710] sm:$0xf]  ;;  %v7134_v60 = vld [vmem:[%s11709_s1 + $0x714] sm:$0xf0]  ;;  %v1727_v19 = vunpack.c.l.b16 %v1709_v41  ;;  %v9410_v20 = vor.u32 %v7118_v24, %v6109_v32  ;;  %v1738_v11 = vrot.slane %v1728_v13, 1  ;;  %2076 = vmatpush.bf16.msra.mxu0 %v9408_v31 }
  0xe8   :  { %12420 = vst [vmem:[#allocation210_spill] sm:$0xff] %v9384_v61  ;;  %v6237_v40 = vld [vmem:[%s11709_s1 + $0x790] sm:$0xf]  ;;  %v7150_v49 = vld [vmem:[%s11709_s1 + $0x794] sm:$0xf0]  ;;  %v9423_v41 = vor.u32 %v7134_v60, %v6173_v39  ;;  %v628_v60 = vpop.f32.mrf.mxu3  ;;  %v1734_v55 = vrot.slane %v1726_v4, 1 }
  0xe9   :  { %12421 = vst [vmem:[#allocation211_spill] sm:$0xff] %v9396_v42  ;;  %v1722_v36 = vld.sshfl [vmem:[#allocation1 + $0x30] sm:$0xff pattern:$0x73625140]  ;;  %v6037_v54 = vld [vmem:[%s11709_s1 + $0x600] sm:$0xf]  ;;  %v9425_v24 = vor.u32 %v7150_v49, %v6237_v40  ;;  %v591_v42 = vpop.f32.mrf.mxu0  ;;  %v9446_v52 = vadd.f32 %v628_v60, %v616_v1  ;;  %2089 = vmatpush.bf16.msra.mxu1 %v9410_v20 }
  0xea   :  { %v7100_v53 = vld [vmem:[%s11709_s1 + $0x604] sm:$0xf0]  ;;  %v1724_v37 = vld.sshfl [vmem:[#allocation1 + $0x38] sm:$0xff pattern:$0x73625140]  ;;  %12422 = vst [vmem:[#allocation212_spill] sm:$0xff] %v9410_v20  ;;  %v1732_v59 = vunpack.c.l.b16 %v1722_v36  ;;  %2102 = vmatpush.bf16.msra.mxu2 %v9423_v41 }
  0xeb   :  { %v1718_v10 = vld.sshfl [vmem:[#allocation1 + $0x20] sm:$0xff pattern:$0x73625140]  ;;  %v7116_v18 = vld [vmem:[%s11709_s1 + $0x684] sm:$0xf0]  ;;  %12423 = vst [vmem:[#allocation213_spill] sm:$0xff] %v9423_v41  ;;  %v1733_v40 = vunpack.c.l.b16 %v1724_v37  ;;  %v9449_v35 = vor.u32 %v7100_v53, %v6037_v54  ;;  %2115 = vmatpush.bf16.msra.mxu3 %v9425_v24 }
  0xec   :  { %v6101_v0 = vld [vmem:[%s11709_s1 + $0x680] sm:$0xf]  ;;  %v1720_v22 = vld.sshfl [vmem:[#allocation1 + $0x28] sm:$0xff pattern:$0x73625140]  ;;  %v1740_v49 = vrot.slane %v1729_v63, 1  ;;  %v1730_v26 = vunpack.c.l.b16 %v1718_v10  ;;  %v604_v63 = vpop.f32.mrf.mxu1 }
  0xed   :  { %v6165_v15 = vld [vmem:[%s11709_s1 + $0x700] sm:$0xf]  ;;  %v7132_v30 = vld [vmem:[%s11709_s1 + $0x704] sm:$0xf0]  ;;  %v7113_v39 = vld [vmem:[%s11709_s1 + $0x674] sm:$0xf]  ;;  %v1731_v51 = vunpack.c.l.b16 %v1720_v22  ;;  %v9462_v1 = vor.u32 %v7116_v18, %v6101_v0  ;;  %v617_v22 = vpop.f32.mrf.mxu2  ;;  %2077 = vmatpush.bf16.msra.mxu0 %v9449_v35 }
  0xee   :  { %v6229_v32 = vld [vmem:[%s11709_s1 + $0x780] sm:$0xf]  ;;  %v7148_v61 = vld [vmem:[%s11709_s1 + $0x784] sm:$0xf0]  ;;  %v6095_v36 = vld [vmem:[%s11709_s1 + $0x678] sm:$0xf0]  ;;  %v9464_v54 = vor.u32 %v7132_v30, %v6165_v15  ;;  %v1741_v0 = vsel %vm192_vm0, %v1733_v40, %v1740_v49  ;;  %v1735_v18 = vsel %vm192_vm0, %v1730_v26, %v1734_v55 }
  0xef   :  { %v7129_v13 = vld [vmem:[%s11709_s1 + $0x6f4] sm:$0xf]  ;;  %v1736_v43 = vrot.slane %v1727_v19, 1  ;;  %v6159_v10 = vld [vmem:[%s11709_s1 + $0x6f8] sm:$0xf0]  ;;  %12424 = vst [vmem:[#allocation214_spill] sm:$0xff] %v9462_v1  ;;  %v1739_v19 = vsel %vm192_vm0, %v1732_v59, %v1738_v11  ;;  %v9474_v60 = vor.u32 %v7148_v61, %v6229_v32  ;;  %v9476_v63 = vor.u32 %v7113_v39, %v6095_v36  ;;  %2090 = vmatpush.bf16.msra.mxu1 %v9462_v1 }
  0xf0   :  { %v7145_v4 = vld [vmem:[%s11709_s1 + $0x774] sm:$0xf]  ;;  %v6223_v42 = vld [vmem:[%s11709_s1 + $0x778] sm:$0xf0]  ;;  %v9480_v15 = vor.u32 %v7129_v13, %v6159_v10  ;;  %v7111_v41 = vld [vmem:[%s11709_s1 + $0x664] sm:$0xf]  ;;  %v9497_v26 = vpack.c.b16 %v1739_v19, %v1739_v19  ;;  %2103 = vmatpush.bf16.msra.mxu2 %v9464_v54  ;;  %v9518_v36 = vpack.c.b16 %v1735_v18, %v1735_v18 }
  0xf1   :  { %v7161_v53 = vld [vmem:[%s11709_s1 + $0x7f4] sm:$0xf]  ;;  %v6287_v37 = vld [vmem:[%s11709_s1 + $0x7f8] sm:$0xf0]  ;;  %12425 = vst [vmem:[#allocation215_spill] sm:$0xff] %v9474_v60  ;;  %v9482_v30 = vor.u32 %v7145_v4, %v6223_v42  ;;  %v1737_v32 = vsel %vm192_vm0, %v1731_v51, %v1736_v43  ;;  %v9510_v43 = vpack.c.b16 %v1741_v0, %v1741_v0  ;;  %2116 = vmatpush.bf16.msra.mxu3 %v9474_v60  ;;  %v630_v4 = vpop.f32.mrf.mxu3 }
  0xf2   :  { %12426 = vst [vmem:[#allocation216_spill] sm:$0xff] %v9476_v63  ;;  %v6087_v11 = vld [vmem:[%s11709_s1 + $0x668] sm:$0xf0]  ;;  %v7127_v61 = vld [vmem:[%s11709_s1 + $0x6e4] sm:$0xf]  ;;  %v9495_v55 = vor.u32 %v7161_v53, %v6287_v37  ;;  %2122 = vmatpush.bf16.msrb.mxu0 %v9476_v63  ;;  %v9524_v10 = vpack.c.b16 %v1737_v32, %v1737_v32 }
  0xf3   :  { %12427 = vst [vmem:[#allocation217_spill] sm:$0xff] %v9480_v15  ;;  %v6151_v59 = vld [vmem:[%s11709_s1 + $0x6e8] sm:$0xf0]  ;;  %v7143_v39 = vld [vmem:[%s11709_s1 + $0x764] sm:$0xf]  ;;  %v9522_v13 = vor.u32 %v7111_v41, %v6087_v11  ;;  %2135 = vmatpush.bf16.msrb.mxu1 %v9480_v15  ;;  %2104 = vmatmul.bf16.vlgmr.msra.gmra.mxu2 %v9497_v26 }
  0xf4   :  { %12428 = vst [vmem:[#allocation218_spill] sm:$0xff] %v9482_v30  ;;  %v6215_v40 = vld [vmem:[%s11709_s1 + $0x768] sm:$0xf0]  ;;  %v7159_v51 = vld [vmem:[%s11709_s1 + $0x7e4] sm:$0xf]  ;;  %2148 = vmatpush.bf16.msrb.mxu2 %v9482_v30  ;;  %v9528_v42 = vor.u32 %v7127_v61, %v6151_v59  ;;  %2117 = vmatmul.bf16.vlgmr.msra.gmra.mxu3 %v9510_v43 }
  0xf5   :  { %12429 = vst [vmem:[#allocation219_spill] sm:$0xff] %v9495_v55  ;;  %v6279_v49 = vld [vmem:[%s11709_s1 + $0x7e8] sm:$0xf0]  ;;  %v9530_v53 = vor.u32 %v7143_v39, %v6215_v40  ;;  %v7109_v37 = vld [vmem:[%s11709_s1 + $0x654] sm:$0xf]  ;;  %2161 = vmatpush.bf16.msrb.mxu3 %v9495_v55  ;;  %2078 = vmatmul.bf16.vlgmr.msra.gmra.mxu0 %v9518_v36 }
  0xf6   :  { %12430 = vst [vmem:[#allocation220_spill] sm:$0xff] %v9522_v13  ;;  %v6079_v41 = vld [vmem:[%s11709_s1 + $0x658] sm:$0xf0]  ;;  %v7125_v19 = vld [vmem:[%s11709_s1 + $0x6d4] sm:$0xf]  ;;  %v9543_v22 = vor.u32 %v7159_v51, %v6279_v49  ;;  %2123 = vmatpush.bf16.msrb.mxu0 %v9522_v13  ;;  %2091 = vmatmul.bf16.vlgmr.msra.gmra.mxu1 %v9524_v10 }
  0xf7   :  { %12431 = vst [vmem:[#allocation221_spill] sm:$0xff] %v9528_v42  ;;  %v6143_v0 = vld [vmem:[%s11709_s1 + $0x6d8] sm:$0xf0]  ;;  %v7141_v18 = vld [vmem:[%s11709_s1 + $0x754] sm:$0xf]  ;;  %v9564_v59 = vor.u32 %v7109_v37, %v6079_v41  ;;  %2136 = vmatpush.bf16.msrb.mxu1 %v9528_v42 }
  0xf8   :  { %12432 = vst [vmem:[#allocation222_spill] sm:$0xff] %v9530_v53  ;;  %v6207_v11 = vld [vmem:[%s11709_s1 + $0x758] sm:$0xf0]  ;;  %v7157_v61 = vld [vmem:[%s11709_s1 + $0x7d4] sm:$0xf]  ;;  %2149 = vmatpush.bf16.msrb.mxu2 %v9530_v53  ;;  %v9568_v39 = vor.u32 %v7125_v19, %v6143_v0  ;;  %v1017_v53 = vpop.f32.mrf.mxu1 }
  0xf9   :  { %12433 = vst [vmem:[#allocation223_spill] sm:$0xff] %v9543_v22  ;;  %v6271_v32 = vld [vmem:[%s11709_s1 + $0x7d8] sm:$0xf0]  ;;  %v9570_v40 = vor.u32 %v7141_v18, %v6207_v11  ;;  %v7107_v51 = vld [vmem:[%s11709_s1 + $0x644] sm:$0xf]  ;;  %2162 = vmatpush.bf16.msrb.mxu3 %v9543_v22  ;;  %v1004_v18 = vpop.f32.mrf.mxu0 }
  0xfa   :  { %12434 = vst [vmem:[#allocation224_spill] sm:$0xff] %v9564_v59  ;;  %v6071_v49 = vld [vmem:[%s11709_s1 + $0x648] sm:$0xf0]  ;;  %v7123_v4 = vld [vmem:[%s11709_s1 + $0x6c4] sm:$0xf]  ;;  %v9582_v37 = vor.u32 %v7157_v61, %v6271_v32  ;;  %2124 = vmatpush.bf16.msrb.mxu0 %v9564_v59  ;;  %v1005_v32 = vadd.f32 %v1004_v18, %v9264_v2 }
  0xfb   :  { %12435 = vst [vmem:[#allocation225_spill] sm:$0xff] %v9568_v39  ;;  %v6135_v41 = vld [vmem:[%s11709_s1 + $0x6c8] sm:$0xf0]  ;;  %v7139_v19 = vld [vmem:[%s11709_s1 + $0x744] sm:$0xf]  ;;  %v9601_v22 = vor.u32 %v7107_v51, %v6071_v49  ;;  %2137 = vmatpush.bf16.msrb.mxu1 %v9568_v39 }
  0xfc   :  { %12436 = vst [vmem:[#allocation226_spill] sm:$0xff] %v9570_v40  ;;  %v6199_v0 = vld [vmem:[%s11709_s1 + $0x748] sm:$0xf0]  ;;  %v7155_v11 = vld [vmem:[%s11709_s1 + $0x7c4] sm:$0xf]  ;;  %2150 = vmatpush.bf16.msrb.mxu2 %v9570_v40  ;;  %v9605_v42 = vor.u32 %v7123_v4, %v6135_v41  ;;  %v1018_v49 = vadd.f32 %v1017_v53, %v1005_v32 }
  0xfd   :  { %12437 = vst [vmem:[#allocation227_spill] sm:$0xff] %v9582_v37  ;;  %v6263_v61 = vld [vmem:[%s11709_s1 + $0x7c8] sm:$0xf0]  ;;  %v9607_v13 = vor.u32 %v7139_v19, %v6199_v0  ;;  %v7105_v55 = vld [vmem:[%s11709_s1 + $0x634] sm:$0xf]  ;;  %2163 = vmatpush.bf16.msrb.mxu3 %v9582_v37 }
  0xfe   :  { %12438 = vst [vmem:[#allocation228_spill] sm:$0xff] %v9601_v22  ;;  %v6063_v59 = vld [vmem:[%s11709_s1 + $0x638] sm:$0xf0]  ;;  %v7121_v2 = vld [vmem:[%s11709_s1 + $0x6b4] sm:$0xf]  ;;  %v9619_v51 = vor.u32 %v7155_v11, %v6263_v61  ;;  %2125 = vmatpush.bf16.msrb.mxu0 %v9601_v22 }
  0xff   :  { %12439 = vst [vmem:[#allocation229_spill] sm:$0xff] %v9605_v42  ;;  %v6127_v4 = vld [vmem:[%s11709_s1 + $0x6b8] sm:$0xf0]  ;;  %v7137_v41 = vld [vmem:[%s11709_s1 + $0x734] sm:$0xf]  ;;  %v9637_v18 = vor.u32 %v7105_v55, %v6063_v59  ;;  %2138 = vmatpush.bf16.msrb.mxu1 %v9605_v42  ;;  %v1043_v42 = vpop.f32.mrf.mxu3 }
 0x100   :  { %12440 = vst [vmem:[#allocation230_spill] sm:$0xff] %v9607_v13  ;;  %v6191_v19 = vld [vmem:[%s11709_s1 + $0x738] sm:$0xf0]  ;;  %v7153_v0 = vld [vmem:[%s11709_s1 + $0x7b4] sm:$0xf]  ;;  %2151 = vmatpush.bf16.msrb.mxu2 %v9607_v13  ;;  %v9641_v11 = vor.u32 %v7121_v2, %v6127_v4  ;;  %v1030_v2 = vpop.f32.mrf.mxu2  ;;  %v1019_v40 = vpop.f32.mrf.mxu1 }
 0x101   :  { %12441 = vst [vmem:[#allocation231_spill] sm:$0xff] %v9619_v51  ;;  %v6255_v53 = vld [vmem:[%s11709_s1 + $0x7b8] sm:$0xf0]  ;;  %v9643_v61 = vor.u32 %v7137_v41, %v6191_v19  ;;  %v7103_v32 = vld [vmem:[%s11709_s1 + $0x624] sm:$0xf]  ;;  %2164 = vmatpush.bf16.msrb.mxu3 %v9619_v51  ;;  %v1031_v13 = vadd.f32 %v1030_v2, %v1018_v49  ;;  %v1006_v51 = vpop.f32.mrf.mxu0 }
 0x102   :  { %12442 = vst [vmem:[#allocation232_spill] sm:$0xff] %v9641_v11  ;;  %v6055_v37 = vld [vmem:[%s11709_s1 + $0x628] sm:$0xf0]  ;;  %v7119_v55 = vld [vmem:[%s11709_s1 + $0x6a4] sm:$0xf]  ;;  %v9655_v59 = vor.u32 %v7153_v0, %v6255_v53  ;;  %2126 = vmatpush.bf16.msrb.mxu0 %v9637_v18 }
 0x103   :  { %v6119_v4 = vld [vmem:[%s11709_s1 + $0x6a8] sm:$0xf0]  ;;  %v7135_v41 = vld [vmem:[%s11709_s1 + $0x724] sm:$0xf]  ;;  %v9673_v22 = vor.u32 %v7103_v32, %v6055_v37  ;;  %2139 = vmatpush.bf16.msrb.mxu1 %v9641_v11  ;;  %v9677_v49 = vadd.f32 %v1043_v42, %v1031_v13  ;;  %v7101_v30 = vld [vmem:[%s11709_s1 + $0x614] sm:$0xf] }
 0x104   :  { %12443 = vst [vmem:[#allocation233_spill] sm:$0xff] %v9655_v59  ;;  %v6183_v19 = vld [vmem:[%s11709_s1 + $0x728] sm:$0xf0]  ;;  %v7151_v0 = vld [vmem:[%s11709_s1 + $0x7a4] sm:$0xf]  ;;  %2152 = vmatpush.bf16.msrb.mxu2 %v9643_v61  ;;  %v9679_v2 = vor.u32 %v7119_v55, %v6119_v4 }
 0x105   :  { %v6247_v53 = vld [vmem:[%s11709_s1 + $0x7a8] sm:$0xf0]  ;;  %12444 = vst [vmem:[#allocation234_spill] sm:$0xff] %v9673_v22  ;;  %v9681_v39 = vor.u32 %v7135_v41, %v6183_v19  ;;  %v6047_v37 = vld [vmem:[%s11709_s1 + $0x618] sm:$0xf0]  ;;  %2165 = vmatpush.bf16.msrb.mxu3 %v9655_v59 }
 0x106   :  { %12445 = vst [vmem:[#allocation235_spill] sm:$0xff] %v9679_v2  ;;  %v7117_v40 = vld [vmem:[%s11709_s1 + $0x694] sm:$0xf]  ;;  %v9693_v13 = vor.u32 %v7151_v0, %v6247_v53  ;;  %v6111_v42 = vld [vmem:[%s11709_s1 + $0x698] sm:$0xf0]  ;;  %2127 = vmatpush.bf16.msrb.mxu0 %v9673_v22  ;;  %v9711_v41 = vor.u32 %v7101_v30, %v6047_v37 }
 0x107   :  { %12446 = vst [vmem:[#allocation236_spill] sm:$0xff] %v9681_v39  ;;  %v7133_v51 = vld [vmem:[%s11709_s1 + $0x714] sm:$0xf]  ;;  %v6175_v32 = vld [vmem:[%s11709_s1 + $0x718] sm:$0xf0]  ;;  %2140 = vmatpush.bf16.msrb.mxu1 %v9679_v2  ;;  %v9715_v19 = vor.u32 %v7117_v40, %v6111_v42 }
 0x108   :  { %12447 = vst [vmem:[#allocation237_spill] sm:$0xff] %v9693_v13  ;;  %v7149_v55 = vld [vmem:[%s11709_s1 + $0x794] sm:$0xf]  ;;  %v6239_v4 = vld [vmem:[%s11709_s1 + $0x798] sm:$0xf0]  ;;  %2153 = vmatpush.bf16.msrb.mxu2 %v9681_v39  ;;  %v9717_v0 = vor.u32 %v7133_v51, %v6175_v32  ;;  %v1032_v32 = vpop.f32.mrf.mxu2 }
 0x109   :  { %12448 = vst [vmem:[#allocation238_spill] sm:$0xff] %v9711_v41  ;;  %v7099_v53 = vld [vmem:[%s11709_s1 + $0x604] sm:$0xf]  ;;  %v6039_v59 = vld [vmem:[%s11709_s1 + $0x608] sm:$0xf0]  ;;  %2166 = vmatpush.bf16.msrb.mxu3 %v9693_v13  ;;  %v9729_v37 = vor.u32 %v7149_v55, %v6239_v4  ;;  %v1045_v4 = vpop.f32.mrf.mxu3 }
 0x10a   :  { %12449 = vst [vmem:[#allocation239_spill] sm:$0xff] %v9715_v19  ;;  %v7115_v30 = vld [vmem:[%s11709_s1 + $0x684] sm:$0xf]  ;;  %v6103_v40 = vld [vmem:[%s11709_s1 + $0x688] sm:$0xf0]  ;;  %2128 = vmatpush.bf16.msrb.mxu0 %v9711_v41  ;;  %v9747_v13 = vor.u32 %v7099_v53, %v6039_v59 }
 0x10b   :  { %12450 = vst [vmem:[#allocation240_spill] sm:$0xff] %v9717_v0  ;;  %v7131_v42 = vld [vmem:[%s11709_s1 + $0x704] sm:$0xf]  ;;  %v6167_v51 = vld [vmem:[%s11709_s1 + $0x708] sm:$0xf0]  ;;  %2141 = vmatpush.bf16.msrb.mxu1 %v9715_v19  ;;  %v9751_v2 = vor.u32 %v7115_v30, %v6103_v40 }
 0x10c   :  { %12451 = vst [vmem:[#allocation241_spill] sm:$0xff] %v9729_v37  ;;  %v7147_v39 = vld [vmem:[%s11709_s1 + $0x784] sm:$0xf]  ;;  %v6231_v55 = vld [vmem:[%s11709_s1 + $0x788] sm:$0xf0]  ;;  %2154 = vmatpush.bf16.msrb.mxu2 %v9717_v0  ;;  %v9753_v32 = vor.u32 %v7131_v42, %v6167_v51 }
 0x10d   :  { %12452 = vst [vmem:[#allocation242_spill] sm:$0xff] %v9747_v13  ;;  %2167 = vmatpush.bf16.msrb.mxu3 %v9729_v37  ;;  %v9756_v22 = vor.u32 %v7147_v39, %v6231_v55  ;;  %v2232_v39 = vld [vmem:[%s11710_s0] sm:$0xaa] }
 0x10e   :  { %12453 = vst [vmem:[#allocation243_spill] sm:$0xff] %v9751_v2  ;;  %2129 = vmatpush.bf16.msrb.mxu0 %v9747_v13 }
 0x10f   :  { %12454 = vst [vmem:[#allocation244_spill] sm:$0xff] %v9753_v32  ;;  %2142 = vmatpush.bf16.msrb.mxu1 %v9751_v2 }
 0x110   :  { %12455 = vst [vmem:[#allocation245_spill] sm:$0xff] %v9756_v22  ;;  %2155 = vmatpush.bf16.msrb.mxu2 %v9753_v32  ;;  %v1082_v53 = vpop.f32.mrf.mxu2 }
 0x111   :  { %2168 = vmatpush.bf16.msrb.mxu3 %v9756_v22  ;;  %2130 = vmatmul.bf16.vlgmr.msrb.gmra.mxu0 %v9518_v36  ;;  %2235 = vst [vmem:[#allocation1] ss:$4 sm:$0xff] %v2232_v39  ;;  %v1095_v42 = vpop.f32.mrf.mxu3 }
 0x112   :  { %2283 = vmatpush.bf16.msra.mxu0 %v7346_v3  ;;  %2143 = vmatmul.bf16.vlgmr.msrb.gmra.mxu1 %v9524_v10  ;;  %v1069_v10 = vpop.f32.mrf.mxu1 }
 0x113   :  { %2296 = vmatpush.bf16.msra.mxu1 %v7357_v7  ;;  %2156 = vmatmul.bf16.vlgmr.msrb.gmra.mxu2 %v9497_v26  ;;  %v2233_v26 = vld [vmem:[%s11710_s0 + $0x18] sm:$0xaa]  ;;  %v12513_v7 = vld [vmem:[#allocation74_spill] sm:$0xff] }
 0x114   :  { %2309 = vmatpush.bf16.msra.mxu2 %v7359_v8  ;;  %2169 = vmatmul.bf16.vlgmr.msrb.gmra.mxu3 %v9510_v43  ;;  %v1056_v43 = vpop.f32.mrf.mxu0  ;;  %2246 = vst [vmem:[#allocation1 + $0x20] ss:$4 sm:$0xff] %v2233_v26 }
 0x115   :  { %2322 = vmatpush.bf16.msra.mxu3 %v7371_v12  ;;  %v1057_v36 = vadd.f32 %v1056_v43, %v9446_v52 }
 0x116   :  { %2284 = vmatpush.bf16.msra.mxu0 %v7384_v16 }
 0x117   :  { %2297 = vmatpush.bf16.msra.mxu1 %v7386_v17  ;;  %v1070_v59 = vadd.f32 %v1069_v10, %v1057_v36  ;;  %v12506_v17 = vld [vmem:[#allocation67_spill] sm:$0xff] }
 0x118   :  { %2310 = vmatpush.bf16.msra.mxu2 %v7398_v21  ;;  %v2240_v30 = vld.sshfl [vmem:[#allocation1 + $0x10] sm:$0xff pattern:$0x73625140]  ;;  %v2242_v55 = vld.sshfl [vmem:[#allocation1 + $0x18] sm:$0xff pattern:$0x73625140] }
 0x119   :  { %2323 = vmatpush.bf16.msra.mxu3 %v7409_v25  ;;  %v1083_v52 = vadd.f32 %v1082_v53, %v1070_v59  ;;  %v2257_v43 = vunpack.c.l.b16 %v2240_v30  ;;  %v2236_v10 = vld.sshfl [vmem:[#allocation1] sm:$0xff pattern:$0x73625140]  ;;  %v12498_v25 = vld [vmem:[#allocation59_spill] sm:$0xff] }
 0x11a   :  { %2285 = vmatpush.bf16.msra.mxu0 %v7421_v29  ;;  %v1071_v39 = vpop.f32.mrf.mxu1 }
 0x11b   :  { %2298 = vmatpush.bf16.msra.mxu1 %v7434_v33  ;;  %v2251_v40 = vld.sshfl [vmem:[#allocation1 + $0x30] sm:$0xff pattern:$0x73625140]  ;;  %v2253_v4 = vld.sshfl [vmem:[#allocation1 + $0x38] sm:$0xff pattern:$0x73625140]  ;;  %v9792_v26 = vadd.f32 %v1095_v42, %v1083_v52  ;;  %v1084_v42 = vpop.f32.mrf.mxu2 }
 0x11c   :  { %2311 = vmatpush.bf16.msra.mxu2 %v7436_v34  ;;  %v1058_v51 = vpop.f32.mrf.mxu0  ;;  %v2261_v36 = vunpack.c.l.b16 %v2251_v40  ;;  %v2262_v59 = vunpack.c.l.b16 %v2253_v4  ;;  %v2247_v53 = vld.sshfl [vmem:[#allocation1 + $0x20] sm:$0xff pattern:$0x73625140]  ;;  %v2249_v33 = vld.sshfl [vmem:[#allocation1 + $0x28] sm:$0xff pattern:$0x73625140] }
 0x11d   :  { %2324 = vmatpush.bf16.msra.mxu3 %v7448_v38  ;;  %v2255_v51 = vunpack.c.l.b16 %v2236_v10  ;;  %v2238_v38 = vld.sshfl [vmem:[#allocation1 + $0x8] sm:$0xff pattern:$0x73625140]  ;;  %v2269_v30 = vrot.slane %v2257_v43, 2  ;;  %v2260_v52 = vunpack.c.l.b16 %v2249_v33  ;;  %2397 = vst [vmem:[#allocation1 + $0x20] ss:$4 sm:$0xff] %v7734_v48 }
 0x11e   :  { %2286 = vmatpush.bf16.msra.mxu0 %v7466_v44  ;;  %v2256_v39 = vunpack.c.l.b16 %v2238_v38  ;;  %2387 = vst [vmem:[#allocation1] ss:$4 sm:$0xff] %v7729_v47  ;;  %v2270_v40 = vrot.slane %v2261_v36, 1  ;;  %v2273_v4 = vrot.slane %v2262_v59, 1  ;;  %v12456_v47 = vld [vmem:[#allocation19_spill] sm:$0xff]  ;;  %v12458_v36 = vld [vmem:[#allocation21_spill] sm:$0xff] }
 0x11f   :  { %2299 = vmatpush.bf16.msra.mxu1 %v7470_v45  ;;  %v2259_v45 = vunpack.c.l.b16 %v2247_v53  ;;  %v2263_v10 = vrot.slane %v2255_v51, 2  ;;  %v12459_v59 = vld [vmem:[#allocation22_spill] sm:$0xff]  ;;  %v12462_v42 = vld [vmem:[#allocation25_spill] sm:$0xff] }
 0x120   :  { %2312 = vmatpush.bf16.msra.mxu2 %v7472_v46  ;;  %v2266_v38 = vrot.slane %v2256_v39, 2  ;;  %v2271_v33 = vsel %vm192_vm0, %v2270_v40, %v2269_v30  ;;  %v12460_v30 = vld [vmem:[#allocation23_spill] sm:$0xff]  ;;  %v12461_v40 = vld [vmem:[#allocation24_spill] sm:$0xff] }
 0x121   :  { %2325 = vmatpush.bf16.msra.mxu3 %v7484_v50  ;;  %v2258_v50 = vunpack.c.l.b16 %v2242_v55  ;;  %v2264_v53 = vrot.slane %v2259_v45, 1  ;;  %v12457_v45 = vld [vmem:[#allocation20_spill] sm:$0xff] }
 0x122   :  { %2287 = vmatpush.bf16.msra.mxu0 %v7502_v56 }
 0x123   :  { %2300 = vmatpush.bf16.msra.mxu1 %v7506_v57  ;;  %v2272_v55 = vrot.slane %v2258_v50, 2  ;;  %v2267_v57 = vrot.slane %v2260_v52, 1  ;;  %v2265_v50 = vsel %vm192_vm0, %v2264_v53, %v2263_v10  ;;  %v12466_v10 = vld [vmem:[#allocation29_spill] sm:$0xff]  ;;  %v12467_v53 = vld [vmem:[#allocation30_spill] sm:$0xff] }
 0x124   :  { %2313 = vmatpush.bf16.msra.mxu2 %v7508_v58  ;;  %v9816_v39 = vpack.c.b16 %v2265_v50, %v2265_v50  ;;  %v12470_v50 = vld [vmem:[#allocation33_spill] sm:$0xff] }
 0x125   :  { %2326 = vmatpush.bf16.msra.mxu3 %v7520_v62  ;;  %v1097_v62 = vpop.f32.mrf.mxu3  ;;  %v2274_v48 = vsel %vm192_vm0, %v2273_v4, %v2272_v55  ;;  %v2268_v43 = vsel %vm192_vm0, %v2267_v57, %v2266_v38  ;;  %v12463_v57 = vld [vmem:[#allocation26_spill] sm:$0xff]  ;;  %v12464_v55 = vld [vmem:[#allocation27_spill] sm:$0xff]  ;;  %v12465_v4 = vld [vmem:[#allocation28_spill] sm:$0xff] }
 0x126   :  { %2288 = vmatpush.bf16.msra.mxu0 %v7538_v5  ;;  %v9810_v62 = vpack.c.b16 %v2271_v33, %v2271_v33  ;;  %v9814_v51 = vpack.c.b16 %v2274_v48, %v2274_v48  ;;  %v9820_v52 = vpack.c.b16 %v2268_v43, %v2268_v43  ;;  %v12468_v38 = vld [vmem:[#allocation31_spill] sm:$0xff]  ;;  %v12469_v33 = vld [vmem:[#allocation32_spill] sm:$0xff]  ;;  %v12471_v43 = vld [vmem:[#allocation34_spill] sm:$0xff] }
 0x127   :  { %2301 = vmatpush.bf16.msra.mxu1 %v7542_v6 }
 0x128   :  { %2314 = vmatpush.bf16.msra.mxu2 %v7544_v9 }
 0x129   :  { %2327 = vmatpush.bf16.msra.mxu3 %v7556_v14  ;;  %v12476_v14 = vld [vmem:[#allocation39_spill] sm:$0xff] }
 0x12a   :  { %2289 = vmatpush.bf16.msra.mxu0 %v7574_v23 }
 0x12b   :  { %2302 = vmatpush.bf16.msra.mxu1 %v7584_v27 }
 0x12c   :  { %2315 = vmatpush.bf16.msra.mxu2 %v7586_v28 }
 0x12d   :  { %2328 = vmatpush.bf16.msra.mxu3 %v12456_v47  ;;  %v1541_v48 = vpop.f32.mrf.mxu0  ;;  %v12474_v47 = vld [vmem:[#allocation37_spill] sm:$0xff] }
 0x12e   :  { %2290 = vmatpush.bf16.msra.mxu0 %v12457_v45 }
 0x12f   :  { %2303 = vmatpush.bf16.msra.mxu1 %v12458_v36  ;;  %v12473_v36 = vld [vmem:[#allocation36_spill] sm:$0xff] }
 0x130   :  { %2316 = vmatpush.bf16.msra.mxu2 %v12459_v59 }
 0x131   :  { %2329 = vmatpush.bf16.msra.mxu3 %v12460_v30  ;;  %2291 = vmatmul.bf16.vlgmr.msra.gmra.mxu0 %v9816_v39  ;;  %v1567_v27 = vpop.f32.mrf.mxu2 }
 0x132   :  { %2335 = vmatpush.bf16.msrb.mxu0 %v12461_v40  ;;  %2304 = vmatmul.bf16.vlgmr.msra.gmra.mxu1 %v9820_v52  ;;  %v1580_v6 = vpop.f32.mrf.mxu3  ;;  %v12511_v40 = vld [vmem:[#allocation72_spill] sm:$0xff] }
 0x133   :  { %2348 = vmatpush.bf16.msrb.mxu1 %v12462_v42  ;;  %2317 = vmatmul.bf16.vlgmr.msra.gmra.mxu2 %v9810_v62  ;;  %v12472_v42 = vld [vmem:[#allocation35_spill] sm:$0xff] }
 0x134   :  { %2361 = vmatpush.bf16.msrb.mxu2 %v12463_v57  ;;  %2330 = vmatmul.bf16.vlgmr.msra.gmra.mxu3 %v9814_v51  ;;  %v12510_v57 = vld [vmem:[#allocation71_spill] sm:$0xff] }
 0x135   :  { %2374 = vmatpush.bf16.msrb.mxu3 %v12464_v55  ;;  %v1554_v55 = vpop.f32.mrf.mxu1 }
 0x136   :  { %2336 = vmatpush.bf16.msrb.mxu0 %v12465_v4  ;;  %v1555_v30 = vadd.f32 %v1554_v55, %v1541_v48  ;;  %v12479_v4 = vld [vmem:[#allocation42_spill] sm:$0xff]  ;;  %v12480_v48 = vld [vmem:[#allocation43_spill] sm:$0xff] }
 0x137   :  { %2349 = vmatpush.bf16.msrb.mxu1 %v12466_v10  ;;  %v12475_v10 = vld [vmem:[#allocation38_spill] sm:$0xff] }
 0x138   :  { %2362 = vmatpush.bf16.msrb.mxu2 %v12467_v53  ;;  %v1543_v53 = vpop.f32.mrf.mxu0 }
 0x139   :  { %2375 = vmatpush.bf16.msrb.mxu3 %v12468_v38  ;;  %v1568_v38 = vadd.f32 %v1567_v27, %v1555_v30  ;;  %v12483_v27 = vld [vmem:[#allocation46_spill] sm:$0xff]  ;;  %v1569_v30 = vpop.f32.mrf.mxu2  ;;  %v12485_v53 = vld [vmem:[#allocation48_spill] sm:$0xff] }
 0x13a   :  { %2337 = vmatpush.bf16.msrb.mxu0 %v12469_v33  ;;  %v12477_v33 = vld [vmem:[#allocation40_spill] sm:$0xff]  ;;  %v9861_v30 = vld.sshfl [vmem:[#allocation1 + $0x28] sm:$0xff pattern:$0x73625140] }
 0x13b   :  { %2350 = vmatpush.bf16.msrb.mxu1 %v12470_v50  ;;  %v1581_v50 = vadd.f32 %v1580_v6, %v1568_v38  ;;  %v1582_v6 = vpop.f32.mrf.mxu3  ;;  %v12486_v38 = vld [vmem:[#allocation49_spill] sm:$0xff] }
 0x13c   :  { %2363 = vmatpush.bf16.msrb.mxu2 %v12471_v43  ;;  %v12478_v43 = vld [vmem:[#allocation41_spill] sm:$0xff] }
 0x13d   :  { %2376 = vmatpush.bf16.msrb.mxu3 %v12472_v42  ;;  %v1556_v55 = vpop.f32.mrf.mxu1  ;;  %v12481_v42 = vld [vmem:[#allocation44_spill] sm:$0xff] }
 0x13e   :  { %2338 = vmatpush.bf16.msrb.mxu0 %v12473_v36  ;;  %v12487_v55 = vld [vmem:[#allocation50_spill] sm:$0xff]  ;;  %v2394_v6 = vld.sshfl [vmem:[#allocation1 + $0x18] sm:$0xff pattern:$0x73625140] }
 0x13f   :  { %2351 = vmatpush.bf16.msrb.mxu1 %v12474_v47  ;;  %v9846_v47 = vadd.f32 %v1581_v50, %v9677_v49  ;;  %v2388_v49 = vld.sshfl [vmem:[#allocation1] sm:$0xff pattern:$0x73625140]  ;;  %v2392_v50 = vld.sshfl [vmem:[#allocation1 + $0x10] sm:$0xff pattern:$0x73625140] }
 0x140   :  { %2364 = vmatpush.bf16.msrb.mxu2 %v12475_v10  ;;  %v12482_v10 = vld [vmem:[#allocation45_spill] sm:$0xff] }
 0x141   :  { %2377 = vmatpush.bf16.msrb.mxu3 %v12476_v14  ;;  %v12484_v14 = vld [vmem:[#allocation47_spill] sm:$0xff]  ;;  %v12496_v36 = vld [vmem:[#allocation57_spill] sm:$0xff] }
 0x142   :  { %2339 = vmatpush.bf16.msrb.mxu0 %v12477_v33  ;;  %v12495_v33 = vld [vmem:[#allocation179_spill] sm:$0xff] }
 0x143   :  { %2352 = vmatpush.bf16.msrb.mxu1 %v12478_v43  ;;  %v9856_v43 = vld.sshfl [vmem:[#allocation1 + $0x20] sm:$0xff pattern:$0x73625140] }
 0x144   :  { %2365 = vmatpush.bf16.msrb.mxu2 %v12479_v4  ;;  %v12494_v4 = vld [vmem:[#allocation56_spill] sm:$0xff] }
 0x145   :  { %2378 = vmatpush.bf16.msrb.mxu3 %v12480_v48  ;;  %v12488_v48 = vld [vmem:[#allocation51_spill] sm:$0xff] }
 0x146   :  { %2340 = vmatpush.bf16.msrb.mxu0 %v12481_v42  ;;  %v9858_v42 = vld.sshfl [vmem:[#allocation1 + $0x30] sm:$0xff pattern:$0x73625140] }
 0x147   :  { %2353 = vmatpush.bf16.msrb.mxu1 %v12482_v10  ;;  %v2390_v10 = vld.sshfl [vmem:[#allocation1 + $0x8] sm:$0xff pattern:$0x73625140] }
 0x148   :  { %2366 = vmatpush.bf16.msrb.mxu2 %v12483_v27  ;;  %v12489_v27 = vld [vmem:[#allocation52_spill] sm:$0xff] }
 0x149   :  { %2379 = vmatpush.bf16.msrb.mxu3 %v12484_v14  ;;  %v12490_v14 = vld [vmem:[#allocation53_spill] sm:$0xff] }
 0x14a   :  { %2341 = vmatpush.bf16.msrb.mxu0 %v12485_v53  ;;  %v12491_v53 = vld [vmem:[#allocation54_spill] sm:$0xff] }
 0x14b   :  { %2354 = vmatpush.bf16.msrb.mxu1 %v12486_v38  ;;  %v9865_v38 = vld.sshfl [vmem:[#allocation1 + $0x38] sm:$0xff pattern:$0x73625140] }
 0x14c   :  { %2367 = vmatpush.bf16.msrb.mxu2 %v12487_v55  ;;  %v12492_v55 = vld [vmem:[#allocation175_spill] sm:$0xff]  ;;  %2544 = vst [vmem:[#allocation1 + $0x20] ss:$4 sm:$0xff] %v12495_v33 }
 0x14d   :  { %2380 = vmatpush.bf16.msrb.mxu3 %v12488_v48  ;;  %2534 = vst [vmem:[#allocation1] ss:$4 sm:$0xff] %v12492_v55  ;;  %v12493_v48 = vld [vmem:[#allocation55_spill] sm:$0xff] }
 0x14e   :  { %2342 = vmatpush.bf16.msrb.mxu0 %v12489_v27  ;;  %v12497_v27 = vld [vmem:[#allocation58_spill] sm:$0xff] }
 0x14f   :  { %2355 = vmatpush.bf16.msrb.mxu1 %v12490_v14  ;;  %v12499_v14 = vld [vmem:[#allocation60_spill] sm:$0xff] }
 0x150   :  { %2368 = vmatpush.bf16.msrb.mxu2 %v12491_v53  ;;  %v12502_v53 = vld [vmem:[#allocation63_spill] sm:$0xff] }
 0x151   :  { %2381 = vmatpush.bf16.msrb.mxu3 %v12493_v48  ;;  %2343 = vmatmul.bf16.vlgmr.msrb.gmra.mxu0 %v9816_v39  ;;  %v12500_v48 = vld [vmem:[#allocation61_spill] sm:$0xff]  ;;  %v12505_v39 = vld [vmem:[#allocation66_spill] sm:$0xff] }
 0x152   :  { %2430 = vmatpush.bf16.msra.mxu0 %v12494_v4  ;;  %2356 = vmatmul.bf16.vlgmr.msrb.gmra.mxu1 %v9820_v52  ;;  %v12501_v4 = vld [vmem:[#allocation62_spill] sm:$0xff] }
 0x153   :  { %2443 = vmatpush.bf16.msra.mxu1 %v12496_v36  ;;  %2369 = vmatmul.bf16.vlgmr.msrb.gmra.mxu2 %v9810_v62  ;;  %v12503_v36 = vld [vmem:[#allocation64_spill] sm:$0xff]  ;;  %v1606_v62 = vpop.f32.mrf.mxu1 }
 0x154   :  { %2456 = vmatpush.bf16.msra.mxu2 %v12497_v27  ;;  %2382 = vmatmul.bf16.vlgmr.msrb.gmra.mxu3 %v9814_v51  ;;  %v1593_v27 = vpop.f32.mrf.mxu0  ;;  %v12508_v51 = vld [vmem:[#allocation69_spill] sm:$0xff] }
 0x155   :  { %2469 = vmatpush.bf16.msra.mxu3 %v12498_v25  ;;  %v12504_v25 = vld [vmem:[#allocation65_spill] sm:$0xff]  ;;  %v1607_v52 = vadd.f32 %v1606_v62, %v1593_v27  ;;  %v2406_v27 = vunpack.c.l.b16 %v2388_v49  ;;  %v12518_v49 = vld [vmem:[#allocation79_spill] sm:$0xff] }
 0x156   :  { %2431 = vmatpush.bf16.msra.mxu0 %v12499_v14  ;;  %v12507_v14 = vld [vmem:[#allocation68_spill] sm:$0xff] }
 0x157   :  { %2444 = vmatpush.bf16.msra.mxu1 %v12500_v48  ;;  %v12509_v48 = vld [vmem:[#allocation70_spill] sm:$0xff] }
 0x158   :  { %2457 = vmatpush.bf16.msra.mxu2 %v12501_v4  ;;  %v1619_v4 = vpop.f32.mrf.mxu2 }
 0x159   :  { %2470 = vmatpush.bf16.msra.mxu3 %v12502_v53  ;;  %v1620_v53 = vadd.f32 %v1619_v4, %v1607_v52  ;;  %v12515_v4 = vld [vmem:[#allocation76_spill] sm:$0xff]  ;;  %v12516_v52 = vld [vmem:[#allocation77_spill] sm:$0xff] }
 0x15a   :  { %2432 = vmatpush.bf16.msra.mxu0 %v12503_v36  ;;  %v1632_v36 = vpop.f32.mrf.mxu3 }
 0x15b   :  { %2445 = vmatpush.bf16.msra.mxu1 %v12504_v25  ;;  %v1633_v25 = vadd.f32 %v1632_v36, %v1620_v53  ;;  %v1608_v62 = vpop.f32.mrf.mxu1  ;;  %v12517_v36 = vld [vmem:[#allocation78_spill] sm:$0xff]  ;;  %v2414_v53 = vrot.slane %v2406_v27, 1 }
 0x15c   :  { %2458 = vmatpush.bf16.msra.mxu2 %v12505_v39  ;;  %v1595_v12 = vpop.f32.mrf.mxu0  ;;  %v12512_v39 = vld [vmem:[#allocation73_spill] sm:$0xff]  ;;  %v2412_v62 = vunpack.c.l.b16 %v9858_v42  ;;  %v12525_v27 = vld [vmem:[#allocation86_spill] sm:$0xff] }
 0x15d   :  { %2471 = vmatpush.bf16.msra.mxu3 %v12506_v17  ;;  %v12514_v17 = vld [vmem:[#allocation75_spill] sm:$0xff]  ;;  %v2410_v12 = vunpack.c.l.b16 %v9856_v43 }
 0x15e   :  { %2433 = vmatpush.bf16.msra.mxu0 %v12507_v14  ;;  %v2407_v14 = vunpack.c.l.b16 %v2390_v10 }
 0x15f   :  { %2446 = vmatpush.bf16.msra.mxu1 %v12508_v51  ;;  %v9895_v51 = vadd.f32 %v1633_v25, %v9792_v26  ;;  %v2411_v25 = vunpack.c.l.b16 %v9861_v30  ;;  %v2415_v43 = vsel %vm192_vm0, %v2410_v12, %v2414_v53  ;;  %v12523_v30 = vld [vmem:[#allocation84_spill] sm:$0xff]  ;;  %v12526_v12 = vld [vmem:[#allocation87_spill] sm:$0xff] }
 0x160   :  { %2459 = vmatpush.bf16.msra.mxu2 %v12509_v48  ;;  %v2408_v48 = vunpack.c.l.b16 %v2392_v50  ;;  %v2416_v26 = vrot.slane %v2407_v14, 1  ;;  %v2413_v50 = vunpack.c.l.b16 %v9865_v38  ;;  %v9914_v38 = vpack.c.b16 %v2415_v43, %v2415_v43  ;;  %v12527_v53 = vld [vmem:[#allocation88_spill] sm:$0xff]  ;;  %v12533_v43 = vld [vmem:[#allocation94_spill] sm:$0xff] }
 0x161   :  { %2472 = vmatpush.bf16.msra.mxu3 %v12510_v57  ;;  %v2409_v57 = vunpack.c.l.b16 %v2394_v6 }
 0x162   :  { %2434 = vmatpush.bf16.msra.mxu0 %v12511_v40  ;;  %v1634_v10 = vpop.f32.mrf.mxu3  ;;  %v12579_v40 = vld [vmem:[#allocation140_spill] sm:$0xff] }
 0x163   :  { %2447 = vmatpush.bf16.msra.mxu1 %v12512_v39  ;;  %v1621_v39 = vpop.f32.mrf.mxu2  ;;  %v2420_v6 = vrot.slane %v2409_v57, 1  ;;  %v12524_v57 = vld [vmem:[#allocation85_spill] sm:$0xff] }
 0x164   :  { %2460 = vmatpush.bf16.msra.mxu2 %v12513_v7  ;;  %v12522_v39 = vld [vmem:[#allocation83_spill] sm:$0xff] }
 0x165   :  { %2473 = vmatpush.bf16.msra.mxu3 %v12514_v17  ;;  %v2418_v17 = vrot.slane %v2408_v48, 1  ;;  %v2417_v48 = vsel %vm192_vm0, %v2411_v25, %v2416_v26  ;;  %v2421_v14 = vsel %vm192_vm0, %v2413_v50, %v2420_v6  ;;  %v12529_v25 = vld [vmem:[#allocation90_spill] sm:$0xff]  ;;  %v12530_v26 = vld [vmem:[#allocation91_spill] sm:$0xff]  ;;  %v12531_v50 = vld [vmem:[#allocation92_spill] sm:$0xff] }
 0x166   :  { %2435 = vmatpush.bf16.msra.mxu0 %v12515_v4  ;;  %v12519_v4 = vld [vmem:[#allocation80_spill] sm:$0xff]  ;;  %v12532_v6 = vld [vmem:[#allocation93_spill] sm:$0xff] }
 0x167   :  { %2448 = vmatpush.bf16.msra.mxu1 %v12516_v52  ;;  %v12520_v52 = vld [vmem:[#allocation81_spill] sm:$0xff]  ;;  %v2419_v42 = vsel %vm192_vm0, %v2412_v62, %v2418_v17  ;;  %v9924_v17 = vpack.c.b16 %v2421_v14, %v2421_v14 }
 0x168   :  { %2461 = vmatpush.bf16.msra.mxu2 %v12517_v36  ;;  %v12521_v36 = vld [vmem:[#allocation82_spill] sm:$0xff]  ;;  %v9918_v10 = vpack.c.b16 %v2419_v42, %v2419_v42  ;;  %v12528_v62 = vld [vmem:[#allocation89_spill] sm:$0xff]  ;;  %v12534_v42 = vld [vmem:[#allocation95_spill] sm:$0xff] }
 0x169   :  { %2474 = vmatpush.bf16.msra.mxu3 %v12518_v49  ;;  %v12539_v49 = vld [vmem:[#allocation100_spill] sm:$0xff] }
 0x16a   :  { %2436 = vmatpush.bf16.msra.mxu0 %v12519_v4  ;;  %v12577_v4 = vld [vmem:[#allocation138_spill] sm:$0xff] }
 0x16b   :  { %2449 = vmatpush.bf16.msra.mxu1 %v12520_v52  ;;  %v9920_v52 = vpack.c.b16 %v2417_v48, %v2417_v48  ;;  %v12535_v48 = vld [vmem:[#allocation96_spill] sm:$0xff] }
 0x16c   :  { %2462 = vmatpush.bf16.msra.mxu2 %v12521_v36  ;;  %v12576_v36 = vld [vmem:[#allocation137_spill] sm:$0xff] }
 0x16d   :  { %2475 = vmatpush.bf16.msra.mxu3 %v12522_v39 }
 0x16e   :  { %2437 = vmatpush.bf16.msra.mxu0 %v12523_v30  ;;  %v12545_v30 = vld [vmem:[#allocation106_spill] sm:$0xff] }
 0x16f   :  { %2450 = vmatpush.bf16.msra.mxu1 %v12524_v57  ;;  %v12538_v57 = vld [vmem:[#allocation99_spill] sm:$0xff] }
 0x170   :  { %2463 = vmatpush.bf16.msra.mxu2 %v12525_v27 }
 0x171   :  { %2476 = vmatpush.bf16.msra.mxu3 %v12526_v12  ;;  %2438 = vmatmul.bf16.vlgmr.msra.gmra.mxu0 %v9914_v38 }
 0x172   :  { %2482 = vmatpush.bf16.msrb.mxu0 %v12527_v53  ;;  %2451 = vmatmul.bf16.vlgmr.msra.gmra.mxu1 %v9920_v52  ;;  %v2079_v14 = vpop.f32.mrf.mxu0  ;;  %v12543_v53 = vld [vmem:[#allocation104_spill] sm:$0xff] }
 0x173   :  { %2495 = vmatpush.bf16.msrb.mxu1 %v12528_v62  ;;  %2464 = vmatmul.bf16.vlgmr.msra.gmra.mxu2 %v9918_v10  ;;  %v12537_v62 = vld [vmem:[#allocation98_spill] sm:$0xff]  ;;  %v2092_v12 = vpop.f32.mrf.mxu1 }
 0x174   :  { %2508 = vmatpush.bf16.msrb.mxu2 %v12529_v25  ;;  %2477 = vmatmul.bf16.vlgmr.msra.gmra.mxu3 %v9924_v17  ;;  %v2093_v39 = vadd.f32 %v2092_v12, %v2079_v14  ;;  %v12542_v25 = vld [vmem:[#allocation103_spill] sm:$0xff] }
 0x175   :  { %2521 = vmatpush.bf16.msrb.mxu3 %v12530_v26  ;;  %v12536_v26 = vld [vmem:[#allocation97_spill] sm:$0xff]  ;;  %v12546_v14 = vld [vmem:[#allocation107_spill] sm:$0xff] }
 0x176   :  { %2483 = vmatpush.bf16.msrb.mxu0 %v12531_v50  ;;  %v12540_v50 = vld [vmem:[#allocation101_spill] sm:$0xff] }
 0x177   :  { %2496 = vmatpush.bf16.msrb.mxu1 %v12532_v6  ;;  %v12541_v6 = vld [vmem:[#allocation102_spill] sm:$0xff] }
 0x178   :  { %2509 = vmatpush.bf16.msrb.mxu2 %v12533_v43  ;;  %v2105_v43 = vpop.f32.mrf.mxu2 }
 0x179   :  { %2522 = vmatpush.bf16.msrb.mxu3 %v12534_v42  ;;  %v2106_v42 = vadd.f32 %v2105_v43, %v2093_v39  ;;  %v12549_v39 = vld [vmem:[#allocation110_spill] sm:$0xff] }
 0x17a   :  { %2484 = vmatpush.bf16.msrb.mxu0 %v12535_v48  ;;  %v2118_v48 = vpop.f32.mrf.mxu3  ;;  %v2081_v27 = vpop.f32.mrf.mxu0 }
 0x17b   :  { %2497 = vmatpush.bf16.msrb.mxu1 %v12536_v26  ;;  %v2119_v26 = vadd.f32 %v2118_v48, %v2106_v42  ;;  %v2094_v12 = vpop.f32.mrf.mxu1  ;;  %v12551_v42 = vld [vmem:[#allocation112_spill] sm:$0xff]  ;;  %v12552_v48 = vld [vmem:[#allocation113_spill] sm:$0xff] }
 0x17c   :  { %2510 = vmatpush.bf16.msrb.mxu2 %v12537_v62  ;;  %v12544_v62 = vld [vmem:[#allocation105_spill] sm:$0xff]  ;;  %v12553_v12 = vld [vmem:[#allocation114_spill] sm:$0xff] }
 0x17d   :  { %2523 = vmatpush.bf16.msrb.mxu3 %v12538_v57  ;;  %v12547_v57 = vld [vmem:[#allocation108_spill] sm:$0xff] }
 0x17e   :  { %2485 = vmatpush.bf16.msrb.mxu0 %v12539_v49  ;;  %v2547_v49 = vld.sshfl [vmem:[#allocation1 + $0x28] sm:$0xff pattern:$0x73625140] }
 0x17f   :  { %2498 = vmatpush.bf16.msrb.mxu1 %v12540_v50  ;;  %v9950_v50 = vadd.f32 %v2119_v26, %v9846_v47  ;;  %v9963_v47 = vld [vmem:[%s11710_s0 + $0x8] sm:$0xaa]  ;;  %v9968_v26 = vld [vmem:[%s11710_s0 + $0x20] sm:$0xaa] }
 0x180   :  { %2511 = vmatpush.bf16.msrb.mxu2 %v12541_v6  ;;  %v12548_v6 = vld [vmem:[#allocation109_spill] sm:$0xff]  ;;  %v2107_v43 = vpop.f32.mrf.mxu2  ;;  %12555 = vst [vmem:[#allocation20_spill] sm:$0xff] %v9963_v47 }
 0x181   :  { %2524 = vmatpush.bf16.msrb.mxu3 %v12542_v25  ;;  %v12550_v25 = vld [vmem:[#allocation111_spill] sm:$0xff]  ;;  %12556 = vst [vmem:[#allocation246_spill] sm:$0xff] %v9968_v26  ;;  %v12557_v43 = vld [vmem:[#allocation116_spill] sm:$0xff] }
 0x182   :  { %2486 = vmatpush.bf16.msrb.mxu0 %v12543_v53  ;;  %v2120_v27 = vpop.f32.mrf.mxu3  ;;  %v12562_v53 = vld [vmem:[#allocation121_spill] sm:$0xff] }
 0x183   :  { %2499 = vmatpush.bf16.msrb.mxu1 %v12544_v62  ;;  %v2539_v27 = vld.sshfl [vmem:[#allocation1 + $0x10] sm:$0xff pattern:$0x73625140] }
 0x184   :  { %2512 = vmatpush.bf16.msrb.mxu2 %v12545_v30  ;;  %v9973_v62 = vld.sshfl [vmem:[#allocation1 + $0x30] sm:$0xff pattern:$0x73625140]  ;;  %v2537_v30 = vld.sshfl [vmem:[#allocation1 + $0x8] sm:$0xff pattern:$0x73625140] }
 0x185   :  { %2525 = vmatpush.bf16.msrb.mxu3 %v12546_v14  ;;  %v12554_v14 = vld [vmem:[#allocation115_spill] sm:$0xff] }
 0x186   :  { %2487 = vmatpush.bf16.msrb.mxu0 %v12547_v57  ;;  %v9979_v57 = vld.sshfl [vmem:[#allocation1 + $0x20] sm:$0xff pattern:$0x73625140] }
 0x187   :  { %2500 = vmatpush.bf16.msrb.mxu1 %v12548_v6  ;;  %v12558_v6 = vld [vmem:[#allocation117_spill] sm:$0xff] }
 0x188   :  { %2513 = vmatpush.bf16.msrb.mxu2 %v12549_v39  ;;  %v12561_v39 = vld [vmem:[#allocation120_spill] sm:$0xff] }
 0x189   :  { %2526 = vmatpush.bf16.msrb.mxu3 %v12550_v25  ;;  %v2541_v25 = vld.sshfl [vmem:[#allocation1 + $0x18] sm:$0xff pattern:$0x73625140] }
 0x18a   :  { %2488 = vmatpush.bf16.msrb.mxu0 %v12551_v42  ;;  %v12560_v42 = vld [vmem:[#allocation119_spill] sm:$0xff] }
 0x18b   :  { %2501 = vmatpush.bf16.msrb.mxu1 %v12552_v48  ;;  %v12559_v48 = vld [vmem:[#allocation118_spill] sm:$0xff] }
 0x18c   :  { %2514 = vmatpush.bf16.msrb.mxu2 %v12553_v12  ;;  %v2535_v12 = vld.sshfl [vmem:[#allocation1] sm:$0xff pattern:$0x73625140] }
 0x18d   :  { %2527 = vmatpush.bf16.msrb.mxu3 %v12554_v14  ;;  %v9975_v14 = vld.sshfl [vmem:[#allocation1 + $0x38] sm:$0xff pattern:$0x73625140]  ;;  %2686 = vst [vmem:[#allocation1] ss:$4 sm:$0xff] %v9963_v47  ;;  %v12569_v47 = vld [vmem:[#allocation130_spill] sm:$0xff] }
 0x18e   :  { %2489 = vmatpush.bf16.msrb.mxu0 %v12557_v43  ;;  %v12563_v43 = vld [vmem:[#allocation122_spill] sm:$0xff]  ;;  %2697 = vst [vmem:[#allocation1 + $0x20] ss:$4 sm:$0xff] %v9968_v26  ;;  %v12571_v26 = vld [vmem:[#allocation132_spill] sm:$0xff] }
 0x18f   :  { %2502 = vmatpush.bf16.msrb.mxu1 %v12558_v6  ;;  %v12564_v6 = vld [vmem:[#allocation123_spill] sm:$0xff] }
 0x190   :  { %2515 = vmatpush.bf16.msrb.mxu2 %v12559_v48  ;;  %v12572_v48 = vld [vmem:[#allocation133_spill] sm:$0xff] }
 0x191   :  { %2528 = vmatpush.bf16.msrb.mxu3 %v12560_v42  ;;  %2490 = vmatmul.bf16.vlgmr.msrb.gmra.mxu0 %v9914_v38  ;;  %v12565_v42 = vld [vmem:[#allocation124_spill] sm:$0xff]  ;;  %v12570_v38 = vld [vmem:[#allocation131_spill] sm:$0xff] }
 0x192   :  { %2577 = vmatpush.bf16.msra.mxu0 %v12561_v39  ;;  %2503 = vmatmul.bf16.vlgmr.msrb.gmra.mxu1 %v9920_v52  ;;  %v12568_v39 = vld [vmem:[#allocation128_spill] sm:$0xff] }
 0x193   :  { %2590 = vmatpush.bf16.msra.mxu1 %v12562_v53  ;;  %2516 = vmatmul.bf16.vlgmr.msrb.gmra.mxu2 %v9918_v10  ;;  %v12566_v53 = vld [vmem:[#allocation125_spill] sm:$0xff]  ;;  %v2144_v10 = vpop.f32.mrf.mxu1 }
 0x194   :  { %2603 = vmatpush.bf16.msra.mxu2 %v12563_v43  ;;  %2529 = vmatmul.bf16.vlgmr.msrb.gmra.mxu3 %v9924_v17  ;;  %v12567_v43 = vld [vmem:[#allocation126_spill] sm:$0xff] }
 0x195   :  { %2616 = vmatpush.bf16.msra.mxu3 %v12564_v6  ;;  %v2131_v6 = vpop.f32.mrf.mxu0  ;;  %v12573_v17 = vld [vmem:[#allocation134_spill] sm:$0xff] }
 0x196   :  { %2578 = vmatpush.bf16.msra.mxu0 %v12565_v42  ;;  %v2145_v52 = vadd.f32 %v2144_v10, %v2131_v6  ;;  %v12574_v42 = vld [vmem:[#allocation135_spill] sm:$0xff]  ;;  %v2555_v6 = vunpack.c.l.b16 %v2539_v27  ;;  %v12584_v27 = vld [vmem:[#allocation145_spill] sm:$0xff] }
 0x197   :  { %2591 = vmatpush.bf16.msra.mxu1 %v12566_v53  ;;  %v12575_v53 = vld [vmem:[#allocation136_spill] sm:$0xff] }
 0x198   :  { %2604 = vmatpush.bf16.msra.mxu2 %v12567_v43  ;;  %v2157_v43 = vpop.f32.mrf.mxu2 }
 0x199   :  { %2617 = vmatpush.bf16.msra.mxu3 %v12568_v39  ;;  %v2158_v39 = vadd.f32 %v2157_v43, %v2145_v52  ;;  %v12581_v43 = vld [vmem:[#allocation142_spill] sm:$0xff]  ;;  %v12582_v52 = vld [vmem:[#allocation143_spill] sm:$0xff] }
 0x19a   :  { %2579 = vmatpush.bf16.msra.mxu0 %v12569_v47  ;;  %v2170_v47 = vpop.f32.mrf.mxu3 }
 0x19b   :  { %2592 = vmatpush.bf16.msra.mxu1 %v12570_v38  ;;  %v2171_v38 = vadd.f32 %v2170_v47, %v2158_v39  ;;  %v2146_v10 = vpop.f32.mrf.mxu1  ;;  %v12583_v39 = vld [vmem:[#allocation144_spill] sm:$0xff]  ;;  %v2565_v47 = vrot.slane %v2555_v6, 1 }
 0x19c   :  { %2605 = vmatpush.bf16.msra.mxu2 %v12571_v26  ;;  %v12578_v26 = vld [vmem:[#allocation139_spill] sm:$0xff]  ;;  %v2560_v10 = vunpack.c.l.b16 %v9975_v14  ;;  %v12589_v14 = vld [vmem:[#allocation150_spill] sm:$0xff] }
 0x19d   :  { %2618 = vmatpush.bf16.msra.mxu3 %v12572_v48  ;;  %v2133_v7 = vpop.f32.mrf.mxu0  ;;  %v12580_v48 = vld [vmem:[#allocation141_spill] sm:$0xff] }
 0x19e   :  { %2580 = vmatpush.bf16.msra.mxu0 %v12573_v17  ;;  %v2553_v17 = vunpack.c.l.b16 %v2535_v12  ;;  %v2559_v7 = vunpack.c.l.b16 %v9973_v62 }
 0x19f   :  { %2593 = vmatpush.bf16.msra.mxu1 %v12574_v42  ;;  %v10007_v42 = vadd.f32 %v2171_v38, %v9895_v51  ;;  %v2557_v51 = vunpack.c.l.b16 %v9979_v57 }
 0x1a0   :  { %2606 = vmatpush.bf16.msra.mxu2 %v12575_v53  ;;  %v2556_v53 = vunpack.c.l.b16 %v2541_v25  ;;  %v2561_v25 = vrot.slane %v2553_v17, 1  ;;  %v2566_v62 = vsel %vm192_vm0, %v2559_v7, %v2565_v47  ;;  %v12591_v17 = vld [vmem:[#allocation152_spill] sm:$0xff]  ;;  %v12592_v7 = vld [vmem:[#allocation153_spill] sm:$0xff]  ;;  %v12593_v47 = vld [vmem:[#allocation154_spill] sm:$0xff] }
 0x1a1   :  { %2619 = vmatpush.bf16.msra.mxu3 %v12576_v36  ;;  %v2554_v36 = vunpack.c.l.b16 %v2537_v30  ;;  %v2558_v30 = vunpack.c.l.b16 %v2547_v49  ;;  %v10025_v49 = vpack.c.b16 %v2566_v62, %v2566_v62  ;;  %v12599_v62 = vld [vmem:[#allocation160_spill] sm:$0xff] }
 0x1a2   :  { %2581 = vmatpush.bf16.msra.mxu0 %v12577_v4  ;;  %v2172_v12 = vpop.f32.mrf.mxu3 }
 0x1a3   :  { %2594 = vmatpush.bf16.msra.mxu1 %v12578_v26  ;;  %v2159_v26 = vpop.f32.mrf.mxu2  ;;  %v2563_v38 = vrot.slane %v2554_v36, 1  ;;  %v12590_v36 = vld [vmem:[#allocation151_spill] sm:$0xff] }
 0x1a4   :  { %2607 = vmatpush.bf16.msra.mxu2 %v12579_v40  ;;  %v12588_v26 = vld [vmem:[#allocation149_spill] sm:$0xff] }
 0x1a5   :  { %2620 = vmatpush.bf16.msra.mxu3 %v12580_v48  ;;  %v2567_v48 = vrot.slane %v2556_v53, 1  ;;  %v2562_v53 = vsel %vm192_vm0, %v2557_v51, %v2561_v25  ;;  %v2564_v57 = vsel %vm192_vm0, %v2558_v30, %v2563_v38  ;;  %v12595_v51 = vld [vmem:[#allocation156_spill] sm:$0xff]  ;;  %v12596_v25 = vld [vmem:[#allocation157_spill] sm:$0xff]  ;;  %v12597_v30 = vld [vmem:[#allocation158_spill] sm:$0xff] }
 0x1a6   :  { %2582 = vmatpush.bf16.msra.mxu0 %v12581_v43  ;;  %v12585_v43 = vld [vmem:[#allocation146_spill] sm:$0xff]  ;;  %v12598_v38 = vld [vmem:[#allocation159_spill] sm:$0xff]  ;;  %v12642_v40 = vld [vmem:[#allocation205_spill] sm:$0xff] }
 0x1a7   :  { %2595 = vmatpush.bf16.msra.mxu1 %v12582_v52  ;;  %v12586_v52 = vld [vmem:[#allocation147_spill] sm:$0xff]  ;;  %v2568_v6 = vsel %vm192_vm0, %v2560_v10, %v2567_v48  ;;  %v10035_v48 = vpack.c.b16 %v2564_v57, %v2564_v57 }
 0x1a8   :  { %2608 = vmatpush.bf16.msra.mxu2 %v12583_v39  ;;  %v12587_v39 = vld [vmem:[#allocation148_spill] sm:$0xff]  ;;  %v10029_v12 = vpack.c.b16 %v2568_v6, %v2568_v6  ;;  %v12594_v10 = vld [vmem:[#allocation155_spill] sm:$0xff]  ;;  %v12600_v6 = vld [vmem:[#allocation161_spill] sm:$0xff] }
 0x1a9   :  { %2621 = vmatpush.bf16.msra.mxu3 %v12584_v27  ;;  %v12605_v27 = vld [vmem:[#allocation166_spill] sm:$0xff] }
 0x1aa   :  { %2583 = vmatpush.bf16.msra.mxu0 %v12585_v43  ;;  %v12641_v43 = vld [vmem:[#allocation204_spill] sm:$0xff] }
 0x1ab   :  { %2596 = vmatpush.bf16.msra.mxu1 %v12586_v52  ;;  %v10031_v52 = vpack.c.b16 %v2562_v53, %v2562_v53  ;;  %v12601_v53 = vld [vmem:[#allocation162_spill] sm:$0xff] }
 0x1ac   :  { %2609 = vmatpush.bf16.msra.mxu2 %v12587_v39 }
 0x1ad   :  { %2622 = vmatpush.bf16.msra.mxu3 %v12588_v26 }
 0x1ae   :  { %2584 = vmatpush.bf16.msra.mxu0 %v12589_v14  ;;  %v2292_v57 = vpop.f32.mrf.mxu0  ;;  %v12627_v14 = vld [vmem:[#allocation190_spill] sm:$0xff] }
 0x1af   :  { %2597 = vmatpush.bf16.msra.mxu1 %v12590_v36  ;;  %v12604_v36 = vld [vmem:[#allocation165_spill] sm:$0xff] }
 0x1b0   :  { %2610 = vmatpush.bf16.msra.mxu2 %v12591_v17  ;;  %v12610_v17 = vld [vmem:[#allocation171_spill] sm:$0xff] }
 0x1b1   :  { %2623 = vmatpush.bf16.msra.mxu3 %v12592_v7  ;;  %2585 = vmatmul.bf16.vlgmr.msra.gmra.mxu0 %v10031_v52  ;;  %v2305_v7 = vpop.f32.mrf.mxu1 }
 0x1b2   :  { %2629 = vmatpush.bf16.msrb.mxu0 %v12593_v47  ;;  %2598 = vmatmul.bf16.vlgmr.msra.gmra.mxu1 %v10035_v48  ;;  %v2306_v26 = vadd.f32 %v2305_v7, %v2292_v57  ;;  %v12609_v47 = vld [vmem:[#allocation170_spill] sm:$0xff]  ;;  %v12612_v57 = vld [vmem:[#allocation173_spill] sm:$0xff] }
 0x1b3   :  { %2642 = vmatpush.bf16.msrb.mxu1 %v12594_v10  ;;  %2611 = vmatmul.bf16.vlgmr.msra.gmra.mxu2 %v10025_v49  ;;  %v12603_v10 = vld [vmem:[#allocation164_spill] sm:$0xff] }
 0x1b4   :  { %2655 = vmatpush.bf16.msrb.mxu2 %v12595_v51  ;;  %2624 = vmatmul.bf16.vlgmr.msra.gmra.mxu3 %v10029_v12  ;;  %v12608_v51 = vld [vmem:[#allocation169_spill] sm:$0xff] }
 0x1b5   :  { %2668 = vmatpush.bf16.msrb.mxu3 %v12596_v25  ;;  %v12602_v25 = vld [vmem:[#allocation163_spill] sm:$0xff] }
 0x1b6   :  { %2630 = vmatpush.bf16.msrb.mxu0 %v12597_v30  ;;  %v12606_v30 = vld [vmem:[#allocation167_spill] sm:$0xff] }
 0x1b7   :  { %2643 = vmatpush.bf16.msrb.mxu1 %v12598_v38  ;;  %v12607_v38 = vld [vmem:[#allocation168_spill] sm:$0xff] }
 0x1b8   :  { %2656 = vmatpush.bf16.msrb.mxu2 %v12599_v62  ;;  %v2318_v62 = vpop.f32.mrf.mxu2 }
 0x1b9   :  { %2669 = vmatpush.bf16.msrb.mxu3 %v12600_v6  ;;  %v2319_v6 = vadd.f32 %v2318_v62, %v2306_v26  ;;  %v2307_v7 = vpop.f32.mrf.mxu1  ;;  %v12616_v62 = vld [vmem:[#allocation178_spill] sm:$0xff] }
 0x1ba   :  { %2631 = vmatpush.bf16.msrb.mxu0 %v12601_v53  ;;  %v2331_v53 = vpop.f32.mrf.mxu3  ;;  %v2691_v7 = vld.sshfl [vmem:[#allocation1 + $0x10] sm:$0xff pattern:$0x73625140] }
 0x1bb   :  { %2644 = vmatpush.bf16.msrb.mxu1 %v12602_v25  ;;  %v10057_v25 = vadd.f32 %v2331_v53, %v2319_v6  ;;  %v12617_v6 = vld [vmem:[#allocation180_spill] sm:$0xff]  ;;  %v12619_v53 = vld [vmem:[#allocation182_spill] sm:$0xff] }
 0x1bc   :  { %2657 = vmatpush.bf16.msrb.mxu2 %v12603_v10  ;;  %v2294_v10 = vpop.f32.mrf.mxu0 }
 0x1bd   :  { %2670 = vmatpush.bf16.msrb.mxu3 %v12604_v36  ;;  %v12611_v36 = vld [vmem:[#allocation172_spill] sm:$0xff]  ;;  %v12618_v10 = vld [vmem:[#allocation181_spill] sm:$0xff] }
 0x1be   :  { %2632 = vmatpush.bf16.msrb.mxu0 %v12605_v27  ;;  %v12615_v27 = vld [vmem:[#allocation177_spill] sm:$0xff] }
 0x1bf   :  { %2645 = vmatpush.bf16.msrb.mxu1 %v12606_v30  ;;  %v12613_v30 = vld [vmem:[#allocation174_spill] sm:$0xff] }
 0x1c0   :  { %2658 = vmatpush.bf16.msrb.mxu2 %v12607_v38  ;;  %v12614_v38 = vld [vmem:[#allocation176_spill] sm:$0xff]  ;;  %v2320_v26 = vpop.f32.mrf.mxu2 }
 0x1c1   :  { %2671 = vmatpush.bf16.msrb.mxu3 %v12608_v51  ;;  %v12623_v26 = vld [vmem:[#allocation186_spill] sm:$0xff] }
 0x1c2   :  { %2633 = vmatpush.bf16.msrb.mxu0 %v12609_v47  ;;  %v2333_v51 = vpop.f32.mrf.mxu3  ;;  %v2687_v47 = vld.sshfl [vmem:[#allocation1] sm:$0xff pattern:$0x73625140] }
 0x1c3   :  { %2646 = vmatpush.bf16.msrb.mxu1 %v12610_v17  ;;  %v12620_v17 = vld [vmem:[#allocation183_spill] sm:$0xff]  ;;  %v2698_v51 = vld.sshfl [vmem:[#allocation1 + $0x20] sm:$0xff pattern:$0x73625140] }
 0x1c4   :  { %2659 = vmatpush.bf16.msrb.mxu2 %v12611_v36  ;;  %v12621_v36 = vld [vmem:[#allocation184_spill] sm:$0xff]  ;;  %v2710_v4 = vunpack.c.l.b16 %v2698_v51 }
 0x1c5   :  { %2672 = vmatpush.bf16.msrb.mxu3 %v12612_v57  ;;  %v2693_v57 = vld.sshfl [vmem:[#allocation1 + $0x18] sm:$0xff pattern:$0x73625140] }
 0x1c6   :  { %2634 = vmatpush.bf16.msrb.mxu0 %v12613_v30  ;;  %v2702_v30 = vld.sshfl [vmem:[#allocation1 + $0x30] sm:$0xff pattern:$0x73625140] }
 0x1c7   :  { %2647 = vmatpush.bf16.msrb.mxu1 %v12614_v38  ;;  %v2704_v38 = vld.sshfl [vmem:[#allocation1 + $0x38] sm:$0xff pattern:$0x73625140] }
 0x1c8   :  { %2660 = vmatpush.bf16.msrb.mxu2 %v12615_v27  ;;  %v12622_v27 = vld [vmem:[#allocation185_spill] sm:$0xff] }
 0x1c9   :  { %2673 = vmatpush.bf16.msrb.mxu3 %v12616_v62  ;;  %v2689_v62 = vld.sshfl [vmem:[#allocation1 + $0x8] sm:$0xff pattern:$0x73625140] }
 0x1ca   :  { %2635 = vmatpush.bf16.msrb.mxu0 %v12617_v6  ;;  %v12624_v6 = vld [vmem:[#allocation187_spill] sm:$0xff]  ;;  %3309 = vst [vmem:[#allocation1] ss:$4 sm:$0xff] %v12492_v55  ;;  %v12631_v55 = vld [vmem:[#allocation194_spill] sm:$0xff] }
 0x1cb   :  { %2648 = vmatpush.bf16.msrb.mxu1 %v12618_v10  ;;  %v12625_v10 = vld [vmem:[#allocation188_spill] sm:$0xff] }
 0x1cc   :  { %2661 = vmatpush.bf16.msrb.mxu2 %v12619_v53  ;;  %v2700_v53 = vld.sshfl [vmem:[#allocation1 + $0x28] sm:$0xff pattern:$0x73625140] }
 0x1cd   :  { %2674 = vmatpush.bf16.msrb.mxu3 %v12620_v17  ;;  %v12626_v17 = vld [vmem:[#allocation189_spill] sm:$0xff]  ;;  %3319 = vst [vmem:[#allocation1 + $0x20] ss:$4 sm:$0xff] %v12495_v33  ;;  %v12633_v33 = vld [vmem:[#allocation196_spill] sm:$0xff] }
 0x1ce   :  { %2636 = vmatpush.bf16.msrb.mxu0 %v12621_v36  ;;  %v12628_v36 = vld [vmem:[#allocation191_spill] sm:$0xff] }
 0x1cf   :  { %2649 = vmatpush.bf16.msrb.mxu1 %v12622_v27  ;;  %v12630_v27 = vld [vmem:[#allocation193_spill] sm:$0xff] }
 0x1d0   :  { %2662 = vmatpush.bf16.msrb.mxu2 %v12623_v26 }
 0x1d1   :  { %2675 = vmatpush.bf16.msrb.mxu3 %v12624_v6  ;;  %2637 = vmatmul.bf16.vlgmr.msrb.gmra.mxu0 %v10031_v52  ;;  %v12629_v6 = vld [vmem:[#allocation192_spill] sm:$0xff]  ;;  %v12636_v52 = vld [vmem:[#allocation199_spill] sm:$0xff] }
 0x1d2   :  { %2734 = vmatpush.bf16.msra.mxu0 %v12625_v10  ;;  %2650 = vmatmul.bf16.vlgmr.msrb.gmra.mxu1 %v10035_v48  ;;  %v2344_v10 = vpop.f32.mrf.mxu0  ;;  %v12638_v48 = vld [vmem:[#allocation201_spill] sm:$0xff] }
 0x1d3   :  { %2747 = vmatpush.bf16.msra.mxu1 %v12626_v17  ;;  %2663 = vmatmul.bf16.vlgmr.msrb.gmra.mxu2 %v10025_v49  ;;  %v12632_v17 = vld [vmem:[#allocation195_spill] sm:$0xff]  ;;  %v12635_v49 = vld [vmem:[#allocation198_spill] sm:$0xff] }
 0x1d4   :  { %2760 = vmatpush.bf16.msra.mxu2 %v12627_v14  ;;  %2676 = vmatmul.bf16.vlgmr.msrb.gmra.mxu3 %v10029_v12  ;;  %v12634_v14 = vld [vmem:[#allocation197_spill] sm:$0xff] }
 0x1d5   :  { %2773 = vmatpush.bf16.msra.mxu3 %v12628_v36  ;;  %v2357_v36 = vpop.f32.mrf.mxu1 }
 0x1d6   :  { %2735 = vmatpush.bf16.msra.mxu0 %v12629_v6  ;;  %v2358_v12 = vadd.f32 %v2357_v36, %v2344_v10  ;;  %v12637_v6 = vld [vmem:[#allocation200_spill] sm:$0xff]  ;;  %v12643_v36 = vld [vmem:[#allocation206_spill] sm:$0xff]  ;;  %v2708_v10 = vunpack.c.l.b16 %v2691_v7  ;;  %v12648_v7 = vld [vmem:[#allocation211_spill] sm:$0xff] }
 0x1d7   :  { %2748 = vmatpush.bf16.msra.mxu1 %v12630_v27  ;;  %v12639_v27 = vld [vmem:[#allocation202_spill] sm:$0xff] }
 0x1d8   :  { %2761 = vmatpush.bf16.msra.mxu2 %v12631_v55  ;;  %v12640_v55 = vld [vmem:[#allocation203_spill] sm:$0xff] }
 0x1d9   :  { %2774 = vmatpush.bf16.msra.mxu3 %v12632_v17  ;;  %v2370_v17 = vpop.f32.mrf.mxu2 }
 0x1da   :  { %2736 = vmatpush.bf16.msra.mxu0 %v12633_v33  ;;  %v2371_v26 = vadd.f32 %v2370_v17, %v2358_v12  ;;  %v2346_v39 = vpop.f32.mrf.mxu0  ;;  %v2383_v33 = vpop.f32.mrf.mxu3  ;;  %v2707_v17 = vunpack.c.l.b16 %v2689_v62  ;;  %v12645_v12 = vld [vmem:[#allocation208_spill] sm:$0xff]  ;;  %v12649_v62 = vld [vmem:[#allocation213_spill] sm:$0xff] }
 0x1db   :  { %2749 = vmatpush.bf16.msra.mxu1 %v12634_v14  ;;  %v2711_v39 = vunpack.c.l.b16 %v2700_v53 }
 0x1dc   :  { %2762 = vmatpush.bf16.msra.mxu2 %v12635_v49  ;;  %v2713_v49 = vunpack.c.l.b16 %v2704_v38  ;;  %v2717_v38 = vrot.slane %v2707_v17, 2  ;;  %v12652_v17 = vld [vmem:[#allocation220_spill] sm:$0xff] }
 0x1dd   :  { %2775 = vmatpush.bf16.msra.mxu3 %v12636_v52  ;;  %v2359_v14 = vpop.f32.mrf.mxu1  ;;  %v2712_v52 = vunpack.c.l.b16 %v2702_v30 }
 0x1de   :  { %2737 = vmatpush.bf16.msra.mxu0 %v12637_v6  ;;  %v10099_v6 = vadd.f32 %v2383_v33, %v2371_v26  ;;  %v12647_v14 = vld [vmem:[#allocation210_spill] sm:$0xff]  ;;  %v2724_v30 = vrot.slane %v2713_v49, 1 }
 0x1df   :  { %2750 = vmatpush.bf16.msra.mxu1 %v12638_v48  ;;  %v12644_v48 = vld [vmem:[#allocation207_spill] sm:$0xff] }
 0x1e0   :  { %2763 = vmatpush.bf16.msra.mxu2 %v12639_v27  ;;  %v2709_v27 = vunpack.c.l.b16 %v2693_v57 }
 0x1e1   :  { %2776 = vmatpush.bf16.msra.mxu3 %v12640_v55  ;;  %v2706_v55 = vunpack.c.l.b16 %v2687_v47  ;;  %v2372_v57 = vpop.f32.mrf.mxu2  ;;  %v2718_v47 = vrot.slane %v2711_v39, 1  ;;  %v12653_v39 = vld [vmem:[#allocation221_spill] sm:$0xff] }
 0x1e2   :  { %2738 = vmatpush.bf16.msra.mxu0 %v12641_v43  ;;  %v12646_v43 = vld [vmem:[#allocation209_spill] sm:$0xff]  ;;  %v2723_v33 = vrot.slane %v2709_v27, 2  ;;  %v2385_v51 = vpop.f32.mrf.mxu3  ;;  %v12656_v57 = vld [vmem:[#allocation224_spill] sm:$0xff] }
 0x1e3   :  { %2751 = vmatpush.bf16.msra.mxu1 %v12642_v40  ;;  %v2720_v40 = vrot.slane %v2708_v10, 2  ;;  %v2714_v26 = vrot.slane %v2706_v55, 2  ;;  %v2719_v55 = vsel %vm192_vm0, %v2718_v47, %v2717_v38  ;;  %v12657_v51 = vld [vmem:[#allocation225_spill] sm:$0xff] }
 0x1e4   :  { %2764 = vmatpush.bf16.msra.mxu2 %v12643_v36  ;;  %v2721_v36 = vrot.slane %v2712_v52, 1  ;;  %v2725_v52 = vsel %vm192_vm0, %v2724_v30, %v2723_v33  ;;  %v12654_v33 = vld [vmem:[#allocation222_spill] sm:$0xff]  ;;  %v12655_v30 = vld [vmem:[#allocation223_spill] sm:$0xff] }
 0x1e5   :  { %2777 = vmatpush.bf16.msra.mxu3 %v12644_v48  ;;  %v2715_v48 = vrot.slane %v2710_v4, 1  ;;  %v2729_v49 = vpack.c.b16 %v2725_v52, %v2725_v52  ;;  %v12659_v52 = vld [vmem:[#allocation227_spill] sm:$0xff] }
 0x1e6   :  { %2739 = vmatpush.bf16.msra.mxu0 %v12645_v12  ;;  %v2722_v53 = vsel %vm192_vm0, %v2721_v36, %v2720_v40  ;;  %v2727_v40 = vpack.c.b16 %v2719_v55, %v2719_v55  ;;  %v12650_v36 = vld [vmem:[#allocation218_spill] sm:$0xff]  ;;  %v12660_v55 = vld [vmem:[#allocation228_spill] sm:$0xff] }
 0x1e7   :  { %2752 = vmatpush.bf16.msra.mxu1 %v12646_v43  ;;  %v2716_v27 = vsel %vm192_vm0, %v2715_v48, %v2714_v26  ;;  %v2728_v4 = vpack.c.b16 %v2722_v53, %v2722_v53  ;;  %v12651_v48 = vld [vmem:[#allocation219_spill] sm:$0xff]  ;;  %v12658_v53 = vld [vmem:[#allocation226_spill] sm:$0xff] }
 0x1e8   :  { %2765 = vmatpush.bf16.msra.mxu2 %v12647_v14  ;;  %v2726_v10 = vpack.c.b16 %v2716_v27, %v2716_v27 }
 0x1e9   :  { %2778 = vmatpush.bf16.msra.mxu3 %v12648_v7 }
 0x1ea   :  { %2740 = vmatpush.bf16.msra.mxu0 %v9408_v31 }
 0x1eb   :  { %2753 = vmatpush.bf16.msra.mxu1 %v9410_v20 }
 0x1ec   :  { %2766 = vmatpush.bf16.msra.mxu2 %v12649_v62 }
 0x1ed   :  { %2779 = vmatpush.bf16.msra.mxu3 %v9425_v24 }
 0x1ee   :  { %2741 = vmatpush.bf16.msra.mxu0 %v9449_v35  ;;  %v2439_v26 = vpop.f32.mrf.mxu0 }
 0x1ef   :  { %2754 = vmatpush.bf16.msra.mxu1 %v9462_v1  ;;  %v2440_v38 = vadd.f32 %v2439_v26, %v10057_v25  ;;  %v2452_v47 = vpop.f32.mrf.mxu1 }
 0x1f0   :  { %2767 = vmatpush.bf16.msra.mxu2 %v9464_v54 }
 0x1f1   :  { %2780 = vmatpush.bf16.msra.mxu3 %v9474_v60  ;;  %2742 = vmatmul.bf16.vlgmr.msra.gmra.mxu0 %v2726_v10  ;;  %v2453_v27 = vadd.f32 %v2452_v47, %v2440_v38  ;;  %v12664_v47 = vld [vmem:[#allocation233_spill] sm:$0xff] }
 0x1f2   :  { %2786 = vmatpush.bf16.msrb.mxu0 %v9476_v63  ;;  %2755 = vmatmul.bf16.vlgmr.msra.gmra.mxu1 %v2727_v40 }
 0x1f3   :  { %2799 = vmatpush.bf16.msrb.mxu1 %v9480_v15  ;;  %2768 = vmatmul.bf16.vlgmr.msra.gmra.mxu2 %v2728_v4 }
 0x1f4   :  { %2812 = vmatpush.bf16.msrb.mxu2 %v12650_v36  ;;  %2781 = vmatmul.bf16.vlgmr.msra.gmra.mxu3 %v2729_v49 }
 0x1f5   :  { %2825 = vmatpush.bf16.msrb.mxu3 %v12651_v48  ;;  %v12662_v48 = vld [vmem:[#allocation230_spill] sm:$0xff] }
 0x1f6   :  { %2787 = vmatpush.bf16.msrb.mxu0 %v12652_v17  ;;  %v2465_v15 = vpop.f32.mrf.mxu2  ;;  %v2441_v25 = vpop.f32.mrf.mxu0 }
 0x1f7   :  { %2800 = vmatpush.bf16.msrb.mxu1 %v12653_v39  ;;  %v12661_v39 = vld [vmem:[#allocation229_spill] sm:$0xff]  ;;  %v2466_v60 = vadd.f32 %v2465_v15, %v2453_v27  ;;  %v2478_v1 = vpop.f32.mrf.mxu3  ;;  %v2454_v26 = vpop.f32.mrf.mxu1 }
 0x1f8   :  { %2813 = vmatpush.bf16.msrb.mxu2 %v12654_v33  ;;  %v12668_v15 = vld [vmem:[#allocation237_spill] sm:$0xff] }
 0x1f9   :  { %2826 = vmatpush.bf16.msrb.mxu3 %v12655_v30  ;;  %v12663_v30 = vld [vmem:[#allocation231_spill] sm:$0xff]  ;;  %v10138_v38 = vadd.f32 %v2478_v1, %v2466_v60 }
 0x1fa   :  { %2788 = vmatpush.bf16.msrb.mxu0 %v12656_v57 }
 0x1fb   :  { %2801 = vmatpush.bf16.msrb.mxu1 %v12657_v51 }
 0x1fc   :  { %2814 = vmatpush.bf16.msrb.mxu2 %v12658_v53 }
 0x1fd   :  { %2827 = vmatpush.bf16.msrb.mxu3 %v12659_v52  ;;  %v12666_v52 = vld [vmem:[#allocation235_spill] sm:$0xff] }
 0x1fe   :  { %2789 = vmatpush.bf16.msrb.mxu0 %v12660_v55  ;;  %v2467_v27 = vpop.f32.mrf.mxu2 }
 0x1ff   :  { %2802 = vmatpush.bf16.msrb.mxu1 %v12661_v39  ;;  %v12665_v39 = vld [vmem:[#allocation234_spill] sm:$0xff]  ;;  %v2480_v25 = vpop.f32.mrf.mxu3 }
 0x200   :  { %2815 = vmatpush.bf16.msrb.mxu2 %v12662_v48 }
 0x201   :  { %2828 = vmatpush.bf16.msrb.mxu3 %v12663_v30  ;;  %v12667_v30 = vld [vmem:[#allocation236_spill] sm:$0xff] }
 0x202   :  { %2790 = vmatpush.bf16.msrb.mxu0 %v9637_v18 }
 0x203   :  { %2803 = vmatpush.bf16.msrb.mxu1 %v9641_v11 }
 0x204   :  { %2816 = vmatpush.bf16.msrb.mxu2 %v9643_v61 }
 0x205   :  { %2829 = vmatpush.bf16.msrb.mxu3 %v12664_v47 }
 0x206   :  { %2791 = vmatpush.bf16.msrb.mxu0 %v12665_v39 }
 0x207   :  { %2804 = vmatpush.bf16.msrb.mxu1 %v12666_v52 }
 0x208   :  { %2817 = vmatpush.bf16.msrb.mxu2 %v12667_v30 }
 0x209   :  { %2830 = vmatpush.bf16.msrb.mxu3 %v12668_v15 }
 0x20a   :  { %2792 = vmatpush.bf16.msrb.mxu0 %v9711_v41  ;;  %v7196_v41 = vld [vmem:[%s11711_s4 + $0x104] sm:$0xf0] }
 0x20b   :  { %2805 = vmatpush.bf16.msrb.mxu1 %v9715_v19 }
 0x20c   :  { %2818 = vmatpush.bf16.msrb.mxu2 %v9717_v0 }
 0x20d   :  { %2831 = vmatpush.bf16.msrb.mxu3 %v9729_v37 }
 0x20e   :  { %2793 = vmatpush.bf16.msrb.mxu0 %v9747_v13  ;;  %v2491_v1 = vpop.f32.mrf.mxu0  ;;  %v6439_v13 = vld [vmem:[%s11711_s4 + $0x1e0] sm:$0xf] }
 0x20f   :  { %2806 = vmatpush.bf16.msrb.mxu1 %v9751_v2  ;;  %v2492_v60 = vadd.f32 %v2491_v1, %v10099_v6  ;;  %v2504_v26 = vpop.f32.mrf.mxu1  ;;  %v6375_v6 = vld [vmem:[%s11711_s4 + $0x160] sm:$0xf]  ;;  %v7206_v1 = vld [vmem:[%s11711_s4 + $0x154] sm:$0xf0] }
 0x210   :  { %2819 = vmatpush.bf16.msrb.mxu2 %v9753_v32  ;;  %v7226_v2 = vld [vmem:[%s11711_s4 + $0x1f4] sm:$0xf0]  ;;  %v7224_v32 = vld [vmem:[%s11711_s4 + $0x1e4] sm:$0xf0] }
 0x211   :  { %2832 = vmatpush.bf16.msrb.mxu3 %v9756_v22  ;;  %2794 = vmatmul.bf16.vlgmr.msrb.gmra.mxu0 %v2726_v10  ;;  %v2505_v27 = vadd.f32 %v2504_v26, %v2492_v60  ;;  %v6383_v22 = vld [vmem:[%s11711_s4 + $0x170] sm:$0xf]  ;;  %v7208_v10 = vld [vmem:[%s11711_s4 + $0x164] sm:$0xf0]  ;;  %v7209_v60 = vld [vmem:[%s11711_s4 + $0x174] sm:$0xf] }
 0x212   :  { %2807 = vmatmul.bf16.vlgmr.msrb.gmra.mxu1 %v2727_v40 }
 0x213   :  { %2820 = vmatmul.bf16.vlgmr.msrb.gmra.mxu2 %v2728_v4  ;;  %v7210_v4 = vld [vmem:[%s11711_s4 + $0x174] sm:$0xf0] }
 0x214   :  { %2833 = vmatmul.bf16.vlgmr.msrb.gmra.mxu3 %v2729_v49  ;;  %v6384_v49 = vor.u32 %v7210_v4, %v6383_v22  ;;  %v6367_v22 = vld [vmem:[%s11711_s4 + $0x150] sm:$0xf] }
 0x216   :  { %v2517_v25 = vpop.f32.mrf.mxu2  ;;  %v2493_v15 = vpop.f32.mrf.mxu0  ;;  %3045 = vmatpush.bf16.msra.mxu0 %v6384_v49 }
 0x217   :  { %v2518_v19 = vadd.f32 %v2517_v25, %v2505_v27  ;;  %v2530_v37 = vpop.f32.mrf.mxu3  ;;  %v2506_v52 = vpop.f32.mrf.mxu1  ;;  %v6368_v27 = vor.u32 %v7206_v1, %v6367_v22  ;;  %v6385_v25 = vld [vmem:[%s11711_s4 + $0x178] sm:$0xf0]  ;;  %v6377_v1 = vld [vmem:[%s11711_s4 + $0x168] sm:$0xf0] }
 0x218   :  { %v6388_v49 = vor.u32 %v7209_v60, %v6385_v25  ;;  %v6351_v60 = vld [vmem:[%s11711_s4 + $0x130] sm:$0xf] }
 0x219   :  { %v10154_v47 = vadd.f32 %v2530_v37, %v2518_v19  ;;  %v6376_v19 = vor.u32 %v7208_v10, %v6375_v6  ;;  %v6359_v10 = vld [vmem:[%s11711_s4 + $0x140] sm:$0xf] }
 0x21a   :  { %3071 = vmatpush.bf16.msra.mxu2 %v6388_v49  ;;  %v7205_v49 = vld [vmem:[%s11711_s4 + $0x154] sm:$0xf] }
 0x21b   :  { %3046 = vmatpush.bf16.msra.mxu0 %v6376_v19  ;;  %v7207_v19 = vld [vmem:[%s11711_s4 + $0x164] sm:$0xf] }
 0x21c   :  { %v6380_v25 = vor.u32 %v7207_v19, %v6377_v1  ;;  %v6447_v1 = vld [vmem:[%s11711_s4 + $0x1f0] sm:$0xf] }
 0x21e   :  { %v2519_v40 = vpop.f32.mrf.mxu2  ;;  %3072 = vmatpush.bf16.msra.mxu2 %v6380_v25  ;;  %v6361_v25 = vld [vmem:[%s11711_s4 + $0x148] sm:$0xf0] }
 0x21f   :  { %v2532_v37 = vpop.f32.mrf.mxu3  ;;  %3047 = vmatpush.bf16.msra.mxu0 %v6368_v27  ;;  %v7204_v40 = vld [vmem:[%s11711_s4 + $0x144] sm:$0xf0]  ;;  %v7202_v27 = vld [vmem:[%s11711_s4 + $0x134] sm:$0xf0] }
 0x220   :  { %v6360_v22 = vor.u32 %v7204_v40, %v6359_v10  ;;  %v6352_v10 = vor.u32 %v7202_v27, %v6351_v60  ;;  %v6343_v40 = vld [vmem:[%s11711_s4 + $0x120] sm:$0xf]  ;;  %v7203_v27 = vld [vmem:[%s11711_s4 + $0x144] sm:$0xf] }
 0x223   :  { %3048 = vmatpush.bf16.msra.mxu0 %v6360_v22  ;;  %v7225_v22 = vld [vmem:[%s11711_s4 + $0x1f4] sm:$0xf] }
 0x227   :  { %3049 = vmatpush.bf16.msra.mxu0 %v6352_v10  ;;  %v6335_v10 = vld [vmem:[%s11711_s4 + $0x110] sm:$0xf] }
 0x22e   :  { %v10168_v52 = vpop.f32.mrf.mxu0 }
 0x22f   :  { %v10170_v15 = vpop.f32.mrf.mxu1 }
 0x236   :  { %v10181_v26 = vpop.f32.mrf.mxu2  ;;  %v2588_v6 = vpop.f32.mrf.mxu0 }
 0x237   :  { %v10186_v4 = vpop.f32.mrf.mxu3  ;;  %v2601_v37 = vpop.f32.mrf.mxu1  ;;  %v6369_v6 = vld [vmem:[%s11711_s4 + $0x158] sm:$0xf0] }
 0x238   :  { %v7200_v37 = vld [vmem:[%s11711_s4 + $0x124] sm:$0xf0]  ;;  %v6372_v19 = vor.u32 %v7205_v49, %v6369_v6  ;;  %v6448_v49 = vor.u32 %v7226_v2, %v6447_v1  ;;  %v6449_v6 = vld [vmem:[%s11711_s4 + $0x1f8] sm:$0xf0]  ;;  %v7223_v2 = vld [vmem:[%s11711_s4 + $0x1e4] sm:$0xf]  ;;  %v6364_v1 = vor.u32 %v7203_v27, %v6361_v25 }
 0x239   :  { %v6452_v51 = vor.u32 %v7225_v22, %v6449_v6  ;;  %v7222_v27 = vld [vmem:[%s11711_s4 + $0x1d4] sm:$0xf0]  ;;  %v6433_v6 = vld [vmem:[%s11711_s4 + $0x1d8] sm:$0xf0] }
 0x23a   :  { %3058 = vmatpush.bf16.msra.mxu1 %v6448_v49  ;;  %3073 = vmatpush.bf16.msra.mxu2 %v6372_v19  ;;  %v7201_v49 = vld [vmem:[%s11711_s4 + $0x134] sm:$0xf]  ;;  %v6353_v19 = vld [vmem:[%s11711_s4 + $0x138] sm:$0xf0] }
 0x23b   :  { %3084 = vmatpush.bf16.msra.mxu3 %v6452_v51  ;;  %v6431_v51 = vld [vmem:[%s11711_s4 + $0x1d0] sm:$0xf] }
 0x23c   :  { %v6432_v25 = vor.u32 %v7222_v27, %v6431_v51  ;;  %v7197_v51 = vld [vmem:[%s11711_s4 + $0x114] sm:$0xf]  ;;  %v6337_v27 = vld [vmem:[%s11711_s4 + $0x118] sm:$0xf0] }
 0x23e   :  { %v2614_v60 = vpop.f32.mrf.mxu2  ;;  %3074 = vmatpush.bf16.msra.mxu2 %v6364_v1  ;;  %v6511_v1 = vld [vmem:[%s11711_s4 + $0x70] sm:$0xf] }
 0x23f   :  { %v2627_v11 = vpop.f32.mrf.mxu3  ;;  %v6344_v60 = vor.u32 %v7200_v37, %v6343_v40  ;;  %v7198_v40 = vld [vmem:[%s11711_s4 + $0x114] sm:$0xf0]  ;;  %v6440_v37 = vor.u32 %v7224_v32, %v6439_v13  ;;  %v7221_v13 = vld [vmem:[%s11711_s4 + $0x1d4] sm:$0xf] }
 0x240   :  { %v6441_v11 = vld [vmem:[%s11711_s4 + $0x1e8] sm:$0xf0]  ;;  %v6336_v32 = vor.u32 %v7198_v40, %v6335_v10  ;;  %v6436_v10 = vor.u32 %v7221_v13, %v6433_v6  ;;  %v6503_v13 = vld [vmem:[%s11711_s4 + $0x60] sm:$0xf] }
 0x241   :  { %v6444_v22 = vor.u32 %v7223_v2, %v6441_v11  ;;  %3050 = vmatpush.bf16.msra.mxu0 %v6344_v60  ;;  %3059 = vmatpush.bf16.msra.mxu1 %v6440_v37  ;;  %v6356_v2 = vor.u32 %v7201_v49, %v6353_v19  ;;  %v6327_v11 = vld [vmem:[%s11711_s4 + $0x100] sm:$0xf]  ;;  %v7199_v60 = vld [vmem:[%s11711_s4 + $0x124] sm:$0xf]  ;;  %v6345_v40 = vld [vmem:[%s11711_s4 + $0x128] sm:$0xf0] }
 0x242   :  { %v7178_v37 = vld [vmem:[%s11711_s4 + $0x74] sm:$0xf0]  ;;  %v6348_v49 = vor.u32 %v7199_v60, %v6345_v40  ;;  %v7219_v60 = vld [vmem:[%s11711_s4 + $0x1c4] sm:$0xf] }
 0x243   :  { %3085 = vmatpush.bf16.msra.mxu3 %v6444_v22  ;;  %v6328_v22 = vor.u32 %v7196_v41, %v6327_v11  ;;  %3075 = vmatpush.bf16.msra.mxu2 %v6356_v2  ;;  %v6512_v19 = vor.u32 %v7178_v37, %v6511_v1  ;;  %v7176_v41 = vld [vmem:[%s11711_s4 + $0x64] sm:$0xf0]  ;;  %v6423_v2 = vld [vmem:[%s11711_s4 + $0x1c0] sm:$0xf]  ;;  %v6425_v1 = vld [vmem:[%s11711_s4 + $0x1c8] sm:$0xf0] }
 0x244   :  { %v7220_v11 = vld [vmem:[%s11711_s4 + $0x1c4] sm:$0xf0]  ;;  %v6428_v37 = vor.u32 %v7219_v60, %v6425_v1  ;;  %v7218_v60 = vld [vmem:[%s11711_s4 + $0x1b4] sm:$0xf0] }
 0x245   :  { %3051 = vmatpush.bf16.msra.mxu0 %v6336_v32  ;;  %3060 = vmatpush.bf16.msra.mxu1 %v6432_v25  ;;  %v6340_v32 = vor.u32 %v7197_v51, %v6337_v27  ;;  %v6504_v25 = vor.u32 %v7176_v41, %v6503_v13  ;;  %v6424_v40 = vor.u32 %v7220_v11, %v6423_v2  ;;  %v6495_v51 = vld [vmem:[%s11711_s4 + $0x50] sm:$0xf]  ;;  %v7174_v27 = vld [vmem:[%s11711_s4 + $0x54] sm:$0xf0]  ;;  %v7177_v13 = vld [vmem:[%s11711_s4 + $0x74] sm:$0xf] }
 0x246   :  { %v6496_v41 = vor.u32 %v7174_v27, %v6495_v51  ;;  %v6415_v11 = vld [vmem:[%s11711_s4 + $0x1b0] sm:$0xf]  ;;  %v6487_v51 = vld [vmem:[%s11711_s4 + $0x40] sm:$0xf]  ;;  %v7172_v27 = vld [vmem:[%s11711_s4 + $0x44] sm:$0xf0] }
 0x247   :  { %3086 = vmatpush.bf16.msra.mxu3 %v6436_v10  ;;  %3076 = vmatpush.bf16.msra.mxu2 %v6348_v49  ;;  %v6329_v49 = vld [vmem:[%s11711_s4 + $0x108] sm:$0xf0] }
 0x249   :  { %3052 = vmatpush.bf16.msra.mxu0 %v6328_v22  ;;  %v7195_v22 = vld [vmem:[%s11711_s4 + $0x104] sm:$0xf]  ;;  %3061 = vmatpush.bf16.msra.mxu1 %v6424_v40  ;;  %v7217_v40 = vld [vmem:[%s11711_s4 + $0x1b4] sm:$0xf] }
 0x24b   :  { %3077 = vmatpush.bf16.msra.mxu2 %v6340_v32  ;;  %3087 = vmatpush.bf16.msra.mxu3 %v6428_v37  ;;  %v6513_v32 = vld [vmem:[%s11711_s4 + $0x78] sm:$0xf0]  ;;  %v6416_v37 = vor.u32 %v7218_v60, %v6415_v11  ;;  %v6407_v60 = vld [vmem:[%s11711_s4 + $0x1a0] sm:$0xf] }
 0x24c   :  { %v6516_v2 = vor.u32 %v7177_v13, %v6513_v32  ;;  %v6505_v32 = vld [vmem:[%s11711_s4 + $0x68] sm:$0xf0] }
 0x24d   :  { %3257 = vmatpush.bf16.msrb.mxu0 %v6512_v19  ;;  %v6332_v19 = vor.u32 %v7195_v22, %v6329_v49  ;;  %v6417_v22 = vld [vmem:[%s11711_s4 + $0x1b8] sm:$0xf0]  ;;  %3062 = vmatpush.bf16.msra.mxu1 %v6416_v37  ;;  %v7215_v37 = vld [vmem:[%s11711_s4 + $0x1a4] sm:$0xf] }
 0x24e   :  { %v10302_v6 = vpop.f32.mrf.mxu0  ;;  %v6420_v49 = vor.u32 %v7217_v40, %v6417_v22  ;;  %v7216_v40 = vld [vmem:[%s11711_s4 + $0x1a4] sm:$0xf0] }
 0x24f   :  { %v10313_v10 = vpop.f32.mrf.mxu1  ;;  %3078 = vmatpush.bf16.msra.mxu2 %v6332_v19  ;;  %v7175_v19 = vld [vmem:[%s11711_s4 + $0x64] sm:$0xf]  ;;  %v6408_v22 = vor.u32 %v7216_v40, %v6407_v60  ;;  %v6399_v60 = vld [vmem:[%s11711_s4 + $0x190] sm:$0xf]  ;;  %v7214_v40 = vld [vmem:[%s11711_s4 + $0x194] sm:$0xf0] }
 0x250   :  { %3088 = vmatpush.bf16.msra.mxu3 %v6420_v49  ;;  %v6508_v11 = vor.u32 %v7175_v19, %v6505_v32  ;;  %v7170_v19 = vld [vmem:[%s11711_s4 + $0x34] sm:$0xf0]  ;;  %v6497_v32 = vld [vmem:[%s11711_s4 + $0x58] sm:$0xf0] }
 0x251   :  { %3258 = vmatpush.bf16.msrb.mxu0 %v6504_v25  ;;  %3063 = vmatpush.bf16.msra.mxu1 %v6408_v22 }
 0x253   :  { %3283 = vmatpush.bf16.msrb.mxu2 %v6516_v2 }
 0x255   :  { %3259 = vmatpush.bf16.msrb.mxu0 %v6496_v41  ;;  %v6488_v41 = vor.u32 %v7172_v27, %v6487_v51  ;;  %v6409_v51 = vld [vmem:[%s11711_s4 + $0x1a8] sm:$0xf0]  ;;  %v6479_v27 = vld [vmem:[%s11711_s4 + $0x30] sm:$0xf] }
 0x256   :  { %v10336_v25 = vpop.f32.mrf.mxu2  ;;  %v2640_v13 = vpop.f32.mrf.mxu0  ;;  %v6412_v49 = vor.u32 %v7215_v37, %v6409_v51  ;;  %v7213_v37 = vld [vmem:[%s11711_s4 + $0x194] sm:$0xf]  ;;  %v6400_v51 = vor.u32 %v7214_v40, %v6399_v60  ;;  %v6391_v60 = vld [vmem:[%s11711_s4 + $0x180] sm:$0xf]  ;;  %v7212_v40 = vld [vmem:[%s11711_s4 + $0x184] sm:$0xf0] }
 0x257   :  { %v10347_v1 = vpop.f32.mrf.mxu3  ;;  %v2653_v2 = vpop.f32.mrf.mxu1  ;;  %3284 = vmatpush.bf16.msrb.mxu2 %v6508_v11  ;;  %v7173_v13 = vld [vmem:[%s11711_s4 + $0x54] sm:$0xf] }
 0x258   :  { %3089 = vmatpush.bf16.msra.mxu3 %v6412_v49  ;;  %v6500_v11 = vor.u32 %v7173_v13, %v6497_v32  ;;  %v6401_v49 = vld [vmem:[%s11711_s4 + $0x198] sm:$0xf0]  ;;  %v7168_v13 = vld [vmem:[%s11711_s4 + $0x24] sm:$0xf0]  ;;  %v7171_v32 = vld [vmem:[%s11711_s4 + $0x44] sm:$0xf]  ;;  %3064 = vmatpush.bf16.msra.mxu1 %v6400_v51 }
 0x259   :  { %3260 = vmatpush.bf16.msrb.mxu0 %v6488_v41  ;;  %v6480_v41 = vor.u32 %v7170_v19, %v6479_v27  ;;  %v6404_v27 = vor.u32 %v7213_v37, %v6401_v49  ;;  %v6471_v19 = vld [vmem:[%s11711_s4 + $0x20] sm:$0xf]  ;;  %v7211_v37 = vld [vmem:[%s11711_s4 + $0x184] sm:$0xf]  ;;  %v6393_v51 = vld [vmem:[%s11711_s4 + $0x188] sm:$0xf0] }
 0x25a   :  { %v6575_v49 = vld [vmem:[%s11711_s4 + $0xf0] sm:$0xf] }
 0x25b   :  { %3285 = vmatpush.bf16.msrb.mxu2 %v6500_v11 }
 0x25c   :  { %3090 = vmatpush.bf16.msra.mxu3 %v6404_v27  ;;  %v7194_v27 = vld [vmem:[%s11711_s4 + $0xf4] sm:$0xf0] }
 0x25d   :  { %3261 = vmatpush.bf16.msrb.mxu0 %v6480_v41  ;;  %v6472_v41 = vor.u32 %v7168_v13, %v6471_v19  ;;  %v6396_v19 = vor.u32 %v7211_v37, %v6393_v51  ;;  %v6576_v13 = vor.u32 %v7194_v27, %v6575_v49  ;;  %v6481_v37 = vld [vmem:[%s11711_s4 + $0x38] sm:$0xf0]  ;;  %v7192_v27 = vld [vmem:[%s11711_s4 + $0xe4] sm:$0xf0] }
 0x25e   :  { %v2666_v2 = vpop.f32.mrf.mxu2 }
 0x25f   :  { %v2679_v22 = vpop.f32.mrf.mxu3  ;;  %v6489_v2 = vld [vmem:[%s11711_s4 + $0x48] sm:$0xf0] }
 0x260   :  { %v6492_v11 = vor.u32 %v7171_v32, %v6489_v2  ;;  %v6392_v22 = vor.u32 %v7212_v40, %v6391_v60  ;;  %v7193_v32 = vld [vmem:[%s11711_s4 + $0xf4] sm:$0xf]  ;;  %v6463_v2 = vld [vmem:[%s11711_s4 + $0x10] sm:$0xf]  ;;  %3091 = vmatpush.bf16.msra.mxu3 %v6396_v19  ;;  %v6569_v19 = vld [vmem:[%s11711_s4 + $0xe8] sm:$0xf0] }
 0x261   :  { %3262 = vmatpush.bf16.msrb.mxu0 %v6472_v41  ;;  %v6577_v41 = vld [vmem:[%s11711_s4 + $0xf8] sm:$0xf0]  ;;  %v7169_v40 = vld [vmem:[%s11711_s4 + $0x34] sm:$0xf] }
 0x262   :  { %3286 = vmatpush.bf16.msrb.mxu2 %v6492_v11  ;;  %3065 = vmatpush.bf16.msra.mxu1 %v6392_v22  ;;  %v6580_v60 = vor.u32 %v7193_v32, %v6577_v41  ;;  %v7166_v11 = vld [vmem:[%s11711_s4 + $0x14] sm:$0xf0]  ;;  %v6484_v49 = vor.u32 %v7169_v40, %v6481_v37  ;;  %v6567_v22 = vld [vmem:[%s11711_s4 + $0xe0] sm:$0xf]  ;;  %v7191_v32 = vld [vmem:[%s11711_s4 + $0xe4] sm:$0xf] }
 0x263   :  { %v6464_v51 = vor.u32 %v7166_v11, %v6463_v2  ;;  %v6568_v41 = vor.u32 %v7192_v27, %v6567_v22  ;;  %v7164_v2 = vld [vmem:[%s11711_s4 + $0x4] sm:$0xf0]  ;;  %v6572_v11 = vor.u32 %v7191_v32, %v6569_v19  ;;  %v6473_v37 = vld [vmem:[%s11711_s4 + $0x28] sm:$0xf0]  ;;  %v2600_v27 = vadd.f32 %v10170_v15, %v10168_v52  ;;  %v7189_v32 = vld [vmem:[%s11711_s4 + $0xd4] sm:$0xf] }
 0x264   :  { %3296 = vmatpush.bf16.msrb.mxu3 %v6580_v60  ;;  %v7167_v60 = vld [vmem:[%s11711_s4 + $0x24] sm:$0xf]  ;;  %v6561_v52 = vld [vmem:[%s11711_s4 + $0xd8] sm:$0xf0]  ;;  %v7165_v15 = vld [vmem:[%s11711_s4 + $0x14] sm:$0xf] }
 0x265   :  { %3263 = vmatpush.bf16.msrb.mxu0 %v6464_v51  ;;  %v6476_v22 = vor.u32 %v7167_v60, %v6473_v37  ;;  %v6559_v51 = vld [vmem:[%s11711_s4 + $0xd0] sm:$0xf]  ;;  %v7187_v60 = vld [vmem:[%s11711_s4 + $0xc4] sm:$0xf] }
 0x266   :  { %3270 = vmatpush.bf16.msrb.mxu1 %v6576_v13  ;;  %v6455_v13 = vld [vmem:[%s11711_s4] sm:$0xf]  ;;  %3287 = vmatpush.bf16.msrb.mxu2 %v6484_v49  ;;  %v7190_v49 = vld [vmem:[%s11711_s4 + $0xd4] sm:$0xf0] }
 0x267   :  { %v6456_v40 = vor.u32 %v7164_v2, %v6455_v13  ;;  %v6560_v19 = vor.u32 %v7190_v49, %v6559_v51  ;;  %v6564_v13 = vor.u32 %v7189_v32, %v6561_v52  ;;  %v2613_v51 = vadd.f32 %v10181_v26, %v2600_v27  ;;  %v6543_v26 = vld [vmem:[%s11711_s4 + $0xb0] sm:$0xf]  ;;  %v7186_v27 = vld [vmem:[%s11711_s4 + $0xb4] sm:$0xf0] }
 0x268   :  { %3297 = vmatpush.bf16.msrb.mxu3 %v6572_v11  ;;  %v6551_v11 = vld [vmem:[%s11711_s4 + $0xc0] sm:$0xf] }
 0x269   :  { %3264 = vmatpush.bf16.msrb.mxu0 %v6456_v40  ;;  %v7188_v40 = vld [vmem:[%s11711_s4 + $0xc4] sm:$0xf0] }
 0x26a   :  { %3271 = vmatpush.bf16.msrb.mxu1 %v6568_v41  ;;  %3288 = vmatpush.bf16.msrb.mxu2 %v6476_v22  ;;  %v6465_v41 = vld [vmem:[%s11711_s4 + $0x18] sm:$0xf0]  ;;  %v6552_v37 = vor.u32 %v7188_v40, %v6551_v11  ;;  %v6553_v22 = vld [vmem:[%s11711_s4 + $0xc8] sm:$0xf0]  ;;  %v2626_v40 = vadd.f32 %v10186_v4, %v2613_v51 }
 0x26b   :  { %v6468_v2 = vor.u32 %v7165_v15, %v6465_v41  ;;  %v6556_v32 = vor.u32 %v7187_v60, %v6553_v22  ;;  %v7163_v15 = vld [vmem:[%s11711_s4 + $0x4] sm:$0xf]  ;;  %v6544_v60 = vor.u32 %v7186_v27, %v6543_v26  ;;  %v6545_v4 = vld [vmem:[%s11711_s4 + $0xb8] sm:$0xf0] }
 0x26c   :  { %3298 = vmatpush.bf16.msrb.mxu3 %v6564_v13  ;;  %v7185_v13 = vld [vmem:[%s11711_s4 + $0xb4] sm:$0xf]  ;;  %v7183_v26 = vld [vmem:[%s11711_s4 + $0xa4] sm:$0xf] }
 0x26d   :  { %v6548_v51 = vor.u32 %v7185_v13, %v6545_v4 }
 0x26e   :  { %3272 = vmatpush.bf16.msrb.mxu1 %v6560_v19  ;;  %v2743_v49 = vpop.f32.mrf.mxu0  ;;  %3289 = vmatpush.bf16.msrb.mxu2 %v6468_v2  ;;  %v6457_v19 = vld [vmem:[%s11711_s4 + $0x8] sm:$0xf0] }
 0x26f   :  { %v2756_v52 = vpop.f32.mrf.mxu1  ;;  %v6460_v11 = vor.u32 %v7163_v15, %v6457_v19 }
 0x270   :  { %v2757_v41 = vadd.f32 %v2756_v52, %v2743_v49  ;;  %3299 = vmatpush.bf16.msrb.mxu3 %v6556_v32  ;;  %v10527_v49 = vld [vmem:[%s11712_s2] sm:$0x3]  ;;  %v2681_v52 = vadd.f32 %v2626_v40, %v10138_v38  ;;  %v6537_v38 = vld [vmem:[%s11711_s4 + $0xa8] sm:$0xf0] }
 0x271   :  { %v10532_v32 = vld [vmem:[%s11713_s3] sm:$0x3]  ;;  %v10548_v40 = vperm.slane %v10527_v49, 0 }
 0x272   :  { %3273 = vmatpush.bf16.msrb.mxu1 %v6552_v37  ;;  %3290 = vmatpush.bf16.msrb.mxu2 %v6460_v11  ;;  %v7184_v11 = vld [vmem:[%s11711_s4 + $0xa4] sm:$0xf0]  ;;  %v10551_v4 = vperm.slane %v10532_v32, 0 }
 0x273   :  { %12669 = vst [vmem:[#allocation208_spill] sm:$0xff] %v10548_v40 }
 0x274   :  { %3300 = vmatpush.bf16.msrb.mxu3 %v6548_v51  ;;  %12670 = vst [vmem:[#allocation209_spill] sm:$0xff] %v10551_v4  ;;  %v7182_v51 = vld [vmem:[%s11711_s4 + $0x94] sm:$0xf0] }
 0x276   :  { %v2769_v2 = vpop.f32.mrf.mxu2  ;;  %3274 = vmatpush.bf16.msrb.mxu1 %v6544_v60  ;;  %v2745_v19 = vpop.f32.mrf.mxu0  ;;  %v6540_v60 = vor.u32 %v7183_v26, %v6537_v38  ;;  %v6519_v38 = vld [vmem:[%s11711_s4 + $0x80] sm:$0xf] }
 0x277   :  { %v2770_v37 = vadd.f32 %v2769_v2, %v2757_v41  ;;  %v2782_v22 = vpop.f32.mrf.mxu3  ;;  %v6535_v41 = vld [vmem:[%s11711_s4 + $0xa0] sm:$0xf]  ;;  %v2758_v27 = vpop.f32.mrf.mxu1 }
 0x278   :  { %v6536_v13 = vor.u32 %v7184_v11, %v6535_v41  ;;  %3301 = vmatpush.bf16.msrb.mxu3 %v6540_v60  ;;  %v6529_v41 = vld [vmem:[%s11711_s4 + $0x98] sm:$0xf0]  ;;  %v7179_v60 = vld [vmem:[%s11711_s4 + $0x84] sm:$0xf] }
 0x279   :  { %v2783_v15 = vadd.f32 %v2782_v22, %v2770_v37  ;;  %v6527_v22 = vld [vmem:[%s11711_s4 + $0x90] sm:$0xf] }
 0x27a   :  { %3275 = vmatpush.bf16.msrb.mxu1 %v6536_v13  ;;  %v6528_v19 = vor.u32 %v7182_v51, %v6527_v22 }
 0x27b   :  { %v2838_v2 = vadd.f32 %v2783_v15, %v2681_v52  ;;  %v7181_v52 = vld [vmem:[%s11711_s4 + $0x94] sm:$0xf] }
 0x27c   :  { %v6532_v27 = vor.u32 %v7181_v52, %v6529_v41 }
 0x27d   :  { %v2840_v37 = vmul.f32 %v2838_v2, %v10548_v40  ;;  %v7180_v2 = vld [vmem:[%s11711_s4 + $0x84] sm:$0xf0] }
 0x27e   :  { %v2771_v15 = vpop.f32.mrf.mxu2  ;;  %3276 = vmatpush.bf16.msrb.mxu1 %v6528_v19  ;;  %3302 = vmatpush.bf16.msrb.mxu3 %v6532_v27  ;;  %v6520_v51 = vor.u32 %v7180_v2, %v6519_v38  ;;  %v2182_v19 = vmul.f32 %v10548_v40, %v9950_v50  ;;  %v12689_v40 = vld [vmem:[#allocation127_spill] sm:$0xff] }
 0x27f   :  { %v2842_v11 = vadd.f32 %v2840_v37, %v10551_v4  ;;  %v2784_v26 = vpop.f32.mrf.mxu3  ;;  %v6521_v37 = vld [vmem:[%s11711_s4 + $0x88] sm:$0xf0] }
 0x280   :  { %v6524_v52 = vor.u32 %v7179_v60, %v6521_v37  ;;  %v2190_v41 = vadd.f32 %v10551_v4, %v2182_v19  ;;  %v2652_v26 = vadd.f32 %v10313_v10, %v10302_v6  ;;  %v12688_v4 = vld [vmem:[#allocation38_spill] sm:$0xff] }
 0x281   :  { %vm2844_vm1 = vcmp.ge.f32.partialorder %v2842_v11, 0.0  ;;  %v2846_v13 = vmul.f32 0.1, %v2842_v11 }
 0x282   :  { %3277 = vmatpush.bf16.msrb.mxu1 %v6520_v51  ;;  %3303 = vmatpush.bf16.msrb.mxu3 %v6524_v52  ;;  %vm2192_vm2 = vcmp.ge.f32.partialorder %v2190_v41, 0.0 }
 0x283   :  { %v2848_v22 = vsel %vm2844_vm1, %v2842_v11, %v2846_v13  ;;  %v2194_v11 = vmul.f32 0.1, %v2190_v41  ;;  %v2665_v13 = vadd.f32 %v10336_v25, %v2652_v26 }
 0x284   :  { %v2850_v15 = vpack.c.bf16 %v2848_v22, %v2848_v22 }
 0x285   :  { %v2196_v38 = vsel %vm2192_vm2, %v2190_v41, %v2194_v11  ;;  %v2678_v60 = vadd.f32 %v10347_v1, %v2665_v13  ;;  %v10598_v1 = vperm.slane %v10527_v49, 1  ;;  %v10601_v41 = vperm.slane %v10532_v32, 1  ;;  %v3310_v49 = vld.sshfl [vmem:[#allocation1] sm:$0xff pattern:$0x73625140] }
 0x286   :  { %3053 = vmatmul.bf16.vlgmr.msra.gmra.mxu0 %v2850_v15  ;;  %3079 = vmatmul.bf16.vlgmr.msra.gmra.mxu2 %v2850_v15  ;;  %v2198_v6 = vpack.c.bf16 %v2196_v38, %v2196_v38  ;;  %v3328_v13 = vunpack.c.l.b16 %v3310_v49  ;;  %v3320_v38 = vld.sshfl [vmem:[#allocation1 + $0x20] sm:$0xff pattern:$0x73625140]  ;;  %v12682_v49 = vld [vmem:[#allocation8_spill] sm:$0xff] }
 0x287   :  { %3352 = vmatpush.bf16.msra.mxu0 %v7346_v3  ;;  %3378 = vmatpush.bf16.msra.mxu2 %v7359_v8  ;;  %v2682_v25 = vadd.f32 %v2678_v60, %v10154_v47  ;;  %12671 = vst [vmem:[#allocation210_spill] sm:$0xff] %v10598_v1  ;;  %v3332_v60 = vunpack.c.l.b16 %v3320_v38  ;;  %v12684_v38 = vld [vmem:[#allocation34_spill] sm:$0xff] }
 0x288   :  { %12672 = vst [vmem:[#allocation211_spill] sm:$0xff] %v10601_v41 }
 0x28b   :  { %3353 = vmatpush.bf16.msra.mxu0 %v7384_v16  ;;  %3379 = vmatpush.bf16.msra.mxu2 %v7398_v21 }
 0x28e   :  { %v2795_v27 = vpop.f32.mrf.mxu0 }
 0x28f   :  { %v2808_v50 = vpop.f32.mrf.mxu1  ;;  %3354 = vmatpush.bf16.msra.mxu0 %v7421_v29  ;;  %3380 = vmatpush.bf16.msra.mxu2 %v7436_v34 }
 0x290   :  { %v2809_v2 = vadd.f32 %v2808_v50, %v2795_v27 }
 0x293   :  { %3355 = vmatpush.bf16.msra.mxu0 %v7466_v44  ;;  %3381 = vmatpush.bf16.msra.mxu2 %v7472_v46 }
 0x296   :  { %v2821_v10 = vpop.f32.mrf.mxu2  ;;  %v2797_v51 = vpop.f32.mrf.mxu0  ;;  %3265 = vmatmul.bf16.vlgmr.msrb.gmra.mxu0 %v2198_v6  ;;  %3291 = vmatmul.bf16.vlgmr.msrb.gmra.mxu2 %v2198_v6  ;;  %v3336_v6 = vrot.slane %v3328_v13, 1  ;;  %v3314_v13 = vld.sshfl [vmem:[#allocation1 + $0x10] sm:$0xff pattern:$0x73625140] }
 0x297   :  { %v2822_v37 = vadd.f32 %v2821_v10, %v2809_v2  ;;  %v2834_v22 = vpop.f32.mrf.mxu3  ;;  %v2810_v52 = vpop.f32.mrf.mxu1  ;;  %3356 = vmatpush.bf16.msra.mxu0 %v7502_v56  ;;  %3382 = vmatpush.bf16.msra.mxu2 %v7508_v58  ;;  %v2183_v10 = vmul.f32 %v10598_v1, %v10007_v42  ;;  %v12674_v51 = vld [vmem:[#allocation4_spill] sm:$0xff]  ;;  %v12801_v58 = vld [vmem:[#allocation121_spill] sm:$0xff] }
 0x299   :  { %v2835_v15 = vadd.f32 %v2834_v22, %v2822_v37  ;;  %v3337_v37 = vsel %vm192_vm0, %v3332_v60, %v3336_v6  ;;  %v12673_v22 = vld [vmem:[#allocation3_spill] sm:$0xff]  ;;  %v2191_v42 = vadd.f32 %v10601_v41, %v2183_v10 }
 0x29a   :  { %v10616_v52 = vpack.c.b16 %v3337_v37, %v3337_v37  ;;  %v3324_v6 = vld.sshfl [vmem:[#allocation1 + $0x30] sm:$0xff pattern:$0x73625140] }
 0x29b   :  { %v2839_v19 = vadd.f32 %v2835_v15, %v2682_v25  ;;  %3357 = vmatpush.bf16.msra.mxu0 %v7538_v5  ;;  %3383 = vmatpush.bf16.msra.mxu2 %v7544_v9  ;;  %v12675_v25 = vld [vmem:[#allocation24_spill] sm:$0xff]  ;;  %v12676_v15 = vld [vmem:[#allocation26_spill] sm:$0xff]  ;;  %vm2193_vm4 = vcmp.ge.f32.partialorder %v2191_v42, 0.0  ;;  %v3334_v10 = vunpack.c.l.b16 %v3324_v6  ;;  %v12691_v6 = vld [vmem:[#allocation11_spill] sm:$0xff] }
 0x29d   :  { %v2841_v26 = vmul.f32 %v2839_v19, %v10598_v1  ;;  %v12677_v19 = vld [vmem:[#allocation5_spill] sm:$0xff]  ;;  %v12686_v1 = vld [vmem:[#allocation10_spill] sm:$0xff] }
 0x29e   :  { %v2823_v11 = vpop.f32.mrf.mxu2 }
 0x29f   :  { %v2843_v47 = vadd.f32 %v2841_v26, %v10601_v41  ;;  %v2836_v27 = vpop.f32.mrf.mxu3  ;;  %3358 = vmatpush.bf16.msra.mxu0 %v7574_v23  ;;  %3384 = vmatpush.bf16.msra.mxu2 %v7586_v28  ;;  %v12678_v26 = vld [vmem:[#allocation6_spill] sm:$0xff]  ;;  %v12679_v11 = vld [vmem:[#allocation28_spill] sm:$0xff]  ;;  %v12685_v41 = vld [vmem:[#allocation9_spill] sm:$0xff] }
 0x2a0   :  { %v2195_v27 = vmul.f32 0.1, %v2191_v42 }
 0x2a1   :  { %vm2845_vm3 = vcmp.ge.f32.partialorder %v2843_v47, 0.0  ;;  %v2847_v50 = vmul.f32 0.1, %v2843_v47 }
 0x2a2   :  { %v2197_v60 = vsel %vm2193_vm4, %v2191_v42, %v2195_v27  ;;  %v3326_v42 = vld.sshfl [vmem:[#allocation1 + $0x38] sm:$0xff pattern:$0x73625140]  ;;  %v3322_v27 = vld.sshfl [vmem:[#allocation1 + $0x28] sm:$0xff pattern:$0x73625140] }
 0x2a3   :  { %v2849_v32 = vsel %vm2845_vm3, %v2843_v47, %v2847_v50  ;;  %3359 = vmatpush.bf16.msra.mxu0 %v12457_v45  ;;  %3385 = vmatpush.bf16.msra.mxu2 %v12459_v59  ;;  %v12680_v47 = vld [vmem:[#allocation30_spill] sm:$0xff]  ;;  %v12681_v50 = vld [vmem:[#allocation7_spill] sm:$0xff] }
 0x2a4   :  { %v2851_v2 = vpack.c.bf16 %v2849_v32, %v2849_v32  ;;  %v12683_v32 = vld [vmem:[#allocation32_spill] sm:$0xff] }
 0x2a6   :  { %3066 = vmatmul.bf16.vlgmr.msra.gmra.mxu1 %v2851_v2  ;;  %3092 = vmatmul.bf16.vlgmr.msra.gmra.mxu3 %v2851_v2  ;;  %v3330_v2 = vunpack.c.l.b16 %v3314_v13 }
 0x2a7   :  { %3365 = vmatpush.bf16.msra.mxu1 %v12673_v22  ;;  %3391 = vmatpush.bf16.msra.mxu3 %v12674_v51 }
 0x2a8   :  { %3404 = vmatpush.bf16.msrb.mxu0 %v12675_v25  ;;  %3430 = vmatpush.bf16.msrb.mxu2 %v12676_v15  ;;  %v3340_v37 = vrot.slane %v3330_v2, 1  ;;  %v2199_v15 = vpack.c.bf16 %v2197_v60, %v2197_v60  ;;  %v12687_v25 = vld [vmem:[#allocation36_spill] sm:$0xff]  ;;  %v12690_v2 = vld [vmem:[#allocation129_spill] sm:$0xff] }
 0x2a9   :  { %3360 = vmatmul.bf16.vlgmr.msra.gmra.mxu0 %v10616_v52  ;;  %3466 = vst [vmem:[#allocation1 + $0x20] ss:$4 sm:$0xff] %v12690_v2  ;;  %v12693_v60 = vld [vmem:[#allocation40_spill] sm:$0xff] }
 0x2ab   :  { %3366 = vmatpush.bf16.msra.mxu1 %v12677_v19  ;;  %3392 = vmatpush.bf16.msra.mxu3 %v12678_v26 }
 0x2ac   :  { %3405 = vmatpush.bf16.msrb.mxu0 %v12679_v11  ;;  %3431 = vmatpush.bf16.msrb.mxu2 %v12680_v47  ;;  %v3316_v47 = vld.sshfl [vmem:[#allocation1 + $0x18] sm:$0xff pattern:$0x73625140]  ;;  %v3312_v11 = vld.sshfl [vmem:[#allocation1 + $0x8] sm:$0xff pattern:$0x73625140] }
 0x2ad   :  { %3456 = vst [vmem:[#allocation1] ss:$4 sm:$0xff] %v12689_v40  ;;  %v3329_v59 = vunpack.c.l.b16 %v3312_v11  ;;  %v12696_v40 = vld [vmem:[#allocation16_spill] sm:$0xff]  ;;  %v12702_v11 = vld [vmem:[#allocation50_spill] sm:$0xff] }
 0x2af   :  { %3367 = vmatpush.bf16.msra.mxu1 %v12681_v50  ;;  %3393 = vmatpush.bf16.msra.mxu3 %v12682_v49  ;;  %v3338_v28 = vrot.slane %v3329_v59, 1  ;;  %v12705_v59 = vld [vmem:[#allocation25_spill] sm:$0xff]  ;;  %v12736_v49 = vld [vmem:[#allocation55_spill] sm:$0xff] }
 0x2b0   :  { %3406 = vmatpush.bf16.msrb.mxu0 %v12683_v32  ;;  %3432 = vmatpush.bf16.msrb.mxu2 %v12684_v38  ;;  %v3341_v32 = vsel %vm192_vm0, %v3334_v10, %v3340_v37  ;;  %v12692_v38 = vld [vmem:[#allocation13_spill] sm:$0xff]  ;;  %v12695_v10 = vld [vmem:[#allocation14_spill] sm:$0xff]  ;;  %v3335_v37 = vunpack.c.l.b16 %v3326_v42 }
 0x2b1   :  { %v3346_v13 = vpack.c.b16 %v3341_v32, %v3341_v32  ;;  %v12697_v32 = vld [vmem:[#allocation44_spill] sm:$0xff]  ;;  %v12799_v50 = vld [vmem:[#allocation117_spill] sm:$0xff] }
 0x2b3   :  { %3368 = vmatpush.bf16.msra.mxu1 %v12685_v41  ;;  %3394 = vmatpush.bf16.msra.mxu3 %v12686_v1 }
 0x2b4   :  { %3407 = vmatpush.bf16.msrb.mxu0 %v12687_v25  ;;  %3433 = vmatpush.bf16.msrb.mxu2 %v12688_v4  ;;  %v12694_v25 = vld [vmem:[#allocation42_spill] sm:$0xff]  ;;  %v3331_v4 = vunpack.c.l.b16 %v3316_v47  ;;  %v3463_v1 = vld.sshfl [vmem:[#allocation1 + $0x18] sm:$0xff pattern:$0x73625140] }
 0x2b5   :  { %3386 = vmatmul.bf16.vlgmr.msra.gmra.mxu2 %v3346_v13 }
 0x2b6   :  { %3278 = vmatmul.bf16.vlgmr.msrb.gmra.mxu1 %v2199_v15  ;;  %3304 = vmatmul.bf16.vlgmr.msrb.gmra.mxu3 %v2199_v15  ;;  %v12698_v15 = vld [vmem:[#allocation46_spill] sm:$0xff]  ;;  %v3342_v2 = vrot.slane %v3331_v4, 1 }
 0x2b7   :  { %3369 = vmatpush.bf16.msra.mxu1 %v12691_v6  ;;  %3395 = vmatpush.bf16.msra.mxu3 %v12692_v38  ;;  %v3333_v6 = vunpack.c.l.b16 %v3322_v27  ;;  %v12699_v38 = vld [vmem:[#allocation17_spill] sm:$0xff]  ;;  %v12706_v27 = vld [vmem:[#allocation27_spill] sm:$0xff] }
 0x2b8   :  { %3408 = vmatpush.bf16.msrb.mxu0 %v12693_v60  ;;  %3434 = vmatpush.bf16.msrb.mxu2 %v12694_v25  ;;  %v12700_v60 = vld [vmem:[#allocation19_spill] sm:$0xff]  ;;  %v12701_v25 = vld [vmem:[#allocation48_spill] sm:$0xff]  ;;  %v3343_v47 = vsel %vm192_vm0, %v3335_v37, %v3342_v2  ;;  %v12710_v37 = vld [vmem:[#allocation58_spill] sm:$0xff] }
 0x2b9   :  { %v10653_v42 = vpack.c.b16 %v3343_v47, %v3343_v47  ;;  %v12714_v2 = vld [vmem:[#allocation62_spill] sm:$0xff]  ;;  %v12715_v47 = vld [vmem:[#allocation33_spill] sm:$0xff] }
 0x2bb   :  { %3370 = vmatpush.bf16.msra.mxu1 %v12695_v10  ;;  %3396 = vmatpush.bf16.msra.mxu3 %v12696_v40  ;;  %v3339_v40 = vsel %vm192_vm0, %v3333_v6, %v3338_v28  ;;  %v12703_v10 = vld [vmem:[#allocation21_spill] sm:$0xff]  ;;  %v12712_v6 = vld [vmem:[#allocation31_spill] sm:$0xff] }
 0x2bc   :  { %3409 = vmatpush.bf16.msrb.mxu0 %v12697_v32  ;;  %3435 = vmatpush.bf16.msrb.mxu2 %v12698_v15  ;;  %v12704_v32 = vld [vmem:[#allocation23_spill] sm:$0xff]  ;;  %v10655_v4 = vpack.c.b16 %v3339_v40, %v3339_v40  ;;  %v12707_v15 = vld [vmem:[#allocation52_spill] sm:$0xff]  ;;  %v12711_v28 = vld [vmem:[#allocation29_spill] sm:$0xff] }
 0x2bd   :  { %v12713_v40 = vld [vmem:[#allocation60_spill] sm:$0xff] }
 0x2bf   :  { %3371 = vmatpush.bf16.msra.mxu1 %v12699_v38  ;;  %3397 = vmatpush.bf16.msra.mxu3 %v12700_v60  ;;  %v12730_v60 = vld [vmem:[#allocation78_spill] sm:$0xff] }
 0x2c0   :  { %3410 = vmatpush.bf16.msrb.mxu0 %v12701_v25  ;;  %3436 = vmatpush.bf16.msrb.mxu2 %v12702_v11  ;;  %v12708_v25 = vld [vmem:[#allocation54_spill] sm:$0xff]  ;;  %v12709_v11 = vld [vmem:[#allocation56_spill] sm:$0xff] }
 0x2c1   :  { %v3459_v38 = vld.sshfl [vmem:[#allocation1 + $0x8] sm:$0xff pattern:$0x73625140] }
 0x2c3   :  { %3372 = vmatpush.bf16.msra.mxu1 %v12703_v10  ;;  %3398 = vmatpush.bf16.msra.mxu3 %v12704_v32  ;;  %v3473_v32 = vld.sshfl [vmem:[#allocation1 + $0x38] sm:$0xff pattern:$0x73625140] }
 0x2c4   :  { %3411 = vmatpush.bf16.msrb.mxu0 %v12707_v15  ;;  %3437 = vmatpush.bf16.msrb.mxu2 %v12708_v25  ;;  %v12718_v25 = vld [vmem:[#allocation66_spill] sm:$0xff]  ;;  %v12719_v15 = vld [vmem:[#allocation37_spill] sm:$0xff]  ;;  %v12729_v10 = vld [vmem:[#allocation76_spill] sm:$0xff] }
 0x2c6   :  { %3399 = vmatmul.bf16.vlgmr.msra.gmra.mxu3 %v10653_v42  ;;  %3373 = vmatmul.bf16.vlgmr.msra.gmra.mxu1 %v10655_v4 }
 0x2c7   :  { %3417 = vmatpush.bf16.msrb.mxu1 %v12705_v59  ;;  %3443 = vmatpush.bf16.msrb.mxu3 %v12706_v27  ;;  %v12727_v27 = vld [vmem:[#allocation45_spill] sm:$0xff]  ;;  %v3469_v59 = vld.sshfl [vmem:[#allocation1 + $0x28] sm:$0xff pattern:$0x73625140] }
 0x2c8   :  { %3499 = vmatpush.bf16.msra.mxu0 %v12709_v11  ;;  %3525 = vmatpush.bf16.msra.mxu2 %v12710_v37  ;;  %v12716_v11 = vld [vmem:[#allocation35_spill] sm:$0xff]  ;;  %v12717_v37 = vld [vmem:[#allocation64_spill] sm:$0xff] }
 0x2c9   :  { %3412 = vmatmul.bf16.vlgmr.msrb.gmra.mxu0 %v10616_v52  ;;  %3438 = vmatmul.bf16.vlgmr.msrb.gmra.mxu2 %v3346_v13  ;;  %v12722_v52 = vld [vmem:[#allocation70_spill] sm:$0xff]  ;;  %v12723_v13 = vld [vmem:[#allocation41_spill] sm:$0xff] }
 0x2cb   :  { %3418 = vmatpush.bf16.msrb.mxu1 %v12711_v28  ;;  %3444 = vmatpush.bf16.msrb.mxu3 %v12712_v6  ;;  %v12720_v28 = vld [vmem:[#allocation39_spill] sm:$0xff]  ;;  %v12721_v6 = vld [vmem:[#allocation68_spill] sm:$0xff] }
 0x2cc   :  { %3500 = vmatpush.bf16.msra.mxu0 %v12713_v40  ;;  %3526 = vmatpush.bf16.msra.mxu2 %v12714_v2  ;;  %v12724_v40 = vld [vmem:[#allocation43_spill] sm:$0xff]  ;;  %v3467_v2 = vld.sshfl [vmem:[#allocation1 + $0x20] sm:$0xff pattern:$0x73625140] }
 0x2cf   :  { %3419 = vmatpush.bf16.msrb.mxu1 %v12715_v47  ;;  %3445 = vmatpush.bf16.msrb.mxu3 %v12716_v11  ;;  %v3471_v47 = vld.sshfl [vmem:[#allocation1 + $0x30] sm:$0xff pattern:$0x73625140] }
 0x2d0   :  { %3501 = vmatpush.bf16.msra.mxu0 %v12717_v37  ;;  %3527 = vmatpush.bf16.msra.mxu2 %v12718_v25  ;;  %v6581_v37 = vld [vmem:[%s11710_s0 + $0x10] sm:$0x55] }
 0x2d1   :  { %v12725_v25 = vld [vmem:[#allocation72_spill] sm:$0xff] }
 0x2d2   :  { %v3461_v11 = vld.sshfl [vmem:[#allocation1 + $0x10] sm:$0xff pattern:$0x73625140] }
 0x2d3   :  { %3420 = vmatpush.bf16.msrb.mxu1 %v12719_v15  ;;  %3446 = vmatpush.bf16.msrb.mxu3 %v12720_v28  ;;  %v6582_v15 = vld [vmem:[%s11710_s0 + $0x28] sm:$0x55] }
 0x2d4   :  { %3502 = vmatpush.bf16.msra.mxu0 %v12721_v6  ;;  %3528 = vmatpush.bf16.msra.mxu2 %v12722_v52  ;;  %v12726_v28 = vld [vmem:[#allocation74_spill] sm:$0xff]  ;;  %v3479_v52 = vunpack.c.l.b16 %v3467_v2  ;;  %3618 = vst [vmem:[#allocation1 + $0x20] ss:$4 sm:$0xff] %v6582_v15  ;;  %v12731_v2 = vld [vmem:[#allocation49_spill] sm:$0xff] }
 0x2d5   :  { %v3457_v6 = vld.sshfl [vmem:[#allocation1] sm:$0xff pattern:$0x73625140] }
 0x2d6   :  { %v3483_v41 = vrot.slane %v3479_v52, 7  ;;  %3607 = vst [vmem:[#allocation1] ss:$4 sm:$0xff] %v6581_v37  ;;  %v12739_v37 = vld [vmem:[#allocation84_spill] sm:$0xff] }
 0x2d7   :  { %3421 = vmatpush.bf16.msrb.mxu1 %v12723_v13  ;;  %3447 = vmatpush.bf16.msrb.mxu3 %v12724_v40  ;;  %v3481_v13 = vunpack.c.l.b16 %v3471_v47  ;;  %v12728_v40 = vld [vmem:[#allocation47_spill] sm:$0xff] }
 0x2d8   :  { %3503 = vmatpush.bf16.msra.mxu0 %v12725_v25  ;;  %3529 = vmatpush.bf16.msra.mxu2 %v12726_v28  ;;  %v3475_v25 = vunpack.c.l.b16 %v3457_v6  ;;  %v3477_v28 = vunpack.c.l.b16 %v3461_v11  ;;  %v12732_v47 = vld [vmem:[#allocation51_spill] sm:$0xff]  ;;  %v12737_v6 = vld [vmem:[#allocation57_spill] sm:$0xff] }
 0x2d9   :  { %v3487_v9 = vrot.slane %v3481_v13, 7  ;;  %v12738_v11 = vld [vmem:[#allocation59_spill] sm:$0xff]  ;;  %v12740_v13 = vld [vmem:[#allocation86_spill] sm:$0xff] }
 0x2da   :  { %v3484_v15 = vsel %vm192_vm0, %v3483_v41, %v3475_v25  ;;  %v12743_v41 = vld [vmem:[#allocation61_spill] sm:$0xff]  ;;  %v12744_v25 = vld [vmem:[#allocation63_spill] sm:$0xff] }
 0x2db   :  { %3422 = vmatpush.bf16.msrb.mxu1 %v12727_v27  ;;  %3448 = vmatpush.bf16.msrb.mxu3 %v12728_v40  ;;  %v12733_v27 = vld [vmem:[#allocation80_spill] sm:$0xff]  ;;  %v12734_v40 = vld [vmem:[#allocation82_spill] sm:$0xff]  ;;  %v3491_v52 = vpack.c.b16 %v3484_v15, %v3484_v15 }
 0x2dc   :  { %3504 = vmatpush.bf16.msra.mxu0 %v12729_v10  ;;  %3530 = vmatpush.bf16.msra.mxu2 %v12730_v60  ;;  %v3488_v10 = vsel %vm192_vm0, %v3487_v9, %v3477_v28  ;;  %v12735_v60 = vld [vmem:[#allocation53_spill] sm:$0xff]  ;;  %v12742_v9 = vld [vmem:[#allocation90_spill] sm:$0xff]  ;;  %v12745_v28 = vld [vmem:[#allocation92_spill] sm:$0xff] }
 0x2dd   :  { %v12746_v15 = vld [vmem:[#allocation94_spill] sm:$0xff] }
 0x2df   :  { %3423 = vmatpush.bf16.msrb.mxu1 %v12731_v2  ;;  %3449 = vmatpush.bf16.msrb.mxu3 %v12732_v47  ;;  %v12741_v47 = vld [vmem:[#allocation88_spill] sm:$0xff]  ;;  %v3621_v2 = vld.sshfl [vmem:[#allocation1 + $0x28] sm:$0xff pattern:$0x73625140] }
 0x2e0   :  { %3505 = vmatpush.bf16.msra.mxu0 %v12733_v27  ;;  %3531 = vmatpush.bf16.msra.mxu2 %v12734_v40  ;;  %v3493_v27 = vpack.c.b16 %v3488_v10, %v3488_v10  ;;  %v12748_v10 = vld [vmem:[#allocation67_spill] sm:$0xff] }
 0x2e3   :  { %3424 = vmatpush.bf16.msrb.mxu1 %v12735_v60  ;;  %3450 = vmatpush.bf16.msrb.mxu3 %v12736_v49  ;;  %v12761_v49 = vld [vmem:[#allocation108_spill] sm:$0xff]  ;;  %v10787_v60 = vld.sshfl [vmem:[#allocation1 + $0x8] sm:$0xff pattern:$0x73625140] }
 0x2e4   :  { %3506 = vmatpush.bf16.msra.mxu0 %v12739_v37  ;;  %3532 = vmatpush.bf16.msra.mxu2 %v12740_v13  ;;  %v12747_v13 = vld [vmem:[#allocation65_spill] sm:$0xff] }
 0x2e5   :  { %v12755_v37 = vld [vmem:[#allocation73_spill] sm:$0xff] }
 0x2e6   :  { %3425 = vmatmul.bf16.vlgmr.msrb.gmra.mxu1 %v10655_v4  ;;  %3451 = vmatmul.bf16.vlgmr.msrb.gmra.mxu3 %v10653_v42  ;;  %v12750_v4 = vld [vmem:[#allocation98_spill] sm:$0xff]  ;;  %v12751_v42 = vld [vmem:[#allocation69_spill] sm:$0xff] }
 0x2e7   :  { %3512 = vmatpush.bf16.msra.mxu1 %v12737_v6  ;;  %3538 = vmatpush.bf16.msra.mxu3 %v12738_v11  ;;  %v12757_v11 = vld [vmem:[#allocation104_spill] sm:$0xff]  ;;  %v3478_v6 = vunpack.c.l.b16 %v3463_v1  ;;  %v12766_v1 = vld [vmem:[#allocation114_spill] sm:$0xff] }
 0x2e8   :  { %3551 = vmatpush.bf16.msrb.mxu0 %v12741_v47  ;;  %3577 = vmatpush.bf16.msrb.mxu2 %v12742_v9  ;;  %v12749_v47 = vld [vmem:[#allocation96_spill] sm:$0xff]  ;;  %v12752_v9 = vld [vmem:[#allocation71_spill] sm:$0xff] }
 0x2e9   :  { %3507 = vmatmul.bf16.vlgmr.msra.gmra.mxu0 %v3491_v52  ;;  %3533 = vmatmul.bf16.vlgmr.msra.gmra.mxu2 %v3493_v27 }
 0x2eb   :  { %3513 = vmatpush.bf16.msra.mxu1 %v12743_v41  ;;  %3539 = vmatpush.bf16.msra.mxu3 %v12744_v25  ;;  %v12753_v41 = vld [vmem:[#allocation100_spill] sm:$0xff]  ;;  %v12754_v25 = vld [vmem:[#allocation102_spill] sm:$0xff] }
 0x2ec   :  { %3552 = vmatpush.bf16.msrb.mxu0 %v12745_v28  ;;  %3578 = vmatpush.bf16.msrb.mxu2 %v12746_v15  ;;  %v12756_v28 = vld [vmem:[#allocation75_spill] sm:$0xff]  ;;  %v3480_v15 = vunpack.c.l.b16 %v3469_v59 }
 0x2ed   :  { %v12764_v59 = vld [vmem:[#allocation83_spill] sm:$0xff] }
 0x2ef   :  { %3514 = vmatpush.bf16.msra.mxu1 %v12747_v13  ;;  %3540 = vmatpush.bf16.msra.mxu3 %v12748_v10  ;;  %v3482_v13 = vunpack.c.l.b16 %v3473_v32  ;;  %v12758_v10 = vld [vmem:[#allocation106_spill] sm:$0xff] }
 0x2f0   :  { %3553 = vmatpush.bf16.msrb.mxu0 %v12749_v47  ;;  %3579 = vmatpush.bf16.msrb.mxu2 %v12750_v4  ;;  %v12759_v47 = vld [vmem:[#allocation77_spill] sm:$0xff]  ;;  %v12760_v4 = vld [vmem:[#allocation79_spill] sm:$0xff] }
 0x2f3   :  { %3515 = vmatpush.bf16.msra.mxu1 %v12751_v42  ;;  %3541 = vmatpush.bf16.msra.mxu3 %v12752_v9  ;;  %v3476_v42 = vunpack.c.l.b16 %v3459_v38  ;;  %v3485_v9 = vrot.slane %v3480_v15, 7  ;;  %v12768_v15 = vld [vmem:[#allocation87_spill] sm:$0xff] }
 0x2f4   :  { %3554 = vmatpush.bf16.msrb.mxu0 %v12753_v41  ;;  %3580 = vmatpush.bf16.msrb.mxu2 %v12754_v25  ;;  %v3489_v41 = vrot.slane %v3482_v13, 7  ;;  %v12762_v25 = vld [vmem:[#allocation110_spill] sm:$0xff]  ;;  %v12767_v13 = vld [vmem:[#allocation85_spill] sm:$0xff] }
 0x2f5   :  { %v3486_v32 = vsel %vm192_vm0, %v3485_v9, %v3476_v42  ;;  %v12773_v9 = vld [vmem:[#allocation120_spill] sm:$0xff]  ;;  %v12776_v42 = vld [vmem:[#allocation122_spill] sm:$0xff] }
 0x2f7   :  { %3516 = vmatpush.bf16.msra.mxu1 %v12755_v37  ;;  %3542 = vmatpush.bf16.msra.mxu3 %v12756_v28  ;;  %v12763_v37 = vld [vmem:[#allocation81_spill] sm:$0xff] }
 0x2f8   :  { %3555 = vmatpush.bf16.msrb.mxu0 %v12757_v11  ;;  %3581 = vmatpush.bf16.msrb.mxu2 %v12758_v10  ;;  %v3490_v10 = vsel %vm192_vm0, %v3489_v41, %v3478_v6  ;;  %v12765_v11 = vld [vmem:[#allocation112_spill] sm:$0xff]  ;;  %v12772_v6 = vld [vmem:[#allocation118_spill] sm:$0xff]  ;;  %v12774_v41 = vld [vmem:[#allocation93_spill] sm:$0xff] }
 0x2f9   :  { %v10735_v38 = vpack.c.b16 %v3490_v10, %v3490_v10  ;;  %v12775_v10 = vld [vmem:[#allocation95_spill] sm:$0xff]  ;;  %v3608_v28 = vld.sshfl [vmem:[#allocation1] sm:$0xff pattern:$0x73625140] }
 0x2fb   :  { %3517 = vmatpush.bf16.msra.mxu1 %v12759_v47  ;;  %3543 = vmatpush.bf16.msra.mxu3 %v12760_v4  ;;  %v10733_v47 = vpack.c.b16 %v3486_v32, %v3486_v32  ;;  %v12796_v4 = vld [vmem:[#allocation115_spill] sm:$0xff] }
 0x2fc   :  { %3556 = vmatpush.bf16.msrb.mxu0 %v12761_v49  ;;  %3582 = vmatpush.bf16.msrb.mxu2 %v12762_v25  ;;  %v12769_v25 = vld [vmem:[#allocation89_spill] sm:$0xff] }
 0x2fd   :  { %v12795_v49 = vld [vmem:[#allocation113_spill] sm:$0xff] }
 0x2ff   :  { %3518 = vmatpush.bf16.msra.mxu1 %v12763_v37  ;;  %3544 = vmatpush.bf16.msra.mxu3 %v12764_v59  ;;  %v12770_v37 = vld [vmem:[#allocation91_spill] sm:$0xff]  ;;  %v12771_v59 = vld [vmem:[#allocation116_spill] sm:$0xff] }
 0x300   :  { %3557 = vmatpush.bf16.msrb.mxu0 %v12765_v11  ;;  %3583 = vmatpush.bf16.msrb.mxu2 %v12766_v1  ;;  %v10783_v1 = vld.sshfl [vmem:[#allocation1 + $0x38] sm:$0xff pattern:$0x73625140] }
 0x303   :  { %3519 = vmatpush.bf16.msra.mxu1 %v12767_v13  ;;  %3545 = vmatpush.bf16.msra.mxu3 %v12768_v15  ;;  %v10750_v32 = vpop.f32.mrf.mxu0  ;;  %v12780_v15 = vld [vmem:[#allocation126_spill] sm:$0xff]  ;;  %v10781_v13 = vld.sshfl [vmem:[#allocation1 + $0x18] sm:$0xff pattern:$0x73625140] }
 0x304   :  { %3558 = vmatpush.bf16.msrb.mxu0 %v12771_v59  ;;  %3584 = vmatpush.bf16.msrb.mxu2 %v12772_v6  ;;  %v12778_v59 = vld [vmem:[#allocation97_spill] sm:$0xff]  ;;  %v12781_v6 = vld [vmem:[#allocation130_spill] sm:$0xff] }
 0x306   :  { %3520 = vmatmul.bf16.vlgmr.msra.gmra.mxu1 %v10733_v47  ;;  %3546 = vmatmul.bf16.vlgmr.msra.gmra.mxu3 %v10735_v38 }
 0x307   :  { %3564 = vmatpush.bf16.msrb.mxu1 %v12769_v25  ;;  %3590 = vmatpush.bf16.msrb.mxu3 %v12770_v37  ;;  %v12777_v37 = vld [vmem:[#allocation124_spill] sm:$0xff]  ;;  %v12779_v25 = vld [vmem:[#allocation99_spill] sm:$0xff] }
 0x308   :  { %3651 = vmatpush.bf16.msra.mxu0 %v12773_v9  ;;  %3677 = vmatpush.bf16.msra.mxu2 %v12776_v42  ;;  %v12782_v9 = vld [vmem:[#allocation101_spill] sm:$0xff]  ;;  %v12784_v42 = vld [vmem:[#allocation132_spill] sm:$0xff] }
 0x309   :  { %3559 = vmatmul.bf16.vlgmr.msrb.gmra.mxu0 %v3491_v52  ;;  %3585 = vmatmul.bf16.vlgmr.msrb.gmra.mxu2 %v3493_v27  ;;  %v10759_v52 = vpop.f32.mrf.mxu2 }
 0x30b   :  { %3565 = vmatpush.bf16.msrb.mxu1 %v12774_v41  ;;  %3591 = vmatpush.bf16.msrb.mxu3 %v12775_v10  ;;  %v12783_v41 = vld [vmem:[#allocation103_spill] sm:$0xff]  ;;  %v3056_v27 = vpop.f32.mrf.mxu0  ;;  %v12785_v10 = vld [vmem:[#allocation134_spill] sm:$0xff] }
 0x30c   :  { %3652 = vmatpush.bf16.msra.mxu0 %v12777_v37  ;;  %3678 = vmatpush.bf16.msra.mxu2 %v12780_v15  ;;  %v12786_v37 = vld [vmem:[#allocation105_spill] sm:$0xff]  ;;  %v12789_v15 = vld [vmem:[#allocation138_spill] sm:$0xff] }
 0x30d   :  { %v10777_v27 = vld [vmem:[%s11710_s0 + $0x28] sm:$0x55] }
 0x30e   :  { %12792 = vst [vmem:[#allocation213_spill] sm:$0xff] %v10777_v27 }
 0x30f   :  { %3566 = vmatpush.bf16.msrb.mxu1 %v12778_v59  ;;  %3592 = vmatpush.bf16.msrb.mxu3 %v12779_v25  ;;  %v12787_v59 = vld [vmem:[#allocation107_spill] sm:$0xff]  ;;  %v12788_v25 = vld [vmem:[#allocation136_spill] sm:$0xff] }
 0x310   :  { %3653 = vmatpush.bf16.msra.mxu0 %v12781_v6  ;;  %3679 = vmatpush.bf16.msra.mxu2 %v12784_v42  ;;  %v12790_v6 = vld [vmem:[#allocation109_spill] sm:$0xff]  ;;  %v10772_v42 = vld [vmem:[%s11710_s0 + $0x10] sm:$0x55] }
 0x313   :  { %3567 = vmatpush.bf16.msrb.mxu1 %v12782_v9  ;;  %3593 = vmatpush.bf16.msrb.mxu3 %v12783_v41  ;;  %v12791_v9 = vld [vmem:[#allocation111_spill] sm:$0xff] }
 0x314   :  { %3654 = vmatpush.bf16.msra.mxu0 %v12785_v10  ;;  %3680 = vmatpush.bf16.msra.mxu2 %v12788_v25  ;;  %v3623_v41 = vld.sshfl [vmem:[#allocation1 + $0x30] sm:$0xff pattern:$0x73625140]  ;;  %v3266_v10 = vpop.f32.mrf.mxu0 }
 0x315   :  { %v3612_v25 = vld.sshfl [vmem:[#allocation1 + $0x10] sm:$0xff pattern:$0x73625140] }
 0x316   :  { %3760 = vst [vmem:[#allocation1] ss:$4 sm:$0xff] %v10772_v42 }
 0x317   :  { %3568 = vmatpush.bf16.msrb.mxu1 %v12786_v37  ;;  %3594 = vmatpush.bf16.msrb.mxu3 %v12787_v59  ;;  %v3082_v59 = vpop.f32.mrf.mxu2  ;;  %v12793_v37 = vld [vmem:[#allocation140_spill] sm:$0xff] }
 0x318   :  { %3655 = vmatpush.bf16.msra.mxu0 %v12789_v15  ;;  %3681 = vmatpush.bf16.msra.mxu2 %v12793_v37  ;;  %v3619_v15 = vld.sshfl [vmem:[#allocation1 + $0x20] sm:$0xff pattern:$0x73625140]  ;;  %v12797_v59 = vld [vmem:[#allocation144_spill] sm:$0xff]  ;;  %v3627_v37 = vunpack.c.l.b16 %v3608_v28 }
 0x319   :  { %v3631_v11 = vunpack.c.l.b16 %v3619_v15  ;;  %3771 = vst [vmem:[#allocation1 + $0x20] ss:$4 sm:$0xff] %v10777_v27  ;;  %v12803_v28 = vld [vmem:[#allocation148_spill] sm:$0xff]  ;;  %v12823_v27 = vld [vmem:[#allocation145_spill] sm:$0xff] }
 0x31b   :  { %3569 = vmatpush.bf16.msrb.mxu1 %v12790_v6  ;;  %3595 = vmatpush.bf16.msrb.mxu3 %v12791_v9  ;;  %v12794_v6 = vld [vmem:[#allocation142_spill] sm:$0xff]  ;;  %v3633_v9 = vunpack.c.l.b16 %v3623_v41  ;;  %v3635_v40 = vrot.slane %v3631_v11, 7 }
 0x31c   :  { %3656 = vmatpush.bf16.msra.mxu0 %v12794_v6  ;;  %3682 = vmatpush.bf16.msra.mxu2 %v12797_v59  ;;  %v12798_v41 = vld [vmem:[#allocation146_spill] sm:$0xff]  ;;  %v3629_v6 = vunpack.c.l.b16 %v3612_v25  ;;  %v12802_v59 = vld [vmem:[#allocation123_spill] sm:$0xff] }
 0x31d   :  { %v3639_v15 = vrot.slane %v3633_v9, 7 }
 0x31f   :  { %3570 = vmatpush.bf16.msrb.mxu1 %v12795_v49  ;;  %3596 = vmatpush.bf16.msrb.mxu3 %v12796_v4  ;;  %v12800_v49 = vld [vmem:[#allocation119_spill] sm:$0xff]  ;;  %v3636_v4 = vsel %vm192_vm0, %v3635_v40, %v3627_v37  ;;  %v3292_v11 = vpop.f32.mrf.mxu2  ;;  %v3640_v25 = vsel %vm192_vm0, %v3639_v15, %v3629_v6  ;;  %v12806_v40 = vld [vmem:[#allocation128_spill] sm:$0xff] }
 0x320   :  { %3657 = vmatpush.bf16.msra.mxu0 %v12798_v41  ;;  %3683 = vmatpush.bf16.msra.mxu2 %v12803_v28  ;;  %v3268_v41 = vpop.f32.mrf.mxu0  ;;  %v10802_v9 = vpack.c.b16 %v3636_v4, %v3636_v4  ;;  %v12807_v37 = vld [vmem:[#allocation152_spill] sm:$0xff]  ;;  %v10809_v28 = vpack.c.b16 %v3640_v25, %v3640_v25  ;;  %v12811_v4 = vld [vmem:[#allocation133_spill] sm:$0xff] }
 0x323   :  { %3571 = vmatpush.bf16.msrb.mxu1 %v12799_v50  ;;  %3597 = vmatpush.bf16.msrb.mxu3 %v12800_v49  ;;  %v12804_v50 = vld [vmem:[#allocation150_spill] sm:$0xff]  ;;  %v12805_v49 = vld [vmem:[#allocation125_spill] sm:$0xff]  ;;  %v3067_v6 = vpop.f32.mrf.mxu1 }
 0x324   :  { %3658 = vmatpush.bf16.msra.mxu0 %v12804_v50  ;;  %3684 = vmatpush.bf16.msra.mxu2 %v12807_v37  ;;  %v3068_v15 = vadd.f32 %v3067_v6, %v10750_v32  ;;  %v12813_v37 = vld [vmem:[#allocation160_spill] sm:$0xff]  ;;  %v12818_v6 = vld [vmem:[#allocation139_spill] sm:$0xff] }
 0x325   :  { %v12817_v50 = vld [vmem:[#allocation164_spill] sm:$0xff] }
 0x326   :  { %3572 = vmatmul.bf16.vlgmr.msrb.gmra.mxu1 %v10733_v47  ;;  %3598 = vmatmul.bf16.vlgmr.msrb.gmra.mxu3 %v10735_v38  ;;  %v12809_v47 = vld [vmem:[#allocation156_spill] sm:$0xff]  ;;  %v12810_v38 = vld [vmem:[#allocation131_spill] sm:$0xff]  ;;  %v3267_v25 = vadd.f32 %v3266_v10, %v3068_v15  ;;  %v3634_v10 = vunpack.c.l.b16 %v10783_v1  ;;  %v3632_v15 = vunpack.c.l.b16 %v3621_v2 }
 0x327   :  { %3664 = vmatpush.bf16.msra.mxu1 %v12801_v58  ;;  %3690 = vmatpush.bf16.msra.mxu3 %v12802_v59  ;;  %v12808_v59 = vld [vmem:[#allocation154_spill] sm:$0xff]  ;;  %v3294_v41 = vpop.f32.mrf.mxu2  ;;  %v12825_v2 = vld [vmem:[#allocation172_spill] sm:$0xff] }
 0x328   :  { %3703 = vmatpush.bf16.msrb.mxu0 %v12808_v59  ;;  %3729 = vmatpush.bf16.msrb.mxu2 %v12809_v47  ;;  %v10819_v59 = vpop.f32.mrf.mxu0  ;;  %v12814_v47 = vld [vmem:[#allocation135_spill] sm:$0xff]  ;;  %v12819_v41 = vld [vmem:[#allocation141_spill] sm:$0xff]  ;;  %v12820_v58 = vld [vmem:[#allocation166_spill] sm:$0xff] }
 0x329   :  { %3659 = vmatmul.bf16.vlgmr.msra.gmra.mxu0 %v10802_v9  ;;  %3685 = vmatmul.bf16.vlgmr.msra.gmra.mxu2 %v10809_v28 }
 0x32b   :  { %3665 = vmatpush.bf16.msra.mxu1 %v12805_v49  ;;  %3691 = vmatpush.bf16.msra.mxu3 %v12806_v40  ;;  %v12812_v49 = vld [vmem:[#allocation158_spill] sm:$0xff]  ;;  %v12815_v40 = vld [vmem:[#allocation137_spill] sm:$0xff] }
 0x32c   :  { %3704 = vmatpush.bf16.msrb.mxu0 %v12812_v49  ;;  %3730 = vmatpush.bf16.msrb.mxu2 %v12813_v37  ;;  %v3069_v49 = vpop.f32.mrf.mxu1 }
 0x32d   :  { %v12824_v49 = vld [vmem:[#allocation170_spill] sm:$0xff] }
 0x32f   :  { %3666 = vmatpush.bf16.msra.mxu1 %v12810_v38  ;;  %3692 = vmatpush.bf16.msra.mxu3 %v12811_v4  ;;  %v12816_v38 = vld [vmem:[#allocation162_spill] sm:$0xff]  ;;  %v3093_v4 = vpop.f32.mrf.mxu3 }
 0x330   :  { %3705 = vmatpush.bf16.msrb.mxu0 %v12816_v38  ;;  %3731 = vmatpush.bf16.msrb.mxu2 %v12817_v50  ;;  %v3094_v32 = vadd.f32 %v3093_v4, %v10759_v52  ;;  %v12822_v38 = vld [vmem:[#allocation143_spill] sm:$0xff]  ;;  %v3630_v52 = vunpack.c.l.b16 %v10781_v13  ;;  %v3641_v4 = vrot.slane %v3634_v10, 7  ;;  %v12829_v13 = vld [vmem:[#allocation174_spill] sm:$0xff] }
 0x331   :  { %v12867_v50 = vld [vmem:[#allocation191_spill] sm:$0xff] }
 0x332   :  { %v3293_v37 = vadd.f32 %v3292_v11, %v3094_v32  ;;  %v12826_v11 = vld [vmem:[#allocation147_spill] sm:$0xff]  ;;  %v12827_v32 = vld [vmem:[#allocation149_spill] sm:$0xff] }
 0x333   :  { %3667 = vmatpush.bf16.msra.mxu1 %v12814_v47  ;;  %3693 = vmatpush.bf16.msra.mxu3 %v12815_v40  ;;  %v12821_v47 = vld [vmem:[#allocation168_spill] sm:$0xff]  ;;  %v3363_v40 = vpop.f32.mrf.mxu0 }
 0x334   :  { %3706 = vmatpush.bf16.msrb.mxu0 %v12820_v58  ;;  %3732 = vmatpush.bf16.msrb.mxu2 %v12821_v47  ;;  %v3279_v40 = vpop.f32.mrf.mxu1  ;;  %v12866_v58 = vld [vmem:[#allocation189_spill] sm:$0xff] }
 0x335   :  { %v10841_v47 = vadd.f32 %v3279_v40, %v3267_v25  ;;  %v12836_v25 = vld [vmem:[#allocation180_spill] sm:$0xff] }
 0x337   :  { %3668 = vmatpush.bf16.msra.mxu1 %v12818_v6  ;;  %3694 = vmatpush.bf16.msra.mxu3 %v12819_v41  ;;  %v3628_v6 = vunpack.c.l.b16 %v10787_v60  ;;  %v3637_v41 = vrot.slane %v3632_v15, 7  ;;  %v3095_v1 = vpop.f32.mrf.mxu3  ;;  %12828 = vst [vmem:[#allocation218_spill] sm:$0xff] %v10841_v47  ;;  %v12830_v60 = vld [vmem:[#allocation177_spill] sm:$0xff]  ;;  %v12840_v47 = vld [vmem:[#allocation186_spill] sm:$0xff] }
 0x338   :  { %3707 = vmatpush.bf16.msrb.mxu0 %v12824_v49  ;;  %3733 = vmatpush.bf16.msrb.mxu2 %v12825_v2  ;;  %v12831_v1 = vld [vmem:[#allocation151_spill] sm:$0xff]  ;;  %v12834_v2 = vld [vmem:[#allocation157_spill] sm:$0xff]  ;;  %v3387_v40 = vpop.f32.mrf.mxu2 }
 0x33b   :  { %3669 = vmatpush.bf16.msra.mxu1 %v12822_v38  ;;  %3695 = vmatpush.bf16.msra.mxu3 %v12823_v27  ;;  %v3642_v38 = vsel %vm192_vm0, %v3641_v4, %v3630_v52  ;;  %v3638_v27 = vsel %vm192_vm0, %v3637_v41, %v3628_v6  ;;  %v12835_v6 = vld [vmem:[#allocation182_spill] sm:$0xff]  ;;  %v12839_v4 = vld [vmem:[#allocation161_spill] sm:$0xff] }
 0x33c   :  { %3708 = vmatpush.bf16.msrb.mxu0 %v12829_v13  ;;  %3734 = vmatpush.bf16.msrb.mxu2 %v12830_v60  ;;  %v10845_v10 = vpack.c.b16 %v3642_v38, %v3642_v38  ;;  %v10847_v15 = vpack.c.b16 %v3638_v27, %v3638_v27  ;;  %v3281_v27 = vpop.f32.mrf.mxu1  ;;  %v12838_v38 = vld [vmem:[#allocation159_spill] sm:$0xff] }
 0x33d   :  { %v12846_v27 = vld [vmem:[#allocation194_spill] sm:$0xff] }
 0x33e   :  { %v10892_v60 = vld.sshfl [vmem:[#allocation1 + $0x28] sm:$0xff pattern:$0x73625140] }
 0x33f   :  { %3670 = vmatpush.bf16.msra.mxu1 %v12826_v11  ;;  %3696 = vmatpush.bf16.msra.mxu3 %v12827_v32  ;;  %v12832_v11 = vld [vmem:[#allocation153_spill] sm:$0xff]  ;;  %v12833_v32 = vld [vmem:[#allocation155_spill] sm:$0xff]  ;;  %v3305_v52 = vpop.f32.mrf.mxu3 }
 0x340   :  { %3735 = vmatpush.bf16.msrb.mxu2 %v12835_v6  ;;  %3709 = vmatpush.bf16.msrb.mxu0 %v12836_v25  ;;  %v10855_v41 = vadd.f32 %v3305_v52, %v3293_v37  ;;  %v12843_v6 = vld [vmem:[#allocation188_spill] sm:$0xff]  ;;  %v12844_v37 = vld [vmem:[#allocation163_spill] sm:$0xff]  ;;  %v12845_v52 = vld [vmem:[#allocation165_spill] sm:$0xff] }
 0x342   :  { %12837 = vst [vmem:[#allocation224_spill] sm:$0xff] %v10855_v41 }
 0x343   :  { %3671 = vmatpush.bf16.msra.mxu1 %v12831_v1  ;;  %3697 = vmatpush.bf16.msra.mxu3 %v12832_v11  ;;  %v12858_v1 = vld [vmem:[#allocation206_spill] sm:$0xff] }
 0x344   :  { %3736 = vmatpush.bf16.msrb.mxu2 %v12840_v47  ;;  %v12848_v47 = vld [vmem:[#allocation167_spill] sm:$0xff] }
 0x346   :  { %3698 = vmatmul.bf16.vlgmr.msra.gmra.mxu3 %v10845_v10  ;;  %3672 = vmatmul.bf16.vlgmr.msra.gmra.mxu1 %v10847_v15 }
 0x347   :  { %3716 = vmatpush.bf16.msrb.mxu1 %v12833_v32  ;;  %3742 = vmatpush.bf16.msrb.mxu3 %v12834_v2  ;;  %v12841_v2 = vld [vmem:[#allocation184_spill] sm:$0xff]  ;;  %v12842_v32 = vld [vmem:[#allocation190_spill] sm:$0xff]  ;;  %v3307_v41 = vpop.f32.mrf.mxu3 }
 0x348   :  { %3710 = vmatpush.bf16.msrb.mxu0 %v12841_v2  ;;  %3830 = vmatpush.bf16.msra.mxu2 %v12842_v32  ;;  %v12849_v2 = vld [vmem:[#allocation169_spill] sm:$0xff]  ;;  %v3374_v32 = vpop.f32.mrf.mxu1  ;;  %v12851_v41 = vld [vmem:[#allocation196_spill] sm:$0xff] }
 0x349   :  { %3737 = vmatmul.bf16.vlgmr.msrb.gmra.mxu2 %v10809_v28 }
 0x34b   :  { %3717 = vmatpush.bf16.msrb.mxu1 %v12838_v38  ;;  %3743 = vmatpush.bf16.msrb.mxu3 %v12839_v4  ;;  %v12847_v4 = vld [vmem:[#allocation192_spill] sm:$0xff]  ;;  %v3389_v38 = vpop.f32.mrf.mxu2 }
 0x34c   :  { %3804 = vmatpush.bf16.msra.mxu0 %v12843_v6  ;;  %3831 = vmatpush.bf16.msra.mxu2 %v12846_v27  ;;  %v3375_v6 = vadd.f32 %v3374_v32, %v10819_v59  ;;  %v12853_v27 = vld [vmem:[#allocation173_spill] sm:$0xff]  ;;  %v12856_v38 = vld [vmem:[#allocation176_spill] sm:$0xff]  ;;  %v12857_v59 = vld [vmem:[#allocation178_spill] sm:$0xff] }
 0x34d   :  { %3711 = vmatmul.bf16.vlgmr.msrb.gmra.mxu0 %v10802_v9  ;;  %v12852_v9 = vld [vmem:[#allocation171_spill] sm:$0xff] }
 0x34e   :  { %v3388_v28 = vadd.f32 %v3387_v40, %v3375_v6  ;;  %v12859_v40 = vld [vmem:[#allocation204_spill] sm:$0xff] }
 0x34f   :  { %3718 = vmatpush.bf16.msrb.mxu1 %v12844_v37  ;;  %3744 = vmatpush.bf16.msrb.mxu3 %v12845_v52  ;;  %v12850_v37 = vld [vmem:[#allocation198_spill] sm:$0xff]  ;;  %v10875_v52 = vpop.f32.mrf.mxu0 }
 0x350   :  { %3805 = vmatpush.bf16.msra.mxu0 %v12847_v4  ;;  %3832 = vmatpush.bf16.msra.mxu2 %v12850_v37  ;;  %v12854_v4 = vld [vmem:[#allocation202_spill] sm:$0xff]  ;;  %v3376_v32 = vpop.f32.mrf.mxu1  ;;  %v3765_v37 = vld.sshfl [vmem:[#allocation1 + $0x10] sm:$0xff pattern:$0x73625140] }
 0x351   :  { %v3772_v32 = vld.sshfl [vmem:[#allocation1 + $0x20] sm:$0xff pattern:$0x73625140] }
 0x353   :  { %3719 = vmatpush.bf16.msrb.mxu1 %v12848_v47  ;;  %3745 = vmatpush.bf16.msrb.mxu3 %v12849_v2  ;;  %v12855_v47 = vld [vmem:[#allocation200_spill] sm:$0xff]  ;;  %v3400_v2 = vpop.f32.mrf.mxu3  ;;  %v3439_v11 = vpop.f32.mrf.mxu2 }
 0x354   :  { %3806 = vmatpush.bf16.msra.mxu0 %v12851_v41  ;;  %3833 = vmatpush.bf16.msra.mxu2 %v12854_v4  ;;  %v3401_v25 = vadd.f32 %v3400_v2, %v3388_v28  ;;  %v3782_v41 = vunpack.c.l.b16 %v3765_v37  ;;  %v10886_v4 = vld.sshfl [vmem:[#allocation1 + $0x18] sm:$0xff pattern:$0x73625140] }
 0x355   :  { %v12860_v28 = vld [vmem:[#allocation181_spill] sm:$0xff] }
 0x356   :  { %v3792_v13 = vrot.slane %v3782_v41, 1 }
 0x357   :  { %3720 = vmatpush.bf16.msrb.mxu1 %v12852_v9  ;;  %3746 = vmatpush.bf16.msrb.mxu3 %v12853_v27  ;;  %v3415_v6 = vpop.f32.mrf.mxu0  ;;  %v3776_v9 = vld.sshfl [vmem:[#allocation1 + $0x30] sm:$0xff pattern:$0x73625140]  ;;  %v3761_v27 = vld.sshfl [vmem:[#allocation1] sm:$0xff pattern:$0x73625140] }
 0x358   :  { %3807 = vmatpush.bf16.msra.mxu0 %v12855_v47  ;;  %3834 = vmatpush.bf16.msra.mxu2 %v12858_v1  ;;  %v10888_v47 = vld.sshfl [vmem:[#allocation1 + $0x38] sm:$0xff pattern:$0x73625140]  ;;  %v3780_v2 = vunpack.c.l.b16 %v3761_v27  ;;  %v12863_v6 = vld [vmem:[#allocation246_spill] sm:$0xff]  ;;  %v3784_v27 = vunpack.c.l.b16 %v3772_v32  ;;  %v12869_v32 = vld [vmem:[#allocation195_spill] sm:$0xff] }
 0x359   :  { %v12862_v1 = vld [vmem:[#allocation20_spill] sm:$0xff]  ;;  %4179 = vst [vmem:[#allocation1 + $0x20] ss:$4 sm:$0xff] %v12863_v6 }
 0x35a   :  { %v3788_v49 = vrot.slane %v3780_v2, 1  ;;  %v12868_v2 = vld [vmem:[#allocation193_spill] sm:$0xff] }
 0x35b   :  { %3721 = vmatpush.bf16.msrb.mxu1 %v12856_v38  ;;  %3747 = vmatpush.bf16.msrb.mxu3 %v12857_v59  ;;  %v12861_v38 = vld [vmem:[#allocation183_spill] sm:$0xff]  ;;  %v3402_v37 = vpop.f32.mrf.mxu3 }
 0x35c   :  { %3808 = vmatpush.bf16.msra.mxu0 %v12859_v40  ;;  %v3763_v59 = vld.sshfl [vmem:[#allocation1 + $0x8] sm:$0xff pattern:$0x73625140]  ;;  %3835 = vmatpush.bf16.msra.mxu2 %v12647_v14  ;;  %v3786_v40 = vunpack.c.l.b16 %v3776_v9  ;;  %v3789_v9 = vsel %vm192_vm0, %v3784_v27, %v3788_v49 }
 0x35d   :  { %4169 = vst [vmem:[#allocation1] ss:$4 sm:$0xff] %v12862_v1  ;;  %v3441_v1 = vpop.f32.mrf.mxu2  ;;  %v3796_v6 = vpack.c.b16 %v3789_v9, %v3789_v9 }
 0x35e   :  { %v3793_v41 = vsel %vm192_vm0, %v3786_v40, %v3792_v13  ;;  %v12872_v13 = vld [vmem:[#allocation201_spill] sm:$0xff]  ;;  %v12873_v40 = vld [vmem:[#allocation203_spill] sm:$0xff] }
 0x35f   :  { %3722 = vmatpush.bf16.msrb.mxu1 %v12860_v28  ;;  %3748 = vmatpush.bf16.msrb.mxu3 %v12861_v38  ;;  %v12864_v28 = vld [vmem:[#allocation185_spill] sm:$0xff]  ;;  %v12865_v38 = vld [vmem:[#allocation187_spill] sm:$0xff]  ;;  %v3798_v37 = vpack.c.b16 %v3793_v41, %v3793_v41 }
 0x360   :  { %3809 = vmatpush.bf16.msra.mxu0 %v12645_v12  ;;  %3836 = vmatpush.bf16.msra.mxu2 %v12649_v62 }
 0x363   :  { %3723 = vmatpush.bf16.msrb.mxu1 %v12864_v28  ;;  %3749 = vmatpush.bf16.msrb.mxu3 %v12865_v38  ;;  %v3426_v49 = vpop.f32.mrf.mxu1 }
 0x364   :  { %3810 = vmatpush.bf16.msra.mxu0 %v9408_v31  ;;  %3837 = vmatpush.bf16.msra.mxu2 %v9464_v54  ;;  %v3427_v27 = vadd.f32 %v3426_v49, %v10875_v52 }
 0x366   :  { %3750 = vmatmul.bf16.vlgmr.msrb.gmra.mxu3 %v10845_v10  ;;  %3724 = vmatmul.bf16.vlgmr.msrb.gmra.mxu1 %v10847_v15  ;;  %v12870_v10 = vld [vmem:[#allocation197_spill] sm:$0xff]  ;;  %v12871_v15 = vld [vmem:[#allocation199_spill] sm:$0xff]  ;;  %v3508_v1 = vpop.f32.mrf.mxu0  ;;  %v3440_v41 = vadd.f32 %v3439_v11, %v3427_v27  ;;  %v3787_v11 = vunpack.c.l.b16 %v10888_v47  ;;  %v3785_v27 = vunpack.c.l.b16 %v10892_v60  ;;  %v12876_v47 = vld [vmem:[#allocation214_spill] sm:$0xff] }
 0x367   :  { %3817 = vmatpush.bf16.msra.mxu1 %v12866_v58  ;;  %3843 = vmatpush.bf16.msra.mxu3 %v12867_v50  ;;  %v3509_v9 = vadd.f32 %v3508_v1, %v3401_v25  ;;  %v12877_v60 = vld [vmem:[#allocation215_spill] sm:$0xff] }
 0x368   :  { %3811 = vmatpush.bf16.msra.mxu0 %v9449_v35  ;;  %3882 = vmatpush.bf16.msrb.mxu2 %v12650_v36 }
 0x369   :  { %3838 = vmatmul.bf16.vlgmr.msra.gmra.mxu2 %v3798_v37 }
 0x36b   :  { %3818 = vmatpush.bf16.msra.mxu1 %v12868_v2  ;;  %3844 = vmatpush.bf16.msra.mxu3 %v12869_v32  ;;  %v3428_v49 = vpop.f32.mrf.mxu1 }
 0x36c   :  { %3856 = vmatpush.bf16.msrb.mxu0 %v9476_v63  ;;  %3883 = vmatpush.bf16.msrb.mxu2 %v12654_v33  ;;  %v3781_v33 = vunpack.c.l.b16 %v3763_v59  ;;  %v3452_v63 = vpop.f32.mrf.mxu3 }
 0x36d   :  { %3812 = vmatmul.bf16.vlgmr.msra.gmra.mxu0 %v3796_v6  ;;  %v3453_v52 = vadd.f32 %v3452_v63, %v3440_v41 }
 0x36e   :  { %v3790_v1 = vrot.slane %v3781_v33, 1 }
 0x36f   :  { %3819 = vmatpush.bf16.msra.mxu1 %v12870_v10  ;;  %3845 = vmatpush.bf16.msra.mxu3 %v12871_v15  ;;  %v12874_v15 = vld [vmem:[#allocation205_spill] sm:$0xff]  ;;  %v12875_v10 = vld [vmem:[#allocation207_spill] sm:$0xff] }
 0x370   :  { %3857 = vmatpush.bf16.msrb.mxu0 %v12652_v17  ;;  %3884 = vmatpush.bf16.msrb.mxu2 %v12658_v53  ;;  %v3783_v17 = vunpack.c.l.b16 %v10886_v4  ;;  %v3510_v4 = vpop.f32.mrf.mxu0  ;;  %v3791_v59 = vsel %vm192_vm0, %v3785_v27, %v3790_v1  ;;  %v12882_v27 = vld [vmem:[#allocation223_spill] sm:$0xff]  ;;  %v12883_v1 = vld [vmem:[#allocation244_spill] sm:$0xff] }
 0x371   :  { %v3797_v33 = vpack.c.b16 %v3791_v59, %v3791_v59  ;;  %v12878_v4 = vld [vmem:[#allocation217_spill] sm:$0xff] }
 0x372   :  { %v3794_v25 = vrot.slane %v3783_v17, 1  ;;  %v12885_v59 = vld [vmem:[#allocation225_spill] sm:$0xff] }
 0x373   :  { %3820 = vmatpush.bf16.msra.mxu1 %v12872_v13  ;;  %3846 = vmatpush.bf16.msra.mxu3 %v12873_v40 }
 0x374   :  { %3858 = vmatpush.bf16.msrb.mxu0 %v12656_v57  ;;  %3885 = vmatpush.bf16.msrb.mxu2 %v12662_v48  ;;  %v3795_v63 = vsel %vm192_vm0, %v3787_v11, %v3794_v25  ;;  %v3454_v41 = vpop.f32.mrf.mxu3  ;;  %v12880_v11 = vld [vmem:[#allocation238_spill] sm:$0xff]  ;;  %v12881_v25 = vld [vmem:[#allocation221_spill] sm:$0xff] }
 0x375   :  { %v3799_v17 = vpack.c.b16 %v3795_v63, %v3795_v63  ;;  %v12884_v63 = vld [vmem:[#allocation242_spill] sm:$0xff]  ;;  %v12886_v41 = vld [vmem:[#allocation227_spill] sm:$0xff] }
 0x377   :  { %3821 = vmatpush.bf16.msra.mxu1 %v12874_v15  ;;  %3847 = vmatpush.bf16.msra.mxu3 %v12875_v10  ;;  %v3534_v10 = vpop.f32.mrf.mxu2 }
 0x378   :  { %3859 = vmatpush.bf16.msrb.mxu0 %v12660_v55  ;;  %3886 = vmatpush.bf16.msrb.mxu2 %v9643_v61 }
 0x37b   :  { %3822 = vmatpush.bf16.msra.mxu1 %v12646_v43  ;;  %3848 = vmatpush.bf16.msra.mxu3 %v12648_v7 }
 0x37c   :  { %3860 = vmatpush.bf16.msrb.mxu0 %v9637_v18  ;;  %3887 = vmatpush.bf16.msrb.mxu2 %v12667_v30 }
 0x37f   :  { %3823 = vmatpush.bf16.msra.mxu1 %v9410_v20  ;;  %3849 = vmatpush.bf16.msra.mxu3 %v9425_v24  ;;  %v3536_v49 = vpop.f32.mrf.mxu2  ;;  %v12879_v20 = vld [vmem:[#allocation219_spill] sm:$0xff] }
 0x380   :  { %3861 = vmatpush.bf16.msrb.mxu0 %v12665_v39  ;;  %3888 = vmatpush.bf16.msrb.mxu2 %v9717_v0 }
 0x383   :  { %3824 = vmatpush.bf16.msra.mxu1 %v12876_v47  ;;  %3850 = vmatpush.bf16.msra.mxu3 %v12877_v60  ;;  %v3521_v49 = vpop.f32.mrf.mxu1 }
 0x384   :  { %3862 = vmatpush.bf16.msrb.mxu0 %v12880_v11  ;;  %3889 = vmatpush.bf16.msrb.mxu2 %v12883_v1  ;;  %v3522_v0 = vadd.f32 %v3521_v49, %v3509_v9  ;;  %v12888_v11 = vld [vmem:[#allocation231_spill] sm:$0xff]  ;;  %v12890_v1 = vld [vmem:[#allocation233_spill] sm:$0xff] }
 0x385   :  { %v12893_v49 = vld [vmem:[#allocation239_spill] sm:$0xff] }
 0x386   :  { %3851 = vmatmul.bf16.vlgmr.msra.gmra.mxu3 %v3799_v17  ;;  %3825 = vmatmul.bf16.vlgmr.msra.gmra.mxu1 %v3797_v33 }
 0x387   :  { %3869 = vmatpush.bf16.msrb.mxu1 %v12878_v4  ;;  %3895 = vmatpush.bf16.msrb.mxu3 %v12879_v20  ;;  %v12887_v20 = vld [vmem:[#allocation229_spill] sm:$0xff]  ;;  %v3535_v4 = vadd.f32 %v3534_v10, %v3522_v0  ;;  %v12895_v10 = vld [vmem:[#allocation243_spill] sm:$0xff] }
 0x388   :  { %3863 = vmatpush.bf16.msrb.mxu0 %v12884_v63  ;;  %3890 = vmatmul.bf16.vlgmr.msrb.gmra.mxu2 %v3798_v37  ;;  %v12892_v37 = vld [vmem:[#allocation237_spill] sm:$0xff] }
 0x389   :  { %v3547_v63 = vpop.f32.mrf.mxu3 }
 0x38a   :  { %v10956_v47 = vadd.f32 %v3547_v63, %v3535_v4 }
 0x38b   :  { %3870 = vmatpush.bf16.msrb.mxu1 %v12881_v25  ;;  %3896 = vmatpush.bf16.msrb.mxu3 %v12882_v27  ;;  %v3560_v25 = vpop.f32.mrf.mxu0  ;;  %v12889_v27 = vld [vmem:[#allocation232_spill] sm:$0xff] }
 0x38c   :  { %3864 = vmatmul.bf16.vlgmr.msrb.gmra.mxu0 %v3796_v6  ;;  %v3561_v60 = vadd.f32 %v3560_v25, %v3453_v52  ;;  %v3586_v6 = vpop.f32.mrf.mxu2  ;;  %v12896_v52 = vld [vmem:[#allocation245_spill] sm:$0xff] }
 0x38f   :  { %3871 = vmatpush.bf16.msrb.mxu1 %v12885_v59  ;;  %3897 = vmatpush.bf16.msrb.mxu3 %v12886_v41  ;;  %v3523_v59 = vpop.f32.mrf.mxu1  ;;  %v12891_v41 = vld [vmem:[#allocation235_spill] sm:$0xff] }
 0x391   :  { %v3549_v0 = vpop.f32.mrf.mxu3 }
 0x392   :  { %v7242_v0 = vld [vmem:[%s11711_s4 + $0x274] sm:$0xf0] }
 0x393   :  { %3872 = vmatpush.bf16.msrb.mxu1 %v12887_v20  ;;  %3898 = vmatpush.bf16.msrb.mxu3 %v12888_v11  ;;  %v3562_v9 = vpop.f32.mrf.mxu0  ;;  %v12894_v11 = vld [vmem:[#allocation241_spill] sm:$0xff]  ;;  %v7235_v20 = vld [vmem:[%s11711_s4 + $0x244] sm:$0xf] }
 0x394   :  { %v3588_v25 = vpop.f32.mrf.mxu2  ;;  %v6675_v9 = vld [vmem:[%s11711_s4 + $0x270] sm:$0xf] }
 0x397   :  { %3873 = vmatpush.bf16.msrb.mxu1 %v12889_v27  ;;  %3899 = vmatpush.bf16.msrb.mxu3 %v12890_v1 }
 0x39b   :  { %3874 = vmatpush.bf16.msrb.mxu1 %v12891_v41  ;;  %3900 = vmatpush.bf16.msrb.mxu3 %v12892_v37 }
 0x39f   :  { %3875 = vmatpush.bf16.msrb.mxu1 %v12893_v49  ;;  %3901 = vmatpush.bf16.msrb.mxu3 %v12894_v11 }
 0x3a3   :  { %3876 = vmatpush.bf16.msrb.mxu1 %v12895_v10  ;;  %3902 = vmatpush.bf16.msrb.mxu3 %v12896_v52  ;;  %v3573_v4 = vpop.f32.mrf.mxu1  ;;  %v6676_v10 = vor.u32 %v7242_v0, %v6675_v9 }
 0x3a4   :  { %v3574_v63 = vadd.f32 %v3573_v4, %v3561_v60 }
 0x3a5   :  { %4115 = vmatpush.bf16.msra.mxu0 %v6676_v10  ;;  %v7238_v10 = vld [vmem:[%s11711_s4 + $0x254] sm:$0xf0] }
 0x3a6   :  { %3877 = vmatmul.bf16.vlgmr.msrb.gmra.mxu1 %v3797_v33  ;;  %3903 = vmatmul.bf16.vlgmr.msrb.gmra.mxu3 %v3799_v17  ;;  %v3587_v59 = vadd.f32 %v3586_v6, %v3574_v63  ;;  %v3660_v41 = vpop.f32.mrf.mxu0  ;;  %v6667_v17 = vld [vmem:[%s11711_s4 + $0x260] sm:$0xf]  ;;  %v7240_v33 = vld [vmem:[%s11711_s4 + $0x264] sm:$0xf0] }
 0x3a7   :  { %v6668_v6 = vor.u32 %v7240_v33, %v6667_v17  ;;  %v6651_v17 = vld [vmem:[%s11711_s4 + $0x240] sm:$0xf]  ;;  %v7236_v33 = vld [vmem:[%s11711_s4 + $0x244] sm:$0xf0] }
 0x3a9   :  { %v3599_v1 = vpop.f32.mrf.mxu3  ;;  %4116 = vmatpush.bf16.msra.mxu0 %v6668_v6  ;;  %v7241_v6 = vld [vmem:[%s11711_s4 + $0x274] sm:$0xf] }
 0x3aa   :  { %v10970_v11 = vadd.f32 %v3599_v1, %v3587_v59  ;;  %v6659_v1 = vld [vmem:[%s11711_s4 + $0x250] sm:$0xf] }
 0x3ab   :  { %v3575_v52 = vpop.f32.mrf.mxu1  ;;  %v6660_v59 = vor.u32 %v7238_v10, %v6659_v1  ;;  %v7234_v1 = vld [vmem:[%s11711_s4 + $0x234] sm:$0xf0]  ;;  %v7239_v10 = vld [vmem:[%s11711_s4 + $0x264] sm:$0xf] }
 0x3ac   :  { %v3686_v25 = vpop.f32.mrf.mxu2 }
 0x3ad   :  { %4117 = vmatpush.bf16.msra.mxu0 %v6660_v59 }
 0x3ae   :  { %v3662_v60 = vpop.f32.mrf.mxu0 }
 0x3af   :  { %v6652_v60 = vor.u32 %v7236_v33, %v6651_v17  ;;  %v6669_v17 = vld [vmem:[%s11711_s4 + $0x268] sm:$0xf0]  ;;  %v6635_v33 = vld [vmem:[%s11711_s4 + $0x220] sm:$0xf] }
 0x3b1   :  { %v3601_v4 = vpop.f32.mrf.mxu3  ;;  %4118 = vmatpush.bf16.msra.mxu0 %v6652_v60  ;;  %v7232_v60 = vld [vmem:[%s11711_s4 + $0x224] sm:$0xf0] }
 0x3b2   :  { %v6677_v4 = vld [vmem:[%s11711_s4 + $0x278] sm:$0xf0] }
 0x3b4   :  { %v3688_v63 = vpop.f32.mrf.mxu2 }
 0x3c3   :  { %v3673_v52 = vpop.f32.mrf.mxu1 }
 0x3c4   :  { %v3674_v9 = vadd.f32 %v3673_v52, %v3660_v41  ;;  %v6680_v41 = vor.u32 %v7241_v6, %v6677_v4  ;;  %v6672_v4 = vor.u32 %v7239_v10, %v6669_v17  ;;  %v7257_v10 = vld [vmem:[%s11711_s4 + $0x2f4] sm:$0xf]  ;;  %v6741_v17 = vld [vmem:[%s11711_s4 + $0x2f8] sm:$0xf0] }
 0x3c5   :  { %v6744_v37 = vor.u32 %v7257_v10, %v6741_v17 }
 0x3c6   :  { %v3687_v0 = vadd.f32 %v3686_v25, %v3674_v9  ;;  %v6643_v25 = vld [vmem:[%s11711_s4 + $0x230] sm:$0xf]  ;;  %4141 = vmatpush.bf16.msra.mxu2 %v6680_v41  ;;  %v6661_v41 = vld [vmem:[%s11711_s4 + $0x258] sm:$0xf0] }
 0x3c7   :  { %v6644_v9 = vor.u32 %v7234_v1, %v6643_v25  ;;  %v7258_v1 = vld [vmem:[%s11711_s4 + $0x2f4] sm:$0xf0]  ;;  %4154 = vmatpush.bf16.msra.mxu3 %v6744_v37  ;;  %v6723_v37 = vld [vmem:[%s11711_s4 + $0x2d0] sm:$0xf] }
 0x3c9   :  { %v3699_v63 = vpop.f32.mrf.mxu3  ;;  %4119 = vmatpush.bf16.msra.mxu0 %v6644_v9  ;;  %v6731_v9 = vld [vmem:[%s11711_s4 + $0x2e0] sm:$0xf] }
 0x3ca   :  { %v3700_v52 = vadd.f32 %v3699_v63, %v3687_v0  ;;  %v11005_v59 = vpop.f32.mrf.mxu0  ;;  %v7237_v0 = vld [vmem:[%s11711_s4 + $0x254] sm:$0xf]  ;;  %v6739_v63 = vld [vmem:[%s11711_s4 + $0x2f0] sm:$0xf]  ;;  %4142 = vmatpush.bf16.msra.mxu2 %v6672_v4 }
 0x3cb   :  { %v3675_v6 = vpop.f32.mrf.mxu1  ;;  %v6740_v49 = vor.u32 %v7258_v1, %v6739_v63  ;;  %v6664_v27 = vor.u32 %v7237_v0, %v6661_v41  ;;  %v7255_v0 = vld [vmem:[%s11711_s4 + $0x2e4] sm:$0xf]  ;;  %v6733_v41 = vld [vmem:[%s11711_s4 + $0x2e8] sm:$0xf0] }
 0x3cc   :  { %v11026_v25 = vadd.f32 %v3700_v52, %v10956_v47  ;;  %v6636_v6 = vor.u32 %v7232_v60, %v6635_v33  ;;  %v6627_v47 = vld [vmem:[%s11711_s4 + $0x210] sm:$0xf]  ;;  %v7230_v52 = vld [vmem:[%s11711_s4 + $0x214] sm:$0xf0]  ;;  %v7256_v33 = vld [vmem:[%s11711_s4 + $0x2e4] sm:$0xf0]  ;;  %v3738_v63 = vpop.f32.mrf.mxu2  ;;  %v6736_v1 = vor.u32 %v7255_v0, %v6733_v41 }
 0x3cd   :  { %4128 = vmatpush.bf16.msra.mxu1 %v6740_v49  ;;  %v6653_v60 = vld [vmem:[%s11711_s4 + $0x248] sm:$0xf0]  ;;  %v6732_v4 = vor.u32 %v7256_v33, %v6731_v9  ;;  %v6628_v17 = vor.u32 %v7230_v52, %v6627_v47  ;;  %v7254_v49 = vld [vmem:[%s11711_s4 + $0x2d4] sm:$0xf0]  ;;  %v7253_v9 = vld [vmem:[%s11711_s4 + $0x2d4] sm:$0xf] }
 0x3ce   :  { %4120 = vmatpush.bf16.msra.mxu0 %v6636_v6  ;;  %4143 = vmatpush.bf16.msra.mxu2 %v6664_v27  ;;  %v6656_v33 = vor.u32 %v7235_v20, %v6653_v60  ;;  %v6619_v6 = vld [vmem:[%s11711_s4 + $0x200] sm:$0xf]  ;;  %v7228_v47 = vld [vmem:[%s11711_s4 + $0x204] sm:$0xf0]  ;;  %v6725_v52 = vld [vmem:[%s11711_s4 + $0x2d8] sm:$0xf0] }
 0x3cf   :  { %4155 = vmatpush.bf16.msra.mxu3 %v6736_v1  ;;  %v7233_v27 = vld [vmem:[%s11711_s4 + $0x234] sm:$0xf]  ;;  %v6645_v20 = vld [vmem:[%s11711_s4 + $0x238] sm:$0xf0]  ;;  %v6728_v60 = vor.u32 %v7253_v9, %v6725_v52  ;;  %v6620_v0 = vor.u32 %v7228_v47, %v6619_v6  ;;  %v6637_v1 = vld [vmem:[%s11711_s4 + $0x228] sm:$0xf0] }
 0x3d0   :  { %v6648_v41 = vor.u32 %v7233_v27, %v6645_v20  ;;  %v7251_v9 = vld [vmem:[%s11711_s4 + $0x2c4] sm:$0xf]  ;;  %v7229_v47 = vld [vmem:[%s11711_s4 + $0x214] sm:$0xf]  ;;  %v6629_v52 = vld [vmem:[%s11711_s4 + $0x218] sm:$0xf0] }
 0x3d1   :  { %v3701_v10 = vpop.f32.mrf.mxu3  ;;  %4129 = vmatpush.bf16.msra.mxu1 %v6732_v4  ;;  %v7231_v4 = vld [vmem:[%s11711_s4 + $0x224] sm:$0xf]  ;;  %v6632_v20 = vor.u32 %v7229_v47, %v6629_v52 }
 0x3d2   :  { %v3714_v39 = vpop.f32.mrf.mxu0  ;;  %4121 = vmatpush.bf16.msra.mxu0 %v6628_v17  ;;  %4144 = vmatpush.bf16.msra.mxu2 %v6656_v33  ;;  %v6715_v17 = vld [vmem:[%s11711_s4 + $0x2c0] sm:$0xf] }
 0x3d3   :  { %v6724_v39 = vor.u32 %v7254_v49, %v6723_v37  ;;  %4156 = vmatpush.bf16.msra.mxu3 %v6728_v60  ;;  %v6640_v37 = vor.u32 %v7231_v4, %v6637_v1  ;;  %v7252_v49 = vld [vmem:[%s11711_s4 + $0x2c4] sm:$0xf0]  ;;  %v7250_v60 = vld [vmem:[%s11711_s4 + $0x2b4] sm:$0xf0] }
 0x3d4   :  { %v3740_v10 = vpop.f32.mrf.mxu2  ;;  %v6716_v33 = vor.u32 %v7252_v49, %v6715_v17  ;;  %v7247_v49 = vld [vmem:[%s11711_s4 + $0x2a4] sm:$0xf] }
 0x3d5   :  { %4130 = vmatpush.bf16.msra.mxu1 %v6724_v39  ;;  %v7227_v10 = vld [vmem:[%s11711_s4 + $0x204] sm:$0xf] }
 0x3d6   :  { %4122 = vmatpush.bf16.msra.mxu0 %v6620_v0  ;;  %4145 = vmatpush.bf16.msra.mxu2 %v6648_v41  ;;  %v7249_v0 = vld [vmem:[%s11711_s4 + $0x2b4] sm:$0xf] }
 0x3d9   :  { %4131 = vmatpush.bf16.msra.mxu1 %v6716_v33 }
 0x3da   :  { %4216 = vmatpush.bf16.msrb.mxu0 %v7346_v3  ;;  %4146 = vmatpush.bf16.msra.mxu2 %v6640_v37  ;;  %v6717_v3 = vld [vmem:[%s11711_s4 + $0x2c8] sm:$0xf0] }
 0x3db   :  { %v6720_v6 = vor.u32 %v7251_v9, %v6717_v3  ;;  %v6621_v37 = vld [vmem:[%s11711_s4 + $0x208] sm:$0xf0] }
 0x3dc   :  { %v6624_v17 = vor.u32 %v7227_v10, %v6621_v37  ;;  %v6701_v3 = vld [vmem:[%s11711_s4 + $0x2a8] sm:$0xf0] }
 0x3dd   :  { %4157 = vmatpush.bf16.msra.mxu3 %v6720_v6  ;;  %v6704_v52 = vor.u32 %v7247_v49, %v6701_v3  ;;  %v12903_v49 = vld [vmem:[#allocation18_spill] sm:$0xff] }
 0x3de   :  { %4217 = vmatpush.bf16.msrb.mxu0 %v7384_v16  ;;  %v6707_v16 = vld [vmem:[%s11711_s4 + $0x2b0] sm:$0xf]  ;;  %4147 = vmatpush.bf16.msra.mxu2 %v6632_v20 }
 0x3df   :  { %v6708_v41 = vor.u32 %v7250_v60, %v6707_v16  ;;  %v7245_v16 = vld [vmem:[%s11711_s4 + $0x294] sm:$0xf] }
 0x3e1   :  { %4132 = vmatpush.bf16.msra.mxu1 %v6708_v41  ;;  %v6683_v41 = vld [vmem:[%s11711_s4 + $0x280] sm:$0xf] }
 0x3e2   :  { %4218 = vmatpush.bf16.msrb.mxu0 %v7421_v29  ;;  %v6699_v29 = vld [vmem:[%s11711_s4 + $0x2a0] sm:$0xf]  ;;  %4148 = vmatpush.bf16.msra.mxu2 %v6624_v17  ;;  %v12897_v17 = vld [vmem:[#allocation12_spill] sm:$0xff] }
 0x3e3   :  { %v3725_v27 = vpop.f32.mrf.mxu1 }
 0x3e4   :  { %v3726_v39 = vadd.f32 %v3725_v27, %v11005_v59  ;;  %v6709_v59 = vld [vmem:[%s11711_s4 + $0x2b8] sm:$0xf0] }
 0x3e5   :  { %v6712_v1 = vor.u32 %v7249_v0, %v6709_v59  ;;  %v7244_v59 = vld [vmem:[%s11711_s4 + $0x284] sm:$0xf0] }
 0x3e6   :  { %v3739_v4 = vadd.f32 %v3738_v63, %v3726_v39  ;;  %v7248_v63 = vld [vmem:[%s11711_s4 + $0x2a4] sm:$0xf0]  ;;  %4219 = vmatpush.bf16.msrb.mxu0 %v7466_v44  ;;  %4242 = vmatpush.bf16.msrb.mxu2 %v7359_v8  ;;  %v6691_v44 = vld [vmem:[%s11711_s4 + $0x290] sm:$0xf]  ;;  %v7246_v39 = vld [vmem:[%s11711_s4 + $0x294] sm:$0xf0] }
 0x3e7   :  { %4158 = vmatpush.bf16.msra.mxu3 %v6712_v1  ;;  %v6700_v33 = vor.u32 %v7248_v63, %v6699_v29  ;;  %v6692_v8 = vor.u32 %v7246_v39, %v6691_v44  ;;  %v6685_v1 = vld [vmem:[%s11711_s4 + $0x288] sm:$0xf0]  ;;  %v12899_v29 = vld [vmem:[#allocation8_spill] sm:$0xff]  ;;  %v12901_v63 = vld [vmem:[#allocation9_spill] sm:$0xff] }
 0x3e8   :  { %v12909_v39 = vld [vmem:[#allocation208_spill] sm:$0xff] }
 0x3e9   :  { %v3751_v9 = vpop.f32.mrf.mxu3  ;;  %4133 = vmatpush.bf16.msra.mxu1 %v6700_v33  ;;  %v12906_v33 = vld [vmem:[#allocation22_spill] sm:$0xff] }
 0x3ea   :  { %v3752_v6 = vadd.f32 %v3751_v9, %v3739_v4  ;;  %v3813_v47 = vpop.f32.mrf.mxu0  ;;  %4220 = vmatpush.bf16.msrb.mxu0 %v7502_v56  ;;  %4243 = vmatpush.bf16.msrb.mxu2 %v7398_v21  ;;  %v7243_v56 = vld [vmem:[%s11711_s4 + $0x284] sm:$0xf]  ;;  %v6684_v21 = vor.u32 %v7244_v59, %v6683_v41  ;;  %v12912_v41 = vld [vmem:[#allocation19_spill] sm:$0xff] }
 0x3eb   :  { %v3727_v27 = vpop.f32.mrf.mxu1  ;;  %4159 = vmatpush.bf16.msra.mxu3 %v6704_v52  ;;  %v6688_v37 = vor.u32 %v7243_v56, %v6685_v1 }
 0x3ec   :  { %v11146_v20 = vadd.f32 %v3752_v6, %v10970_v11  ;;  %v6693_v11 = vld [vmem:[%s11711_s4 + $0x298] sm:$0xf0]  ;;  %v3839_v0 = vpop.f32.mrf.mxu2  ;;  %v12907_v27 = vld [vmem:[#allocation14_spill] sm:$0xff] }
 0x3ed   :  { %v6696_v60 = vor.u32 %v7245_v16, %v6693_v11  ;;  %4134 = vmatpush.bf16.msra.mxu1 %v6692_v8  ;;  %v12910_v8 = vld [vmem:[#allocation17_spill] sm:$0xff] }
 0x3ee   :  { %4221 = vmatpush.bf16.msrb.mxu0 %v7538_v5  ;;  %4244 = vmatpush.bf16.msrb.mxu2 %v7436_v34  ;;  %v12898_v34 = vld [vmem:[#allocation7_spill] sm:$0xff]  ;;  %v12911_v11 = vld [vmem:[#allocation209_spill] sm:$0xff] }
 0x3ef   :  { %4160 = vmatpush.bf16.msra.mxu3 %v6696_v60 }
 0x3f1   :  { %v3753_v4 = vpop.f32.mrf.mxu3  ;;  %4135 = vmatpush.bf16.msra.mxu1 %v6684_v21  ;;  %v12913_v21 = vld [vmem:[#allocation21_spill] sm:$0xff] }
 0x3f2   :  { %v3815_v10 = vpop.f32.mrf.mxu0  ;;  %4222 = vmatpush.bf16.msrb.mxu0 %v7574_v23  ;;  %4245 = vmatpush.bf16.msrb.mxu2 %v7472_v46  ;;  %v12902_v46 = vld [vmem:[#allocation10_spill] sm:$0xff] }
 0x3f3   :  { %4161 = vmatpush.bf16.msra.mxu3 %v6688_v37  ;;  %v12914_v10 = vld [vmem:[#allocation23_spill] sm:$0xff]  ;;  %v4170_v37 = vld.sshfl [vmem:[#allocation1] sm:$0xff pattern:$0x73625140] }
 0x3f4   :  { %v3841_v5 = vpop.f32.mrf.mxu2 }
 0x3f5   :  { %4229 = vmatpush.bf16.msrb.mxu1 %v12673_v22  ;;  %v12900_v22 = vld [vmem:[#allocation15_spill] sm:$0xff]  ;;  %v4180_v5 = vld.sshfl [vmem:[#allocation1 + $0x20] sm:$0xff pattern:$0x73625140] }
 0x3f6   :  { %4223 = vmatpush.bf16.msrb.mxu0 %v12457_v45  ;;  %4246 = vmatpush.bf16.msrb.mxu2 %v12897_v17  ;;  %v12905_v45 = vld [vmem:[#allocation13_spill] sm:$0xff]  ;;  %v12915_v17 = vld [vmem:[#allocation24_spill] sm:$0xff] }
 0x3f7   :  { %4255 = vmatpush.bf16.msrb.mxu3 %v12674_v51 }
 0x3f9   :  { %4230 = vmatpush.bf16.msrb.mxu1 %v12677_v19 }
 0x3fa   :  { %4247 = vmatpush.bf16.msrb.mxu2 %v12900_v22  ;;  %v4188_v22 = vunpack.c.l.b16 %v4170_v37 }
 0x3fb   :  { %4256 = vmatpush.bf16.msrb.mxu3 %v12678_v26  ;;  %v12904_v26 = vld [vmem:[#allocation11_spill] sm:$0xff] }
 0x3fd   :  { %4231 = vmatpush.bf16.msrb.mxu1 %v12898_v34 }
 0x3fe   :  { %4248 = vmatpush.bf16.msrb.mxu2 %v12903_v49 }
 0x3ff   :  { %4257 = vmatpush.bf16.msrb.mxu3 %v12899_v29  ;;  %v12916_v29 = vld [vmem:[#allocation26_spill] sm:$0xff] }
 0x401   :  { %4232 = vmatpush.bf16.msrb.mxu1 %v12901_v63  ;;  %v12917_v63 = vld [vmem:[#allocation28_spill] sm:$0xff] }
 0x402   :  { %4249 = vmatpush.bf16.msrb.mxu2 %v12906_v33  ;;  %v4174_v33 = vld.sshfl [vmem:[#allocation1 + $0x10] sm:$0xff pattern:$0x73625140] }
 0x403   :  { %v3826_v51 = vpop.f32.mrf.mxu1  ;;  %4258 = vmatpush.bf16.msrb.mxu3 %v12902_v46  ;;  %v4196_v46 = vrot.slane %v4188_v22, 2 }
 0x404   :  { %v3827_v23 = vadd.f32 %v3826_v51, %v3813_v47  ;;  %v12908_v47 = vld [vmem:[#allocation16_spill] sm:$0xff]  ;;  %v4192_v51 = vunpack.c.l.b16 %v4180_v5  ;;  %v12924_v5 = vld [vmem:[#allocation179_spill] sm:$0xff] }
 0x405   :  { %4233 = vmatpush.bf16.msrb.mxu1 %v12904_v26  ;;  %v12919_v26 = vld [vmem:[#allocation32_spill] sm:$0xff] }
 0x406   :  { %v3840_v19 = vadd.f32 %v3839_v0, %v3827_v23  ;;  %v12918_v23 = vld [vmem:[#allocation30_spill] sm:$0xff]  ;;  %v4197_v49 = vrot.slane %v4192_v51, 1 }
 0x407   :  { %4259 = vmatpush.bf16.msrb.mxu3 %v12905_v45  ;;  %v12920_v45 = vld [vmem:[#allocation34_spill] sm:$0xff] }
 0x408   :  { %v12927_v51 = vld [vmem:[#allocation210_spill] sm:$0xff] }
 0x409   :  { %v3852_v9 = vpop.f32.mrf.mxu3  ;;  %v3865_v6 = vpop.f32.mrf.mxu0  ;;  %4234 = vmatpush.bf16.msrb.mxu1 %v12907_v27  ;;  %v4190_v27 = vunpack.c.l.b16 %v4174_v33  ;;  %v12932_v33 = vld [vmem:[#allocation50_spill] sm:$0xff] }
 0x40a   :  { %v3853_v3 = vadd.f32 %v3852_v9, %v3840_v19  ;;  %v4198_v9 = vsel %vm192_vm0, %v4197_v49, %v4196_v46  ;;  %v12929_v46 = vld [vmem:[#allocation46_spill] sm:$0xff]  ;;  %v12930_v49 = vld [vmem:[#allocation211_spill] sm:$0xff] }
 0x40b   :  { %v3828_v52 = vpop.f32.mrf.mxu1  ;;  %4260 = vmatpush.bf16.msrb.mxu3 %v12908_v47  ;;  %v3891_v0 = vpop.f32.mrf.mxu2 }
 0x40c   :  { %v3908_v44 = vadd.f32 %v3853_v3, %v11026_v25  ;;  %v4184_v3 = vld.sshfl [vmem:[#allocation1 + $0x30] sm:$0xff pattern:$0x73625140] }
 0x40d   :  { %4235 = vmatpush.bf16.msrb.mxu1 %v12910_v8  ;;  %v4202_v8 = vrot.slane %v4190_v27, 2  ;;  %v12934_v27 = vld [vmem:[#allocation27_spill] sm:$0xff] }
 0x40e   :  { %v3910_v16 = vmul.f32 %v3908_v44, %v12909_v39  ;;  %v4194_v44 = vunpack.c.l.b16 %v4184_v3 }
 0x40f   :  { %4261 = vmatpush.bf16.msrb.mxu3 %v12912_v41  ;;  %v4176_v41 = vld.sshfl [vmem:[#allocation1 + $0x18] sm:$0xff pattern:$0x73625140] }
 0x410   :  { %v3912_v60 = vadd.f32 %v3910_v16, %v12911_v11  ;;  %v4208_v16 = vpack.c.b16 %v4198_v9, %v4198_v9  ;;  %v12931_v9 = vld [vmem:[#allocation48_spill] sm:$0xff] }
 0x411   :  { %v3854_v59 = vpop.f32.mrf.mxu3  ;;  %v3867_v4 = vpop.f32.mrf.mxu0  ;;  %4236 = vmatpush.bf16.msrb.mxu1 %v12913_v21  ;;  %v4172_v21 = vld.sshfl [vmem:[#allocation1 + $0x8] sm:$0xff pattern:$0x73625140] }
 0x412   :  { %vm3914_vm5 = vcmp.ge.f32.partialorder %v3912_v60, 0.0  ;;  %v3916_v56 = vmul.f32 0.1, %v3912_v60  ;;  %v12921_v59 = vld [vmem:[#allocation36_spill] sm:$0xff] }
 0x413   :  { %4262 = vmatpush.bf16.msrb.mxu3 %v12914_v10  ;;  %v3893_v34 = vpop.f32.mrf.mxu2  ;;  %v4186_v4 = vld.sshfl [vmem:[#allocation1 + $0x38] sm:$0xff pattern:$0x73625140]  ;;  %v4182_v10 = vld.sshfl [vmem:[#allocation1 + $0x28] sm:$0xff pattern:$0x73625140] }
 0x414   :  { %v3918_v1 = vsel %vm3914_vm5, %v3912_v60, %v3916_v56  ;;  %v4203_v60 = vrot.slane %v4194_v44, 1  ;;  %v12922_v56 = vld [vmem:[#allocation38_spill] sm:$0xff]  ;;  %4330 = vst [vmem:[#allocation1 + $0x20] ss:$4 sm:$0xff] %v12924_v5  ;;  %v12925_v34 = vld [vmem:[#allocation40_spill] sm:$0xff]  ;;  %v4191_v44 = vunpack.c.l.b16 %v4176_v41  ;;  %v12940_v5 = vld [vmem:[#allocation31_spill] sm:$0xff] }
 0x415   :  { %v3920_v25 = vpack.c.bf16 %v3918_v1, %v3918_v1  ;;  %v12941_v41 = vld [vmem:[#allocation60_spill] sm:$0xff] }
 0x416   :  { %v4204_v1 = vsel %vm192_vm0, %v4203_v60, %v4202_v8  ;;  %v4189_v8 = vunpack.c.l.b16 %v4172_v21  ;;  %v4193_v60 = vunpack.c.l.b16 %v4182_v10  ;;  %v12943_v21 = vld [vmem:[#allocation33_spill] sm:$0xff]  ;;  %v12944_v10 = vld [vmem:[#allocation35_spill] sm:$0xff] }
 0x417   :  { %4123 = vmatmul.bf16.vlgmr.msra.gmra.mxu0 %v3920_v25  ;;  %4149 = vmatmul.bf16.vlgmr.msra.gmra.mxu2 %v3920_v25  ;;  %v12923_v25 = vld [vmem:[#allocation175_spill] sm:$0xff] }
 0x418   :  { %4268 = vmatpush.bf16.msra.mxu0 %v12915_v17  ;;  %4294 = vmatpush.bf16.msra.mxu2 %v12916_v29  ;;  %4320 = vst [vmem:[#allocation1] ss:$4 sm:$0xff] %v12923_v25  ;;  %v12926_v29 = vld [vmem:[#allocation42_spill] sm:$0xff] }
 0x419   :  { %v12938_v25 = vld [vmem:[#allocation58_spill] sm:$0xff] }
 0x41c   :  { %4269 = vmatpush.bf16.msra.mxu0 %v12917_v63  ;;  %4295 = vmatpush.bf16.msra.mxu2 %v12918_v23  ;;  %v12928_v23 = vld [vmem:[#allocation44_spill] sm:$0xff] }
 0x420   :  { %4270 = vmatpush.bf16.msra.mxu0 %v12919_v26  ;;  %4296 = vmatpush.bf16.msra.mxu2 %v12920_v45 }
 0x423   :  { %v3878_v19 = vpop.f32.mrf.mxu1 }
 0x424   :  { %v3879_v52 = vadd.f32 %v3878_v19, %v3865_v6  ;;  %4271 = vmatpush.bf16.msra.mxu0 %v12921_v59  ;;  %4297 = vmatpush.bf16.msra.mxu2 %v12922_v56  ;;  %v4210_v6 = vpack.c.b16 %v4204_v1, %v4204_v1  ;;  %v12935_v59 = vld [vmem:[#allocation52_spill] sm:$0xff]  ;;  %v12936_v56 = vld [vmem:[#allocation54_spill] sm:$0xff] }
 0x425   :  { %v12937_v1 = vld [vmem:[#allocation56_spill] sm:$0xff] }
 0x426   :  { %v3892_v47 = vadd.f32 %v3891_v0, %v3879_v52 }
 0x427   :  { %4224 = vmatmul.bf16.vlgmr.msrb.gmra.mxu0 %v4208_v16  ;;  %4250 = vmatmul.bf16.vlgmr.msrb.gmra.mxu2 %v4210_v6 }
 0x428   :  { %4272 = vmatpush.bf16.msra.mxu0 %v12925_v34  ;;  %4298 = vmatpush.bf16.msra.mxu2 %v12926_v29  ;;  %v4199_v34 = vrot.slane %v4189_v8, 2  ;;  %v4200_v29 = vrot.slane %v4193_v60, 1  ;;  %v4335_v60 = vld.sshfl [vmem:[#allocation1 + $0x30] sm:$0xff pattern:$0x73625140] }
 0x429   :  { %v3904_v37 = vpop.f32.mrf.mxu3 }
 0x42a   :  { %v3905_v0 = vadd.f32 %v3904_v37, %v3892_v47  ;;  %v4195_v47 = vunpack.c.l.b16 %v4186_v4  ;;  %v12939_v37 = vld [vmem:[#allocation29_spill] sm:$0xff]  ;;  %v12942_v4 = vld [vmem:[#allocation62_spill] sm:$0xff] }
 0x42b   :  { %v3880_v17 = vpop.f32.mrf.mxu1 }
 0x42c   :  { %v3909_v22 = vadd.f32 %v3905_v0, %v11146_v20  ;;  %4273 = vmatpush.bf16.msra.mxu0 %v12928_v23  ;;  %4299 = vmatpush.bf16.msra.mxu2 %v12929_v46  ;;  %v12933_v20 = vld [vmem:[#allocation25_spill] sm:$0xff]  ;;  %v4205_v0 = vrot.slane %v4191_v44, 2  ;;  %v4206_v17 = vrot.slane %v4195_v47, 1  ;;  %v12945_v23 = vld [vmem:[#allocation64_spill] sm:$0xff]  ;;  %v12946_v46 = vld [vmem:[#allocation66_spill] sm:$0xff] }
 0x42d   :  { %v12954_v44 = vld [vmem:[#allocation74_spill] sm:$0xff] }
 0x42e   :  { %v3911_v63 = vmul.f32 %v3909_v22, %v12927_v51  ;;  %v4207_v22 = vsel %vm192_vm0, %v4206_v17, %v4205_v0  ;;  %v4331_v47 = vld.sshfl [vmem:[#allocation1 + $0x20] sm:$0xff pattern:$0x73625140]  ;;  %v4333_v17 = vld.sshfl [vmem:[#allocation1 + $0x28] sm:$0xff pattern:$0x73625140] }
 0x42f   :  { %v12958_v0 = vld [vmem:[#allocation78_spill] sm:$0xff] }
 0x430   :  { %v3913_v19 = vadd.f32 %v3911_v63, %v12930_v49  ;;  %4274 = vmatpush.bf16.msra.mxu0 %v12931_v9  ;;  %4300 = vmatpush.bf16.msra.mxu2 %v12932_v33  ;;  %v4201_v63 = vsel %vm192_vm0, %v4200_v29, %v4199_v34  ;;  %v12950_v9 = vld [vmem:[#allocation70_spill] sm:$0xff]  ;;  %v12951_v33 = vld [vmem:[#allocation41_spill] sm:$0xff]  ;;  %v4343_v29 = vunpack.c.l.b16 %v4331_v47 }
 0x431   :  { %v3906_v26 = vpop.f32.mrf.mxu3  ;;  %v4337_v34 = vld.sshfl [vmem:[#allocation1 + $0x38] sm:$0xff pattern:$0x73625140]  ;;  %v12971_v47 = vld [vmem:[#allocation90_spill] sm:$0xff] }
 0x432   :  { %vm3915_vm6 = vcmp.ge.f32.partialorder %v3913_v19, 0.0  ;;  %v3917_v45 = vmul.f32 0.1, %v3913_v19  ;;  %v4209_v26 = vpack.c.b16 %v4201_v63, %v4201_v63  ;;  %v12961_v63 = vld [vmem:[#allocation51_spill] sm:$0xff] }
 0x434   :  { %v3919_v3 = vsel %vm3915_vm6, %v3913_v19, %v3917_v45  ;;  %4275 = vmatpush.bf16.msra.mxu0 %v12935_v59  ;;  %4301 = vmatpush.bf16.msra.mxu2 %v12936_v56  ;;  %v4211_v19 = vpack.c.b16 %v4207_v22, %v4207_v22  ;;  %v12949_v45 = vld [vmem:[#allocation68_spill] sm:$0xff]  ;;  %v12955_v56 = vld [vmem:[#allocation45_spill] sm:$0xff] }
 0x435   :  { %v3921_v52 = vpack.c.bf16 %v3919_v3, %v3919_v3  ;;  %v12952_v3 = vld [vmem:[#allocation43_spill] sm:$0xff]  ;;  %v12960_v22 = vld [vmem:[#allocation49_spill] sm:$0xff] }
 0x437   :  { %4136 = vmatmul.bf16.vlgmr.msra.gmra.mxu1 %v3921_v52  ;;  %4162 = vmatmul.bf16.vlgmr.msra.gmra.mxu3 %v3921_v52  ;;  %v4321_v52 = vld.sshfl [vmem:[#allocation1] sm:$0xff pattern:$0x73625140] }
 0x438   :  { %4281 = vmatpush.bf16.msra.mxu1 %v12933_v20  ;;  %4307 = vmatpush.bf16.msra.mxu3 %v12934_v27  ;;  %v4325_v20 = vld.sshfl [vmem:[#allocation1 + $0x10] sm:$0xff pattern:$0x73625140]  ;;  %v4339_v8 = vunpack.c.l.b16 %v4321_v52 }
 0x439   :  { %4363 = vmatpush.bf16.msrb.mxu0 %v12937_v1  ;;  %4389 = vmatpush.bf16.msrb.mxu2 %v12938_v25  ;;  %v12953_v27 = vld [vmem:[#allocation72_spill] sm:$0xff]  ;;  %v4341_v59 = vunpack.c.l.b16 %v4325_v20  ;;  %v12956_v1 = vld [vmem:[#allocation47_spill] sm:$0xff]  ;;  %v12969_v20 = vld [vmem:[#allocation86_spill] sm:$0xff] }
 0x43a   :  { %4276 = vmatmul.bf16.vlgmr.msra.gmra.mxu0 %v4208_v16  ;;  %4302 = vmatmul.bf16.vlgmr.msra.gmra.mxu2 %v4210_v6  ;;  %v12947_v16 = vld [vmem:[#allocation37_spill] sm:$0xff]  ;;  %v12948_v6 = vld [vmem:[#allocation39_spill] sm:$0xff] }
 0x43b   :  { %v4323_v25 = vld.sshfl [vmem:[#allocation1 + $0x8] sm:$0xff pattern:$0x73625140] }
 0x43c   :  { %4282 = vmatpush.bf16.msra.mxu1 %v12939_v37  ;;  %4308 = vmatpush.bf16.msra.mxu3 %v12940_v5  ;;  %v4327_v37 = vld.sshfl [vmem:[#allocation1 + $0x18] sm:$0xff pattern:$0x73625140] }
 0x43d   :  { %4364 = vmatpush.bf16.msrb.mxu0 %v12941_v41  ;;  %4390 = vmatpush.bf16.msrb.mxu2 %v12942_v4  ;;  %4467 = vst [vmem:[#allocation1] ss:$4 sm:$0xff] %v10772_v42  ;;  %v12957_v5 = vld [vmem:[#allocation76_spill] sm:$0xff]  ;;  %v4347_v41 = vrot.slane %v4339_v8, 1  ;;  %v4345_v4 = vunpack.c.l.b16 %v4335_v60  ;;  %v12972_v8 = vld [vmem:[#allocation61_spill] sm:$0xff]  ;;  %v12973_v60 = vld [vmem:[#allocation63_spill] sm:$0xff] }
 0x43f   :  { %v4348_v42 = vsel %vm192_vm0, %v4343_v29, %v4347_v41  ;;  %v12981_v29 = vld [vmem:[#allocation71_spill] sm:$0xff]  ;;  %v12982_v41 = vld [vmem:[#allocation100_spill] sm:$0xff] }
 0x440   :  { %4283 = vmatpush.bf16.msra.mxu1 %v12943_v21  ;;  %4309 = vmatpush.bf16.msra.mxu3 %v12944_v10  ;;  %v4351_v21 = vrot.slane %v4341_v59, 1  ;;  %v12959_v10 = vld [vmem:[#allocation213_spill] sm:$0xff]  ;;  %v4355_v52 = vpack.c.b16 %v4348_v42, %v4348_v42  ;;  %v12974_v59 = vld [vmem:[#allocation92_spill] sm:$0xff] }
 0x441   :  { %4365 = vmatpush.bf16.msrb.mxu0 %v12945_v23  ;;  %4391 = vmatpush.bf16.msrb.mxu2 %v12946_v46  ;;  %4477 = vst [vmem:[#allocation1 + $0x20] ss:$4 sm:$0xff] %v12959_v10  ;;  %v12962_v23 = vld [vmem:[#allocation80_spill] sm:$0xff]  ;;  %v12963_v46 = vld [vmem:[#allocation82_spill] sm:$0xff]  ;;  %v12985_v10 = vld [vmem:[#allocation75_spill] sm:$0xff] }
 0x442   :  { %v12988_v42 = vld [vmem:[#allocation77_spill] sm:$0xff] }
 0x444   :  { %4284 = vmatpush.bf16.msra.mxu1 %v12947_v16  ;;  %4310 = vmatpush.bf16.msra.mxu3 %v12948_v6  ;;  %v4352_v16 = vsel %vm192_vm0, %v4345_v4, %v4351_v21  ;;  %v12964_v6 = vld [vmem:[#allocation53_spill] sm:$0xff]  ;;  %v12983_v4 = vld [vmem:[#allocation102_spill] sm:$0xff] }
 0x445   :  { %4366 = vmatpush.bf16.msrb.mxu0 %v12949_v45  ;;  %4392 = vmatpush.bf16.msrb.mxu2 %v12950_v9  ;;  %v12965_v45 = vld [vmem:[#allocation55_spill] sm:$0xff]  ;;  %v12966_v9 = vld [vmem:[#allocation57_spill] sm:$0xff] }
 0x446   :  { %v12984_v21 = vld [vmem:[#allocation73_spill] sm:$0xff] }
 0x447   :  { %4263 = vmatmul.bf16.vlgmr.msrb.gmra.mxu3 %v4211_v19  ;;  %4237 = vmatmul.bf16.vlgmr.msrb.gmra.mxu1 %v4209_v26 }
 0x448   :  { %4285 = vmatpush.bf16.msra.mxu1 %v12951_v33  ;;  %4311 = vmatpush.bf16.msra.mxu3 %v12952_v3  ;;  %v12967_v33 = vld [vmem:[#allocation59_spill] sm:$0xff]  ;;  %v12968_v3 = vld [vmem:[#allocation84_spill] sm:$0xff] }
 0x449   :  { %4367 = vmatpush.bf16.msrb.mxu0 %v12953_v27  ;;  %4393 = vmatpush.bf16.msrb.mxu2 %v12954_v44  ;;  %v4357_v27 = vpack.c.b16 %v4352_v16, %v4352_v16  ;;  %v12970_v44 = vld [vmem:[#allocation88_spill] sm:$0xff]  ;;  %v12989_v16 = vld [vmem:[#allocation79_spill] sm:$0xff] }
 0x44c   :  { %4286 = vmatpush.bf16.msra.mxu1 %v12955_v56  ;;  %4312 = vmatpush.bf16.msra.mxu3 %v12956_v1  ;;  %v12975_v56 = vld [vmem:[#allocation94_spill] sm:$0xff]  ;;  %v12976_v1 = vld [vmem:[#allocation65_spill] sm:$0xff] }
 0x44d   :  { %4368 = vmatpush.bf16.msrb.mxu0 %v12957_v5  ;;  %4394 = vmatpush.bf16.msrb.mxu2 %v12958_v0  ;;  %v12977_v5 = vld [vmem:[#allocation67_spill] sm:$0xff]  ;;  %v12978_v0 = vld [vmem:[#allocation96_spill] sm:$0xff] }
 0x450   :  { %4287 = vmatpush.bf16.msra.mxu1 %v12960_v22  ;;  %4313 = vmatpush.bf16.msra.mxu3 %v12961_v63  ;;  %v4340_v22 = vunpack.c.l.b16 %v4323_v25  ;;  %v4342_v63 = vunpack.c.l.b16 %v4327_v37  ;;  %v12993_v25 = vld [vmem:[#allocation83_spill] sm:$0xff] }
 0x451   :  { %4369 = vmatpush.bf16.msrb.mxu0 %v12962_v23  ;;  %4395 = vmatpush.bf16.msrb.mxu2 %v12963_v46  ;;  %v12986_v23 = vld [vmem:[#allocation104_spill] sm:$0xff]  ;;  %v12987_v46 = vld [vmem:[#allocation106_spill] sm:$0xff] }
 0x454   :  { %4288 = vmatpush.bf16.msra.mxu1 %v12964_v6  ;;  %4314 = vmatpush.bf16.msra.mxu3 %v12965_v45  ;;  %v4344_v6 = vunpack.c.l.b16 %v4333_v17  ;;  %v4349_v45 = vrot.slane %v4340_v22, 1  ;;  %v12995_v17 = vld [vmem:[#allocation114_spill] sm:$0xff]  ;;  %v13008_v22 = vld [vmem:[#allocation99_spill] sm:$0xff] }
 0x455   :  { %4370 = vmatpush.bf16.msrb.mxu0 %v12968_v3  ;;  %4396 = vmatpush.bf16.msrb.mxu2 %v12969_v20  ;;  %v12990_v3 = vld [vmem:[#allocation108_spill] sm:$0xff]  ;;  %v12991_v20 = vld [vmem:[#allocation110_spill] sm:$0xff] }
 0x456   :  { %v4350_v37 = vsel %vm192_vm0, %v4344_v6, %v4349_v45  ;;  %v13015_v6 = vld [vmem:[#allocation105_spill] sm:$0xff]  ;;  %v13017_v45 = vld [vmem:[#allocation136_spill] sm:$0xff] }
 0x457   :  { %4289 = vmatmul.bf16.vlgmr.msra.gmra.mxu1 %v4209_v26  ;;  %4315 = vmatmul.bf16.vlgmr.msra.gmra.mxu3 %v4211_v19  ;;  %v12979_v26 = vld [vmem:[#allocation98_spill] sm:$0xff]  ;;  %v12980_v19 = vld [vmem:[#allocation69_spill] sm:$0xff] }
 0x458   :  { %4376 = vmatpush.bf16.msrb.mxu1 %v12966_v9  ;;  %4402 = vmatpush.bf16.msrb.mxu3 %v12967_v33  ;;  %v4346_v9 = vunpack.c.l.b16 %v4337_v34  ;;  %v4353_v33 = vrot.slane %v4342_v63, 1  ;;  %v12996_v34 = vld [vmem:[#allocation85_spill] sm:$0xff]  ;;  %v13009_v63 = vld [vmem:[#allocation126_spill] sm:$0xff] }
 0x459   :  { %4415 = vmatpush.bf16.msra.mxu0 %v12970_v44  ;;  %4441 = vmatpush.bf16.msra.mxu2 %v12971_v47  ;;  %v12992_v44 = vld [vmem:[#allocation81_spill] sm:$0xff] }
 0x45a   :  { %4371 = vmatmul.bf16.vlgmr.msrb.gmra.mxu0 %v4355_v52  ;;  %4397 = vmatmul.bf16.vlgmr.msrb.gmra.mxu2 %v4357_v27  ;;  %v4354_v47 = vsel %vm192_vm0, %v4346_v9, %v4353_v33  ;;  %v13018_v9 = vld [vmem:[#allocation138_spill] sm:$0xff]  ;;  %v13019_v33 = vld [vmem:[#allocation109_spill] sm:$0xff] }
 0x45c   :  { %4377 = vmatpush.bf16.msrb.mxu1 %v12972_v8  ;;  %4403 = vmatpush.bf16.msrb.mxu3 %v12973_v60  ;;  %v12994_v8 = vld [vmem:[#allocation112_spill] sm:$0xff]  ;;  %v4356_v60 = vpack.c.b16 %v4350_v37, %v4350_v37 }
 0x45d   :  { %4416 = vmatpush.bf16.msra.mxu0 %v12974_v59  ;;  %4442 = vmatpush.bf16.msra.mxu2 %v12975_v56  ;;  %v4358_v59 = vpack.c.b16 %v4354_v47, %v4354_v47  ;;  %v12997_v56 = vld [vmem:[#allocation87_spill] sm:$0xff]  ;;  %v13021_v37 = vld [vmem:[#allocation140_spill] sm:$0xff] }
 0x45e   :  { %v4482_v47 = vld.sshfl [vmem:[#allocation1 + $0x30] sm:$0xff pattern:$0x73625140] }
 0x460   :  { %4378 = vmatpush.bf16.msrb.mxu1 %v12976_v1  ;;  %4404 = vmatpush.bf16.msrb.mxu3 %v12977_v5  ;;  %v12998_v1 = vld [vmem:[#allocation89_spill] sm:$0xff]  ;;  %v12999_v5 = vld [vmem:[#allocation91_spill] sm:$0xff] }
 0x461   :  { %4417 = vmatpush.bf16.msra.mxu0 %v12978_v0  ;;  %4443 = vmatpush.bf16.msra.mxu2 %v12979_v26  ;;  %v13000_v0 = vld [vmem:[#allocation116_spill] sm:$0xff]  ;;  %v13001_v26 = vld [vmem:[#allocation118_spill] sm:$0xff] }
 0x464   :  { %4379 = vmatpush.bf16.msrb.mxu1 %v12980_v19  ;;  %4405 = vmatpush.bf16.msrb.mxu3 %v12981_v29  ;;  %v13002_v19 = vld [vmem:[#allocation120_spill] sm:$0xff]  ;;  %v13003_v29 = vld [vmem:[#allocation93_spill] sm:$0xff] }
 0x465   :  { %4418 = vmatpush.bf16.msra.mxu0 %v12982_v41  ;;  %4444 = vmatpush.bf16.msra.mxu2 %v12983_v4  ;;  %v13004_v41 = vld [vmem:[#allocation95_spill] sm:$0xff]  ;;  %v13005_v4 = vld [vmem:[#allocation122_spill] sm:$0xff] }
 0x468   :  { %4380 = vmatpush.bf16.msrb.mxu1 %v12984_v21  ;;  %4406 = vmatpush.bf16.msrb.mxu3 %v12985_v10  ;;  %v13006_v21 = vld [vmem:[#allocation124_spill] sm:$0xff]  ;;  %v13007_v10 = vld [vmem:[#allocation97_spill] sm:$0xff] }
 0x469   :  { %4419 = vmatpush.bf16.msra.mxu0 %v12986_v23  ;;  %4445 = vmatpush.bf16.msra.mxu2 %v12987_v46  ;;  %v13010_v23 = vld [vmem:[#allocation130_spill] sm:$0xff]  ;;  %v13011_v46 = vld [vmem:[#allocation101_spill] sm:$0xff] }
 0x46c   :  { %4381 = vmatpush.bf16.msrb.mxu1 %v12988_v42  ;;  %4407 = vmatpush.bf16.msrb.mxu3 %v12989_v16  ;;  %v13012_v42 = vld [vmem:[#allocation103_spill] sm:$0xff]  ;;  %v13013_v16 = vld [vmem:[#allocation132_spill] sm:$0xff] }
 0x46d   :  { %4420 = vmatpush.bf16.msra.mxu0 %v12990_v3  ;;  %4446 = vmatpush.bf16.msra.mxu2 %v12991_v20  ;;  %v13020_v3 = vld [vmem:[#allocation111_spill] sm:$0xff] }
 0x46e   :  { %v4472_v20 = vld.sshfl [vmem:[#allocation1 + $0x10] sm:$0xff pattern:$0x73625140] }
 0x470   :  { %4382 = vmatpush.bf16.msrb.mxu1 %v12992_v44  ;;  %4408 = vmatpush.bf16.msrb.mxu3 %v12993_v25  ;;  %v6745_v44 = vld [vmem:[%s11710_s0 + $0x10] sm:$0xaa]  ;;  %v6746_v25 = vld [vmem:[%s11710_s0 + $0x28] sm:$0xaa] }
 0x471   :  { %4421 = vmatpush.bf16.msra.mxu0 %v12994_v8  ;;  %4447 = vmatpush.bf16.msra.mxu2 %v12995_v17  ;;  %v4468_v8 = vld.sshfl [vmem:[#allocation1] sm:$0xff pattern:$0x73625140] }
 0x472   :  { %v13022_v17 = vld [vmem:[#allocation142_spill] sm:$0xff] }
 0x474   :  { %4383 = vmatpush.bf16.msrb.mxu1 %v12996_v34  ;;  %4409 = vmatpush.bf16.msrb.mxu3 %v12997_v56  ;;  %v4488_v34 = vunpack.c.l.b16 %v4472_v20  ;;  %v4474_v56 = vld.sshfl [vmem:[#allocation1 + $0x18] sm:$0xff pattern:$0x73625140] }
 0x475   :  { %4422 = vmatpush.bf16.msra.mxu0 %v13000_v0  ;;  %4448 = vmatpush.bf16.msra.mxu2 %v13001_v26  ;;  %v13023_v0 = vld [vmem:[#allocation113_spill] sm:$0xff]  ;;  %v13024_v26 = vld [vmem:[#allocation115_spill] sm:$0xff]  ;;  %v13034_v20 = vld [vmem:[#allocation128_spill] sm:$0xff] }
 0x477   :  { %4384 = vmatmul.bf16.vlgmr.msrb.gmra.mxu1 %v4356_v60  ;;  %4410 = vmatmul.bf16.vlgmr.msrb.gmra.mxu3 %v4358_v59 }
 0x478   :  { %4428 = vmatpush.bf16.msra.mxu1 %v12998_v1  ;;  %4454 = vmatpush.bf16.msra.mxu3 %v12999_v5  ;;  %v11326_v1 = vld.sshfl [vmem:[#allocation1 + $0x38] sm:$0xff pattern:$0x73625140]  ;;  %v4486_v5 = vunpack.c.l.b16 %v4468_v8 }
 0x479   :  { %4510 = vmatpush.bf16.msrb.mxu0 %v13002_v19  ;;  %4536 = vmatpush.bf16.msrb.mxu2 %v13005_v4  ;;  %v4478_v19 = vld.sshfl [vmem:[#allocation1 + $0x20] sm:$0xff pattern:$0x73625140] }
 0x47a   :  { %4423 = vmatmul.bf16.vlgmr.msra.gmra.mxu0 %v4355_v52  ;;  %4449 = vmatmul.bf16.vlgmr.msra.gmra.mxu2 %v4357_v27  ;;  %v13014_v52 = vld [vmem:[#allocation134_spill] sm:$0xff]  ;;  %v13016_v27 = vld [vmem:[#allocation107_spill] sm:$0xff]  ;;  %v4490_v4 = vunpack.c.l.b16 %v4478_v19 }
 0x47c   :  { %4429 = vmatpush.bf16.msra.mxu1 %v13003_v29  ;;  %4455 = vmatpush.bf16.msra.mxu3 %v13004_v41  ;;  %v4470_v29 = vld.sshfl [vmem:[#allocation1 + $0x8] sm:$0xff pattern:$0x73625140]  ;;  %v13025_v41 = vld [vmem:[#allocation144_spill] sm:$0xff] }
 0x47d   :  { %4511 = vmatpush.bf16.msrb.mxu0 %v13006_v21  ;;  %4537 = vmatpush.bf16.msrb.mxu2 %v13009_v63  ;;  %v4494_v21 = vrot.slane %v4486_v5, 1  ;;  %4619 = vst [vmem:[#allocation1] ss:$4 sm:$0xff] %v6745_v44  ;;  %v4492_v63 = vunpack.c.l.b16 %v4482_v47  ;;  %v13035_v44 = vld [vmem:[#allocation152_spill] sm:$0xff]  ;;  %v13042_v5 = vld [vmem:[#allocation135_spill] sm:$0xff] }
 0x47e   :  { %v13037_v47 = vld [vmem:[#allocation156_spill] sm:$0xff] }
 0x480   :  { %4430 = vmatpush.bf16.msra.mxu1 %v13007_v10  ;;  %4456 = vmatpush.bf16.msra.mxu3 %v13008_v22  ;;  %v4480_v10 = vld.sshfl [vmem:[#allocation1 + $0x28] sm:$0xff pattern:$0x73625140] }
 0x481   :  { %4512 = vmatpush.bf16.msrb.mxu0 %v13010_v23  ;;  %4538 = vmatpush.bf16.msrb.mxu2 %v13013_v16  ;;  %4630 = vst [vmem:[#allocation1 + $0x20] ss:$4 sm:$0xff] %v6746_v25  ;;  %v13026_v22 = vld [vmem:[#allocation146_spill] sm:$0xff]  ;;  %v4498_v23 = vrot.slane %v4488_v34, 1  ;;  %v4495_v16 = vsel %vm192_vm0, %v4490_v4, %v4494_v21  ;;  %v13041_v34 = vld [vmem:[#allocation160_spill] sm:$0xff]  ;;  %v13046_v4 = vld [vmem:[#allocation139_spill] sm:$0xff] }
 0x482   :  { %v13036_v25 = vld [vmem:[#allocation154_spill] sm:$0xff]  ;;  %v13047_v21 = vld [vmem:[#allocation141_spill] sm:$0xff] }
 0x484   :  { %4431 = vmatpush.bf16.msra.mxu1 %v13011_v46  ;;  %4457 = vmatpush.bf16.msra.mxu3 %v13012_v42  ;;  %v13027_v46 = vld [vmem:[#allocation117_spill] sm:$0xff]  ;;  %v13028_v42 = vld [vmem:[#allocation119_spill] sm:$0xff] }
 0x485   :  { %4513 = vmatpush.bf16.msrb.mxu0 %v13014_v52  ;;  %4539 = vmatpush.bf16.msrb.mxu2 %v13017_v45  ;;  %v13029_v52 = vld [vmem:[#allocation121_spill] sm:$0xff]  ;;  %v4499_v45 = vsel %vm192_vm0, %v4492_v63, %v4498_v23  ;;  %v4489_v63 = vunpack.c.l.b16 %v4474_v56  ;;  %v4487_v23 = vunpack.c.l.b16 %v4470_v29  ;;  %v13054_v56 = vld [vmem:[#allocation147_spill] sm:$0xff] }
 0x486   :  { %v13055_v29 = vld [vmem:[#allocation149_spill] sm:$0xff] }
 0x488   :  { %4432 = vmatpush.bf16.msra.mxu1 %v13015_v6  ;;  %4458 = vmatpush.bf16.msra.mxu3 %v13016_v27  ;;  %v13030_v6 = vld [vmem:[#allocation123_spill] sm:$0xff]  ;;  %v13031_v27 = vld [vmem:[#allocation148_spill] sm:$0xff] }
 0x489   :  { %4514 = vmatpush.bf16.msrb.mxu0 %v13018_v9  ;;  %4540 = vmatpush.bf16.msrb.mxu2 %v13021_v37  ;;  %v11339_v9 = vpack.c.b16 %v4495_v16, %v4495_v16  ;;  %v4504_v37 = vpack.c.b16 %v4499_v45, %v4499_v45  ;;  %v13050_v16 = vld [vmem:[#allocation143_spill] sm:$0xff]  ;;  %v4491_v45 = vunpack.c.l.b16 %v4480_v10 }
 0x48c   :  { %4433 = vmatpush.bf16.msra.mxu1 %v13019_v33  ;;  %4459 = vmatpush.bf16.msra.mxu3 %v13020_v3  ;;  %v13032_v33 = vld [vmem:[#allocation150_spill] sm:$0xff]  ;;  %v13033_v3 = vld [vmem:[#allocation125_spill] sm:$0xff] }
 0x48d   :  { %4515 = vmatpush.bf16.msrb.mxu0 %v13022_v17  ;;  %4541 = vmatpush.bf16.msrb.mxu2 %v13025_v41  ;;  %v13040_v17 = vld [vmem:[#allocation158_spill] sm:$0xff]  ;;  %v13045_v41 = vld [vmem:[#allocation164_spill] sm:$0xff] }
 0x490   :  { %4434 = vmatpush.bf16.msra.mxu1 %v13023_v0  ;;  %4460 = vmatpush.bf16.msra.mxu3 %v13024_v26  ;;  %v13043_v0 = vld [vmem:[#allocation137_spill] sm:$0xff]  ;;  %v13044_v26 = vld [vmem:[#allocation162_spill] sm:$0xff] }
 0x491   :  { %4516 = vmatpush.bf16.msrb.mxu0 %v13026_v22  ;;  %4542 = vmatpush.bf16.msrb.mxu2 %v13031_v27  ;;  %v4500_v27 = vrot.slane %v4489_v63, 1  ;;  %v13064_v63 = vld [vmem:[#allocation159_spill] sm:$0xff] }
 0x494   :  { %4435 = vmatpush.bf16.msra.mxu1 %v13027_v46  ;;  %4461 = vmatpush.bf16.msra.mxu3 %v13028_v42  ;;  %v4124_v8 = vpop.f32.mrf.mxu0  ;;  %v13048_v46 = vld [vmem:[#allocation166_spill] sm:$0xff]  ;;  %v13049_v42 = vld [vmem:[#allocation168_spill] sm:$0xff] }
 0x495   :  { %4517 = vmatpush.bf16.msrb.mxu0 %v13032_v33  ;;  %4543 = vmatpush.bf16.msrb.mxu2 %v13035_v44  ;;  %v4496_v33 = vrot.slane %v4487_v23, 1  ;;  %v13053_v44 = vld [vmem:[#allocation172_spill] sm:$0xff]  ;;  %v13065_v23 = vld [vmem:[#allocation161_spill] sm:$0xff] }
 0x497   :  { %4436 = vmatmul.bf16.vlgmr.msra.gmra.mxu1 %v4356_v60  ;;  %4462 = vmatmul.bf16.vlgmr.msra.gmra.mxu3 %v4358_v59  ;;  %v13038_v60 = vld [vmem:[#allocation131_spill] sm:$0xff]  ;;  %v13039_v59 = vld [vmem:[#allocation133_spill] sm:$0xff] }
 0x498   :  { %4523 = vmatpush.bf16.msrb.mxu1 %v13029_v52  ;;  %4549 = vmatpush.bf16.msrb.mxu3 %v13030_v6  ;;  %v13051_v52 = vld [vmem:[#allocation145_spill] sm:$0xff]  ;;  %v4493_v6 = vunpack.c.l.b16 %v11326_v1 }
 0x499   :  { %4562 = vmatpush.bf16.msra.mxu0 %v13036_v25  ;;  %4588 = vmatpush.bf16.msra.mxu2 %v13037_v47  ;;  %v4497_v47 = vsel %vm192_vm0, %v4491_v45, %v4496_v33  ;;  %v13057_v1 = vld [vmem:[#allocation177_spill] sm:$0xff] }
 0x49a   :  { %4518 = vmatmul.bf16.vlgmr.msrb.gmra.mxu0 %v11339_v9  ;;  %4544 = vmatmul.bf16.vlgmr.msrb.gmra.mxu2 %v4504_v37  ;;  %v4150_v19 = vpop.f32.mrf.mxu2  ;;  %v4501_v25 = vsel %vm192_vm0, %v4493_v6, %v4500_v27  ;;  %v13070_v6 = vld [vmem:[#allocation163_spill] sm:$0xff]  ;;  %v13071_v27 = vld [vmem:[#allocation165_spill] sm:$0xff] }
 0x49b   :  { %v11371_v10 = vpack.c.b16 %v4501_v25, %v4501_v25  ;;  %v13075_v25 = vld [vmem:[#allocation167_spill] sm:$0xff] }
 0x49c   :  { %4524 = vmatpush.bf16.msrb.mxu1 %v13033_v3  ;;  %4550 = vmatpush.bf16.msrb.mxu3 %v13034_v20  ;;  %v4126_v22 = vpop.f32.mrf.mxu0  ;;  %v13052_v3 = vld [vmem:[#allocation170_spill] sm:$0xff] }
 0x49d   :  { %4563 = vmatpush.bf16.msra.mxu0 %v13040_v17  ;;  %4589 = vmatpush.bf16.msra.mxu2 %v13041_v34  ;;  %v11373_v17 = vpack.c.b16 %v4497_v47, %v4497_v47  ;;  %v13058_v34 = vld [vmem:[#allocation151_spill] sm:$0xff]  ;;  %v13076_v47 = vld [vmem:[#allocation169_spill] sm:$0xff] }
 0x4a0   :  { %4525 = vmatpush.bf16.msrb.mxu1 %v13038_v60  ;;  %4551 = vmatpush.bf16.msrb.mxu3 %v13039_v59  ;;  %v13056_v59 = vld [vmem:[#allocation174_spill] sm:$0xff] }
 0x4a1   :  { %4564 = vmatpush.bf16.msra.mxu0 %v13044_v26  ;;  %4590 = vmatpush.bf16.msra.mxu2 %v13045_v41  ;;  %v13061_v26 = vld [vmem:[#allocation157_spill] sm:$0xff]  ;;  %v13062_v41 = vld [vmem:[#allocation182_spill] sm:$0xff] }
 0x4a2   :  { %v4152_v20 = vpop.f32.mrf.mxu2 }
 0x4a3   :  { %v13073_v20 = vld [vmem:[#allocation192_spill] sm:$0xff] }
 0x4a4   :  { %4526 = vmatpush.bf16.msrb.mxu1 %v13042_v5  ;;  %4552 = vmatpush.bf16.msrb.mxu3 %v13043_v0  ;;  %v4225_v60 = vpop.f32.mrf.mxu0  ;;  %v13059_v5 = vld [vmem:[#allocation153_spill] sm:$0xff]  ;;  %v13060_v0 = vld [vmem:[#allocation155_spill] sm:$0xff] }
 0x4a5   :  { %4565 = vmatpush.bf16.msra.mxu0 %v13048_v46  ;;  %4591 = vmatpush.bf16.msra.mxu2 %v13049_v42  ;;  %v13066_v46 = vld [vmem:[#allocation186_spill] sm:$0xff]  ;;  %v13067_v42 = vld [vmem:[#allocation184_spill] sm:$0xff] }
 0x4a8   :  { %4527 = vmatpush.bf16.msrb.mxu1 %v13046_v4  ;;  %4553 = vmatpush.bf16.msrb.mxu3 %v13047_v21  ;;  %v13063_v4 = vld [vmem:[#allocation180_spill] sm:$0xff] }
 0x4a9   :  { %4566 = vmatpush.bf16.msra.mxu0 %v13052_v3  ;;  %4592 = vmatpush.bf16.msra.mxu2 %v13053_v44  ;;  %v13072_v3 = vld [vmem:[#allocation194_spill] sm:$0xff] }
 0x4aa   :  { %v4251_v22 = vpop.f32.mrf.mxu2  ;;  %v13074_v44 = vld [vmem:[#allocation218_spill] sm:$0xff] }
 0x4ac   :  { %4528 = vmatpush.bf16.msrb.mxu1 %v13050_v16  ;;  %4554 = vmatpush.bf16.msrb.mxu3 %v13051_v52  ;;  %v4227_v21 = vpop.f32.mrf.mxu0  ;;  %v13068_v16 = vld [vmem:[#allocation190_spill] sm:$0xff]  ;;  %v13069_v52 = vld [vmem:[#allocation188_spill] sm:$0xff] }
 0x4ad   :  { %4567 = vmatpush.bf16.msra.mxu0 %v13056_v59  ;;  %4593 = vmatpush.bf16.msra.mxu2 %v13057_v1  ;;  %v13077_v1 = vld [vmem:[#allocation198_spill] sm:$0xff]  ;;  %v13083_v21 = vld [vmem:[#allocation200_spill] sm:$0xff] }
 0x4b0   :  { %4529 = vmatpush.bf16.msrb.mxu1 %v13054_v56  ;;  %4555 = vmatpush.bf16.msrb.mxu3 %v13055_v29 }
 0x4b1   :  { %4594 = vmatpush.bf16.msra.mxu2 %v13062_v41  ;;  %4568 = vmatpush.bf16.msra.mxu0 %v13063_v4  ;;  %v13082_v4 = vld [vmem:[#allocation202_spill] sm:$0xff] }
 0x4b2   :  { %v4253_v29 = vpop.f32.mrf.mxu2 }
 0x4b3   :  { %v13088_v29 = vld [vmem:[#allocation181_spill] sm:$0xff] }
 0x4b4   :  { %4530 = vmatpush.bf16.msrb.mxu1 %v13058_v34  ;;  %4556 = vmatpush.bf16.msrb.mxu3 %v13059_v5  ;;  %v4137_v45 = vpop.f32.mrf.mxu1  ;;  %v13080_v5 = vld [vmem:[#allocation173_spill] sm:$0xff] }
 0x4b5   :  { %4595 = vmatpush.bf16.msra.mxu2 %v13066_v46  ;;  %4569 = vmatpush.bf16.msra.mxu0 %v13067_v42  ;;  %v4138_v33 = vadd.f32 %v4137_v45, %v4124_v8  ;;  %v13079_v8 = vld [vmem:[#allocation171_spill] sm:$0xff]  ;;  %v13085_v46 = vld [vmem:[#allocation178_spill] sm:$0xff] }
 0x4b6   :  { %v4635_v42 = vld.sshfl [vmem:[#allocation1 + $0x30] sm:$0xff pattern:$0x73625140] }
 0x4b7   :  { %4557 = vmatmul.bf16.vlgmr.msrb.gmra.mxu3 %v11371_v10  ;;  %4531 = vmatmul.bf16.vlgmr.msrb.gmra.mxu1 %v11373_v17  ;;  %v11395_v56 = vadd.f32 %v4138_v33, %v13074_v44  ;;  %v11400_v34 = vpop.f32.mrf.mxu0  ;;  %v4620_v33 = vld.sshfl [vmem:[#allocation1] sm:$0xff pattern:$0x73625140] }
 0x4b8   :  { %4575 = vmatpush.bf16.msra.mxu1 %v13060_v0  ;;  %4601 = vmatpush.bf16.msra.mxu3 %v13061_v26  ;;  %v13081_v26 = vld [vmem:[#allocation224_spill] sm:$0xff]  ;;  %v4639_v44 = vunpack.c.l.b16 %v4620_v33 }
 0x4b9   :  { %4693 = vmatpush.bf16.msrb.mxu2 %v13068_v16  ;;  %4667 = vmatpush.bf16.msrb.mxu0 %v13069_v52  ;;  %v13086_v52 = vld [vmem:[#allocation206_spill] sm:$0xff] }
 0x4ba   :  { %4596 = vmatmul.bf16.vlgmr.msra.gmra.mxu2 %v4504_v37  ;;  %4570 = vmatmul.bf16.vlgmr.msra.gmra.mxu0 %v11339_v9  ;;  %v4163_v59 = vpop.f32.mrf.mxu3  ;;  %v13078_v37 = vld [vmem:[#allocation196_spill] sm:$0xff] }
 0x4bb   :  { %v4164_v9 = vadd.f32 %v4163_v59, %v4150_v19 }
 0x4bc   :  { %4576 = vmatpush.bf16.msra.mxu1 %v13064_v63  ;;  %4602 = vmatpush.bf16.msra.mxu3 %v13065_v23  ;;  %v4139_v0 = vpop.f32.mrf.mxu1  ;;  %v4624_v63 = vld.sshfl [vmem:[#allocation1 + $0x10] sm:$0xff pattern:$0x73625140] }
 0x4bd   :  { %4694 = vmatpush.bf16.msrb.mxu2 %v13072_v3  ;;  %4668 = vmatpush.bf16.msrb.mxu0 %v13073_v20  ;;  %v11406_v41 = vadd.f32 %v4164_v9, %v13081_v26  ;;  %v13084_v23 = vld [vmem:[#allocation176_spill] sm:$0xff]  ;;  %v4303_v16 = vpop.f32.mrf.mxu2  ;;  %v4641_v45 = vunpack.c.l.b16 %v4624_v63  ;;  %v4631_v3 = vld.sshfl [vmem:[#allocation1 + $0x20] sm:$0xff pattern:$0x73625140]  ;;  %v4645_v20 = vunpack.c.l.b16 %v4635_v42  ;;  %v13095_v42 = vld [vmem:[#allocation207_spill] sm:$0xff] }
 0x4be   :  { %v4643_v59 = vunpack.c.l.b16 %v4631_v3  ;;  %v13096_v3 = vld [vmem:[#allocation212_spill] sm:$0xff] }
 0x4c0   :  { %4577 = vmatpush.bf16.msra.mxu1 %v13070_v6  ;;  %4603 = vmatpush.bf16.msra.mxu3 %v13071_v27  ;;  %v4279_v6 = vpop.f32.mrf.mxu0  ;;  %v13087_v27 = vld [vmem:[#allocation204_spill] sm:$0xff]  ;;  %v4648_v0 = vrot.slane %v4643_v59, 1  ;;  %v13103_v59 = vld [vmem:[#allocation238_spill] sm:$0xff] }
 0x4c1   :  { %4695 = vmatpush.bf16.msrb.mxu2 %v13077_v1  ;;  %4669 = vmatpush.bf16.msrb.mxu0 %v13078_v37  ;;  %v4653_v37 = vrot.slane %v4641_v45, 2 }
 0x4c2   :  { %v4165_v19 = vpop.f32.mrf.mxu3 }
 0x4c4   :  { %4578 = vmatpush.bf16.msra.mxu1 %v13075_v25  ;;  %4604 = vmatpush.bf16.msra.mxu3 %v13076_v47  ;;  %v13089_v25 = vld [vmem:[#allocation183_spill] sm:$0xff]  ;;  %v4238_v47 = vpop.f32.mrf.mxu1 }
 0x4c5   :  { %4696 = vmatpush.bf16.msrb.mxu2 %v13082_v4  ;;  %4670 = vmatpush.bf16.msrb.mxu0 %v13083_v21  ;;  %v4239_v1 = vadd.f32 %v4238_v47, %v4225_v60  ;;  %v4305_v26 = vpop.f32.mrf.mxu2  ;;  %v13092_v60 = vld [vmem:[#allocation199_spill] sm:$0xff] }
 0x4c6   :  { %v4633_v21 = vld.sshfl [vmem:[#allocation1 + $0x28] sm:$0xff pattern:$0x73625140] }
 0x4c7   :  { %v4252_v9 = vadd.f32 %v4251_v22, %v4239_v1  ;;  %v4622_v22 = vld.sshfl [vmem:[#allocation1 + $0x8] sm:$0xff pattern:$0x73625140] }
 0x4c8   :  { %4579 = vmatpush.bf16.msra.mxu1 %v13079_v8  ;;  %4605 = vmatpush.bf16.msra.mxu3 %v13080_v5  ;;  %v4654_v8 = vrot.slane %v4645_v20, 1  ;;  %v4647_v5 = vrot.slane %v4639_v44, 2  ;;  %v13101_v47 = vld [vmem:[#allocation219_spill] sm:$0xff] }
 0x4c9   :  { %4697 = vmatpush.bf16.msrb.mxu2 %v13086_v52  ;;  %4671 = vmatpush.bf16.msrb.mxu0 %v13087_v27  ;;  %v4644_v52 = vunpack.c.l.b16 %v4633_v21  ;;  %v13105_v1 = vld [vmem:[#allocation223_spill] sm:$0xff]  ;;  %v13119_v21 = vld [vmem:[#allocation245_spill] sm:$0xff] }
 0x4ca   :  { %v4264_v4 = vpop.f32.mrf.mxu3 }
 0x4cb   :  { %v4651_v27 = vrot.slane %v4644_v52, 1 }
 0x4cc   :  { %4580 = vmatpush.bf16.msra.mxu1 %v13084_v23  ;;  %4606 = vmatpush.bf16.msra.mxu3 %v13085_v46 }
 0x4cd   :  { %4698 = vmatpush.bf16.msrb.mxu2 %v12647_v14  ;;  %4672 = vmatpush.bf16.msrb.mxu0 %v12645_v12  ;;  %v4265_v12 = vadd.f32 %v4264_v4, %v4252_v9  ;;  %v4655_v14 = vsel %vm192_vm0, %v4654_v8, %v4653_v37  ;;  %v13106_v37 = vld [vmem:[#allocation244_spill] sm:$0xff]  ;;  %v13107_v9 = vld [vmem:[#allocation242_spill] sm:$0xff]  ;;  %v13108_v8 = vld [vmem:[#allocation225_spill] sm:$0xff] }
 0x4ce   :  { %v13110_v4 = vld [vmem:[#allocation229_spill] sm:$0xff] }
 0x4d0   :  { %4581 = vmatpush.bf16.msra.mxu1 %v13088_v29  ;;  %4607 = vmatpush.bf16.msra.mxu3 %v13089_v25  ;;  %v13098_v29 = vld [vmem:[#allocation214_spill] sm:$0xff]  ;;  %v13100_v25 = vld [vmem:[#allocation217_spill] sm:$0xff] }
 0x4d1   :  { %4699 = vmatpush.bf16.msrb.mxu2 %v12649_v62  ;;  %4673 = vmatpush.bf16.msrb.mxu0 %v9408_v31  ;;  %v13090_v62 = vld [vmem:[#allocation216_spill] sm:$0xff] }
 0x4d4   :  { %4582 = vmatpush.bf16.msra.mxu1 %v12864_v28  ;;  %4608 = vmatpush.bf16.msra.mxu3 %v12865_v38  ;;  %v4649_v28 = vsel %vm192_vm0, %v4648_v0, %v4647_v5  ;;  %v4240_v38 = vpop.f32.mrf.mxu1  ;;  %v13109_v5 = vld [vmem:[#allocation227_spill] sm:$0xff] }
 0x4d5   :  { %4700 = vmatpush.bf16.msrb.mxu2 %v9464_v54  ;;  %4674 = vmatpush.bf16.msrb.mxu0 %v9449_v35  ;;  %v11434_v31 = vpack.c.b16 %v4649_v28, %v4649_v28  ;;  %v13093_v54 = vld [vmem:[#allocation222_spill] sm:$0xff]  ;;  %v13094_v35 = vld [vmem:[#allocation220_spill] sm:$0xff] }
 0x4d7   :  { %4609 = vmatmul.bf16.vlgmr.msra.gmra.mxu3 %v11371_v10  ;;  %4583 = vmatmul.bf16.vlgmr.msra.gmra.mxu1 %v11373_v17  ;;  %v4266_v10 = vpop.f32.mrf.mxu3  ;;  %v4637_v17 = vld.sshfl [vmem:[#allocation1 + $0x38] sm:$0xff pattern:$0x73625140]  ;;  %v4372_v63 = vpop.f32.mrf.mxu0 }
 0x4d8   :  { %4680 = vmatpush.bf16.msrb.mxu1 %v12866_v58  ;;  %4706 = vmatpush.bf16.msrb.mxu3 %v12867_v50  ;;  %v11432_v58 = vpack.c.b16 %v4655_v14, %v4655_v14  ;;  %v13091_v50 = vld [vmem:[#allocation197_spill] sm:$0xff]  ;;  %v4373_v46 = vadd.f32 %v4372_v63, %v4265_v12  ;;  %v4646_v19 = vunpack.c.l.b16 %v4637_v17  ;;  %v13111_v12 = vld [vmem:[#allocation231_spill] sm:$0xff] }
 0x4d9   :  { %4745 = vmatpush.bf16.msra.mxu2 %v12650_v36  ;;  %4719 = vmatpush.bf16.msra.mxu0 %v13090_v62  ;;  %v13112_v62 = vld [vmem:[#allocation232_spill] sm:$0xff] }
 0x4da   :  { %4701 = vmatmul.bf16.vlgmr.msrb.gmra.mxu2 %v11432_v58  ;;  %4675 = vmatmul.bf16.vlgmr.msrb.gmra.mxu0 %v11434_v31 }
 0x4dc   :  { %4681 = vmatpush.bf16.msrb.mxu1 %v12868_v2  ;;  %4707 = vmatpush.bf16.msrb.mxu3 %v12869_v32  ;;  %v4290_v2 = vpop.f32.mrf.mxu1  ;;  %v4626_v32 = vld.sshfl [vmem:[#allocation1 + $0x18] sm:$0xff pattern:$0x73625140] }
 0x4dd   :  { %4746 = vmatpush.bf16.msra.mxu2 %v13093_v54  ;;  %4720 = vmatpush.bf16.msra.mxu0 %v13094_v35  ;;  %v4291_v36 = vadd.f32 %v4290_v2, %v11400_v34  ;;  %v4398_v45 = vpop.f32.mrf.mxu2  ;;  %v13114_v35 = vld [vmem:[#allocation235_spill] sm:$0xff] }
 0x4df   :  { %v4304_v23 = vadd.f32 %v4303_v16, %v4291_v36  ;;  %v4316_v34 = vpop.f32.mrf.mxu3  ;;  %v4374_v33 = vpop.f32.mrf.mxu0  ;;  %v13116_v36 = vld [vmem:[#allocation239_spill] sm:$0xff] }
 0x4e0   :  { %4682 = vmatpush.bf16.msrb.mxu1 %v13091_v50  ;;  %4708 = vmatpush.bf16.msrb.mxu3 %v13092_v60  ;;  %v13113_v50 = vld [vmem:[#allocation233_spill] sm:$0xff]  ;;  %v6837_v33 = vld [vmem:[%s11711_s4 + $0x370] sm:$0xf] }
 0x4e1   :  { %4747 = vmatpush.bf16.msra.mxu2 %v12658_v53  ;;  %4721 = vmatpush.bf16.msra.mxu0 %v12656_v57  ;;  %v4317_v6 = vadd.f32 %v4316_v34, %v4304_v23  ;;  %v4657_v53 = vrot.slane %v4646_v19, 1 }
 0x4e4   :  { %4683 = vmatpush.bf16.msrb.mxu1 %v12872_v13  ;;  %4709 = vmatpush.bf16.msrb.mxu3 %v12873_v40  ;;  %v4642_v13 = vunpack.c.l.b16 %v4626_v32  ;;  %v4640_v40 = vunpack.c.l.b16 %v4622_v22  ;;  %v4292_v16 = vpop.f32.mrf.mxu1  ;;  %v13117_v32 = vld [vmem:[#allocation241_spill] sm:$0xff]  ;;  %v13118_v22 = vld [vmem:[#allocation243_spill] sm:$0xff] }
 0x4e5   :  { %4748 = vmatpush.bf16.msra.mxu2 %v12662_v48  ;;  %4722 = vmatpush.bf16.msra.mxu0 %v12660_v55 }
 0x4e6   :  { %v4656_v57 = vrot.slane %v4642_v13, 2 }
 0x4e7   :  { %v4318_v55 = vpop.f32.mrf.mxu3 }
 0x4e8   :  { %4684 = vmatpush.bf16.msrb.mxu1 %v12874_v15  ;;  %4710 = vmatpush.bf16.msrb.mxu3 %v13095_v42  ;;  %v4650_v15 = vrot.slane %v4640_v40, 2  ;;  %v4658_v48 = vsel %vm192_vm0, %v4657_v53, %v4656_v57 }
 0x4e9   :  { %4749 = vmatpush.bf16.msra.mxu2 %v9643_v61  ;;  %4723 = vmatpush.bf16.msra.mxu0 %v9637_v18  ;;  %v4662_v20 = vpack.c.b16 %v4658_v48, %v4658_v48  ;;  %v13099_v61 = vld [vmem:[#allocation215_spill] sm:$0xff]  ;;  %v4400_v18 = vpop.f32.mrf.mxu2  ;;  %v7273_v48 = vld [vmem:[%s11711_s4 + $0x374] sm:$0xf] }
 0x4ec   :  { %4685 = vmatpush.bf16.msrb.mxu1 %v12646_v43  ;;  %4711 = vmatpush.bf16.msrb.mxu3 %v12648_v7  ;;  %v4652_v43 = vsel %vm192_vm0, %v4651_v27, %v4650_v15  ;;  %v13097_v7 = vld [vmem:[#allocation234_spill] sm:$0xff] }
 0x4ed   :  { %4750 = vmatpush.bf16.msra.mxu2 %v12667_v30  ;;  %4724 = vmatpush.bf16.msra.mxu0 %v13097_v7  ;;  %v4660_v44 = vpack.c.b16 %v4652_v43, %v4652_v43  ;;  %v13104_v30 = vld [vmem:[#allocation221_spill] sm:$0xff] }
 0x4f0   :  { %4686 = vmatpush.bf16.msrb.mxu1 %v13096_v3  ;;  %4712 = vmatpush.bf16.msrb.mxu3 %v9425_v24  ;;  %v13102_v24 = vld [vmem:[#allocation240_spill] sm:$0xff] }
 0x4f1   :  { %4751 = vmatpush.bf16.msra.mxu2 %v13102_v24  ;;  %4725 = vmatpush.bf16.msra.mxu0 %v13103_v59  ;;  %v7274_v3 = vld [vmem:[%s11711_s4 + $0x374] sm:$0xf0] }
 0x4f2   :  { %v6838_v7 = vor.u32 %v7274_v3, %v6837_v33  ;;  %v6781_v3 = vld [vmem:[%s11711_s4 + $0x300] sm:$0xf] }
 0x4f4   :  { %4687 = vmatpush.bf16.msrb.mxu1 %v13098_v29  ;;  %4713 = vmatpush.bf16.msrb.mxu3 %v13099_v61  ;;  %v4385_v0 = vpop.f32.mrf.mxu1  ;;  %v7272_v29 = vld [vmem:[%s11711_s4 + $0x364] sm:$0xf0] }
 0x4f5   :  { %4752 = vmatpush.bf16.msra.mxu2 %v13106_v37  ;;  %4726 = vmatpush.bf16.msra.mxu0 %v13107_v9  ;;  %v4386_v26 = vadd.f32 %v4385_v0, %v4373_v46  ;;  %v7270_v37 = vld [vmem:[%s11711_s4 + $0x354] sm:$0xf0]  ;;  %v7269_v9 = vld [vmem:[%s11711_s4 + $0x354] sm:$0xf] }
 0x4f7   :  { %4714 = vmatmul.bf16.vlgmr.msrb.gmra.mxu3 %v4662_v20  ;;  %4688 = vmatmul.bf16.vlgmr.msrb.gmra.mxu1 %v4660_v44  ;;  %v4399_v14 = vadd.f32 %v4398_v45, %v4386_v26  ;;  %v4424_v28 = vpop.f32.mrf.mxu0 }
 0x4f8   :  { %4732 = vmatpush.bf16.msra.mxu1 %v13100_v25  ;;  %4758 = vmatpush.bf16.msra.mxu3 %v13101_v47  ;;  %v4425_v38 = vadd.f32 %v4424_v28, %v4317_v6  ;;  %v7271_v25 = vld [vmem:[%s11711_s4 + $0x364] sm:$0xf]  ;;  %v6831_v47 = vld [vmem:[%s11711_s4 + $0x368] sm:$0xf0] }
 0x4f9   :  { %4753 = vmatmul.bf16.vlgmr.msra.gmra.mxu2 %v11432_v58  ;;  %4727 = vmatmul.bf16.vlgmr.msra.gmra.mxu0 %v11434_v31  ;;  %v13115_v58 = vld [vmem:[#allocation237_spill] sm:$0xff] }
 0x4fa   :  { %v4411_v60 = vpop.f32.mrf.mxu3  ;;  %4978 = vmatpush.bf16.msrb.mxu0 %v6838_v7  ;;  %v6901_v7 = vld [vmem:[%s11711_s4 + $0x3f0] sm:$0xf] }
 0x4fb   :  { %v4412_v10 = vadd.f32 %v4411_v60, %v4399_v14  ;;  %v7268_v14 = vld [vmem:[%s11711_s4 + $0x344] sm:$0xf0] }
 0x4fc   :  { %4733 = vmatpush.bf16.msra.mxu1 %v13104_v30  ;;  %4759 = vmatpush.bf16.msra.mxu3 %v13105_v1  ;;  %v4387_v54 = vpop.f32.mrf.mxu1  ;;  %v6834_v30 = vor.u32 %v7271_v25, %v6831_v47  ;;  %v6821_v1 = vld [vmem:[%s11711_s4 + $0x350] sm:$0xf]  ;;  %v6903_v25 = vld [vmem:[%s11711_s4 + $0x3f8] sm:$0xf0] }
 0x4fd   :  { %v4450_v31 = vpop.f32.mrf.mxu2  ;;  %v6822_v0 = vor.u32 %v7270_v37, %v6821_v1  ;;  %v6805_v54 = vld [vmem:[%s11711_s4 + $0x330] sm:$0xf]  ;;  %v6893_v1 = vld [vmem:[%s11711_s4 + $0x3e0] sm:$0xf]  ;;  %v7288_v37 = vld [vmem:[%s11711_s4 + $0x3e4] sm:$0xf0] }
 0x4ff   :  { %v4426_v2 = vpop.f32.mrf.mxu0 }
 0x500   :  { %4734 = vmatpush.bf16.msra.mxu1 %v13108_v8  ;;  %4760 = vmatpush.bf16.msra.mxu3 %v13109_v5  ;;  %v6823_v8 = vld [vmem:[%s11711_s4 + $0x358] sm:$0xf0] }
 0x502   :  { %v4413_v17 = vpop.f32.mrf.mxu3 }
 0x504   :  { %4735 = vmatpush.bf16.msra.mxu1 %v13110_v4  ;;  %4761 = vmatpush.bf16.msra.mxu3 %v13111_v12  ;;  %v6826_v4 = vor.u32 %v7269_v9, %v6823_v8  ;;  %v6813_v12 = vld [vmem:[%s11711_s4 + $0x340] sm:$0xf]  ;;  %v7287_v9 = vld [vmem:[%s11711_s4 + $0x3e4] sm:$0xf]  ;;  %v6894_v8 = vor.u32 %v7288_v37, %v6893_v1 }
 0x505   :  { %v4452_v63 = vpop.f32.mrf.mxu2 }
 0x506   :  { %v7264_v63 = vld [vmem:[%s11711_s4 + $0x324] sm:$0xf0] }
 0x508   :  { %4736 = vmatpush.bf16.msra.mxu1 %v13112_v62  ;;  %4762 = vmatpush.bf16.msra.mxu3 %v13113_v50  ;;  %v6815_v62 = vld [vmem:[%s11711_s4 + $0x348] sm:$0xf0]  ;;  %v6814_v50 = vor.u32 %v7268_v14, %v6813_v12  ;;  %v7285_v12 = vld [vmem:[%s11711_s4 + $0x3d4] sm:$0xf]  ;;  %v6887_v14 = vld [vmem:[%s11711_s4 + $0x3d8] sm:$0xf0] }
 0x50c   :  { %4737 = vmatpush.bf16.msra.mxu1 %v13114_v35  ;;  %4763 = vmatpush.bf16.msra.mxu3 %v13115_v58  ;;  %v7266_v35 = vld [vmem:[%s11711_s4 + $0x334] sm:$0xf0]  ;;  %v7265_v58 = vld [vmem:[%s11711_s4 + $0x334] sm:$0xf] }
 0x50d   :  { %v6806_v2 = vor.u32 %v7266_v35, %v6805_v54  ;;  %v6879_v35 = vld [vmem:[%s11711_s4 + $0x3c8] sm:$0xf0] }
 0x510   :  { %4738 = vmatpush.bf16.msra.mxu1 %v13116_v36  ;;  %4764 = vmatpush.bf16.msra.mxu3 %v13117_v32  ;;  %v6807_v36 = vld [vmem:[%s11711_s4 + $0x338] sm:$0xf0] }
 0x511   :  { %v6810_v17 = vor.u32 %v7265_v58, %v6807_v36  ;;  %v7281_v36 = vld [vmem:[%s11711_s4 + $0x3b4] sm:$0xf] }
 0x514   :  { %4739 = vmatpush.bf16.msra.mxu1 %v13118_v22  ;;  %4765 = vmatpush.bf16.msra.mxu3 %v13119_v21  ;;  %v4437_v23 = vpop.f32.mrf.mxu1  ;;  %v6797_v21 = vld [vmem:[%s11711_s4 + $0x320] sm:$0xf] }
 0x515   :  { %v4438_v46 = vadd.f32 %v4437_v23, %v4425_v38  ;;  %v7267_v38 = vld [vmem:[%s11711_s4 + $0x344] sm:$0xf] }
 0x516   :  { %v6818_v60 = vor.u32 %v7267_v38, %v6815_v62  ;;  %v7263_v23 = vld [vmem:[%s11711_s4 + $0x324] sm:$0xf]  ;;  %v6890_v38 = vor.u32 %v7285_v12, %v6887_v14 }
 0x517   :  { %4740 = vmatmul.bf16.vlgmr.msra.gmra.mxu1 %v4660_v44  ;;  %4766 = vmatmul.bf16.vlgmr.msra.gmra.mxu3 %v4662_v20  ;;  %v4451_v42 = vadd.f32 %v4450_v31, %v4438_v46  ;;  %v4519_v13 = vpop.f32.mrf.mxu0  ;;  %v6839_v20 = vld [vmem:[%s11711_s4 + $0x378] sm:$0xf0]  ;;  %v6829_v44 = vld [vmem:[%s11711_s4 + $0x360] sm:$0xf]  ;;  %v6798_v46 = vor.u32 %v7264_v63, %v6797_v21 }
 0x518   :  { %v6842_v18 = vor.u32 %v7273_v48, %v6839_v20  ;;  %v6830_v59 = vor.u32 %v7272_v29, %v6829_v44  ;;  %v7260_v48 = vld [vmem:[%s11711_s4 + $0x304] sm:$0xf0]  ;;  %v7290_v20 = vld [vmem:[%s11711_s4 + $0x3f4] sm:$0xf0] }
 0x51a   :  { %v4463_v19 = vpop.f32.mrf.mxu3  ;;  %5004 = vmatpush.bf16.msrb.mxu2 %v6842_v18  ;;  %4979 = vmatpush.bf16.msrb.mxu0 %v6830_v59  ;;  %v7289_v18 = vld [vmem:[%s11711_s4 + $0x3f4] sm:$0xf] }
 0x51b   :  { %v11487_v40 = vadd.f32 %v4463_v19, %v4451_v42  ;;  %v6799_v42 = vld [vmem:[%s11711_s4 + $0x328] sm:$0xf0]  ;;  %v6906_v59 = vor.u32 %v7289_v18, %v6903_v25 }
 0x51c   :  { %v4439_v52 = vpop.f32.mrf.mxu1 }
 0x51d   :  { %v4545_v6 = vpop.f32.mrf.mxu2  ;;  %5017 = vmatpush.bf16.msrb.mxu3 %v6906_v59 }
 0x51e   :  { %5005 = vmatpush.bf16.msrb.mxu2 %v6834_v30  ;;  %4980 = vmatpush.bf16.msrb.mxu0 %v6822_v0  ;;  %v6885_v0 = vld [vmem:[%s11711_s4 + $0x3d0] sm:$0xf] }
 0x51f   :  { %v4521_v34 = vpop.f32.mrf.mxu0 }
 0x522   :  { %v4465_v16 = vpop.f32.mrf.mxu3  ;;  %5006 = vmatpush.bf16.msrb.mxu2 %v6826_v4  ;;  %4981 = vmatpush.bf16.msrb.mxu0 %v6814_v50  ;;  %v6877_v50 = vld [vmem:[%s11711_s4 + $0x3c0] sm:$0xf] }
 0x523   :  { %v7262_v16 = vld [vmem:[%s11711_s4 + $0x314] sm:$0xf0] }
 0x525   :  { %v4547_v57 = vpop.f32.mrf.mxu2 }
 0x526   :  { %5007 = vmatpush.bf16.msrb.mxu2 %v6818_v60  ;;  %4982 = vmatpush.bf16.msrb.mxu0 %v6806_v2  ;;  %v7261_v57 = vld [vmem:[%s11711_s4 + $0x314] sm:$0xf]  ;;  %v7284_v60 = vld [vmem:[%s11711_s4 + $0x3c4] sm:$0xf0]  ;;  %v7282_v2 = vld [vmem:[%s11711_s4 + $0x3b4] sm:$0xf0] }
 0x527   :  { %v6878_v54 = vor.u32 %v7284_v60, %v6877_v50 }
 0x52a   :  { %5008 = vmatpush.bf16.msrb.mxu2 %v6810_v17  ;;  %4983 = vmatpush.bf16.msrb.mxu0 %v6798_v46  ;;  %v6871_v17 = vld [vmem:[%s11711_s4 + $0x3b8] sm:$0xf0]  ;;  %v6861_v46 = vld [vmem:[%s11711_s4 + $0x3a0] sm:$0xf] }
 0x52b   :  { %v6874_v21 = vor.u32 %v7281_v36, %v6871_v17 }
 0x534   :  { %v4532_v53 = vpop.f32.mrf.mxu1 }
 0x535   :  { %v4533_v15 = vadd.f32 %v4532_v53, %v4519_v13  ;;  %v6802_v13 = vor.u32 %v7263_v23, %v6799_v42  ;;  %v7280_v42 = vld [vmem:[%s11711_s4 + $0x3a4] sm:$0xf0] }
 0x537   :  { %v4546_v27 = vadd.f32 %v4545_v6, %v4533_v15  ;;  %v4571_v55 = vpop.f32.mrf.mxu0  ;;  %5009 = vmatpush.bf16.msrb.mxu2 %v6802_v13  ;;  %v6789_v6 = vld [vmem:[%s11711_s4 + $0x310] sm:$0xf]  ;;  %v7279_v13 = vld [vmem:[%s11711_s4 + $0x3a4] sm:$0xf] }
 0x538   :  { %v6790_v15 = vor.u32 %v7262_v16, %v6789_v6 }
 0x53a   :  { %v4558_v45 = vpop.f32.mrf.mxu3  ;;  %4984 = vmatpush.bf16.msrb.mxu0 %v6790_v15  ;;  %v7278_v15 = vld [vmem:[%s11711_s4 + $0x394] sm:$0xf0] }
 0x53b   :  { %v4559_v43 = vadd.f32 %v4558_v45, %v4546_v27  ;;  %v6791_v27 = vld [vmem:[%s11711_s4 + $0x318] sm:$0xf0] }
 0x53c   :  { %v4534_v61 = vpop.f32.mrf.mxu1  ;;  %v6794_v33 = vor.u32 %v7261_v57, %v6791_v27  ;;  %v7277_v27 = vld [vmem:[%s11711_s4 + $0x394] sm:$0xf] }
 0x53d   :  { %v11513_v24 = vadd.f32 %v4559_v43, %v4412_v10  ;;  %v4597_v5 = vpop.f32.mrf.mxu2  ;;  %v7259_v43 = vld [vmem:[%s11711_s4 + $0x304] sm:$0xf]  ;;  %v6902_v61 = vor.u32 %v7290_v20, %v6901_v7  ;;  %v6845_v7 = vld [vmem:[%s11711_s4 + $0x380] sm:$0xf]  ;;  %v7276_v20 = vld [vmem:[%s11711_s4 + $0x384] sm:$0xf0] }
 0x53e   :  { %5010 = vmatpush.bf16.msrb.mxu2 %v6794_v33 }
 0x53f   :  { %v4573_v28 = vpop.f32.mrf.mxu0  ;;  %4991 = vmatpush.bf16.msrb.mxu1 %v6902_v61 }
 0x542   :  { %v4560_v26 = vpop.f32.mrf.mxu3 }
 0x543   :  { %v7286_v26 = vld [vmem:[%s11711_s4 + $0x3d4] sm:$0xf0]  ;;  %4992 = vmatpush.bf16.msrb.mxu1 %v6894_v8 }
 0x544   :  { %v6886_v28 = vor.u32 %v7286_v26, %v6885_v0 }
 0x545   :  { %v4599_v10 = vpop.f32.mrf.mxu2 }
 0x546   :  { %v7283_v10 = vld [vmem:[%s11711_s4 + $0x3c4] sm:$0xf] }
 0x547   :  { %4993 = vmatpush.bf16.msrb.mxu1 %v6886_v28  ;;  %v6882_v58 = vor.u32 %v7283_v10, %v6879_v35 }
 0x54b   :  { %4994 = vmatpush.bf16.msrb.mxu1 %v6878_v54 }
 0x554   :  { %v4584_v31 = vpop.f32.mrf.mxu1 }
 0x555   :  { %v4585_v32 = vadd.f32 %v4584_v31, %v4571_v55  ;;  %v6782_v55 = vor.u32 %v7260_v48, %v6781_v3  ;;  %v6869_v31 = vld [vmem:[%s11711_s4 + $0x3b0] sm:$0xf]  ;;  %v6855_v48 = vld [vmem:[%s11711_s4 + $0x398] sm:$0xf0] }
 0x557   :  { %v4598_v22 = vadd.f32 %v4597_v5, %v4585_v32  ;;  %v11563_v34 = vpop.f32.mrf.mxu0  ;;  %4985 = vmatpush.bf16.msrb.mxu0 %v6782_v55  ;;  %v6895_v5 = vld [vmem:[%s11711_s4 + $0x3e8] sm:$0xf0]  ;;  %v6870_v32 = vor.u32 %v7282_v2, %v6869_v31  ;;  %v6858_v55 = vor.u32 %v7277_v27, %v6855_v48 }
 0x558   :  { %v6898_v4 = vor.u32 %v7287_v9, %v6895_v5 }
 0x559   :  { %4995 = vmatpush.bf16.msrb.mxu1 %v6870_v32 }
 0x55a   :  { %v4610_v19 = vpop.f32.mrf.mxu3  ;;  %5018 = vmatpush.bf16.msrb.mxu3 %v6898_v4 }
 0x55b   :  { %v4611_v52 = vadd.f32 %v4610_v19, %v4598_v22  ;;  %v6862_v19 = vor.u32 %v7280_v42, %v6861_v46 }
 0x55c   :  { %v4586_v53 = vpop.f32.mrf.mxu1 }
 0x55d   :  { %v11578_v45 = vadd.f32 %v4611_v52, %v11487_v40  ;;  %v6783_v40 = vld [vmem:[%s11711_s4 + $0x308] sm:$0xf0]  ;;  %v4702_v44 = vpop.f32.mrf.mxu2  ;;  %4996 = vmatpush.bf16.msrb.mxu1 %v6862_v19  ;;  %v6853_v53 = vld [vmem:[%s11711_s4 + $0x390] sm:$0xf] }
 0x55e   :  { %v6786_v29 = vor.u32 %v7259_v43, %v6783_v40  ;;  %5019 = vmatpush.bf16.msrb.mxu3 %v6890_v38  ;;  %v6863_v52 = vld [vmem:[%s11711_s4 + $0x3a8] sm:$0xf0]  ;;  %v6854_v3 = vor.u32 %v7278_v15, %v6853_v53 }
 0x55f   :  { %v4678_v30 = vpop.f32.mrf.mxu0 }
 0x560   :  { %5011 = vmatpush.bf16.msrb.mxu2 %v6786_v29  ;;  %v6846_v29 = vor.u32 %v7276_v20, %v6845_v7 }
 0x561   :  { %4997 = vmatpush.bf16.msrb.mxu1 %v6854_v3 }
 0x562   :  { %v4612_v47 = vpop.f32.mrf.mxu3  ;;  %5020 = vmatpush.bf16.msrb.mxu3 %v6882_v58  ;;  %v13_v58 = vstv %s11714_s7 }
 0x563   :  { %14 = vst [vmem:[#allocation2] sm:$0x1] %v13_v58 }
 0x565   :  { %v4704_v62 = vpop.f32.mrf.mxu2  ;;  %4998 = vmatpush.bf16.msrb.mxu1 %v6846_v29 }
 0x566   :  { %5021 = vmatpush.bf16.msrb.mxu3 %v6874_v21 }
 0x574   :  { %v4689_v22 = vpop.f32.mrf.mxu1 }
 0x575   :  { %v4690_v63 = vadd.f32 %v4689_v22, %v11563_v34  ;;  %v6866_v34 = vor.u32 %v7279_v13, %v6863_v52 }
 0x576   :  { %v4728_v57 = vpop.f32.mrf.mxu0 }
 0x577   :  { %v4703_v23 = vadd.f32 %v4702_v44, %v4690_v63  ;;  %5022 = vmatpush.bf16.msrb.mxu3 %v6866_v34  ;;  %v7275_v44 = vld [vmem:[%s11711_s4 + $0x384] sm:$0xf]  ;;  %v5046_v63 = vld [vmem:[%s11716_s6] sm:$0x3] }
 0x578   :  { %v5048_v42 = vperm.slane %v5046_v63, 0  ;;  %v5049_v52 = vperm.slane %v5046_v63, 1 }
 0x57a   :  { %v4715_v6 = vpop.f32.mrf.mxu3 }
 0x57b   :  { %v4716_v16 = vadd.f32 %v4715_v6, %v4703_v23  ;;  %5023 = vmatpush.bf16.msrb.mxu3 %v6858_v55 }
 0x57c   :  { %v4691_v33 = vpop.f32.mrf.mxu1  ;;  %v4754_v61 = vpop.f32.mrf.mxu2 }
 0x57d   :  { %v4771_v43 = vadd.f32 %v4716_v16, %v11513_v24  ;;  %v6847_v24 = vld [vmem:[%s11711_s4 + $0x388] sm:$0xf0]  ;;  %v7291_v33 = vld [vmem:[#allocation2] ss:$0 sm:$0xff] }
 0x57e   :  { %v6850_v18 = vor.u32 %v7275_v44, %v6847_v24  ;;  %v4730_v59 = vpop.f32.mrf.mxu0 }
 0x57f   :  { %v4773_v40 = vmul.f32 %v4771_v43, %v12909_v39 }
 0x580   :  { %5024 = vmatpush.bf16.msrb.mxu3 %v6850_v18 }
 0x581   :  { %v4775_v39 = vadd.f32 %v4773_v40, %v12911_v11 }
 0x582   :  { %v4717_v25 = vpop.f32.mrf.mxu3 }
 0x583   :  { %vm4777_vm7 = vcmp.ge.f32.partialorder %v4775_v39, 0.0  ;;  %v4779_v47 = vmul.f32 0.1, %v4775_v39 }
 0x584   :  { %v4756_v37 = vpop.f32.mrf.mxu2 }
 0x585   :  { %v4781_v30 = vsel %vm4777_vm7, %v4775_v39, %v4779_v47 }
 0x586   :  { %v4783_v1 = vpack.c.bf16 %v4781_v30, %v4781_v30 }
 0x588   :  { %4986 = vmatmul.bf16.vlgmr.msrb.gmra.mxu0 %v4783_v1  ;;  %5012 = vmatmul.bf16.vlgmr.msrb.gmra.mxu2 %v4783_v1 }
 0x594   :  { %v4741_v9 = vpop.f32.mrf.mxu1 }
 0x595   :  { %v4742_v8 = vadd.f32 %v4741_v9, %v4728_v57 }
 0x597   :  { %v4755_v5 = vadd.f32 %v4754_v61, %v4742_v8 }
 0x59a   :  { %v4767_v0 = vpop.f32.mrf.mxu3 }
 0x59b   :  { %v4768_v26 = vadd.f32 %v4767_v0, %v4755_v5 }
 0x59c   :  { %v4743_v4 = vpop.f32.mrf.mxu1 }
 0x59d   :  { %v4772_v11 = vadd.f32 %v4768_v26, %v11578_v45 }
 0x59f   :  { %v4774_v12 = vmul.f32 %v4772_v11, %v12927_v51  ;;  %v5032_v51 = vld [vmem:[%s11715_s5] sm:$0x3] }
 0x5a0   :  { %v5034_v31 = vperm.slane %v5032_v51, 0  ;;  %v5035_v22 = vperm.slane %v5032_v51, 1 }
 0x5a1   :  { %v4776_v14 = vadd.f32 %v4774_v12, %v12930_v49 }
 0x5a2   :  { %v4769_v28 = vpop.f32.mrf.mxu3 }
 0x5a3   :  { %vm4778_vm8 = vcmp.ge.f32.partialorder %v4776_v14, 0.0  ;;  %v4780_v38 = vmul.f32 0.1, %v4776_v14 }
 0x5a5   :  { %v4782_v62 = vsel %vm4778_vm8, %v4776_v14, %v4780_v38 }
 0x5a6   :  { %v4784_v50 = vpack.c.bf16 %v4782_v62, %v4782_v62 }
 0x5a8   :  { %4999 = vmatmul.bf16.vlgmr.msrb.gmra.mxu1 %v4784_v50  ;;  %5025 = vmatmul.bf16.vlgmr.msrb.gmra.mxu3 %v4784_v50 }
 0x605   :  { %v4987_v60 = vpop.f32.mrf.mxu0 }
 0x60b   :  { %v5013_v10 = vpop.f32.mrf.mxu2 }
 0x60d   :  { %v4989_v54 = vpop.f32.mrf.mxu0 }
 0x613   :  { %v5015_v35 = vpop.f32.mrf.mxu2 }
 0x625   :  { %v5000_v49 = vpop.f32.mrf.mxu1 }
 0x626   :  { %v5001_v45 = vadd.f32 %v5000_v49, %v4987_v60 }
 0x628   :  { %v5030_v2 = vadd.f32 %v5001_v45, %v11395_v56 }
 0x62a   :  { %v5038_v36 = vadd.f32 %v5034_v31, %v5030_v2 }
 0x62b   :  { %v5026_v32 = vpop.f32.mrf.mxu3 }
 0x62c   :  { %v5027_v17 = vadd.f32 %v5026_v32, %v5013_v10  ;;  %v5042_v21 = vmul.f32 0.1, %v5038_v36  ;;  %vm5040_vm9 = vcmp.ge.f32.partialorder %v5038_v36, 0.0 }
 0x62d   :  { %v5002_v23 = vpop.f32.mrf.mxu1 }
 0x62e   :  { %v5031_v46 = vadd.f32 %v5027_v17, %v11406_v41  ;;  %v5044_v19 = vsel %vm5040_vm9, %v5038_v36, %v5042_v21 }
 0x62f   :  { %v5052_v6 = vmul.f32 %v5048_v42, %v5044_v19 }
 0x630   :  { %v5039_v13 = vadd.f32 %v5035_v22, %v5031_v46 }
 0x631   :  { %v5055_v53 = vsel %vm5054_vm11, %v5052_v6, 0.0 }
 0x632   :  { %vm5041_vm10 = vcmp.ge.f32.partialorder %v5039_v13, 0.0  ;;  %v5043_v34 = vmul.f32 0.1, %v5039_v13 }
 0x633   :  { %v5028_v56 = vpop.f32.mrf.mxu3 }
 0x634   :  { %v5045_v16 = vsel %vm5041_vm10, %v5039_v13, %v5043_v34 }
 0x635   :  { %v5053_v57 = vmul.f32 %v5049_v52, %v5045_v16 }
 0x637   :  { %v5056_v15 = vsel %vm5054_vm11, %v5053_v57, 0.0 }
 0x638   :  { %v5057_v27 = vadd.f32 %v5056_v15, %v5055_v53 }
 0x63a   :  { %5058 = vadd.xlane.f32.xlu0 %v5057_v27 }
 0x6ad   :  { %v5059_v3 = vpop.xlane.xlu0 %5058 }
 0x6ae   :  { %v5064_v48 = vadd.f32 %v7291_v33, %v5059_v3 }
 0x6b0   :  { %5066 = vst.msk [vmem:[%s11717_s8] sm:$0x3] %vm5065_vm12, %v5064_v48 }

</bundles_post_ra>
